<compile_context>
chip_gen: v7x
topology: tpu7x:2x2x1
jax: 0.10.0
libtpu: 0.0.40
codegen_flags: <defaults>
</compile_context>

<pallas_src>
import math
import functools

import numpy as np
import jax
import jax.numpy as jnp
from jax import lax
from jax.experimental import pallas as pl
from jax.experimental.pallas import tpu as pltpu


# ---------------- shared math helpers (kernel + reference) ----------------
def _silu(x):
    return x * jax.nn.sigmoid(x)


def _gelu_exact(x):  # matches torch.nn.GELU() (erf form)
    return 0.5 * x * (1.0 + lax.erf(x * (1.0 / math.sqrt(2.0))))


def _elu_plus_one(x):  # ELU(alpha=1) + 1
    return jnp.where(x > 0, x, jnp.exp(jnp.minimum(x, 0.0)) - 1.0) + 1.0


def _layernorm(v, g, b, eps=1e-5):
    mean = jnp.mean(v, axis=-1, keepdims=True)
    xc = v - mean
    var = jnp.mean(xc * xc, axis=-1, keepdims=True)
    return xc * lax.rsqrt(var + eps) * g + b


# ---------------- packed-parameter layout ----------------
def _round8(n):
    return ((n + 7) // 8) * 8


def _build_w_layout(C, hid):
    """Row offsets of every weight matrix inside the packed W buffer.

    Every block starts on a multiple of 8 sublanes and at lane 0, so the
    in-kernel static slices never cross (8,128) tile grids awkwardly.
    """
    order = [('fc1', C), ('fc2', hid), ('act', C), ('in', C), ('q', C),
             ('k', C), ('out', C), ('cpe1', 9), ('dwc', 9), ('lepe', 9),
             ('cpe2', 9), ('mdw', 9)]
    rows, r = {}, 0
    for name, nrows in order:
        rows[name] = r
        r = _round8(r + nrows)
    return rows, r


_V_ORDER = ['cpe1_b', 'n1_g', 'n1_b', 'act_b', 'in_b', 'dwc_b', 'q_b', 'k_b',
            'lepe_b', 'out_b', 'cpe2_b', 'n2_g', 'n2_b', 'fc1_b', 'mdw_b',
            'mn1_g', 'mn1_b', 'mn2_g', 'mn2_b', 'mn3_g', 'mn3_b', 'fc2_b']


def _build_v_layout():
    return {name: i for i, name in enumerate(_V_ORDER)}, _round8(len(_V_ORDER))


def pack_down_layer_params(params_list, C, hid):
    """Pack all per-block parameters into two f32 buffers (leading depth axis)."""
    assert hid <= 128, "vector-packing layout assumes hidden width <= 128 lanes"
    depth = len(params_list)
    wrows, wtot = _build_w_layout(C, hid)
    vrows, vtot = _build_v_layout()
    wcols = max(C, hid)
    Wbuf = np.zeros((depth, wtot, wcols), np.float32)
    Vbuf = np.zeros((depth, vtot, 128), np.float32)

    for d, p in enumerate(params_list):
        def putm(name, a):
            a = np.asarray(a, np.float32)
            r = wrows[name]
            Wbuf[d, r:r + a.shape[0], :a.shape[1]] = a

        def putv(name, a):
            a = np.asarray(a, np.float32).reshape(-1)
            Vbuf[d, vrows[name], :a.shape[0]] = a

        putm('fc1', p['fc1'][0]);                              putv('fc1_b', p['fc1'][1])
        putm('fc2', p['fc2'][0]);                              putv('fc2_b', p['fc2'][1])
        putm('act', p['act_proj'][0]);                         putv('act_b', p['act_proj'][1])
        putm('in', p['in_proj'][0]);                           putv('in_b', p['in_proj'][1])
        qkw, qkb = np.asarray(p['qk'][0]), np.asarray(p['qk'][1])
        putm('q', qkw[:, :C]);                                 putv('q_b', qkb[:C])
        putm('k', qkw[:, C:]);                                 putv('k_b', qkb[C:])
        putm('out', p['out_proj'][0]);                         putv('out_b', p['out_proj'][1])
        putm('cpe1', np.asarray(p['cpe1'][0]).reshape(9, C));  putv('cpe1_b', p['cpe1'][1])
        putm('dwc', np.asarray(p['dwc'][0]).reshape(9, C));    putv('dwc_b', p['dwc'][1])
        putm('lepe', np.asarray(p['lepe'][0]).reshape(9, C));  putv('lepe_b', p['lepe'][1])
        putm('cpe2', np.asarray(p['cpe2'][0]).reshape(9, C));  putv('cpe2_b', p['cpe2'][1])
        putm('mdw', np.asarray(p['mlp_dw'][0]).reshape(9, hid)); putv('mdw_b', p['mlp_dw'][1])
        putv('n1_g', p['norm1'][0]);  putv('n1_b', p['norm1'][1])
        putv('n2_g', p['norm2'][0]);  putv('n2_b', p['norm2'][1])
        putv('mn1_g', p['mlp_n1'][0]); putv('mn1_b', p['mlp_n1'][1])
        putv('mn2_g', p['mlp_n2'][0]); putv('mn2_b', p['mlp_n2'][1])
        putv('mn3_g', p['mlp_n3'][0]); putv('mn3_b', p['mlp_n3'][1])

    return jnp.asarray(Wbuf), jnp.asarray(Vbuf)


# ---------------- constant tables (shift matrices, RoPE, head mask) ----------------
def make_shift_matrix(H, W):
    """Stacked 0/1 shift matrices: (S @ x)[t*N+n] = zero-padded neighbour (t) of pixel n."""
    N = H * W
    S = np.zeros((9, N, N), np.float32)
    for t in range(9):
        di, dj = t // 3 - 1, t % 3 - 1
        for i in range(H):
            si = i + di
            if not (0 <= si < H):
                continue
            for j in range(W):
                sj = j + dj
                if 0 <= sj < W:
                    S[t, i * W + j, si * W + sj] = 1.0
    return jnp.asarray(S.reshape(9 * N, N))


def make_const_tables(H, W, C, num_heads, base=10000.0):
    """One constant buffer: [cos (N,C) | sin (N,C) | RoPE pair-swap P (C,C) | head mask (C,C)]."""
    N = H * W
    k_max = C // 4  # feature_dim // (2 * len(channel_dims)), channel_dims = (H, W)
    theta = 1.0 / (base ** (np.arange(k_max, dtype=np.float32) / k_max))
    ai = np.broadcast_to(np.arange(H, dtype=np.float32)[:, None, None] * theta, (H, W, k_max))
    aj = np.broadcast_to(np.arange(W, dtype=np.float32)[None, :, None] * theta, (H, W, k_max))
    ang = np.concatenate([ai, aj], axis=-1).reshape(N, C // 2)
    cosF = np.repeat(np.cos(ang), 2, axis=-1).astype(np.float32)   # (N, C)
    sinF = np.repeat(np.sin(ang), 2, axis=-1).astype(np.float32)   # (N, C)

    idx = np.arange(C // 2)
    P = np.zeros((C, C), np.float32)
    P[2 * idx + 1, 2 * idx] = -1.0          # (x @ P)[2i]   = -x[2i+1]
    P[2 * idx, 2 * idx + 1] = 1.0           # (x @ P)[2i+1] =  x[2i]

    hd = C // num_heads
    head_id = np.arange(C) // hd
    Hmask = (head_id[:, None] == head_id[None, :]).astype(np.float32)

    Cbuf = np.concatenate([cosF, sinF, P, Hmask], axis=0)           # (2N + 2C, C)
    return jnp.asarray(Cbuf), jnp.asarray(cosF), jnp.asarray(sinF)


# ---------------- fused kernel ----------------
def _make_downlayer_kernel(H, W, C, hid, wrows, vrows):
    N = H * W
    scale = float(N) ** -0.5

    def kernel(x_ref, s_ref, c_ref, w_ref, v_ref, o_ref):
        d = pl.program_id(1)

        # Constant tables (block index never changes -> DMA'd once).
        s_all = s_ref[...]                           # (9N, N)
        cos = c_ref[0:N, :]                          # (N, C)
        sin = c_ref[N:2 * N, :]                      # (N, C)
        pmat = c_ref[2 * N:2 * N + C, :]             # (C, C) signed pair swap
        hmask = c_ref[2 * N + C:2 * N + 2 * C, :]    # (C, C) block-diag head mask

        def wm(name, nrows, ncols):                  # packed weight matrix
            r = wrows[name]
            return w_ref[0, r:r + nrows, 0:ncols]

        def vv(name, n):                             # packed bias / LN vector
            r = vrows[name]
            return v_ref[0, r:r + 1, 0:n]

        def dwconv(seq, name, bias_name, c):
            """Depthwise 3x3 conv (stride 1, zero pad 1) on a (N, c) map.

            One MXU matmul against the stacked 0/1 shift matrices (exact pixel
            gather incl. zero padding), then a 9-tap per-channel weighted sum.
            """
            shifted = jnp.dot(s_all, seq, preferred_element_type=jnp.float32)  # (9N, c)
            r = wrows[name]
            out = None
            for t in range(9):
                term = shifted[t * N:(t + 1) * N, :] * w_ref[0, r + t:r + t + 1, 0:c]
                out = term if out is None else out + term
            return out + vv(bias_name, c)

        def rope(t):
            # t*cos + (t @ P)*sin, P is the constant signed pair-swap matrix.
            return t * cos + jnp.dot(t, pmat, preferred_element_type=jnp.float32) * sin

        # Carry the feature map in the VMEM-resident output block across the
        # depth ("arbitrary") axis: read HBM only at d == 0, write back only
        # when the batch block changes / the grid ends.
        @pl.when(d == 0)
        def _():
            o_ref[0] = x_ref[0]

        x = o_ref[0]                                 # (N, C)

        # ---- LRLA block d ----
        x = x + dwconv(x, 'cpe1', 'cpe1_b', C)
        shortcut = x

        xn = _layernorm(x, vv('n1_g', C), vv('n1_b', C))
        act_res = _silu(
            jnp.dot(xn, wm('act', C, C), preferred_element_type=jnp.float32)
            + vv('act_b', C))
        xi = (jnp.dot(xn, wm('in', C, C), preferred_element_type=jnp.float32)
              + vv('in_b', C))

        xd = _silu(dwconv(xi, 'dwc', 'dwc_b', C))

        # Linear attention (no per-head loop: block-diagonal head mask on KV / z).
        q = _elu_plus_one(
            jnp.dot(xd, wm('q', C, C), preferred_element_type=jnp.float32) + vv('q_b', C))
        k = _elu_plus_one(
            jnp.dot(xd, wm('k', C, C), preferred_element_type=jnp.float32) + vv('k_b', C))
        v = xd
        q_rope = rope(q)
        k_rope = rope(k)

        k_mean = jnp.mean(k, axis=0, keepdims=True)                           # (1, C)
        z = 1.0 / (jnp.dot(q * k_mean, hmask,
                           preferred_element_type=jnp.float32) + 1e-6)        # (N, C)
        kv = lax.dot_general(k_rope * scale, v * scale,
                             (((0,), (0,)), ((), ())),
                             preferred_element_type=jnp.float32) * hmask      # (C, C)
        attn = jnp.dot(q_rope, kv, preferred_element_type=jnp.float32) * z
        attn = attn + dwconv(v, 'lepe', 'lepe_b', C)                          # LePE

        x = shortcut + (jnp.dot(attn * act_res, wm('out', C, C),
                                preferred_element_type=jnp.float32) + vv('out_b', C))

        x = x + dwconv(x, 'cpe2', 'cpe2_b', C)

        # ---- FRN MLP ----
        xn2 = _layernorm(x, vv('n2_g', C), vv('n2_b', C))
        f1 = (jnp.dot(xn2, wm('fc1', C, hid), preferred_element_type=jnp.float32)
              + vv('fc1_b', hid))
        dw = dwconv(f1, 'mdw', 'mdw_b', hid)
        n1 = _layernorm(dw + f1, vv('mn1_g', hid), vv('mn1_b', hid))
        n2 = _layernorm(n1 + f1, vv('mn2_g', hid), vv('mn2_b', hid))
        n3 = _layernorm(n2 + f1, vv('mn3_g', hid), vv('mn3_b', hid))
        x = x + (jnp.dot(_gelu_exact(n3), wm('fc2', hid, C),
                         preferred_element_type=jnp.float32) + vv('fc2_b', C))

        o_ref[0] = x

    return kernel


# ---------------- wrapper: whole DownLayer in one pallas_call ----------------
def down_layer_forward(x, S, Cbuf, Wbuf, Vbuf, *, H, W, hid):
    B, N, C = x.shape
    depth, wtot, wcols = Wbuf.shape
    vtot, vcols = Vbuf.shape[1], Vbuf.shape[2]
    wrows, _ = _build_w_layout(C, hid)
    vrows, _ = _build_v_layout()

    kernel = _make_downlayer_kernel(H, W, C, hid, wrows, vrows)

    in_specs = [
        pl.BlockSpec((1, N, C), lambda b, d: (b, 0, 0)),              # x (per image)
        pl.BlockSpec(S.shape, lambda b, d: (0, 0)),                   # shift matrices
        pl.BlockSpec(Cbuf.shape, lambda b, d: (0, 0)),                # rope / masks
        pl.BlockSpec((1, wtot, wcols), lambda b, d: (d, 0, 0)),       # packed matrices
        pl.BlockSpec((1, vtot, vcols), lambda b, d: (d, 0, 0)),       # packed vectors
    ]
    out_specs = pl.BlockSpec((1, N, C), lambda b, d: (b, 0, 0))

    return pl.pallas_call(
        kernel,
        grid=(B, depth),
        in_specs=in_specs,
        out_specs=out_specs,
        out_shape=jax.ShapeDtypeStruct((B, N, C), jnp.float32),
        compiler_params=pltpu.CompilerParams(
            dimension_semantics=("parallel", "arbitrary"),
        ),
    )(x, S, Cbuf, Wbuf, Vbuf)


# ---------------- deterministic synthetic parameters ----------------
def init_lrla_params(key, C):
    ks = jax.random.split(key, 16)

    def lin(k, cin, cout):
        kw, kb = jax.random.split(k)
        return (jax.random.normal(kw, (cin, cout), jnp.float32) * 0.02,
                jax.random.normal(kb, (cout,), jnp.float32) * 0.02)

    def dconv(k, c):
        kw, kb = jax.random.split(k)
        return (jax.random.normal(kw, (3, 3, c), jnp.float32) * 0.1,
                jax.random.normal(kb, (c,), jnp.float32) * 0.02)

    def ln(c):
        return (jnp.ones((c,), jnp.float32), jnp.zeros((c,), jnp.float32))

    hid = 4 * C
    return {
        'cpe1': dconv(ks[0], C), 'norm1': ln(C),
        'in_proj': lin(ks[1], C, C), 'act_proj': lin(ks[2], C, C),
        'dwc': dconv(ks[3], C), 'qk': lin(ks[4], C, 2 * C),
        'lepe': dconv(ks[5], C), 'out_proj': lin(ks[6], C, C),
        'cpe2': dconv(ks[7], C), 'norm2': ln(C),
        'fc1': lin(ks[8], C, hid), 'mlp_dw': dconv(ks[9], hid),
        'fc2': lin(ks[10], hid, C),
        'mlp_n1': ln(hid), 'mlp_n2': ln(hid), 'mlp_n3': ln(hid),
    }


# ---------------- pure-JAX reference (mirrors the PyTorch module) ----------------
def _ref_dwconv(x, w, b, H, W):
    B, N, c = x.shape
    xm = x.reshape(B, H, W, c)
    xp = jnp.pad(xm, ((0, 0), (1, 1), (1, 1), (0, 0)))
    out = jnp.zeros_like(xm)
    for di in range(3):
        for dj in range(3):
            out = out + xp[:, di:di + H, dj:dj + W, :] * w[di, dj]
    return out.reshape(B, N, c) + b


def _ref_block(x, p, H, W, num_heads, cosF, sinF):
    B, N, C = x.shape
    nh, hd = num_heads, C // num_heads
    scale = float(N) ** -0.5

    def rope(t):
        tp = t.reshape(B, N, C // 2, 2)
        re, im = tp[..., 0], tp[..., 1]
        cs = cosF[:, ::2].reshape(1, N, C // 2)
        sn = sinF[:, ::2].reshape(1, N, C // 2)
        return jnp.stack([re * cs - im * sn, re * sn + im * cs], axis=-1).reshape(B, N, C)

    x = x + _ref_dwconv(x, p['cpe1'][0], p['cpe1'][1], H, W)
    shortcut = x
    xn = _layernorm(x, p['norm1'][0], p['norm1'][1])
    act_res = _silu(xn @ p['act_proj'][0] + p['act_proj'][1])
    xi = xn @ p['in_proj'][0] + p['in_proj'][1]
    xd = _silu(_ref_dwconv(xi, p['dwc'][0], p['dwc'][1], H, W))

    qk = xd @ p['qk'][0] + p['qk'][1]
    q, k, v = _elu_plus_one(qk[..., :C]), _elu_plus_one(qk[..., C:]), xd
    qr, kr = rope(q), rope(k)

    def heads(t):
        return t.reshape(B, N, nh, hd).transpose(0, 2, 1, 3)

    qh, kh, vh, qrh, krh = map(heads, (q, k, v, qr, kr))
    kmean = kh.mean(axis=2, keepdims=True)
    z = 1.0 / (jnp.einsum('bhnd,bhmd->bhnm', qh, kmean) + 1e-6)
    kv = jnp.einsum('bhnd,bhne->bhde', krh * scale, vh * scale)
    attn = jnp.einsum('bhnd,bhde->bhne', qrh, kv) * z
    attn = attn.transpose(0, 2, 1, 3).reshape(B, N, C)
    attn = attn + _ref_dwconv(v, p['lepe'][0], p['lepe'][1], H, W)

    x = shortcut + (attn * act_res) @ p['out_proj'][0] + p['out_proj'][1]
    x = x + _ref_dwconv(x, p['cpe2'][0], p['cpe2'][1], H, W)

    xn2 = _layernorm(x, p['norm2'][0], p['norm2'][1])
    f1 = xn2 @ p['fc1'][0] + p['fc1'][1]
    dw = _ref_dwconv(f1, p['mlp_dw'][0], p['mlp_dw'][1], H, W)
    n1 = _layernorm(dw + f1, p['mlp_n1'][0], p['mlp_n1'][1])
    n2 = _layernorm(n1 + f1, p['mlp_n2'][0], p['mlp_n2'][1])
    n3 = _layernorm(n2 + f1, p['mlp_n3'][0], p['mlp_n3'][1])
    return x + _gelu_exact(n3) @ p['fc2'][0] + p['fc2'][1]


if __name__ == "__main__":
    # DownLayer config: dim=16, input_resolution=(8,8), depth=2, num_heads=2
    B, C, H, W = 2, 16, 8, 8
    num_heads, depth = 2, 2
    N = H * W
    hid = 4 * C

    key = jax.random.PRNGKey(0)
    kx, kp = jax.random.split(key)
    x = jax.random.normal(kx, (B, N, C), jnp.float32)
    params = [init_lrla_params(k, C) for k in jax.random.split(kp, depth)]

    # Host-side one-time packing / constant construction.
    Wbuf, Vbuf = pack_down_layer_params(params, C, hid)
    S = make_shift_matrix(H, W)
    Cbuf, cosF, sinF = make_const_tables(H, W, C, num_heads)

    fwd = jax.jit(functools.partial(down_layer_forward, H=H, W=W, hid=hid))
    out = fwd(x, S, Cbuf, Wbuf, Vbuf)
    jax.block_until_ready(out)
    assert out.shape == (B, N, C)

    # Pure-JAX reference of the PyTorch forward pass for a numerics check.
    ref = x
    for p in params:
        ref = _ref_block(ref, p, H, W, num_heads, cosF, sinF)
    max_diff = float(jnp.max(jnp.abs(out - ref)))
    assert jnp.allclose(out, ref, atol=1e-3, rtol=1e-3), f"max diff {max_diff}"

    print("KERNEL_OK")
</pallas_src>

<mosaic_0001>
module attributes {stable_mosaic.version = 11 : i64} {
  func.func @kernel(%arg0: i32, %arg1: i32, %arg2: memref<1x64x16xf32, #tpu.memory_space<vmem>>, %arg3: memref<576x64xf32, #tpu.memory_space<vmem>>, %arg4: memref<160x16xf32, #tpu.memory_space<vmem>>, %arg5: memref<1x240x64xf32, #tpu.memory_space<vmem>>, %arg6: memref<1x24x128xf32, #tpu.memory_space<vmem>>, %arg7: memref<1x64x16xf32, #tpu.memory_space<vmem>>) attributes {dimension_semantics = [#tpu.dimension_semantics<parallel>, #tpu.dimension_semantics<arbitrary>], iteration_bounds = array<i64: 2, 2>, scalar_prefetch = 0 : i64, scratch_operands = 0 : i64, tpu.core_type = #tpu.core_type<tc>, window_params = [{transform_indices = @transform_0, window_bounds = array<i64: 1, 64, 16>}, {pipeline_mode = #tpu.pipeline_mode<synchronous>, transform_indices = @transform_1, window_bounds = array<i64: 576, 64>}, {pipeline_mode = #tpu.pipeline_mode<synchronous>, transform_indices = @transform_2, window_bounds = array<i64: 160, 16>}, {transform_indices = @transform_3, window_bounds = array<i64: 1, 240, 64>}, {transform_indices = @transform_4, window_bounds = array<i64: 1, 24, 128>}, {transform_indices = @transform_5, window_bounds = array<i64: 1, 64, 16>}]} {
    %c0 = arith.constant 0 : index
    %c0_0 = arith.constant 0 : index
    %0 = vector.load %arg3[%c0, %c0_0] : memref<576x64xf32, #tpu.memory_space<vmem>>, vector<576x64xf32>
    %c0_1 = arith.constant 0 : index
    %c0_2 = arith.constant 0 : index
    %1 = vector.load %arg4[%c0_1, %c0_2] : memref<160x16xf32, #tpu.memory_space<vmem>>, vector<64x16xf32>
    %c64 = arith.constant 64 : index
    %c0_3 = arith.constant 0 : index
    %2 = vector.load %arg4[%c64, %c0_3] : memref<160x16xf32, #tpu.memory_space<vmem>>, vector<64x16xf32>
    %c128 = arith.constant 128 : index
    %c0_4 = arith.constant 0 : index
    %3 = vector.load %arg4[%c128, %c0_4] : memref<160x16xf32, #tpu.memory_space<vmem>>, vector<16x16xf32>
    %c144 = arith.constant 144 : index
    %c0_5 = arith.constant 0 : index
    %4 = vector.load %arg4[%c144, %c0_5] : memref<160x16xf32, #tpu.memory_space<vmem>>, vector<16x16xf32>
    %c0_i32 = arith.constant 0 : i32
    %5 = arith.cmpi eq, %arg1, %c0_i32 : i32
    %6 = arith.extui %5 : i1 to i32
    %c0_i32_6 = arith.constant 0 : i32
    %7 = arith.cmpi ne, %6, %c0_i32_6 : i32
    scf.if %7 {
      %c0_226 = arith.constant 0 : index
      %c0_227 = arith.constant 0 : index
      %c0_228 = arith.constant 0 : index
      %548 = vector.load %arg2[%c0_226, %c0_227, %c0_228] : memref<1x64x16xf32, #tpu.memory_space<vmem>>, vector<1x64x16xf32>
      %549 = vector.shape_cast %548 : vector<1x64x16xf32> to vector<64x16xf32>
      %c0_229 = arith.constant 0 : index
      %c0_230 = arith.constant 0 : index
      %c0_231 = arith.constant 0 : index
      %550 = vector.load %arg7[%c0_229, %c0_230, %c0_231] : memref<1x64x16xf32, #tpu.memory_space<vmem>>, vector<1x64x16xf32>
      %551 = vector.shape_cast %550 : vector<1x64x16xf32> to vector<64x16xf32>
      %552 = vector.shape_cast %549 : vector<64x16xf32> to vector<1x64x16xf32>
      tpu.vector_store %arg7[%c0_229, %c0_230, %c0_231], %552 {strides = array<i32>} : memref<1x64x16xf32, #tpu.memory_space<vmem>>, vector<1x64x16xf32>,
    } else {
    }
    %c0_7 = arith.constant 0 : index
    %c0_8 = arith.constant 0 : index
    %c0_9 = arith.constant 0 : index
    %8 = vector.load %arg7[%c0_7, %c0_8, %c0_9] : memref<1x64x16xf32, #tpu.memory_space<vmem>>, vector<1x64x16xf32>
    %9 = vector.shape_cast %8 : vector<1x64x16xf32> to vector<64x16xf32>
    %cst = arith.constant dense<0.000000e+00> : vector<576x16xf32>
    %10 = tpu.matmul %0, %9, %cst {dimension_numbers = #tpu.dot_dimension_numbers<[1], [0], [0], [1], [0, 0, 1, 1], [], []>} : vector<576x64xf32>, vector<64x16xf32>, vector<576x16xf32> -> vector<576x16xf32>
    %11 = vector.extract_strided_slice %10 {offsets = [0, 0], sizes = [64, 16], strides = [1, 1]} : vector<576x16xf32> to vector<64x16xf32>
    %c0_10 = arith.constant 0 : index
    %c160 = arith.constant 160 : index
    %c0_11 = arith.constant 0 : index
    %12 = vector.load %arg5[%c0_10, %c160, %c0_11] : memref<1x240x64xf32, #tpu.memory_space<vmem>>, vector<1x1x16xf32>
    %13 = vector.shape_cast %12 : vector<1x1x16xf32> to vector<1x16xf32>
    %14 = vector.broadcast %13 : vector<1x16xf32> to vector<64x16xf32>
    %15 = arith.mulf %11, %14 : vector<64x16xf32>
    %16 = vector.extract_strided_slice %10 {offsets = [64, 0], sizes = [64, 16], strides = [1, 1]} : vector<576x16xf32> to vector<64x16xf32>
    %c0_12 = arith.constant 0 : index
    %c161 = arith.constant 161 : index
    %c0_13 = arith.constant 0 : index
    %17 = vector.load %arg5[%c0_12, %c161, %c0_13] : memref<1x240x64xf32, #tpu.memory_space<vmem>>, vector<1x1x16xf32>
    %18 = vector.shape_cast %17 : vector<1x1x16xf32> to vector<1x16xf32>
    %19 = vector.broadcast %18 : vector<1x16xf32> to vector<64x16xf32>
    %20 = arith.mulf %16, %19 : vector<64x16xf32>
    %21 = arith.addf %15, %20 : vector<64x16xf32>
    %22 = vector.extract_strided_slice %10 {offsets = [128, 0], sizes = [64, 16], strides = [1, 1]} : vector<576x16xf32> to vector<64x16xf32>
    %c0_14 = arith.constant 0 : index
    %c162 = arith.constant 162 : index
    %c0_15 = arith.constant 0 : index
    %23 = vector.load %arg5[%c0_14, %c162, %c0_15] : memref<1x240x64xf32, #tpu.memory_space<vmem>>, vector<1x1x16xf32>
    %24 = vector.shape_cast %23 : vector<1x1x16xf32> to vector<1x16xf32>
    %25 = vector.broadcast %24 : vector<1x16xf32> to vector<64x16xf32>
    %26 = arith.mulf %22, %25 : vector<64x16xf32>
    %27 = arith.addf %21, %26 : vector<64x16xf32>
    %28 = vector.extract_strided_slice %10 {offsets = [192, 0], sizes = [64, 16], strides = [1, 1]} : vector<576x16xf32> to vector<64x16xf32>
    %c0_16 = arith.constant 0 : index
    %c163 = arith.constant 163 : index
    %c0_17 = arith.constant 0 : index
    %29 = vector.load %arg5[%c0_16, %c163, %c0_17] : memref<1x240x64xf32, #tpu.memory_space<vmem>>, vector<1x1x16xf32>
    %30 = vector.shape_cast %29 : vector<1x1x16xf32> to vector<1x16xf32>
    %31 = vector.broadcast %30 : vector<1x16xf32> to vector<64x16xf32>
    %32 = arith.mulf %28, %31 : vector<64x16xf32>
    %33 = arith.addf %27, %32 : vector<64x16xf32>
    %34 = vector.extract_strided_slice %10 {offsets = [256, 0], sizes = [64, 16], strides = [1, 1]} : vector<576x16xf32> to vector<64x16xf32>
    %c0_18 = arith.constant 0 : index
    %c164 = arith.constant 164 : index
    %c0_19 = arith.constant 0 : index
    %35 = vector.load %arg5[%c0_18, %c164, %c0_19] : memref<1x240x64xf32, #tpu.memory_space<vmem>>, vector<1x1x16xf32>
    %36 = vector.shape_cast %35 : vector<1x1x16xf32> to vector<1x16xf32>
    %37 = vector.broadcast %36 : vector<1x16xf32> to vector<64x16xf32>
    %38 = arith.mulf %34, %37 : vector<64x16xf32>
    %39 = arith.addf %33, %38 : vector<64x16xf32>
    %40 = vector.extract_strided_slice %10 {offsets = [320, 0], sizes = [64, 16], strides = [1, 1]} : vector<576x16xf32> to vector<64x16xf32>
    %c0_20 = arith.constant 0 : index
    %c165 = arith.constant 165 : index
    %c0_21 = arith.constant 0 : index
    %41 = vector.load %arg5[%c0_20, %c165, %c0_21] : memref<1x240x64xf32, #tpu.memory_space<vmem>>, vector<1x1x16xf32>
    %42 = vector.shape_cast %41 : vector<1x1x16xf32> to vector<1x16xf32>
    %43 = vector.broadcast %42 : vector<1x16xf32> to vector<64x16xf32>
    %44 = arith.mulf %40, %43 : vector<64x16xf32>
    %45 = arith.addf %39, %44 : vector<64x16xf32>
    %46 = vector.extract_strided_slice %10 {offsets = [384, 0], sizes = [64, 16], strides = [1, 1]} : vector<576x16xf32> to vector<64x16xf32>
    %c0_22 = arith.constant 0 : index
    %c166 = arith.constant 166 : index
    %c0_23 = arith.constant 0 : index
    %47 = vector.load %arg5[%c0_22, %c166, %c0_23] : memref<1x240x64xf32, #tpu.memory_space<vmem>>, vector<1x1x16xf32>
    %48 = vector.shape_cast %47 : vector<1x1x16xf32> to vector<1x16xf32>
    %49 = vector.broadcast %48 : vector<1x16xf32> to vector<64x16xf32>
    %50 = arith.mulf %46, %49 : vector<64x16xf32>
    %51 = arith.addf %45, %50 : vector<64x16xf32>
    %52 = vector.extract_strided_slice %10 {offsets = [448, 0], sizes = [64, 16], strides = [1, 1]} : vector<576x16xf32> to vector<64x16xf32>
    %c0_24 = arith.constant 0 : index
    %c167 = arith.constant 167 : index
    %c0_25 = arith.constant 0 : index
    %53 = vector.load %arg5[%c0_24, %c167, %c0_25] : memref<1x240x64xf32, #tpu.memory_space<vmem>>, vector<1x1x16xf32>
    %54 = vector.shape_cast %53 : vector<1x1x16xf32> to vector<1x16xf32>
    %55 = vector.broadcast %54 : vector<1x16xf32> to vector<64x16xf32>
    %56 = arith.mulf %52, %55 : vector<64x16xf32>
    %57 = arith.addf %51, %56 : vector<64x16xf32>
    %58 = vector.extract_strided_slice %10 {offsets = [512, 0], sizes = [64, 16], strides = [1, 1]} : vector<576x16xf32> to vector<64x16xf32>
    %c0_26 = arith.constant 0 : index
    %c168 = arith.constant 168 : index
    %c0_27 = arith.constant 0 : index
    %59 = vector.load %arg5[%c0_26, %c168, %c0_27] : memref<1x240x64xf32, #tpu.memory_space<vmem>>, vector<1x1x16xf32>
    %60 = vector.shape_cast %59 : vector<1x1x16xf32> to vector<1x16xf32>
    %61 = vector.broadcast %60 : vector<1x16xf32> to vector<64x16xf32>
    %62 = arith.mulf %58, %61 : vector<64x16xf32>
    %63 = arith.addf %57, %62 : vector<64x16xf32>
    %c0_28 = arith.constant 0 : index
    %c0_29 = arith.constant 0 : index
    %c0_30 = arith.constant 0 : index
    %64 = vector.load %arg6[%c0_28, %c0_29, %c0_30] : memref<1x24x128xf32, #tpu.memory_space<vmem>>, vector<1x1x16xf32>
    %65 = vector.shape_cast %64 : vector<1x1x16xf32> to vector<1x16xf32>
    %66 = vector.broadcast %65 : vector<1x16xf32> to vector<64x16xf32>
    %67 = arith.addf %63, %66 : vector<64x16xf32>
    %68 = arith.addf %9, %67 : vector<64x16xf32>
    %c0_31 = arith.constant 0 : index
    %c1 = arith.constant 1 : index
    %c0_32 = arith.constant 0 : index
    %69 = vector.load %arg6[%c0_31, %c1, %c0_32] : memref<1x24x128xf32, #tpu.memory_space<vmem>>, vector<1x1x16xf32>
    %70 = vector.shape_cast %69 : vector<1x1x16xf32> to vector<1x16xf32>
    %c0_33 = arith.constant 0 : index
    %c2 = arith.constant 2 : index
    %c0_34 = arith.constant 0 : index
    %71 = vector.load %arg6[%c0_33, %c2, %c0_34] : memref<1x24x128xf32, #tpu.memory_space<vmem>>, vector<1x1x16xf32>
    %72 = vector.shape_cast %71 : vector<1x1x16xf32> to vector<1x16xf32>
    %cst_35 = arith.constant dense<0.000000e+00> : vector<64xf32>
    %73 = vector.multi_reduction <add>, %68, %cst_35 [1] : vector<64x16xf32> to vector<64xf32>
    %74 = vector.shape_cast %73 : vector<64xf32> to vector<64x1xf32>
    %cst_36 = arith.constant 1.600000e+01 : f32
    %75 = vector.broadcast %cst_36 : f32 to vector<64x1xf32>
    %76 = arith.divf %74, %75 : vector<64x1xf32>
    %77 = vector.broadcast %76 : vector<64x1xf32> to vector<64x16xf32>
    %78 = arith.subf %68, %77 : vector<64x16xf32>
    %79 = arith.mulf %78, %78 : vector<64x16xf32>
    %cst_37 = arith.constant dense<0.000000e+00> : vector<64xf32>
    %80 = vector.multi_reduction <add>, %79, %cst_37 [1] : vector<64x16xf32> to vector<64xf32>
    %81 = vector.shape_cast %80 : vector<64xf32> to vector<64x1xf32>
    %cst_38 = arith.constant 1.600000e+01 : f32
    %82 = vector.broadcast %cst_38 : f32 to vector<64x1xf32>
    %83 = arith.divf %81, %82 : vector<64x1xf32>
    %cst_39 = arith.constant 9.99999974E-6 : f32
    %84 = vector.broadcast %cst_39 : f32 to vector<64x1xf32>
    %85 = arith.addf %83, %84 : vector<64x1xf32>
    %86 = math.rsqrt %85 : vector<64x1xf32>
    %87 = vector.broadcast %86 : vector<64x1xf32> to vector<64x16xf32>
    %88 = arith.mulf %78, %87 : vector<64x16xf32>
    %89 = vector.broadcast %70 : vector<1x16xf32> to vector<64x16xf32>
    %90 = arith.mulf %88, %89 : vector<64x16xf32>
    %91 = vector.broadcast %72 : vector<1x16xf32> to vector<64x16xf32>
    %92 = arith.addf %90, %91 : vector<64x16xf32>
    %c0_40 = arith.constant 0 : index
    %c80 = arith.constant 80 : index
    %c0_41 = arith.constant 0 : index
    %93 = vector.load %arg5[%c0_40, %c80, %c0_41] : memref<1x240x64xf32, #tpu.memory_space<vmem>>, vector<1x16x16xf32>
    %94 = vector.shape_cast %93 : vector<1x16x16xf32> to vector<16x16xf32>
    %cst_42 = arith.constant dense<0.000000e+00> : vector<64x16xf32>
    %95 = tpu.matmul %92, %94, %cst_42 {dimension_numbers = #tpu.dot_dimension_numbers<[1], [0], [0], [1], [0, 0, 1, 1], [], []>} : vector<64x16xf32>, vector<16x16xf32>, vector<64x16xf32> -> vector<64x16xf32>
    %c0_43 = arith.constant 0 : index
    %c3 = arith.constant 3 : index
    %c0_44 = arith.constant 0 : index
    %96 = vector.load %arg6[%c0_43, %c3, %c0_44] : memref<1x24x128xf32, #tpu.memory_space<vmem>>, vector<1x1x16xf32>
    %97 = vector.shape_cast %96 : vector<1x1x16xf32> to vector<1x16xf32>
    %98 = vector.broadcast %97 : vector<1x16xf32> to vector<64x16xf32>
    %99 = arith.addf %95, %98 : vector<64x16xf32>
    %100 = arith.negf %99 : vector<64x16xf32>
    %101 = math.exp %100 : vector<64x16xf32>
    %cst_45 = arith.constant 1.000000e+00 : f32
    %102 = vector.broadcast %cst_45 : f32 to vector<64x16xf32>
    %103 = arith.addf %102, %101 : vector<64x16xf32>
    %104 = arith.divf %102, %103 : vector<64x16xf32>
    %105 = arith.mulf %99, %104 : vector<64x16xf32>
    %c0_46 = arith.constant 0 : index
    %c96 = arith.constant 96 : index
    %c0_47 = arith.constant 0 : index
    %106 = vector.load %arg5[%c0_46, %c96, %c0_47] : memref<1x240x64xf32, #tpu.memory_space<vmem>>, vector<1x16x16xf32>
    %107 = vector.shape_cast %106 : vector<1x16x16xf32> to vector<16x16xf32>
    %cst_48 = arith.constant dense<0.000000e+00> : vector<64x16xf32>
    %108 = tpu.matmul %92, %107, %cst_48 {dimension_numbers = #tpu.dot_dimension_numbers<[1], [0], [0], [1], [0, 0, 1, 1], [], []>} : vector<64x16xf32>, vector<16x16xf32>, vector<64x16xf32> -> vector<64x16xf32>
    %c0_49 = arith.constant 0 : index
    %c4 = arith.constant 4 : index
    %c0_50 = arith.constant 0 : index
    %109 = vector.load %arg6[%c0_49, %c4, %c0_50] : memref<1x24x128xf32, #tpu.memory_space<vmem>>, vector<1x1x16xf32>
    %110 = vector.shape_cast %109 : vector<1x1x16xf32> to vector<1x16xf32>
    %111 = vector.broadcast %110 : vector<1x16xf32> to vector<64x16xf32>
    %112 = arith.addf %108, %111 : vector<64x16xf32>
    %cst_51 = arith.constant dense<0.000000e+00> : vector<576x16xf32>
    %113 = tpu.matmul %0, %112, %cst_51 {dimension_numbers = #tpu.dot_dimension_numbers<[1], [0], [0], [1], [0, 0, 1, 1], [], []>} : vector<576x64xf32>, vector<64x16xf32>, vector<576x16xf32> -> vector<576x16xf32>
    %114 = vector.extract_strided_slice %113 {offsets = [0, 0], sizes = [64, 16], strides = [1, 1]} : vector<576x16xf32> to vector<64x16xf32>
    %c0_52 = arith.constant 0 : index
    %c176 = arith.constant 176 : index
    %c0_53 = arith.constant 0 : index
    %115 = vector.load %arg5[%c0_52, %c176, %c0_53] : memref<1x240x64xf32, #tpu.memory_space<vmem>>, vector<1x1x16xf32>
    %116 = vector.shape_cast %115 : vector<1x1x16xf32> to vector<1x16xf32>
    %117 = vector.broadcast %116 : vector<1x16xf32> to vector<64x16xf32>
    %118 = arith.mulf %114, %117 : vector<64x16xf32>
    %119 = vector.extract_strided_slice %113 {offsets = [64, 0], sizes = [64, 16], strides = [1, 1]} : vector<576x16xf32> to vector<64x16xf32>
    %c0_54 = arith.constant 0 : index
    %c177 = arith.constant 177 : index
    %c0_55 = arith.constant 0 : index
    %120 = vector.load %arg5[%c0_54, %c177, %c0_55] : memref<1x240x64xf32, #tpu.memory_space<vmem>>, vector<1x1x16xf32>
    %121 = vector.shape_cast %120 : vector<1x1x16xf32> to vector<1x16xf32>
    %122 = vector.broadcast %121 : vector<1x16xf32> to vector<64x16xf32>
    %123 = arith.mulf %119, %122 : vector<64x16xf32>
    %124 = arith.addf %118, %123 : vector<64x16xf32>
    %125 = vector.extract_strided_slice %113 {offsets = [128, 0], sizes = [64, 16], strides = [1, 1]} : vector<576x16xf32> to vector<64x16xf32>
    %c0_56 = arith.constant 0 : index
    %c178 = arith.constant 178 : index
    %c0_57 = arith.constant 0 : index
    %126 = vector.load %arg5[%c0_56, %c178, %c0_57] : memref<1x240x64xf32, #tpu.memory_space<vmem>>, vector<1x1x16xf32>
    %127 = vector.shape_cast %126 : vector<1x1x16xf32> to vector<1x16xf32>
    %128 = vector.broadcast %127 : vector<1x16xf32> to vector<64x16xf32>
    %129 = arith.mulf %125, %128 : vector<64x16xf32>
    %130 = arith.addf %124, %129 : vector<64x16xf32>
    %131 = vector.extract_strided_slice %113 {offsets = [192, 0], sizes = [64, 16], strides = [1, 1]} : vector<576x16xf32> to vector<64x16xf32>
    %c0_58 = arith.constant 0 : index
    %c179 = arith.constant 179 : index
    %c0_59 = arith.constant 0 : index
    %132 = vector.load %arg5[%c0_58, %c179, %c0_59] : memref<1x240x64xf32, #tpu.memory_space<vmem>>, vector<1x1x16xf32>
    %133 = vector.shape_cast %132 : vector<1x1x16xf32> to vector<1x16xf32>
    %134 = vector.broadcast %133 : vector<1x16xf32> to vector<64x16xf32>
    %135 = arith.mulf %131, %134 : vector<64x16xf32>
    %136 = arith.addf %130, %135 : vector<64x16xf32>
    %137 = vector.extract_strided_slice %113 {offsets = [256, 0], sizes = [64, 16], strides = [1, 1]} : vector<576x16xf32> to vector<64x16xf32>
    %c0_60 = arith.constant 0 : index
    %c180 = arith.constant 180 : index
    %c0_61 = arith.constant 0 : index
    %138 = vector.load %arg5[%c0_60, %c180, %c0_61] : memref<1x240x64xf32, #tpu.memory_space<vmem>>, vector<1x1x16xf32>
    %139 = vector.shape_cast %138 : vector<1x1x16xf32> to vector<1x16xf32>
    %140 = vector.broadcast %139 : vector<1x16xf32> to vector<64x16xf32>
    %141 = arith.mulf %137, %140 : vector<64x16xf32>
    %142 = arith.addf %136, %141 : vector<64x16xf32>
    %143 = vector.extract_strided_slice %113 {offsets = [320, 0], sizes = [64, 16], strides = [1, 1]} : vector<576x16xf32> to vector<64x16xf32>
    %c0_62 = arith.constant 0 : index
    %c181 = arith.constant 181 : index
    %c0_63 = arith.constant 0 : index
    %144 = vector.load %arg5[%c0_62, %c181, %c0_63] : memref<1x240x64xf32, #tpu.memory_space<vmem>>, vector<1x1x16xf32>
    %145 = vector.shape_cast %144 : vector<1x1x16xf32> to vector<1x16xf32>
    %146 = vector.broadcast %145 : vector<1x16xf32> to vector<64x16xf32>
    %147 = arith.mulf %143, %146 : vector<64x16xf32>
    %148 = arith.addf %142, %147 : vector<64x16xf32>
    %149 = vector.extract_strided_slice %113 {offsets = [384, 0], sizes = [64, 16], strides = [1, 1]} : vector<576x16xf32> to vector<64x16xf32>
    %c0_64 = arith.constant 0 : index
    %c182 = arith.constant 182 : index
    %c0_65 = arith.constant 0 : index
    %150 = vector.load %arg5[%c0_64, %c182, %c0_65] : memref<1x240x64xf32, #tpu.memory_space<vmem>>, vector<1x1x16xf32>
    %151 = vector.shape_cast %150 : vector<1x1x16xf32> to vector<1x16xf32>
    %152 = vector.broadcast %151 : vector<1x16xf32> to vector<64x16xf32>
    %153 = arith.mulf %149, %152 : vector<64x16xf32>
    %154 = arith.addf %148, %153 : vector<64x16xf32>
    %155 = vector.extract_strided_slice %113 {offsets = [448, 0], sizes = [64, 16], strides = [1, 1]} : vector<576x16xf32> to vector<64x16xf32>
    %c0_66 = arith.constant 0 : index
    %c183 = arith.constant 183 : index
    %c0_67 = arith.constant 0 : index
    %156 = vector.load %arg5[%c0_66, %c183, %c0_67] : memref<1x240x64xf32, #tpu.memory_space<vmem>>, vector<1x1x16xf32>
    %157 = vector.shape_cast %156 : vector<1x1x16xf32> to vector<1x16xf32>
    %158 = vector.broadcast %157 : vector<1x16xf32> to vector<64x16xf32>
    %159 = arith.mulf %155, %158 : vector<64x16xf32>
    %160 = arith.addf %154, %159 : vector<64x16xf32>
    %161 = vector.extract_strided_slice %113 {offsets = [512, 0], sizes = [64, 16], strides = [1, 1]} : vector<576x16xf32> to vector<64x16xf32>
    %c0_68 = arith.constant 0 : index
    %c184 = arith.constant 184 : index
    %c0_69 = arith.constant 0 : index
    %162 = vector.load %arg5[%c0_68, %c184, %c0_69] : memref<1x240x64xf32, #tpu.memory_space<vmem>>, vector<1x1x16xf32>
    %163 = vector.shape_cast %162 : vector<1x1x16xf32> to vector<1x16xf32>
    %164 = vector.broadcast %163 : vector<1x16xf32> to vector<64x16xf32>
    %165 = arith.mulf %161, %164 : vector<64x16xf32>
    %166 = arith.addf %160, %165 : vector<64x16xf32>
    %c0_70 = arith.constant 0 : index
    %c5 = arith.constant 5 : index
    %c0_71 = arith.constant 0 : index
    %167 = vector.load %arg6[%c0_70, %c5, %c0_71] : memref<1x24x128xf32, #tpu.memory_space<vmem>>, vector<1x1x16xf32>
    %168 = vector.shape_cast %167 : vector<1x1x16xf32> to vector<1x16xf32>
    %169 = vector.broadcast %168 : vector<1x16xf32> to vector<64x16xf32>
    %170 = arith.addf %166, %169 : vector<64x16xf32>
    %171 = arith.negf %170 : vector<64x16xf32>
    %172 = math.exp %171 : vector<64x16xf32>
    %cst_72 = arith.constant 1.000000e+00 : f32
    %173 = vector.broadcast %cst_72 : f32 to vector<64x16xf32>
    %174 = arith.addf %173, %172 : vector<64x16xf32>
    %175 = arith.divf %173, %174 : vector<64x16xf32>
    %176 = arith.mulf %170, %175 : vector<64x16xf32>
    %c0_73 = arith.constant 0 : index
    %c112 = arith.constant 112 : index
    %c0_74 = arith.constant 0 : index
    %177 = vector.load %arg5[%c0_73, %c112, %c0_74] : memref<1x240x64xf32, #tpu.memory_space<vmem>>, vector<1x16x16xf32>
    %178 = vector.shape_cast %177 : vector<1x16x16xf32> to vector<16x16xf32>
    %cst_75 = arith.constant dense<0.000000e+00> : vector<64x16xf32>
    %179 = tpu.matmul %176, %178, %cst_75 {dimension_numbers = #tpu.dot_dimension_numbers<[1], [0], [0], [1], [0, 0, 1, 1], [], []>} : vector<64x16xf32>, vector<16x16xf32>, vector<64x16xf32> -> vector<64x16xf32>
    %c0_76 = arith.constant 0 : index
    %c6 = arith.constant 6 : index
    %c0_77 = arith.constant 0 : index
    %180 = vector.load %arg6[%c0_76, %c6, %c0_77] : memref<1x24x128xf32, #tpu.memory_space<vmem>>, vector<1x1x16xf32>
    %181 = vector.shape_cast %180 : vector<1x1x16xf32> to vector<1x16xf32>
    %182 = vector.broadcast %181 : vector<1x16xf32> to vector<64x16xf32>
    %183 = arith.addf %179, %182 : vector<64x16xf32>
    %cst_78 = arith.constant 0.000000e+00 : f32
    %184 = vector.broadcast %cst_78 : f32 to vector<64x16xf32>
    %185 = arith.cmpf ogt, %183, %184 : vector<64x16xf32>
    %cst_79 = arith.constant 0.000000e+00 : f32
    %186 = vector.broadcast %cst_79 : f32 to vector<64x16xf32>
    %187 = arith.minimumf %183, %186 : vector<64x16xf32>
    %188 = math.exp %187 : vector<64x16xf32>
    %cst_80 = arith.constant 1.000000e+00 : f32
    %189 = vector.broadcast %cst_80 : f32 to vector<64x16xf32>
    %190 = arith.subf %188, %189 : vector<64x16xf32>
    %191 = arith.select %185, %183, %190 : vector<64x16xi1>, vector<64x16xf32>
    %cst_81 = arith.constant 1.000000e+00 : f32
    %192 = vector.broadcast %cst_81 : f32 to vector<64x16xf32>
    %193 = arith.addf %191, %192 : vector<64x16xf32>
    %c0_82 = arith.constant 0 : index
    %c128_83 = arith.constant 128 : index
    %c0_84 = arith.constant 0 : index
    %194 = vector.load %arg5[%c0_82, %c128_83, %c0_84] : memref<1x240x64xf32, #tpu.memory_space<vmem>>, vector<1x16x16xf32>
    %195 = vector.shape_cast %194 : vector<1x16x16xf32> to vector<16x16xf32>
    %cst_85 = arith.constant dense<0.000000e+00> : vector<64x16xf32>
    %196 = tpu.matmul %176, %195, %cst_85 {dimension_numbers = #tpu.dot_dimension_numbers<[1], [0], [0], [1], [0, 0, 1, 1], [], []>} : vector<64x16xf32>, vector<16x16xf32>, vector<64x16xf32> -> vector<64x16xf32>
    %c0_86 = arith.constant 0 : index
    %c7 = arith.constant 7 : index
    %c0_87 = arith.constant 0 : index
    %197 = vector.load %arg6[%c0_86, %c7, %c0_87] : memref<1x24x128xf32, #tpu.memory_space<vmem>>, vector<1x1x16xf32>
    %198 = vector.shape_cast %197 : vector<1x1x16xf32> to vector<1x16xf32>
    %199 = vector.broadcast %198 : vector<1x16xf32> to vector<64x16xf32>
    %200 = arith.addf %196, %199 : vector<64x16xf32>
    %cst_88 = arith.constant 0.000000e+00 : f32
    %201 = vector.broadcast %cst_88 : f32 to vector<64x16xf32>
    %202 = arith.cmpf ogt, %200, %201 : vector<64x16xf32>
    %cst_89 = arith.constant 0.000000e+00 : f32
    %203 = vector.broadcast %cst_89 : f32 to vector<64x16xf32>
    %204 = arith.minimumf %200, %203 : vector<64x16xf32>
    %205 = math.exp %204 : vector<64x16xf32>
    %cst_90 = arith.constant 1.000000e+00 : f32
    %206 = vector.broadcast %cst_90 : f32 to vector<64x16xf32>
    %207 = arith.subf %205, %206 : vector<64x16xf32>
    %208 = arith.select %202, %200, %207 : vector<64x16xi1>, vector<64x16xf32>
    %cst_91 = arith.constant 1.000000e+00 : f32
    %209 = vector.broadcast %cst_91 : f32 to vector<64x16xf32>
    %210 = arith.addf %208, %209 : vector<64x16xf32>
    %211 = arith.mulf %193, %1 : vector<64x16xf32>
    %cst_92 = arith.constant dense<0.000000e+00> : vector<64x16xf32>
    %212 = tpu.matmul %193, %3, %cst_92 {dimension_numbers = #tpu.dot_dimension_numbers<[1], [0], [0], [1], [0, 0, 1, 1], [], []>} : vector<64x16xf32>, vector<16x16xf32>, vector<64x16xf32> -> vector<64x16xf32>
    %213 = arith.mulf %212, %2 : vector<64x16xf32>
    %214 = arith.addf %211, %213 : vector<64x16xf32>
    %215 = arith.mulf %210, %1 : vector<64x16xf32>
    %cst_93 = arith.constant dense<0.000000e+00> : vector<64x16xf32>
    %216 = tpu.matmul %210, %3, %cst_93 {dimension_numbers = #tpu.dot_dimension_numbers<[1], [0], [0], [1], [0, 0, 1, 1], [], []>} : vector<64x16xf32>, vector<16x16xf32>, vector<64x16xf32> -> vector<64x16xf32>
    %217 = arith.mulf %216, %2 : vector<64x16xf32>
    %218 = arith.addf %215, %217 : vector<64x16xf32>
    %cst_94 = arith.constant dense<0.000000e+00> : vector<16xf32>
    %219 = vector.multi_reduction <add>, %210, %cst_94 [0] : vector<64x16xf32> to vector<16xf32>
    %220 = vector.shape_cast %219 : vector<16xf32> to vector<1x16xf32>
    %cst_95 = arith.constant 6.400000e+01 : f32
    %221 = vector.broadcast %cst_95 : f32 to vector<1x16xf32>
    %222 = arith.divf %220, %221 : vector<1x16xf32>
    %223 = vector.broadcast %222 : vector<1x16xf32> to vector<64x16xf32>
    %224 = arith.mulf %193, %223 : vector<64x16xf32>
    %cst_96 = arith.constant dense<0.000000e+00> : vector<64x16xf32>
    %225 = tpu.matmul %224, %4, %cst_96 {dimension_numbers = #tpu.dot_dimension_numbers<[1], [0], [0], [1], [0, 0, 1, 1], [], []>} : vector<64x16xf32>, vector<16x16xf32>, vector<64x16xf32> -> vector<64x16xf32>
    %cst_97 = arith.constant 9.99999997E-7 : f32
    %226 = vector.broadcast %cst_97 : f32 to vector<64x16xf32>
    %227 = arith.addf %225, %226 : vector<64x16xf32>
    %cst_98 = arith.constant 1.000000e+00 : f32
    %228 = vector.broadcast %cst_98 : f32 to vector<64x16xf32>
    %229 = arith.divf %228, %227 : vector<64x16xf32>
    %cst_99 = arith.constant 1.250000e-01 : f32
    %230 = vector.broadcast %cst_99 : f32 to vector<64x16xf32>
    %231 = arith.mulf %218, %230 : vector<64x16xf32>
    %cst_100 = arith.constant 1.250000e-01 : f32
    %232 = vector.broadcast %cst_100 : f32 to vector<64x16xf32>
    %233 = arith.mulf %176, %232 : vector<64x16xf32>
    %cst_101 = arith.constant dense<0.000000e+00> : vector<16x16xf32>
    %234 = tpu.matmul %231, %233, %cst_101 {dimension_numbers = #tpu.dot_dimension_numbers<[0], [0], [1], [1], [0, 1, 1, 1], [], []>} : vector<64x16xf32>, vector<64x16xf32>, vector<16x16xf32> -> vector<16x16xf32>
    %235 = arith.mulf %234, %4 : vector<16x16xf32>
    %cst_102 = arith.constant dense<0.000000e+00> : vector<64x16xf32>
    %236 = tpu.matmul %214, %235, %cst_102 {dimension_numbers = #tpu.dot_dimension_numbers<[1], [0], [0], [1], [0, 0, 1, 1], [], []>} : vector<64x16xf32>, vector<16x16xf32>, vector<64x16xf32> -> vector<64x16xf32>
    %237 = arith.mulf %236, %229 : vector<64x16xf32>
    %cst_103 = arith.constant dense<0.000000e+00> : vector<576x16xf32>
    %238 = tpu.matmul %0, %176, %cst_103 {dimension_numbers = #tpu.dot_dimension_numbers<[1], [0], [0], [1], [0, 0, 1, 1], [], []>} : vector<576x64xf32>, vector<64x16xf32>, vector<576x16xf32> -> vector<576x16xf32>
    %239 = vector.extract_strided_slice %238 {offsets = [0, 0], sizes = [64, 16], strides = [1, 1]} : vector<576x16xf32> to vector<64x16xf32>
    %c0_104 = arith.constant 0 : index
    %c192 = arith.constant 192 : index
    %c0_105 = arith.constant 0 : index
    %240 = vector.load %arg5[%c0_104, %c192, %c0_105] : memref<1x240x64xf32, #tpu.memory_space<vmem>>, vector<1x1x16xf32>
    %241 = vector.shape_cast %240 : vector<1x1x16xf32> to vector<1x16xf32>
    %242 = vector.broadcast %241 : vector<1x16xf32> to vector<64x16xf32>
    %243 = arith.mulf %239, %242 : vector<64x16xf32>
    %244 = vector.extract_strided_slice %238 {offsets = [64, 0], sizes = [64, 16], strides = [1, 1]} : vector<576x16xf32> to vector<64x16xf32>
    %c0_106 = arith.constant 0 : index
    %c193 = arith.constant 193 : index
    %c0_107 = arith.constant 0 : index
    %245 = vector.load %arg5[%c0_106, %c193, %c0_107] : memref<1x240x64xf32, #tpu.memory_space<vmem>>, vector<1x1x16xf32>
    %246 = vector.shape_cast %245 : vector<1x1x16xf32> to vector<1x16xf32>
    %247 = vector.broadcast %246 : vector<1x16xf32> to vector<64x16xf32>
    %248 = arith.mulf %244, %247 : vector<64x16xf32>
    %249 = arith.addf %243, %248 : vector<64x16xf32>
    %250 = vector.extract_strided_slice %238 {offsets = [128, 0], sizes = [64, 16], strides = [1, 1]} : vector<576x16xf32> to vector<64x16xf32>
    %c0_108 = arith.constant 0 : index
    %c194 = arith.constant 194 : index
    %c0_109 = arith.constant 0 : index
    %251 = vector.load %arg5[%c0_108, %c194, %c0_109] : memref<1x240x64xf32, #tpu.memory_space<vmem>>, vector<1x1x16xf32>
    %252 = vector.shape_cast %251 : vector<1x1x16xf32> to vector<1x16xf32>
    %253 = vector.broadcast %252 : vector<1x16xf32> to vector<64x16xf32>
    %254 = arith.mulf %250, %253 : vector<64x16xf32>
    %255 = arith.addf %249, %254 : vector<64x16xf32>
    %256 = vector.extract_strided_slice %238 {offsets = [192, 0], sizes = [64, 16], strides = [1, 1]} : vector<576x16xf32> to vector<64x16xf32>
    %c0_110 = arith.constant 0 : index
    %c195 = arith.constant 195 : index
    %c0_111 = arith.constant 0 : index
    %257 = vector.load %arg5[%c0_110, %c195, %c0_111] : memref<1x240x64xf32, #tpu.memory_space<vmem>>, vector<1x1x16xf32>
    %258 = vector.shape_cast %257 : vector<1x1x16xf32> to vector<1x16xf32>
    %259 = vector.broadcast %258 : vector<1x16xf32> to vector<64x16xf32>
    %260 = arith.mulf %256, %259 : vector<64x16xf32>
    %261 = arith.addf %255, %260 : vector<64x16xf32>
    %262 = vector.extract_strided_slice %238 {offsets = [256, 0], sizes = [64, 16], strides = [1, 1]} : vector<576x16xf32> to vector<64x16xf32>
    %c0_112 = arith.constant 0 : index
    %c196 = arith.constant 196 : index
    %c0_113 = arith.constant 0 : index
    %263 = vector.load %arg5[%c0_112, %c196, %c0_113] : memref<1x240x64xf32, #tpu.memory_space<vmem>>, vector<1x1x16xf32>
    %264 = vector.shape_cast %263 : vector<1x1x16xf32> to vector<1x16xf32>
    %265 = vector.broadcast %264 : vector<1x16xf32> to vector<64x16xf32>
    %266 = arith.mulf %262, %265 : vector<64x16xf32>
    %267 = arith.addf %261, %266 : vector<64x16xf32>
    %268 = vector.extract_strided_slice %238 {offsets = [320, 0], sizes = [64, 16], strides = [1, 1]} : vector<576x16xf32> to vector<64x16xf32>
    %c0_114 = arith.constant 0 : index
    %c197 = arith.constant 197 : index
    %c0_115 = arith.constant 0 : index
    %269 = vector.load %arg5[%c0_114, %c197, %c0_115] : memref<1x240x64xf32, #tpu.memory_space<vmem>>, vector<1x1x16xf32>
    %270 = vector.shape_cast %269 : vector<1x1x16xf32> to vector<1x16xf32>
    %271 = vector.broadcast %270 : vector<1x16xf32> to vector<64x16xf32>
    %272 = arith.mulf %268, %271 : vector<64x16xf32>
    %273 = arith.addf %267, %272 : vector<64x16xf32>
    %274 = vector.extract_strided_slice %238 {offsets = [384, 0], sizes = [64, 16], strides = [1, 1]} : vector<576x16xf32> to vector<64x16xf32>
    %c0_116 = arith.constant 0 : index
    %c198 = arith.constant 198 : index
    %c0_117 = arith.constant 0 : index
    %275 = vector.load %arg5[%c0_116, %c198, %c0_117] : memref<1x240x64xf32, #tpu.memory_space<vmem>>, vector<1x1x16xf32>
    %276 = vector.shape_cast %275 : vector<1x1x16xf32> to vector<1x16xf32>
    %277 = vector.broadcast %276 : vector<1x16xf32> to vector<64x16xf32>
    %278 = arith.mulf %274, %277 : vector<64x16xf32>
    %279 = arith.addf %273, %278 : vector<64x16xf32>
    %280 = vector.extract_strided_slice %238 {offsets = [448, 0], sizes = [64, 16], strides = [1, 1]} : vector<576x16xf32> to vector<64x16xf32>
    %c0_118 = arith.constant 0 : index
    %c199 = arith.constant 199 : index
    %c0_119 = arith.constant 0 : index
    %281 = vector.load %arg5[%c0_118, %c199, %c0_119] : memref<1x240x64xf32, #tpu.memory_space<vmem>>, vector<1x1x16xf32>
    %282 = vector.shape_cast %281 : vector<1x1x16xf32> to vector<1x16xf32>
    %283 = vector.broadcast %282 : vector<1x16xf32> to vector<64x16xf32>
    %284 = arith.mulf %280, %283 : vector<64x16xf32>
    %285 = arith.addf %279, %284 : vector<64x16xf32>
    %286 = vector.extract_strided_slice %238 {offsets = [512, 0], sizes = [64, 16], strides = [1, 1]} : vector<576x16xf32> to vector<64x16xf32>
    %c0_120 = arith.constant 0 : index
    %c200 = arith.constant 200 : index
    %c0_121 = arith.constant 0 : index
    %287 = vector.load %arg5[%c0_120, %c200, %c0_121] : memref<1x240x64xf32, #tpu.memory_space<vmem>>, vector<1x1x16xf32>
    %288 = vector.shape_cast %287 : vector<1x1x16xf32> to vector<1x16xf32>
    %289 = vector.broadcast %288 : vector<1x16xf32> to vector<64x16xf32>
    %290 = arith.mulf %286, %289 : vector<64x16xf32>
    %291 = arith.addf %285, %290 : vector<64x16xf32>
    %c0_122 = arith.constant 0 : index
    %c8 = arith.constant 8 : index
    %c0_123 = arith.constant 0 : index
    %292 = vector.load %arg6[%c0_122, %c8, %c0_123] : memref<1x24x128xf32, #tpu.memory_space<vmem>>, vector<1x1x16xf32>
    %293 = vector.shape_cast %292 : vector<1x1x16xf32> to vector<1x16xf32>
    %294 = vector.broadcast %293 : vector<1x16xf32> to vector<64x16xf32>
    %295 = arith.addf %291, %294 : vector<64x16xf32>
    %296 = arith.addf %237, %295 : vector<64x16xf32>
    %297 = arith.mulf %296, %105 : vector<64x16xf32>
    %c0_124 = arith.constant 0 : index
    %c144_125 = arith.constant 144 : index
    %c0_126 = arith.constant 0 : index
    %298 = vector.load %arg5[%c0_124, %c144_125, %c0_126] : memref<1x240x64xf32, #tpu.memory_space<vmem>>, vector<1x16x16xf32>
    %299 = vector.shape_cast %298 : vector<1x16x16xf32> to vector<16x16xf32>
    %cst_127 = arith.constant dense<0.000000e+00> : vector<64x16xf32>
    %300 = tpu.matmul %297, %299, %cst_127 {dimension_numbers = #tpu.dot_dimension_numbers<[1], [0], [0], [1], [0, 0, 1, 1], [], []>} : vector<64x16xf32>, vector<16x16xf32>, vector<64x16xf32> -> vector<64x16xf32>
    %c0_128 = arith.constant 0 : index
    %c9 = arith.constant 9 : index
    %c0_129 = arith.constant 0 : index
    %301 = vector.load %arg6[%c0_128, %c9, %c0_129] : memref<1x24x128xf32, #tpu.memory_space<vmem>>, vector<1x1x16xf32>
    %302 = vector.shape_cast %301 : vector<1x1x16xf32> to vector<1x16xf32>
    %303 = vector.broadcast %302 : vector<1x16xf32> to vector<64x16xf32>
    %304 = arith.addf %300, %303 : vector<64x16xf32>
    %305 = arith.addf %68, %304 : vector<64x16xf32>
    %cst_130 = arith.constant dense<0.000000e+00> : vector<576x16xf32>
    %306 = tpu.matmul %0, %305, %cst_130 {dimension_numbers = #tpu.dot_dimension_numbers<[1], [0], [0], [1], [0, 0, 1, 1], [], []>} : vector<576x64xf32>, vector<64x16xf32>, vector<576x16xf32> -> vector<576x16xf32>
    %307 = vector.extract_strided_slice %306 {offsets = [0, 0], sizes = [64, 16], strides = [1, 1]} : vector<576x16xf32> to vector<64x16xf32>
    %c0_131 = arith.constant 0 : index
    %c208 = arith.constant 208 : index
    %c0_132 = arith.constant 0 : index
    %308 = vector.load %arg5[%c0_131, %c208, %c0_132] : memref<1x240x64xf32, #tpu.memory_space<vmem>>, vector<1x1x16xf32>
    %309 = vector.shape_cast %308 : vector<1x1x16xf32> to vector<1x16xf32>
    %310 = vector.broadcast %309 : vector<1x16xf32> to vector<64x16xf32>
    %311 = arith.mulf %307, %310 : vector<64x16xf32>
    %312 = vector.extract_strided_slice %306 {offsets = [64, 0], sizes = [64, 16], strides = [1, 1]} : vector<576x16xf32> to vector<64x16xf32>
    %c0_133 = arith.constant 0 : index
    %c209 = arith.constant 209 : index
    %c0_134 = arith.constant 0 : index
    %313 = vector.load %arg5[%c0_133, %c209, %c0_134] : memref<1x240x64xf32, #tpu.memory_space<vmem>>, vector<1x1x16xf32>
    %314 = vector.shape_cast %313 : vector<1x1x16xf32> to vector<1x16xf32>
    %315 = vector.broadcast %314 : vector<1x16xf32> to vector<64x16xf32>
    %316 = arith.mulf %312, %315 : vector<64x16xf32>
    %317 = arith.addf %311, %316 : vector<64x16xf32>
    %318 = vector.extract_strided_slice %306 {offsets = [128, 0], sizes = [64, 16], strides = [1, 1]} : vector<576x16xf32> to vector<64x16xf32>
    %c0_135 = arith.constant 0 : index
    %c210 = arith.constant 210 : index
    %c0_136 = arith.constant 0 : index
    %319 = vector.load %arg5[%c0_135, %c210, %c0_136] : memref<1x240x64xf32, #tpu.memory_space<vmem>>, vector<1x1x16xf32>
    %320 = vector.shape_cast %319 : vector<1x1x16xf32> to vector<1x16xf32>
    %321 = vector.broadcast %320 : vector<1x16xf32> to vector<64x16xf32>
    %322 = arith.mulf %318, %321 : vector<64x16xf32>
    %323 = arith.addf %317, %322 : vector<64x16xf32>
    %324 = vector.extract_strided_slice %306 {offsets = [192, 0], sizes = [64, 16], strides = [1, 1]} : vector<576x16xf32> to vector<64x16xf32>
    %c0_137 = arith.constant 0 : index
    %c211 = arith.constant 211 : index
    %c0_138 = arith.constant 0 : index
    %325 = vector.load %arg5[%c0_137, %c211, %c0_138] : memref<1x240x64xf32, #tpu.memory_space<vmem>>, vector<1x1x16xf32>
    %326 = vector.shape_cast %325 : vector<1x1x16xf32> to vector<1x16xf32>
    %327 = vector.broadcast %326 : vector<1x16xf32> to vector<64x16xf32>
    %328 = arith.mulf %324, %327 : vector<64x16xf32>
    %329 = arith.addf %323, %328 : vector<64x16xf32>
    %330 = vector.extract_strided_slice %306 {offsets = [256, 0], sizes = [64, 16], strides = [1, 1]} : vector<576x16xf32> to vector<64x16xf32>
    %c0_139 = arith.constant 0 : index
    %c212 = arith.constant 212 : index
    %c0_140 = arith.constant 0 : index
    %331 = vector.load %arg5[%c0_139, %c212, %c0_140] : memref<1x240x64xf32, #tpu.memory_space<vmem>>, vector<1x1x16xf32>
    %332 = vector.shape_cast %331 : vector<1x1x16xf32> to vector<1x16xf32>
    %333 = vector.broadcast %332 : vector<1x16xf32> to vector<64x16xf32>
    %334 = arith.mulf %330, %333 : vector<64x16xf32>
    %335 = arith.addf %329, %334 : vector<64x16xf32>
    %336 = vector.extract_strided_slice %306 {offsets = [320, 0], sizes = [64, 16], strides = [1, 1]} : vector<576x16xf32> to vector<64x16xf32>
    %c0_141 = arith.constant 0 : index
    %c213 = arith.constant 213 : index
    %c0_142 = arith.constant 0 : index
    %337 = vector.load %arg5[%c0_141, %c213, %c0_142] : memref<1x240x64xf32, #tpu.memory_space<vmem>>, vector<1x1x16xf32>
    %338 = vector.shape_cast %337 : vector<1x1x16xf32> to vector<1x16xf32>
    %339 = vector.broadcast %338 : vector<1x16xf32> to vector<64x16xf32>
    %340 = arith.mulf %336, %339 : vector<64x16xf32>
    %341 = arith.addf %335, %340 : vector<64x16xf32>
    %342 = vector.extract_strided_slice %306 {offsets = [384, 0], sizes = [64, 16], strides = [1, 1]} : vector<576x16xf32> to vector<64x16xf32>
    %c0_143 = arith.constant 0 : index
    %c214 = arith.constant 214 : index
    %c0_144 = arith.constant 0 : index
    %343 = vector.load %arg5[%c0_143, %c214, %c0_144] : memref<1x240x64xf32, #tpu.memory_space<vmem>>, vector<1x1x16xf32>
    %344 = vector.shape_cast %343 : vector<1x1x16xf32> to vector<1x16xf32>
    %345 = vector.broadcast %344 : vector<1x16xf32> to vector<64x16xf32>
    %346 = arith.mulf %342, %345 : vector<64x16xf32>
    %347 = arith.addf %341, %346 : vector<64x16xf32>
    %348 = vector.extract_strided_slice %306 {offsets = [448, 0], sizes = [64, 16], strides = [1, 1]} : vector<576x16xf32> to vector<64x16xf32>
    %c0_145 = arith.constant 0 : index
    %c215 = arith.constant 215 : index
    %c0_146 = arith.constant 0 : index
    %349 = vector.load %arg5[%c0_145, %c215, %c0_146] : memref<1x240x64xf32, #tpu.memory_space<vmem>>, vector<1x1x16xf32>
    %350 = vector.shape_cast %349 : vector<1x1x16xf32> to vector<1x16xf32>
    %351 = vector.broadcast %350 : vector<1x16xf32> to vector<64x16xf32>
    %352 = arith.mulf %348, %351 : vector<64x16xf32>
    %353 = arith.addf %347, %352 : vector<64x16xf32>
    %354 = vector.extract_strided_slice %306 {offsets = [512, 0], sizes = [64, 16], strides = [1, 1]} : vector<576x16xf32> to vector<64x16xf32>
    %c0_147 = arith.constant 0 : index
    %c216 = arith.constant 216 : index
    %c0_148 = arith.constant 0 : index
    %355 = vector.load %arg5[%c0_147, %c216, %c0_148] : memref<1x240x64xf32, #tpu.memory_space<vmem>>, vector<1x1x16xf32>
    %356 = vector.shape_cast %355 : vector<1x1x16xf32> to vector<1x16xf32>
    %357 = vector.broadcast %356 : vector<1x16xf32> to vector<64x16xf32>
    %358 = arith.mulf %354, %357 : vector<64x16xf32>
    %359 = arith.addf %353, %358 : vector<64x16xf32>
    %c0_149 = arith.constant 0 : index
    %c10 = arith.constant 10 : index
    %c0_150 = arith.constant 0 : index
    %360 = vector.load %arg6[%c0_149, %c10, %c0_150] : memref<1x24x128xf32, #tpu.memory_space<vmem>>, vector<1x1x16xf32>
    %361 = vector.shape_cast %360 : vector<1x1x16xf32> to vector<1x16xf32>
    %362 = vector.broadcast %361 : vector<1x16xf32> to vector<64x16xf32>
    %363 = arith.addf %359, %362 : vector<64x16xf32>
    %364 = arith.addf %305, %363 : vector<64x16xf32>
    %c0_151 = arith.constant 0 : index
    %c11 = arith.constant 11 : index
    %c0_152 = arith.constant 0 : index
    %365 = vector.load %arg6[%c0_151, %c11, %c0_152] : memref<1x24x128xf32, #tpu.memory_space<vmem>>, vector<1x1x16xf32>
    %366 = vector.shape_cast %365 : vector<1x1x16xf32> to vector<1x16xf32>
    %c0_153 = arith.constant 0 : index
    %c12 = arith.constant 12 : index
    %c0_154 = arith.constant 0 : index
    %367 = vector.load %arg6[%c0_153, %c12, %c0_154] : memref<1x24x128xf32, #tpu.memory_space<vmem>>, vector<1x1x16xf32>
    %368 = vector.shape_cast %367 : vector<1x1x16xf32> to vector<1x16xf32>
    %cst_155 = arith.constant dense<0.000000e+00> : vector<64xf32>
    %369 = vector.multi_reduction <add>, %364, %cst_155 [1] : vector<64x16xf32> to vector<64xf32>
    %370 = vector.shape_cast %369 : vector<64xf32> to vector<64x1xf32>
    %cst_156 = arith.constant 1.600000e+01 : f32
    %371 = vector.broadcast %cst_156 : f32 to vector<64x1xf32>
    %372 = arith.divf %370, %371 : vector<64x1xf32>
    %373 = vector.broadcast %372 : vector<64x1xf32> to vector<64x16xf32>
    %374 = arith.subf %364, %373 : vector<64x16xf32>
    %375 = arith.mulf %374, %374 : vector<64x16xf32>
    %cst_157 = arith.constant dense<0.000000e+00> : vector<64xf32>
    %376 = vector.multi_reduction <add>, %375, %cst_157 [1] : vector<64x16xf32> to vector<64xf32>
    %377 = vector.shape_cast %376 : vector<64xf32> to vector<64x1xf32>
    %cst_158 = arith.constant 1.600000e+01 : f32
    %378 = vector.broadcast %cst_158 : f32 to vector<64x1xf32>
    %379 = arith.divf %377, %378 : vector<64x1xf32>
    %cst_159 = arith.constant 9.99999974E-6 : f32
    %380 = vector.broadcast %cst_159 : f32 to vector<64x1xf32>
    %381 = arith.addf %379, %380 : vector<64x1xf32>
    %382 = math.rsqrt %381 : vector<64x1xf32>
    %383 = vector.broadcast %382 : vector<64x1xf32> to vector<64x16xf32>
    %384 = arith.mulf %374, %383 : vector<64x16xf32>
    %385 = vector.broadcast %366 : vector<1x16xf32> to vector<64x16xf32>
    %386 = arith.mulf %384, %385 : vector<64x16xf32>
    %387 = vector.broadcast %368 : vector<1x16xf32> to vector<64x16xf32>
    %388 = arith.addf %386, %387 : vector<64x16xf32>
    %c0_160 = arith.constant 0 : index
    %c0_161 = arith.constant 0 : index
    %c0_162 = arith.constant 0 : index
    %389 = vector.load %arg5[%c0_160, %c0_161, %c0_162] : memref<1x240x64xf32, #tpu.memory_space<vmem>>, vector<1x16x64xf32>
    %390 = vector.shape_cast %389 : vector<1x16x64xf32> to vector<16x64xf32>
    %cst_163 = arith.constant dense<0.000000e+00> : vector<64x64xf32>
    %391 = tpu.matmul %388, %390, %cst_163 {dimension_numbers = #tpu.dot_dimension_numbers<[1], [0], [0], [1], [0, 0, 1, 1], [], []>} : vector<64x16xf32>, vector<16x64xf32>, vector<64x64xf32> -> vector<64x64xf32>
    %c0_164 = arith.constant 0 : index
    %c13 = arith.constant 13 : index
    %c0_165 = arith.constant 0 : index
    %392 = vector.load %arg6[%c0_164, %c13, %c0_165] : memref<1x24x128xf32, #tpu.memory_space<vmem>>, vector<1x1x64xf32>
    %393 = vector.shape_cast %392 : vector<1x1x64xf32> to vector<1x64xf32>
    %394 = vector.broadcast %393 : vector<1x64xf32> to vector<64x64xf32>
    %395 = arith.addf %391, %394 : vector<64x64xf32>
    %cst_166 = arith.constant dense<0.000000e+00> : vector<576x64xf32>
    %396 = tpu.matmul %0, %395, %cst_166 {dimension_numbers = #tpu.dot_dimension_numbers<[1], [0], [0], [1], [0, 0, 1, 1], [], []>} : vector<576x64xf32>, vector<64x64xf32>, vector<576x64xf32> -> vector<576x64xf32>
    %397 = vector.extract_strided_slice %396 {offsets = [0, 0], sizes = [64, 64], strides = [1, 1]} : vector<576x64xf32> to vector<64x64xf32>
    %c0_167 = arith.constant 0 : index
    %c224 = arith.constant 224 : index
    %c0_168 = arith.constant 0 : index
    %398 = vector.load %arg5[%c0_167, %c224, %c0_168] : memref<1x240x64xf32, #tpu.memory_space<vmem>>, vector<1x1x64xf32>
    %399 = vector.shape_cast %398 : vector<1x1x64xf32> to vector<1x64xf32>
    %400 = vector.broadcast %399 : vector<1x64xf32> to vector<64x64xf32>
    %401 = arith.mulf %397, %400 : vector<64x64xf32>
    %402 = vector.extract_strided_slice %396 {offsets = [64, 0], sizes = [64, 64], strides = [1, 1]} : vector<576x64xf32> to vector<64x64xf32>
    %c0_169 = arith.constant 0 : index
    %c225 = arith.constant 225 : index
    %c0_170 = arith.constant 0 : index
    %403 = vector.load %arg5[%c0_169, %c225, %c0_170] : memref<1x240x64xf32, #tpu.memory_space<vmem>>, vector<1x1x64xf32>
    %404 = vector.shape_cast %403 : vector<1x1x64xf32> to vector<1x64xf32>
    %405 = vector.broadcast %404 : vector<1x64xf32> to vector<64x64xf32>
    %406 = arith.mulf %402, %405 : vector<64x64xf32>
    %407 = arith.addf %401, %406 : vector<64x64xf32>
    %408 = vector.extract_strided_slice %396 {offsets = [128, 0], sizes = [64, 64], strides = [1, 1]} : vector<576x64xf32> to vector<64x64xf32>
    %c0_171 = arith.constant 0 : index
    %c226 = arith.constant 226 : index
    %c0_172 = arith.constant 0 : index
    %409 = vector.load %arg5[%c0_171, %c226, %c0_172] : memref<1x240x64xf32, #tpu.memory_space<vmem>>, vector<1x1x64xf32>
    %410 = vector.shape_cast %409 : vector<1x1x64xf32> to vector<1x64xf32>
    %411 = vector.broadcast %410 : vector<1x64xf32> to vector<64x64xf32>
    %412 = arith.mulf %408, %411 : vector<64x64xf32>
    %413 = arith.addf %407, %412 : vector<64x64xf32>
    %414 = vector.extract_strided_slice %396 {offsets = [192, 0], sizes = [64, 64], strides = [1, 1]} : vector<576x64xf32> to vector<64x64xf32>
    %c0_173 = arith.constant 0 : index
    %c227 = arith.constant 227 : index
    %c0_174 = arith.constant 0 : index
    %415 = vector.load %arg5[%c0_173, %c227, %c0_174] : memref<1x240x64xf32, #tpu.memory_space<vmem>>, vector<1x1x64xf32>
    %416 = vector.shape_cast %415 : vector<1x1x64xf32> to vector<1x64xf32>
    %417 = vector.broadcast %416 : vector<1x64xf32> to vector<64x64xf32>
    %418 = arith.mulf %414, %417 : vector<64x64xf32>
    %419 = arith.addf %413, %418 : vector<64x64xf32>
    %420 = vector.extract_strided_slice %396 {offsets = [256, 0], sizes = [64, 64], strides = [1, 1]} : vector<576x64xf32> to vector<64x64xf32>
    %c0_175 = arith.constant 0 : index
    %c228 = arith.constant 228 : index
    %c0_176 = arith.constant 0 : index
    %421 = vector.load %arg5[%c0_175, %c228, %c0_176] : memref<1x240x64xf32, #tpu.memory_space<vmem>>, vector<1x1x64xf32>
    %422 = vector.shape_cast %421 : vector<1x1x64xf32> to vector<1x64xf32>
    %423 = vector.broadcast %422 : vector<1x64xf32> to vector<64x64xf32>
    %424 = arith.mulf %420, %423 : vector<64x64xf32>
    %425 = arith.addf %419, %424 : vector<64x64xf32>
    %426 = vector.extract_strided_slice %396 {offsets = [320, 0], sizes = [64, 64], strides = [1, 1]} : vector<576x64xf32> to vector<64x64xf32>
    %c0_177 = arith.constant 0 : index
    %c229 = arith.constant 229 : index
    %c0_178 = arith.constant 0 : index
    %427 = vector.load %arg5[%c0_177, %c229, %c0_178] : memref<1x240x64xf32, #tpu.memory_space<vmem>>, vector<1x1x64xf32>
    %428 = vector.shape_cast %427 : vector<1x1x64xf32> to vector<1x64xf32>
    %429 = vector.broadcast %428 : vector<1x64xf32> to vector<64x64xf32>
    %430 = arith.mulf %426, %429 : vector<64x64xf32>
    %431 = arith.addf %425, %430 : vector<64x64xf32>
    %432 = vector.extract_strided_slice %396 {offsets = [384, 0], sizes = [64, 64], strides = [1, 1]} : vector<576x64xf32> to vector<64x64xf32>
    %c0_179 = arith.constant 0 : index
    %c230 = arith.constant 230 : index
    %c0_180 = arith.constant 0 : index
    %433 = vector.load %arg5[%c0_179, %c230, %c0_180] : memref<1x240x64xf32, #tpu.memory_space<vmem>>, vector<1x1x64xf32>
    %434 = vector.shape_cast %433 : vector<1x1x64xf32> to vector<1x64xf32>
    %435 = vector.broadcast %434 : vector<1x64xf32> to vector<64x64xf32>
    %436 = arith.mulf %432, %435 : vector<64x64xf32>
    %437 = arith.addf %431, %436 : vector<64x64xf32>
    %438 = vector.extract_strided_slice %396 {offsets = [448, 0], sizes = [64, 64], strides = [1, 1]} : vector<576x64xf32> to vector<64x64xf32>
    %c0_181 = arith.constant 0 : index
    %c231 = arith.constant 231 : index
    %c0_182 = arith.constant 0 : index
    %439 = vector.load %arg5[%c0_181, %c231, %c0_182] : memref<1x240x64xf32, #tpu.memory_space<vmem>>, vector<1x1x64xf32>
    %440 = vector.shape_cast %439 : vector<1x1x64xf32> to vector<1x64xf32>
    %441 = vector.broadcast %440 : vector<1x64xf32> to vector<64x64xf32>
    %442 = arith.mulf %438, %441 : vector<64x64xf32>
    %443 = arith.addf %437, %442 : vector<64x64xf32>
    %444 = vector.extract_strided_slice %396 {offsets = [512, 0], sizes = [64, 64], strides = [1, 1]} : vector<576x64xf32> to vector<64x64xf32>
    %c0_183 = arith.constant 0 : index
    %c232 = arith.constant 232 : index
    %c0_184 = arith.constant 0 : index
    %445 = vector.load %arg5[%c0_183, %c232, %c0_184] : memref<1x240x64xf32, #tpu.memory_space<vmem>>, vector<1x1x64xf32>
    %446 = vector.shape_cast %445 : vector<1x1x64xf32> to vector<1x64xf32>
    %447 = vector.broadcast %446 : vector<1x64xf32> to vector<64x64xf32>
    %448 = arith.mulf %444, %447 : vector<64x64xf32>
    %449 = arith.addf %443, %448 : vector<64x64xf32>
    %c0_185 = arith.constant 0 : index
    %c14 = arith.constant 14 : index
    %c0_186 = arith.constant 0 : index
    %450 = vector.load %arg6[%c0_185, %c14, %c0_186] : memref<1x24x128xf32, #tpu.memory_space<vmem>>, vector<1x1x64xf32>
    %451 = vector.shape_cast %450 : vector<1x1x64xf32> to vector<1x64xf32>
    %452 = vector.broadcast %451 : vector<1x64xf32> to vector<64x64xf32>
    %453 = arith.addf %449, %452 : vector<64x64xf32>
    %454 = arith.addf %453, %395 : vector<64x64xf32>
    %c0_187 = arith.constant 0 : index
    %c15 = arith.constant 15 : index
    %c0_188 = arith.constant 0 : index
    %455 = vector.load %arg6[%c0_187, %c15, %c0_188] : memref<1x24x128xf32, #tpu.memory_space<vmem>>, vector<1x1x64xf32>
    %456 = vector.shape_cast %455 : vector<1x1x64xf32> to vector<1x64xf32>
    %c0_189 = arith.constant 0 : index
    %c16 = arith.constant 16 : index
    %c0_190 = arith.constant 0 : index
    %457 = vector.load %arg6[%c0_189, %c16, %c0_190] : memref<1x24x128xf32, #tpu.memory_space<vmem>>, vector<1x1x64xf32>
    %458 = vector.shape_cast %457 : vector<1x1x64xf32> to vector<1x64xf32>
    %cst_191 = arith.constant dense<0.000000e+00> : vector<64xf32>
    %459 = vector.multi_reduction <add>, %454, %cst_191 [1] : vector<64x64xf32> to vector<64xf32>
    %460 = vector.shape_cast %459 : vector<64xf32> to vector<64x1xf32>
    %cst_192 = arith.constant 6.400000e+01 : f32
    %461 = vector.broadcast %cst_192 : f32 to vector<64x1xf32>
    %462 = arith.divf %460, %461 : vector<64x1xf32>
    %463 = vector.broadcast %462 : vector<64x1xf32> to vector<64x64xf32>
    %464 = arith.subf %454, %463 : vector<64x64xf32>
    %465 = arith.mulf %464, %464 : vector<64x64xf32>
    %cst_193 = arith.constant dense<0.000000e+00> : vector<64xf32>
    %466 = vector.multi_reduction <add>, %465, %cst_193 [1] : vector<64x64xf32> to vector<64xf32>
    %467 = vector.shape_cast %466 : vector<64xf32> to vector<64x1xf32>
    %cst_194 = arith.constant 6.400000e+01 : f32
    %468 = vector.broadcast %cst_194 : f32 to vector<64x1xf32>
    %469 = arith.divf %467, %468 : vector<64x1xf32>
    %cst_195 = arith.constant 9.99999974E-6 : f32
    %470 = vector.broadcast %cst_195 : f32 to vector<64x1xf32>
    %471 = arith.addf %469, %470 : vector<64x1xf32>
    %472 = math.rsqrt %471 : vector<64x1xf32>
    %473 = vector.broadcast %472 : vector<64x1xf32> to vector<64x64xf32>
    %474 = arith.mulf %464, %473 : vector<64x64xf32>
    %475 = vector.broadcast %456 : vector<1x64xf32> to vector<64x64xf32>
    %476 = arith.mulf %474, %475 : vector<64x64xf32>
    %477 = vector.broadcast %458 : vector<1x64xf32> to vector<64x64xf32>
    %478 = arith.addf %476, %477 : vector<64x64xf32>
    %479 = arith.addf %478, %395 : vector<64x64xf32>
    %c0_196 = arith.constant 0 : index
    %c17 = arith.constant 17 : index
    %c0_197 = arith.constant 0 : index
    %480 = vector.load %arg6[%c0_196, %c17, %c0_197] : memref<1x24x128xf32, #tpu.memory_space<vmem>>, vector<1x1x64xf32>
    %481 = vector.shape_cast %480 : vector<1x1x64xf32> to vector<1x64xf32>
    %c0_198 = arith.constant 0 : index
    %c18 = arith.constant 18 : index
    %c0_199 = arith.constant 0 : index
    %482 = vector.load %arg6[%c0_198, %c18, %c0_199] : memref<1x24x128xf32, #tpu.memory_space<vmem>>, vector<1x1x64xf32>
    %483 = vector.shape_cast %482 : vector<1x1x64xf32> to vector<1x64xf32>
    %cst_200 = arith.constant dense<0.000000e+00> : vector<64xf32>
    %484 = vector.multi_reduction <add>, %479, %cst_200 [1] : vector<64x64xf32> to vector<64xf32>
    %485 = vector.shape_cast %484 : vector<64xf32> to vector<64x1xf32>
    %cst_201 = arith.constant 6.400000e+01 : f32
    %486 = vector.broadcast %cst_201 : f32 to vector<64x1xf32>
    %487 = arith.divf %485, %486 : vector<64x1xf32>
    %488 = vector.broadcast %487 : vector<64x1xf32> to vector<64x64xf32>
    %489 = arith.subf %479, %488 : vector<64x64xf32>
    %490 = arith.mulf %489, %489 : vector<64x64xf32>
    %cst_202 = arith.constant dense<0.000000e+00> : vector<64xf32>
    %491 = vector.multi_reduction <add>, %490, %cst_202 [1] : vector<64x64xf32> to vector<64xf32>
    %492 = vector.shape_cast %491 : vector<64xf32> to vector<64x1xf32>
    %cst_203 = arith.constant 6.400000e+01 : f32
    %493 = vector.broadcast %cst_203 : f32 to vector<64x1xf32>
    %494 = arith.divf %492, %493 : vector<64x1xf32>
    %cst_204 = arith.constant 9.99999974E-6 : f32
    %495 = vector.broadcast %cst_204 : f32 to vector<64x1xf32>
    %496 = arith.addf %494, %495 : vector<64x1xf32>
    %497 = math.rsqrt %496 : vector<64x1xf32>
    %498 = vector.broadcast %497 : vector<64x1xf32> to vector<64x64xf32>
    %499 = arith.mulf %489, %498 : vector<64x64xf32>
    %500 = vector.broadcast %481 : vector<1x64xf32> to vector<64x64xf32>
    %501 = arith.mulf %499, %500 : vector<64x64xf32>
    %502 = vector.broadcast %483 : vector<1x64xf32> to vector<64x64xf32>
    %503 = arith.addf %501, %502 : vector<64x64xf32>
    %504 = arith.addf %503, %395 : vector<64x64xf32>
    %c0_205 = arith.constant 0 : index
    %c19 = arith.constant 19 : index
    %c0_206 = arith.constant 0 : index
    %505 = vector.load %arg6[%c0_205, %c19, %c0_206] : memref<1x24x128xf32, #tpu.memory_space<vmem>>, vector<1x1x64xf32>
    %506 = vector.shape_cast %505 : vector<1x1x64xf32> to vector<1x64xf32>
    %c0_207 = arith.constant 0 : index
    %c20 = arith.constant 20 : index
    %c0_208 = arith.constant 0 : index
    %507 = vector.load %arg6[%c0_207, %c20, %c0_208] : memref<1x24x128xf32, #tpu.memory_space<vmem>>, vector<1x1x64xf32>
    %508 = vector.shape_cast %507 : vector<1x1x64xf32> to vector<1x64xf32>
    %cst_209 = arith.constant dense<0.000000e+00> : vector<64xf32>
    %509 = vector.multi_reduction <add>, %504, %cst_209 [1] : vector<64x64xf32> to vector<64xf32>
    %510 = vector.shape_cast %509 : vector<64xf32> to vector<64x1xf32>
    %cst_210 = arith.constant 6.400000e+01 : f32
    %511 = vector.broadcast %cst_210 : f32 to vector<64x1xf32>
    %512 = arith.divf %510, %511 : vector<64x1xf32>
    %513 = vector.broadcast %512 : vector<64x1xf32> to vector<64x64xf32>
    %514 = arith.subf %504, %513 : vector<64x64xf32>
    %515 = arith.mulf %514, %514 : vector<64x64xf32>
    %cst_211 = arith.constant dense<0.000000e+00> : vector<64xf32>
    %516 = vector.multi_reduction <add>, %515, %cst_211 [1] : vector<64x64xf32> to vector<64xf32>
    %517 = vector.shape_cast %516 : vector<64xf32> to vector<64x1xf32>
    %cst_212 = arith.constant 6.400000e+01 : f32
    %518 = vector.broadcast %cst_212 : f32 to vector<64x1xf32>
    %519 = arith.divf %517, %518 : vector<64x1xf32>
    %cst_213 = arith.constant 9.99999974E-6 : f32
    %520 = vector.broadcast %cst_213 : f32 to vector<64x1xf32>
    %521 = arith.addf %519, %520 : vector<64x1xf32>
    %522 = math.rsqrt %521 : vector<64x1xf32>
    %523 = vector.broadcast %522 : vector<64x1xf32> to vector<64x64xf32>
    %524 = arith.mulf %514, %523 : vector<64x64xf32>
    %525 = vector.broadcast %506 : vector<1x64xf32> to vector<64x64xf32>
    %526 = arith.mulf %524, %525 : vector<64x64xf32>
    %527 = vector.broadcast %508 : vector<1x64xf32> to vector<64x64xf32>
    %528 = arith.addf %526, %527 : vector<64x64xf32>
    %cst_214 = arith.constant 5.000000e-01 : f32
    %529 = vector.broadcast %cst_214 : f32 to vector<64x64xf32>
    %530 = arith.mulf %529, %528 : vector<64x64xf32>
    %cst_215 = arith.constant 0.707106769 : f32
    %531 = vector.broadcast %cst_215 : f32 to vector<64x64xf32>
    %532 = arith.mulf %528, %531 : vector<64x64xf32>
    %533 = math.erf %532 : vector<64x64xf32>
    %cst_216 = arith.constant 1.000000e+00 : f32
    %534 = vector.broadcast %cst_216 : f32 to vector<64x64xf32>
    %535 = arith.addf %534, %533 : vector<64x64xf32>
    %536 = arith.mulf %530, %535 : vector<64x64xf32>
    %c0_217 = arith.constant 0 : index
    %c16_218 = arith.constant 16 : index
    %c0_219 = arith.constant 0 : index
    %537 = vector.load %arg5[%c0_217, %c16_218, %c0_219] : memref<1x240x64xf32, #tpu.memory_space<vmem>>, vector<1x64x16xf32>
    %538 = vector.shape_cast %537 : vector<1x64x16xf32> to vector<64x16xf32>
    %cst_220 = arith.constant dense<0.000000e+00> : vector<64x16xf32>
    %539 = tpu.matmul %536, %538, %cst_220 {dimension_numbers = #tpu.dot_dimension_numbers<[1], [0], [0], [1], [0, 0, 1, 1], [], []>} : vector<64x64xf32>, vector<64x16xf32>, vector<64x16xf32> -> vector<64x16xf32>
    %c0_221 = arith.constant 0 : index
    %c21 = arith.constant 21 : index
    %c0_222 = arith.constant 0 : index
    %540 = vector.load %arg6[%c0_221, %c21, %c0_222] : memref<1x24x128xf32, #tpu.memory_space<vmem>>, vector<1x1x16xf32>
    %541 = vector.shape_cast %540 : vector<1x1x16xf32> to vector<1x16xf32>
    %542 = vector.broadcast %541 : vector<1x16xf32> to vector<64x16xf32>
    %543 = arith.addf %539, %542 : vector<64x16xf32>
    %544 = arith.addf %364, %543 : vector<64x16xf32>
    %c0_223 = arith.constant 0 : index
    %c0_224 = arith.constant 0 : index
    %c0_225 = arith.constant 0 : index
    %545 = vector.load %arg7[%c0_223, %c0_224, %c0_225] : memref<1x64x16xf32, #tpu.memory_space<vmem>>, vector<1x64x16xf32>
    %546 = vector.shape_cast %545 : vector<1x64x16xf32> to vector<64x16xf32>
    %547 = vector.shape_cast %544 : vector<64x16xf32> to vector<1x64x16xf32>
    tpu.vector_store %arg7[%c0_223, %c0_224, %c0_225], %547 {strides = array<i32>} : memref<1x64x16xf32, #tpu.memory_space<vmem>>, vector<1x64x16xf32>,
    return
  }
  func.func @transform_0(%arg0: i32, %arg1: i32) -> (i32, i32, i32) {
    %c0_i32 = arith.constant 0 : i32
    %c0_i32_0 = arith.constant 0 : i32
    %c0_i32_1 = arith.constant 0 : i32
    return %arg0, %c0_i32, %c0_i32_0 : i32, i32, i32
  }
  func.func @transform_1(%arg0: i32, %arg1: i32) -> (i32, i32) {
    %c0_i32 = arith.constant 0 : i32
    %c0_i32_0 = arith.constant 0 : i32
    %c0_i32_1 = arith.constant 0 : i32
    return %c0_i32, %c0_i32_0 : i32, i32
  }
  func.func @transform_2(%arg0: i32, %arg1: i32) -> (i32, i32) {
    %c0_i32 = arith.constant 0 : i32
    %c0_i32_0 = arith.constant 0 : i32
    %c0_i32_1 = arith.constant 0 : i32
    return %c0_i32, %c0_i32_0 : i32, i32
  }
  func.func @transform_3(%arg0: i32, %arg1: i32) -> (i32, i32, i32) {
    %c0_i32 = arith.constant 0 : i32
    %c0_i32_0 = arith.constant 0 : i32
    %c0_i32_1 = arith.constant 0 : i32
    return %arg1, %c0_i32, %c0_i32_0 : i32, i32, i32
  }
  func.func @transform_4(%arg0: i32, %arg1: i32) -> (i32, i32, i32) {
    %c0_i32 = arith.constant 0 : i32
    %c0_i32_0 = arith.constant 0 : i32
    %c0_i32_1 = arith.constant 0 : i32
    return %arg1, %c0_i32, %c0_i32_0 : i32, i32, i32
  }
  func.func @transform_5(%arg0: i32, %arg1: i32) -> (i32, i32, i32) {
    %c0_i32 = arith.constant 0 : i32
    %c0_i32_0 = arith.constant 0 : i32
    %c0_i32_1 = arith.constant 0 : i32
    return %arg0, %c0_i32, %c0_i32_0 : i32, i32, i32
  }
}

</mosaic_0001>

<bundles_post_ra>
// kernel: down_layer_forward.1
= control target key start
LH: loop header
LB: loop body
LE: loop exit
PB: predicated region body
PF: predicated region fallthrough
CT: control target
= control target key end

     0   :  { %s8855_s18 = smov 0   ;;  %s8857_s19 = smov 0   ;;  %s11332_s0 = inlined_call_operand.vmem [shape: f32[2,64,16], index: 0, kind: input, shape index: {}]   ;;  %s11333_s1 = inlined_call_operand.vmem [shape: f32[576,64], index: 1, kind: input, shape index: {}]   ;;  %s11334_s2 = inlined_call_operand.vmem [shape: f32[160,16], index: 2, kind: input, shape index: {}]   ;;  %s11335_s3 = inlined_call_operand.vmem [shape: f32[2,240,64], index: 3, kind: input, shape index: {}]   ;;  %s11336_s4 = inlined_call_operand.vmem [shape: f32[2,24,128], index: 4, kind: input, shape index: {}]   ;;  %s11337_s5 = inlined_call_operand.vmem [shape: f32[2,64,16], index: 5, kind: output, shape index: {}]  }
   0x1   :  { %s8859_s20 = smov 0   ;;  %s8861_s21 = smov 0  }
   0x2   :  { %s8863_s22 = smov 0  }
   0x3 LB: > { %s24_s23 = sadd.s32 1, %s8815_s20  ;;  %s27_s24 = sadd.s32 1, %s8819_s21  ;;  %s8823_s22 = sphi %s8863_s22, %s15_s22   ;;  %s8819_s21 = sphi %s8861_s21, %s11840_s21   ;;  %s8815_s20 = sphi %s8859_s20, %s11839_s20   ;;  %s8811_s19 = sphi %s8857_s19, %s11838_s19   ;;  %s8807_s18 = sphi %s8855_s18, %s11837_s18  }
   0x4   : > { %p25_p0 = scmp.ge.s32.totalorder %s24_s23, 2  ;;  %p6460_p1 = scmp.ge.s32.totalorder %s8823_s22, 1 }
   0x5   : > { %p219_p2 = scmp.lt.s32.totalorder %s8823_s22, 5 }
   0x6   : > { %s11842_s23 = smov (%p25_p0, %s24_s23), 0  ;;  %s11844_s24 = smov (!%p25_p0, %s27_s24), %s8819_s21 }
   0x7   : > { %p220_p3 = pnand %p6460_p1, %p219_p2  ;;  %p29_p4 = scmp.ge.s32.totalorder %s11844_s24, 2 }
   0x9   : > { %s11846_s24 = smov (%p29_p4, %s11844_s24), 0  ;;  %223 = sbr.rel (%p220_p3) target bundleno = 5070 (0x13ce), region = 40 }
  0x10   : > { %p257_p5 = scmp.lt.s32.totalorder %s8811_s19, 1  ;;  %p262_p6 = scmp.lt.s32.totalorder %s8807_s18, 1  ;;  %v8891_v0 = vld [vmem:[%s11333_s1] sm:$0xff]  ;;  %v8896_v1 = vld [vmem:[%s11333_s1 + $0x8] sm:$0xff]  ;;  %v8901_v2 = vld [vmem:[%s11333_s1 + $0x10] sm:$0xff] }
  0x11   : > { %11470 = vst [vmem:[#allocation2_spill] sm:$0xff] %v8891_v0  ;;  %v8906_v3 = vld [vmem:[%s11333_s1 + $0x18] sm:$0xff]  ;;  %v8911_v4 = vld [vmem:[%s11333_s1 + $0x20] sm:$0xff]  ;;  %v8916_v5 = vld [vmem:[%s11333_s1 + $0x28] sm:$0xff]  ;;  %p6467_p7 = scmp.ne.s32.totalorder %s8807_s18, 0 }
  0x12   : > { %s11848_s19 = smov (!%p257_p5, %s8811_s19), 1  ;;  %v8921_v6 = vld [vmem:[%s11333_s1 + $0x30] sm:$0xff]  ;;  %v8926_v7 = vld [vmem:[%s11333_s1 + $0x38] sm:$0xff]  ;;  %v8931_v8 = vld [vmem:[%s11333_s1 + $0x40] sm:$0xff]  ;;  %vm381_vm0 = vcmask (!%p6467_p7), 130048  }
  0x13   : > { %s263_s25 = scalar_select %p262_p6, %s8807_s18, 1  ;;  %v8937_v9 = vld [vmem:[%s11333_s1 + $0x48] sm:$0xff]  ;;  %v8942_v10 = vld [vmem:[%s11333_s1 + $0x50] sm:$0xff]  ;;  %v8947_v11 = vld [vmem:[%s11333_s1 + $0x58] sm:$0xff] }
  0x14   : > { %s7019_s7 = sshll.u32 %s11848_s19, 6  ;;  %v8952_v12 = vld [vmem:[%s11333_s1 + $0x60] sm:$0xff]  ;;  %v8957_v13 = vld [vmem:[%s11333_s1 + $0x68] sm:$0xff]  ;;  %v8962_v14 = vld [vmem:[%s11333_s1 + $0x70] sm:$0xff] }
  0x15   : > { %11471 = vst [vmem:[#allocation3_spill] sm:$0xff] %v8952_v12  ;;  %11472 = vst [vmem:[#allocation4_spill] sm:$0xff] %v8957_v13  ;;  %s8967_s16 = scalar_lea.vmem %s11332_s0, %s7019_s7  ;;  %s8534_s19 = smul.u32 240, %s263_s25  ;;  %v8972_v15 = vld [vmem:[%s11333_s1 + $0x78] sm:$0xff]  ;;  %v8977_v16 = vld [vmem:[%s11333_s1 + $0x80] sm:$0xff] }
  0x16   : > { %11473 = vst [vmem:[#allocation5_spill] sm:$0xff] %v8962_v14  ;;  %11474 = vst [vmem:[#allocation6_spill] sm:$0xff] %v8972_v15  ;;  %v8982_v17 = vld [vmem:[%s11333_s1 + $0x88] sm:$0xff]  ;;  %s8535_s6 = smul.u32 24, %s263_s25  ;;  %s8987_s10 = scalar_lea.vmem %s11337_s5, %s7019_s7  ;;  %v8992_v18 = vld [vmem:[%s11333_s1 + $0x90] sm:$0xff] }
  0x17   : > { %11475 = vst [vmem:[#allocation7_spill] sm:$0xff] %v8977_v16  ;;  %11476 = vst [vmem:[#allocation8_spill] sm:$0xff] %v8982_v17  ;;  %v8997_v19 = vld [vmem:[%s11333_s1 + $0x98] sm:$0xff]  ;;  %v9002_v20 = vld [vmem:[%s11333_s1 + $0xa0] sm:$0xff]  ;;  %s9007_s7 = scalar_lea.vmem %s11335_s3, %s8534_s19 }
  0x18   : > { %11477 = vst [vmem:[#allocation9_spill] sm:$0xff] %v8992_v18  ;;  %11478 = vst [vmem:[#allocation10_spill] sm:$0xff] %v8997_v19  ;;  %v9012_v21 = vld [vmem:[%s11333_s1 + $0xa8] sm:$0xff]  ;;  %v9017_v22 = vld [vmem:[%s11333_s1 + $0xb0] sm:$0xff]  ;;  %s9027_s19 = scalar_lea.vmem %s11336_s4, %s8535_s6 }
  0x19   : > { %11479 = vst [vmem:[#allocation11_spill] sm:$0xff] %v9002_v20  ;;  %11480 = vst [vmem:[#allocation12_spill] sm:$0xff] %v9012_v21  ;;  %v9022_v23 = vld [vmem:[%s11333_s1 + $0xb8] sm:$0xff]  ;;  %v9032_v24 = vld [vmem:[%s11333_s1 + $0xc0] sm:$0xff] }
  0x1a   : > { %11481 = vst [vmem:[#allocation13_spill] sm:$0xff] %v9017_v22  ;;  %11482 = vst [vmem:[#allocation14_spill] sm:$0xff] %v9022_v23  ;;  %v9037_v25 = vld [vmem:[%s11333_s1 + $0xc8] sm:$0xff]  ;;  %v9042_v26 = vld [vmem:[%s11333_s1 + $0xd0] sm:$0xff] }
  0x1b   : > { %11483 = vst [vmem:[#allocation15_spill] sm:$0xff] %v9032_v24  ;;  %11484 = vst [vmem:[#allocation16_spill] sm:$0xff] %v9037_v25  ;;  %v9047_v27 = vld [vmem:[%s11333_s1 + $0xd8] sm:$0xff]  ;;  %v9052_v28 = vld [vmem:[%s11333_s1 + $0xe0] sm:$0xff] }
  0x1c   : > { %11485 = vst [vmem:[#allocation17_spill] sm:$0xff] %v9042_v26  ;;  %11486 = vst [vmem:[#allocation18_spill] sm:$0xff] %v9047_v27  ;;  %v9057_v29 = vld [vmem:[%s11333_s1 + $0xe8] sm:$0xff]  ;;  %v9062_v30 = vld [vmem:[%s11333_s1 + $0xf0] sm:$0xff] }
  0x1d   : > { %11487 = vst [vmem:[#allocation19_spill] sm:$0xff] %v9052_v28  ;;  %11488 = vst [vmem:[#allocation20_spill] sm:$0xff] %v9057_v29  ;;  %v9067_v31 = vld [vmem:[%s11333_s1 + $0xf8] sm:$0xff]  ;;  %v9072_v32 = vld [vmem:[%s11333_s1 + $0x100] sm:$0xff] }
  0x1e   : > { %11489 = vst [vmem:[#allocation21_spill] sm:$0xff] %v9062_v30  ;;  %11490 = vst [vmem:[#allocation22_spill] sm:$0xff] %v9067_v31  ;;  %v9077_v33 = vld [vmem:[%s11333_s1 + $0x108] sm:$0xff]  ;;  %v9082_v34 = vld [vmem:[%s11333_s1 + $0x110] sm:$0xff] }
  0x1f   : > { %11491 = vst [vmem:[#allocation23_spill] sm:$0xff] %v9072_v32  ;;  %11492 = vst [vmem:[#allocation24_spill] sm:$0xff] %v9077_v33  ;;  %v9087_v35 = vld [vmem:[%s11333_s1 + $0x118] sm:$0xff]  ;;  %v9092_v36 = vld [vmem:[%s11333_s1 + $0x120] sm:$0xff] }
  0x20   : > { %11493 = vst [vmem:[#allocation25_spill] sm:$0xff] %v9082_v34  ;;  %11494 = vst [vmem:[#allocation26_spill] sm:$0xff] %v9087_v35  ;;  %v9097_v37 = vld [vmem:[%s11333_s1 + $0x128] sm:$0xff]  ;;  %v9102_v38 = vld [vmem:[%s11333_s1 + $0x130] sm:$0xff] }
  0x21   : > { %11495 = vst [vmem:[#allocation27_spill] sm:$0xff] %v9092_v36  ;;  %11496 = vst [vmem:[#allocation28_spill] sm:$0xff] %v9097_v37  ;;  %v9107_v39 = vld [vmem:[%s11333_s1 + $0x138] sm:$0xff]  ;;  %v9112_v40 = vld [vmem:[%s11333_s1 + $0x140] sm:$0xff] }
  0x22   : > { %11497 = vst [vmem:[#allocation29_spill] sm:$0xff] %v9102_v38  ;;  %11498 = vst [vmem:[#allocation30_spill] sm:$0xff] %v9107_v39  ;;  %v9117_v41 = vld [vmem:[%s11333_s1 + $0x148] sm:$0xff]  ;;  %v9122_v42 = vld [vmem:[%s11333_s1 + $0x150] sm:$0xff] }
  0x23   : > { %11499 = vst [vmem:[#allocation31_spill] sm:$0xff] %v9112_v40  ;;  %11500 = vst [vmem:[#allocation32_spill] sm:$0xff] %v9117_v41  ;;  %v9127_v43 = vld [vmem:[%s11333_s1 + $0x158] sm:$0xff]  ;;  %v9132_v44 = vld [vmem:[%s11333_s1 + $0x160] sm:$0xff] }
  0x24   : > { %11501 = vst [vmem:[#allocation33_spill] sm:$0xff] %v9122_v42  ;;  %11502 = vst [vmem:[#allocation34_spill] sm:$0xff] %v9127_v43  ;;  %v9137_v45 = vld [vmem:[%s11333_s1 + $0x168] sm:$0xff]  ;;  %v9142_v46 = vld [vmem:[%s11333_s1 + $0x170] sm:$0xff] }
  0x25   : > { %11503 = vst [vmem:[#allocation35_spill] sm:$0xff] %v9132_v44  ;;  %11504 = vst [vmem:[#allocation36_spill] sm:$0xff] %v9137_v45  ;;  %v9147_v47 = vld [vmem:[%s11333_s1 + $0x178] sm:$0xff]  ;;  %v9152_v48 = vld [vmem:[%s11333_s1 + $0x180] sm:$0xff] }
  0x26   : > { %11505 = vst [vmem:[#allocation37_spill] sm:$0xff] %v9142_v46  ;;  %11506 = vst [vmem:[#allocation38_spill] sm:$0xff] %v9147_v47  ;;  %v9157_v49 = vld [vmem:[%s11333_s1 + $0x188] sm:$0xff]  ;;  %v9162_v50 = vld [vmem:[%s11333_s1 + $0x190] sm:$0xff] }
  0x27   : > { %11507 = vst [vmem:[#allocation39_spill] sm:$0xff] %v9152_v48  ;;  %11508 = vst [vmem:[#allocation40_spill] sm:$0xff] %v9157_v49  ;;  %v9167_v51 = vld [vmem:[%s11333_s1 + $0x198] sm:$0xff]  ;;  %v9172_v52 = vld [vmem:[%s11333_s1 + $0x1a0] sm:$0xff] }
  0x28   : > { %11509 = vst [vmem:[#allocation41_spill] sm:$0xff] %v9162_v50  ;;  %11510 = vst [vmem:[#allocation42_spill] sm:$0xff] %v9167_v51  ;;  %v9177_v53 = vld [vmem:[%s11333_s1 + $0x1a8] sm:$0xff]  ;;  %v9182_v54 = vld [vmem:[%s11333_s1 + $0x1b0] sm:$0xff] }
  0x29   : > { %11511 = vst [vmem:[#allocation43_spill] sm:$0xff] %v9172_v52  ;;  %11512 = vst [vmem:[#allocation44_spill] sm:$0xff] %v9177_v53  ;;  %v9187_v55 = vld [vmem:[%s11333_s1 + $0x1b8] sm:$0xff]  ;;  %v9192_v56 = vld [vmem:[%s11333_s1 + $0x1c0] sm:$0xff] }
  0x2a   : > { %11513 = vst [vmem:[#allocation45_spill] sm:$0xff] %v9182_v54  ;;  %11514 = vst [vmem:[#allocation46_spill] sm:$0xff] %v9187_v55  ;;  %v9197_v57 = vld [vmem:[%s11333_s1 + $0x1c8] sm:$0xff]  ;;  %v9202_v58 = vld [vmem:[%s11333_s1 + $0x1d0] sm:$0xff] }
  0x2b   : > { %11515 = vst [vmem:[#allocation47_spill] sm:$0xff] %v9192_v56  ;;  %11516 = vst [vmem:[#allocation48_spill] sm:$0xff] %v9197_v57  ;;  %v9207_v59 = vld [vmem:[%s11333_s1 + $0x1d8] sm:$0xff]  ;;  %v9212_v60 = vld [vmem:[%s11333_s1 + $0x1e0] sm:$0xff] }
  0x2c   : > { %11517 = vst [vmem:[#allocation49_spill] sm:$0xff] %v9202_v58  ;;  %11518 = vst [vmem:[#allocation50_spill] sm:$0xff] %v9207_v59  ;;  %v9217_v61 = vld [vmem:[%s11333_s1 + $0x1e8] sm:$0xff]  ;;  %v9222_v62 = vld [vmem:[%s11333_s1 + $0x1f0] sm:$0xff] }
  0x2d   : > { %11519 = vst [vmem:[#allocation51_spill] sm:$0xff] %v9212_v60  ;;  %11520 = vst [vmem:[#allocation52_spill] sm:$0xff] %v9217_v61  ;;  %v9227_v63 = vld [vmem:[%s11333_s1 + $0x1f8] sm:$0xff]  ;;  %v9232_v59 = vld [vmem:[%s11333_s1 + $0x200] sm:$0xff] }
  0x2e   : > { %11521 = vst [vmem:[#allocation53_spill] sm:$0xff] %v9222_v62  ;;  %11522 = vst [vmem:[#allocation54_spill] sm:$0xff] %v9227_v63  ;;  %v9237_v60 = vld [vmem:[%s11333_s1 + $0x208] sm:$0xff]  ;;  %v9242_v61 = vld [vmem:[%s11333_s1 + $0x210] sm:$0xff] }
  0x2f   : > { %11523 = vst [vmem:[#allocation55_spill] sm:$0xff] %v9232_v59  ;;  %11524 = vst [vmem:[#allocation56_spill] sm:$0xff] %v9237_v60  ;;  %v9247_v62 = vld [vmem:[%s11333_s1 + $0x218] sm:$0xff]  ;;  %v9252_v63 = vld [vmem:[%s11333_s1 + $0x220] sm:$0xff] }
  0x30   : > { %11525 = vst [vmem:[#allocation57_spill] sm:$0xff] %v9242_v61  ;;  %11526 = vst [vmem:[#allocation58_spill] sm:$0xff] %v9247_v62  ;;  %v9257_v59 = vld [vmem:[%s11333_s1 + $0x228] sm:$0xff]  ;;  %v9262_v60 = vld [vmem:[%s11333_s1 + $0x230] sm:$0xff] }
  0x31   : > { %11527 = vst [vmem:[#allocation59_spill] sm:$0xff] %v9252_v63  ;;  %11528 = vst [vmem:[#allocation60_spill] sm:$0xff] %v9257_v59  ;;  %v9267_v61 = vld [vmem:[%s11333_s1 + $0x238] sm:$0xff]  ;;  %v9272_v62 = vld [vmem:[%s11334_s2] sm:$0xff] }
  0x32   : > { %11529 = vst [vmem:[#allocation61_spill] sm:$0xff] %v9262_v60  ;;  %11530 = vst [vmem:[#allocation62_spill] sm:$0xff] %v9267_v61  ;;  %v9277_v63 = vld [vmem:[%s11334_s2 + $0x8] sm:$0xff]  ;;  %v9282_v59 = vld [vmem:[%s11334_s2 + $0x10] sm:$0xff] }
  0x33   : > { %11531 = vst [vmem:[#allocation63_spill] sm:$0xff] %v9272_v62  ;;  %11532 = vst [vmem:[#allocation64_spill] sm:$0xff] %v9277_v63  ;;  %v9287_v60 = vld [vmem:[%s11334_s2 + $0x18] sm:$0xff]  ;;  %v9292_v61 = vld [vmem:[%s11334_s2 + $0x20] sm:$0xff] }
  0x34   : > { %11533 = vst [vmem:[#allocation65_spill] sm:$0xff] %v9282_v59  ;;  %11534 = vst [vmem:[#allocation66_spill] sm:$0xff] %v9287_v60  ;;  %v9297_v62 = vld [vmem:[%s11334_s2 + $0x28] sm:$0xff]  ;;  %v9302_v63 = vld [vmem:[%s11334_s2 + $0x30] sm:$0xff] }
  0x35   : > { %11535 = vst [vmem:[#allocation67_spill] sm:$0xff] %v9292_v61  ;;  %11536 = vst [vmem:[#allocation68_spill] sm:$0xff] %v9297_v62  ;;  %v9307_v59 = vld [vmem:[%s11334_s2 + $0x38] sm:$0xff]  ;;  %v9312_v60 = vld [vmem:[%s11334_s2 + $0x40] sm:$0xff] }
  0x36   : > { %11537 = vst [vmem:[#allocation69_spill] sm:$0xff] %v9302_v63  ;;  %11538 = vst [vmem:[#allocation70_spill] sm:$0xff] %v9307_v59  ;;  %v9317_v61 = vld [vmem:[%s11334_s2 + $0x48] sm:$0xff]  ;;  %v9322_v62 = vld [vmem:[%s11334_s2 + $0x50] sm:$0xff]  ;;  %372 = sbr.rel (%p6467_p7) target bundleno = 65 (0x41), region = 44 }
  0x37   : > { %11539 = vst [vmem:[#allocation71_spill] sm:$0xff] %v9312_v60  ;;  %11540 = vst [vmem:[#allocation72_spill] sm:$0xff] %v9317_v61  ;;  %v9327_v63 = vld [vmem:[%s11334_s2 + $0x58] sm:$0xff]  ;;  %v9332_v59 = vld [vmem:[%s11334_s2 + $0x60] sm:$0xff] }
  0x38   : > { %11541 = vst [vmem:[#allocation73_spill] sm:$0xff] %v9322_v62  ;;  %11542 = vst [vmem:[#allocation74_spill] sm:$0xff] %v9327_v63  ;;  %v9337_v60 = vld [vmem:[%s11334_s2 + $0x68] sm:$0xff]  ;;  %v9342_v61 = vld [vmem:[%s11334_s2 + $0x70] sm:$0xff] }
  0x39   : > { %11543 = vst [vmem:[#allocation75_spill] sm:$0xff] %v9332_v59  ;;  %11544 = vst [vmem:[#allocation76_spill] sm:$0xff] %v9337_v60  ;;  %v9347_v62 = vld [vmem:[%s11334_s2 + $0x78] sm:$0xff]  ;;  %v9352_v63 = vld [vmem:[%s11334_s2 + $0x80] sm:$0xff] }
  0x3a   : > { %11545 = vst [vmem:[#allocation77_spill] sm:$0xff] %v9342_v61  ;;  %11546 = vst [vmem:[#allocation78_spill] sm:$0xff] %v9347_v62  ;;  %v9357_v59 = vld [vmem:[%s11334_s2 + $0x88] sm:$0xff]  ;;  %v9362_v60 = vld [vmem:[%s11334_s2 + $0x90] sm:$0xff] }
  0x3b   : > { %11547 = vst [vmem:[#allocation79_spill] sm:$0xff] %v9352_v63  ;;  %11548 = vst [vmem:[#allocation80_spill] sm:$0xff] %v9357_v59  ;;  %v9367_v61 = vld [vmem:[%s11334_s2 + $0x98] sm:$0xff]  ;;  %v373_v62 = vld [vmem:[%s8967_s16] sm:$0xff] (!%p6467_p7) }
  0x3c   : > { %11549 = vst [vmem:[#allocation81_spill] sm:$0xff] %v9362_v60  ;;  %11550 = vst [vmem:[#allocation82_spill] sm:$0xff] %v9367_v61  ;;  %v374_v61 = vld [vmem:[%s8967_s16 + $0x8] sm:$0xff] (!%p6467_p7)  ;;  %v375_v60 = vld [vmem:[%s8967_s16 + $0x10] sm:$0xff] (!%p6467_p7) }
  0x3d   : > { %382 = vst.msk [vmem:[%s8987_s10] sm:$0xff] %vm381_vm0, %v373_v62  ;;  %383 = vst.msk [vmem:[%s8987_s10 + $0x8] sm:$0xff] %vm381_vm0, %v374_v61  ;;  %v376_v59 = vld [vmem:[%s8967_s16 + $0x18] sm:$0xff]  ;;  %v377_v63 = vld [vmem:[%s8967_s16 + $0x20] sm:$0xff] }
  0x3e   : > { %384 = vst.msk [vmem:[%s8987_s10 + $0x10] sm:$0xff] %vm381_vm0, %v375_v60  ;;  %v378_v58 = vld [vmem:[%s8967_s16 + $0x28] sm:$0xff]  ;;  %385 = vst.msk [vmem:[%s8987_s10 + $0x18] sm:$0xff] %vm381_vm0, %v376_v59  ;;  %v379_v57 = vld [vmem:[%s8967_s16 + $0x30] sm:$0xff] }
  0x3f   : > { %386 = vst.msk [vmem:[%s8987_s10 + $0x20] sm:$0xff] %vm381_vm0, %v377_v63  ;;  %387 = vst.msk [vmem:[%s8987_s10 + $0x28] sm:$0xff] %vm381_vm0, %v378_v58  ;;  %v380_v56 = vld [vmem:[%s8967_s16 + $0x38] sm:$0xff] }
  0x40   : > { %388 = vst.msk [vmem:[%s8987_s10 + $0x30] sm:$0xff] %vm381_vm0, %v379_v57  ;;  %389 = vst.msk [vmem:[%s8987_s10 + $0x38] sm:$0xff] %vm381_vm0, %v380_v56 }
  0x41 PF: > { %vm398_vm1 = vcmask 523264   ;;  %vm1244_vm2 = vcmask 130048  }
  0x42   : > { %7563 = vmatprep.mubr.msk.f32.mxu0 %vm398_vm1, %v8891_v0 }
  0x45   : > { %v9393_v59 = vld [vmem:[%s8987_s10 + $0x10] sm:$0xff]  ;;  %v9398_v56 = vld [vmem:[%s8987_s10 + $0x18] sm:$0xff] }
  0x46   : > { %v8378_v58 = vpack.c.bf16 %v9398_v56, %v9393_v59  ;;  %v9405_v62 = vld [vmem:[%s8987_s10 + $0x20] sm:$0xff]  ;;  %v9408_v63 = vld [vmem:[%s8987_s10 + $0x28] sm:$0xff] }
  0x47   : > { %v8382_v55 = vpack.c.bf16 %v9408_v63, %v9405_v62  ;;  %v9413_v54 = vld [vmem:[%s8987_s10 + $0x30] sm:$0xff] }
  0x48   : > { %v9387_v60 = vld [vmem:[%s8987_s10] sm:$0xff]  ;;  %v9390_v61 = vld [vmem:[%s8987_s10 + $0x8] sm:$0xff] }
  0x49   : > { %11551 = vst [vmem:[#allocation83_spill] sm:$0xff] %v9387_v60  ;;  %11552 = vst [vmem:[#allocation84_spill] sm:$0xff] %v9390_v61  ;;  %v8374_v57 = vpack.c.bf16 %v9390_v61, %v9387_v60  ;;  %v9416_v61 = vld [vmem:[%s8987_s10 + $0x38] sm:$0xff] }
  0x4a   : > { %v8386_v60 = vpack.c.bf16 %v9416_v61, %v9413_v54 }
  0x4b   : > { %8375 = vmatprep.subr.bf16.mxu0 %v8374_v57 }
  0x4c   : > { %8377 = vmatpush3.bf16.msra.mxu0 %v8374_v57  ;;  %v11555_v57 = vld [vmem:[#allocation47_spill] sm:$0xff] }
  0x4d   : > { %8379 = vmatprep.subr.bf16.mxu0 %v8378_v58 }
  0x50   : > { %8381 = vmatpush3.bf16.msra.mxu0 %v8378_v58  ;;  %v11556_v58 = vld [vmem:[#allocation48_spill] sm:$0xff] }
  0x51   : > { %8383 = vmatprep.subr.bf16.mxu0 %v8382_v55 }
  0x54   : > { %8385 = vmatpush3.bf16.msra.mxu0 %v8382_v55  ;;  %v11553_v55 = vld [vmem:[#allocation45_spill] sm:$0xff] }
  0x55   : > { %8387 = vmatprep.subr.bf16.mxu0 %v8386_v60 }
  0x58   : > { %8389 = vmatpush3.bf16.msra.mxu0 %v8386_v60  ;;  %v11554_v60 = vld [vmem:[#allocation46_spill] sm:$0xff] }
  0x5b   : > { %7564 = vmatmul.mubr.msk.f32.vlgmr.msra.gmra.mrb[0].mxu0 %vm398_vm1, %v8896_v1 }
  0x5c   : > { %7566 = vmatprep.mubr.msk.f32.mxu0 %vm398_vm1, %v8901_v2 }
  0x5f   : > { %7567 = vmatmul.mubr.msk.f32.gmra.mrb[2].mxu0 %vm398_vm1, %v8906_v3 }
  0x60   : > { %7569 = vmatprep.mubr.msk.f32.mxu0 %vm398_vm1, %v8911_v4 }
  0x63   : > { %7570 = vmatmul.mubr.msk.f32.gmra.mrb[4].mxu0 %vm398_vm1, %v8916_v5 }
  0x64   : > { %7572 = vmatprep.mubr.msk.f32.mxu0 %vm398_vm1, %v8921_v6 }
  0x67   : > { %7573 = vmatmul.mubr.msk.f32.gmra.mrb[6].mxu0 %vm398_vm1, %v8926_v7 }
  0x68   : > { %7575 = vmatprep.mubr.msk.f32.mxu0 %vm398_vm1, %v8931_v8 }
  0x6b   : > { %7576 = vmatmul.mubr.msk.f32.gmra.mrb[8].mxu0 %vm398_vm1, %v8937_v9 }
  0x6c   : > { %7578 = vmatprep.mubr.msk.f32.mxu0 %vm398_vm1, %v8942_v10 }
  0x6f   : > { %7579 = vmatmul.mubr.msk.f32.gmra.mrb[10].mxu0 %vm398_vm1, %v8947_v11 }
  0x70   : > { %7581 = vmatprep.mubr.msk.f32.mxu0 %vm398_vm1, %v8952_v12 }
  0x73   : > { %7582 = vmatmul.mubr.msk.f32.gmra.mrb[12].mxu0 %vm398_vm1, %v8957_v13 }
  0x74   : > { %7584 = vmatprep.mubr.msk.f32.mxu0 %vm398_vm1, %v8962_v14 }
  0x77   : > { %7585 = vmatmul.mubr.msk.f32.gmra.mrb[14].mxu0 %vm398_vm1, %v8972_v15 }
  0x78   : > { %7587 = vmatprep.mubr.msk.f32.mxu0 %vm398_vm1, %v8977_v16 }
  0x7b   : > { %7588 = vmatmul.mubr.msk.f32.gmra.mrb[16].mxu0 %vm398_vm1, %v8982_v17 }
  0x7c   : > { %7590 = vmatprep.mubr.msk.f32.mxu0 %vm398_vm1, %v8992_v18 }
  0x7f   : > { %7591 = vmatmul.mubr.msk.f32.gmra.mrb[18].mxu0 %vm398_vm1, %v8997_v19 }
  0x80   : > { %7593 = vmatprep.mubr.msk.f32.mxu0 %vm398_vm1, %v9002_v20 }
  0x83   : > { %7594 = vmatmul.mubr.msk.f32.gmra.mrb[20].mxu0 %vm398_vm1, %v9012_v21 }
  0x84   : > { %7596 = vmatprep.mubr.msk.f32.mxu0 %vm398_vm1, %v9017_v22  ;;  %v6541_v22 = vld [vmem:[%s9007_s7 + $0xa1] ss:$0 sm:$0xff] }
  0x87   : > { %7597 = vmatmul.mubr.msk.f32.gmra.mrb[22].mxu0 %vm398_vm1, %v9022_v23 }
  0x88   : > { %7599 = vmatprep.mubr.msk.f32.mxu0 %vm398_vm1, %v9032_v24 }
  0x8b   : > { %7600 = vmatmul.mubr.msk.f32.gmra.mrb[24].mxu0 %vm398_vm1, %v9037_v25  ;;  %v11559_v25 = vld [vmem:[#allocation51_spill] sm:$0xff] }
  0x8c   : > { %7602 = vmatprep.mubr.msk.f32.mxu0 %vm398_vm1, %v9042_v26  ;;  %v11558_v26 = vld [vmem:[#allocation50_spill] sm:$0xff] }
  0x8f   : > { %7603 = vmatmul.mubr.msk.f32.gmra.mrb[26].mxu0 %vm398_vm1, %v9047_v27  ;;  %v11557_v27 = vld [vmem:[#allocation49_spill] sm:$0xff] }
  0x90   : > { %7605 = vmatprep.mubr.msk.f32.mxu0 %vm398_vm1, %v9052_v28 }
  0x93   : > { %7606 = vmatmul.mubr.msk.f32.gmra.mrb[28].mxu0 %vm398_vm1, %v9057_v29 }
  0x94   : > { %7608 = vmatprep.mubr.msk.f32.mxu0 %vm398_vm1, %v9062_v30 }
  0x97   : > { %7609 = vmatmul.mubr.msk.f32.gmra.mrb[30].mxu0 %vm398_vm1, %v9067_v31 }
  0x98   : > { %7611 = vmatprep.mubr.msk.f32.mxu0 %vm398_vm1, %v9072_v32 }
  0x9b   : > { %7612 = vmatmul.mubr.msk.f32.gmra.mrb[32].mxu0 %vm398_vm1, %v9077_v33 }
  0x9c   : > { %7614 = vmatprep.mubr.msk.f32.mxu0 %vm398_vm1, %v9082_v34 }
  0x9f   : > { %7615 = vmatmul.mubr.msk.f32.gmra.mrb[34].mxu0 %vm398_vm1, %v9087_v35 }
  0xa0   : > { %7617 = vmatprep.mubr.msk.f32.mxu0 %vm398_vm1, %v9092_v36 }
  0xa3   : > { %7618 = vmatmul.mubr.msk.f32.gmra.mrb[36].mxu0 %vm398_vm1, %v9097_v37 }
  0xa4   : > { %7620 = vmatprep.mubr.msk.f32.mxu0 %vm398_vm1, %v9102_v38 }
  0xa7   : > { %7621 = vmatmul.mubr.msk.f32.gmra.mrb[38].mxu0 %vm398_vm1, %v9107_v39 }
  0xa8   : > { %7623 = vmatprep.mubr.msk.f32.mxu0 %vm398_vm1, %v9112_v40 }
  0xab   : > { %7624 = vmatmul.mubr.msk.f32.gmra.mrb[40].mxu0 %vm398_vm1, %v9117_v41 }
  0xac   : > { %7626 = vmatprep.mubr.msk.f32.mxu0 %vm398_vm1, %v9122_v42 }
  0xaf   : > { %7627 = vmatmul.mubr.msk.f32.gmra.mrb[42].mxu0 %vm398_vm1, %v9127_v43 }
  0xb0   : > { %7629 = vmatprep.mubr.msk.f32.mxu0 %vm398_vm1, %v9132_v44 }
  0xb3   : > { %7630 = vmatmul.mubr.msk.f32.gmra.mrb[44].mxu0 %vm398_vm1, %v9137_v45 }
  0xb4   : > { %7632 = vmatprep.mubr.msk.f32.mxu0 %vm398_vm1, %v9142_v46 }
  0xb7   : > { %7633 = vmatmul.mubr.msk.f32.gmra.mrb[46].mxu0 %vm398_vm1, %v9147_v47 }
  0xb8   : > { %7635 = vmatprep.mubr.msk.f32.mxu0 %vm398_vm1, %v9152_v48 }
  0xbb   : > { %7636 = vmatmul.mubr.msk.f32.gmra.mrb[48].mxu0 %vm398_vm1, %v9157_v49 }
  0xbc   : > { %7638 = vmatprep.mubr.msk.f32.mxu0 %vm398_vm1, %v9162_v50 }
  0xbf   : > { %7639 = vmatmul.mubr.msk.f32.gmra.mrb[50].mxu0 %vm398_vm1, %v9167_v51  ;;  %v6540_v51 = vld [vmem:[%s9007_s7 + $0xa0] ss:$0 sm:$0xff] }
  0xc0   : > { %7641 = vmatprep.mubr.msk.f32.mxu0 %vm398_vm1, %v9172_v52 }
  0xc3   : > { %7642 = vmatmul.mubr.msk.f32.gmra.mrb[52].mxu0 %vm398_vm1, %v9177_v53  ;;  %v11560_v53 = vld [vmem:[#allocation52_spill] sm:$0xff] }
  0xc4   : > { %7644 = vmatprep.mubr.msk.f32.mxu0 %vm398_vm1, %v11553_v55  ;;  %v11561_v55 = vld [vmem:[#allocation53_spill] sm:$0xff] }
  0xc7   : > { %7645 = vmatmul.mubr.msk.f32.gmra.mrb[54].mxu0 %vm398_vm1, %v11554_v60  ;;  %v11562_v60 = vld [vmem:[#allocation54_spill] sm:$0xff] }
  0xc8   : > { %7647 = vmatprep.mubr.msk.f32.mxu0 %vm398_vm1, %v11555_v57  ;;  %v11563_v57 = vld [vmem:[#allocation55_spill] sm:$0xff] }
  0xcb   : > { %7648 = vmatmul.mubr.msk.f32.gmra.mrb[56].mxu0 %vm398_vm1, %v11556_v58  ;;  %v11564_v58 = vld [vmem:[#allocation56_spill] sm:$0xff] }
  0xcc   : > { %7650 = vmatprep.mubr.msk.f32.mxu0 %vm398_vm1, %v11557_v27  ;;  %v11565_v27 = vld [vmem:[#allocation57_spill] sm:$0xff] }
  0xcf   : > { %7651 = vmatmul.mubr.msk.f32.gmra.mrb[58].mxu0 %vm398_vm1, %v11558_v26 }
  0xd0   : > { %7653 = vmatprep.mubr.msk.f32.mxu0 %vm398_vm1, %v11559_v25  ;;  %v11566_v25 = vld [vmem:[#allocation58_spill] sm:$0xff] }
  0xd3   : > { %7654 = vmatmul.mubr.msk.f32.gmra.mrb[60].mxu0 %vm398_vm1, %v11560_v53  ;;  %v11567_v53 = vld [vmem:[#allocation59_spill] sm:$0xff] }
  0xd4   : > { %7656 = vmatprep.mubr.msk.f32.mxu0 %vm398_vm1, %v11561_v55  ;;  %v11568_v55 = vld [vmem:[#allocation60_spill] sm:$0xff] }
  0xd7   : > { %7657 = vmatmul.mubr.msk.f32.gmra.mrb[62].mxu0 %vm398_vm1, %v11562_v60  ;;  %v11569_v60 = vld [vmem:[#allocation61_spill] sm:$0xff] }
  0xd8   : > { %7659 = vmatprep.mubr.msk.f32.mxu0 %vm398_vm1, %v11563_v57  ;;  %v11570_v57 = vld [vmem:[#allocation62_spill] sm:$0xff] }
  0xdb   : > { %7660 = vmatmul.mubr.msk.f32.gmra.mrb[64].mxu0 %vm398_vm1, %v11564_v58 }
  0xdc   : > { %7662 = vmatprep.mubr.msk.f32.mxu0 %vm398_vm1, %v11565_v27 }
  0xdf   : > { %7663 = vmatmul.mubr.msk.f32.gmra.mrb[66].mxu0 %vm398_vm1, %v11566_v25 }
  0xe0   : > { %7665 = vmatprep.mubr.msk.f32.mxu0 %vm398_vm1, %v11567_v53 }
  0xe3   : > { %7666 = vmatmul.mubr.msk.f32.gmra.mrb[68].mxu0 %vm398_vm1, %v11568_v55 }
  0xe4   : > { %7668 = vmatprep.mubr.msk.f32.mxu0 %vm398_vm1, %v11569_v60 }
  0xe7   : > { %7669 = vmatmul.mubr.msk.f32.gmra.mrb[70].mxu0 %vm398_vm1, %v11570_v57 }
  0xe8   : > { %7719 = vmatprep.mubr.msk.f32.mxu0 %vm398_vm1, %v8891_v0 }
 0x12e   : > { %v7565_v27 = vpop.f32.mrb[0].mxu0 }
 0x12f   : > { %v681_v58 = vpop.f32.mrb[1].mxu0  ;;  %v1046_v50 = vmul.f32 %v7565_v27, %v6540_v51 }
 0x130   : > { %v1045_v49 = vmul.f32 %v6540_v51, %v681_v58 }
 0x132   : > { %v7568_v26 = vpop.f32.mrb[2].mxu0 }
 0x133   : > { %v691_v24 = vpop.f32.mrb[3].mxu0  ;;  %v1048_v0 = vmul.f32 %v7568_v26, %v6540_v51 }
 0x134   : > { %v1047_v46 = vmul.f32 %v6540_v51, %v691_v24 }
 0x136   : > { %v7571_v25 = vpop.f32.mrb[4].mxu0 }
 0x137   : > { %v701_v52 = vpop.f32.mrb[5].mxu0  ;;  %v1050_v15 = vmul.f32 %v7571_v25, %v6540_v51 }
 0x138   : > { %v1049_v27 = vmul.f32 %v6540_v51, %v701_v52 }
 0x13a   : > { %v7574_v23 = vpop.f32.mrb[6].mxu0 }
 0x13b   : > { %v711_v53 = vpop.f32.mrb[7].mxu0 }
 0x13c   : > { %v1051_v26 = vmul.f32 %v6540_v51, %v711_v53 }
 0x13e   : > { %v7577_v55 = vpop.f32.mrb[8].mxu0 }
 0x13f   : > { %v1059_v21 = vmul.f32 %v7577_v55, %v6541_v22  ;;  %v721_v60 = vpop.f32.mrb[9].mxu0 }
 0x140   : > { %v1058_v20 = vmul.f32 %v6541_v22, %v721_v60 }
 0x141   : > { %v1067_v57 = vadd.f32 %v1059_v21, %v1046_v50  ;;  %v1052_v21 = vmul.f32 %v7574_v23, %v6540_v51  ;;  %v6542_v50 = vld [vmem:[%s9007_s7 + $0xa2] ss:$0 sm:$0xff] }
 0x142   : > { %v1066_v48 = vadd.f32 %v1058_v20, %v1045_v49  ;;  %v7580_v19 = vpop.f32.mrb[10].mxu0 }
 0x143   : > { %v1061_v47 = vmul.f32 %v7580_v19, %v6541_v22  ;;  %v731_v18 = vpop.f32.mrb[11].mxu0 }
 0x144   : > { %v1060_v17 = vmul.f32 %v6541_v22, %v731_v18 }
 0x145   : > { %v1069_v45 = vadd.f32 %v1061_v47, %v1048_v0 }
 0x146   : > { %v1068_v16 = vadd.f32 %v1060_v17, %v1047_v46  ;;  %v7583_v44 = vpop.f32.mrb[12].mxu0 }
 0x147   : > { %v1063_v43 = vmul.f32 %v7583_v44, %v6541_v22  ;;  %v741_v14 = vpop.f32.mrb[13].mxu0 }
 0x148   : > { %v1062_v55 = vmul.f32 %v6541_v22, %v741_v14 }
 0x149   : > { %v1071_v42 = vadd.f32 %v1063_v43, %v1050_v15 }
 0x14a   : > { %v1070_v58 = vadd.f32 %v1062_v55, %v1049_v27  ;;  %v7586_v60 = vpop.f32.mrb[14].mxu0 }
 0x14b   : > { %v1065_v20 = vmul.f32 %v7586_v60, %v6541_v22  ;;  %v751_v49 = vpop.f32.mrb[15].mxu0 }
 0x14c   : > { %v1064_v19 = vmul.f32 %v6541_v22, %v751_v49 }
 0x14d   : > { %v1073_v24 = vadd.f32 %v1065_v20, %v1052_v21 }
 0x14e   : > { %v1072_v18 = vadd.f32 %v1064_v19, %v1051_v26  ;;  %v7589_v0 = vpop.f32.mrb[16].mxu0  ;;  %v6543_v19 = vld [vmem:[%s9007_s7 + $0xa3] ss:$0 sm:$0xff] }
 0x14f   : > { %v1080_v47 = vmul.f32 %v7589_v0, %v6542_v50  ;;  %v761_v17 = vpop.f32.mrb[17].mxu0 }
 0x150   : > { %v1079_v46 = vmul.f32 %v6542_v50, %v761_v17 }
 0x151   : > { %v1088_v25 = vadd.f32 %v1080_v47, %v1067_v57 }
 0x152   : > { %v1087_v44 = vadd.f32 %v1079_v46, %v1066_v48  ;;  %v7592_v13 = vpop.f32.mrb[18].mxu0 }
 0x153   : > { %v1082_v14 = vmul.f32 %v7592_v13, %v6542_v50  ;;  %v771_v15 = vpop.f32.mrb[19].mxu0 }
 0x154   : > { %v1081_v43 = vmul.f32 %v6542_v50, %v771_v15 }
 0x155   : > { %v1090_v52 = vadd.f32 %v1082_v14, %v1069_v45 }
 0x156   : > { %v1089_v23 = vadd.f32 %v1081_v43, %v1068_v16  ;;  %v7595_v27 = vpop.f32.mrb[20].mxu0 }
 0x157   : > { %v1084_v55 = vmul.f32 %v7595_v27, %v6542_v50  ;;  %v781_v51 = vpop.f32.mrb[21].mxu0 }
 0x158   : > { %v1083_v22 = vmul.f32 %v6542_v50, %v781_v51 }
 0x159   : > { %v1092_v53 = vadd.f32 %v1084_v55, %v1071_v42 }
 0x15a   : > { %v1091_v60 = vadd.f32 %v1083_v22, %v1070_v58  ;;  %v7598_v21 = vpop.f32.mrb[22].mxu0 }
 0x15b   : > { %v1086_v20 = vmul.f32 %v7598_v21, %v6542_v50  ;;  %v791_v49 = vpop.f32.mrb[23].mxu0 }
 0x15c   : > { %v1085_v26 = vmul.f32 %v6542_v50, %v791_v49 }
 0x15d   : > { %v1094_v57 = vadd.f32 %v1086_v20, %v1073_v24 }
 0x15e   : > { %v1093_v48 = vadd.f32 %v1085_v26, %v1072_v18  ;;  %v7601_v0 = vpop.f32.mrb[24].mxu0  ;;  %v6544_v26 = vld [vmem:[%s9007_s7 + $0xa4] ss:$0 sm:$0xff] }
 0x15f   : > { %v1101_v47 = vmul.f32 %v7601_v0, %v6543_v19  ;;  %v801_v13 = vpop.f32.mrb[25].mxu0 }
 0x160   : > { %v1100_v17 = vmul.f32 %v6543_v19, %v801_v13 }
 0x161   : > { %v1109_v46 = vadd.f32 %v1101_v47, %v1088_v25 }
 0x162   : > { %v1108_v45 = vadd.f32 %v1100_v17, %v1087_v44  ;;  %v7604_v16 = vpop.f32.mrb[26].mxu0 }
 0x163   : > { %v1103_v14 = vmul.f32 %v7604_v16, %v6543_v19  ;;  %v811_v15 = vpop.f32.mrb[27].mxu0 }
 0x164   : > { %v1102_v43 = vmul.f32 %v6543_v19, %v811_v15 }
 0x165   : > { %v1111_v42 = vadd.f32 %v1103_v14, %v1090_v52 }
 0x166   : > { %v1110_v58 = vadd.f32 %v1102_v43, %v1089_v23  ;;  %v7607_v27 = vpop.f32.mrb[28].mxu0 }
 0x167   : > { %v1105_v55 = vmul.f32 %v7607_v27, %v6543_v19  ;;  %v821_v51 = vpop.f32.mrb[29].mxu0 }
 0x168   : > { %v1104_v50 = vmul.f32 %v6543_v19, %v821_v51 }
 0x169   : > { %v1113_v22 = vadd.f32 %v1105_v55, %v1092_v53 }
 0x16a   : > { %v1112_v24 = vadd.f32 %v1104_v50, %v1091_v60  ;;  %v7610_v18 = vpop.f32.mrb[30].mxu0 }
 0x16b   : > { %v1107_v21 = vmul.f32 %v7610_v18, %v6543_v19  ;;  %v831_v20 = vpop.f32.mrb[31].mxu0 }
 0x16c   : > { %v1106_v49 = vmul.f32 %v6543_v19, %v831_v20 }
 0x16d   : > { %v1115_v25 = vadd.f32 %v1107_v21, %v1094_v57 }
 0x16e   : > { %v1114_v44 = vadd.f32 %v1106_v49, %v1093_v48  ;;  %v7613_v0 = vpop.f32.mrb[32].mxu0  ;;  %v6545_v49 = vld [vmem:[%s9007_s7 + $0xa5] ss:$0 sm:$0xff] }
 0x16f   : > { %v1122_v47 = vmul.f32 %v7613_v0, %v6544_v26  ;;  %v841_v13 = vpop.f32.mrb[33].mxu0 }
 0x170   : > { %v1121_v17 = vmul.f32 %v6544_v26, %v841_v13 }
 0x171   : > { %v1130_v16 = vadd.f32 %v1122_v47, %v1109_v46 }
 0x172   : > { %v1129_v52 = vadd.f32 %v1121_v17, %v1108_v45  ;;  %v7616_v23 = vpop.f32.mrb[34].mxu0 }
 0x173   : > { %v1124_v14 = vmul.f32 %v7616_v23, %v6544_v26  ;;  %v851_v15 = vpop.f32.mrb[35].mxu0 }
 0x174   : > { %v1123_v43 = vmul.f32 %v6544_v26, %v851_v15 }
 0x175   : > { %v1132_v53 = vadd.f32 %v1124_v14, %v1111_v42 }
 0x176   : > { %v1131_v60 = vadd.f32 %v1123_v43, %v1110_v58  ;;  %v7619_v27 = vpop.f32.mrb[36].mxu0 }
 0x177   : > { %v1126_v55 = vmul.f32 %v7619_v27, %v6544_v26  ;;  %v861_v51 = vpop.f32.mrb[37].mxu0 }
 0x178   : > { %v1125_v19 = vmul.f32 %v6544_v26, %v861_v51 }
 0x179   : > { %v1134_v50 = vadd.f32 %v1126_v55, %v1113_v22 }
 0x17a   : > { %v1133_v57 = vadd.f32 %v1125_v19, %v1112_v24  ;;  %v7622_v48 = vpop.f32.mrb[38].mxu0 }
 0x17b   : > { %v1128_v18 = vmul.f32 %v7622_v48, %v6544_v26  ;;  %v871_v21 = vpop.f32.mrb[39].mxu0 }
 0x17c   : > { %v1127_v20 = vmul.f32 %v6544_v26, %v871_v21 }
 0x17d   : > { %v1136_v46 = vadd.f32 %v1128_v18, %v1115_v25 }
 0x17e   : > { %v1135_v45 = vadd.f32 %v1127_v20, %v1114_v44  ;;  %v7625_v0 = vpop.f32.mrb[40].mxu0  ;;  %v6546_v20 = vld [vmem:[%s9007_s7 + $0xa6] ss:$0 sm:$0xff] }
 0x17f   : > { %v1143_v47 = vmul.f32 %v7625_v0, %v6545_v49  ;;  %v881_v13 = vpop.f32.mrb[41].mxu0 }
 0x180   : > { %v1142_v17 = vmul.f32 %v6545_v49, %v881_v13 }
 0x181   : > { %v1151_v23 = vadd.f32 %v1143_v47, %v1130_v16 }
 0x182   : > { %v1150_v42 = vadd.f32 %v1142_v17, %v1129_v52  ;;  %v7628_v58 = vpop.f32.mrb[42].mxu0 }
 0x183   : > { %v1145_v14 = vmul.f32 %v7628_v58, %v6545_v49  ;;  %v891_v15 = vpop.f32.mrb[43].mxu0 }
 0x184   : > { %v1144_v43 = vmul.f32 %v6545_v49, %v891_v15 }
 0x185   : > { %v1153_v22 = vadd.f32 %v1145_v14, %v1132_v53 }
 0x186   : > { %v1152_v24 = vadd.f32 %v1144_v43, %v1131_v60  ;;  %v7631_v27 = vpop.f32.mrb[44].mxu0 }
 0x187   : > { %v1147_v55 = vmul.f32 %v7631_v27, %v6545_v49  ;;  %v901_v51 = vpop.f32.mrb[45].mxu0 }
 0x188   : > { %v1146_v26 = vmul.f32 %v6545_v49, %v901_v51 }
 0x189   : > { %v1155_v19 = vadd.f32 %v1147_v55, %v1134_v50 }
 0x18a   : > { %v1154_v25 = vadd.f32 %v1146_v26, %v1133_v57  ;;  %v7634_v44 = vpop.f32.mrb[46].mxu0 }
 0x18b   : > { %v1149_v48 = vmul.f32 %v7634_v44, %v6545_v49  ;;  %v911_v18 = vpop.f32.mrb[47].mxu0 }
 0x18c   : > { %v1148_v21 = vmul.f32 %v6545_v49, %v911_v18 }
 0x18d   : > { %v1157_v16 = vadd.f32 %v1149_v48, %v1136_v46 }
 0x18e   : > { %v1156_v52 = vadd.f32 %v1148_v21, %v1135_v45  ;;  %v7637_v0 = vpop.f32.mrb[48].mxu0  ;;  %v6547_v21 = vld [vmem:[%s9007_s7 + $0xa7] ss:$0 sm:$0xff] }
 0x18f   : > { %v1164_v47 = vmul.f32 %v7637_v0, %v6546_v20  ;;  %v921_v13 = vpop.f32.mrb[49].mxu0 }
 0x190   : > { %v1163_v17 = vmul.f32 %v6546_v20, %v921_v13 }
 0x191   : > { %v1172_v58 = vadd.f32 %v1164_v47, %v1151_v23 }
 0x192   : > { %v1171_v53 = vadd.f32 %v1163_v17, %v1150_v42  ;;  %v7640_v60 = vpop.f32.mrb[50].mxu0 }
 0x193   : > { %v1166_v14 = vmul.f32 %v7640_v60, %v6546_v20  ;;  %v931_v15 = vpop.f32.mrb[51].mxu0 }
 0x194   : > { %v1165_v43 = vmul.f32 %v6546_v20, %v931_v15 }
 0x195   : > { %v1174_v50 = vadd.f32 %v1166_v14, %v1153_v22 }
 0x196   : > { %v1173_v57 = vadd.f32 %v1165_v43, %v1152_v24  ;;  %v7643_v27 = vpop.f32.mrb[52].mxu0 }
 0x197   : > { %v1168_v55 = vmul.f32 %v7643_v27, %v6546_v20  ;;  %v941_v51 = vpop.f32.mrb[53].mxu0 }
 0x198   : > { %v1167_v49 = vmul.f32 %v6546_v20, %v941_v51 }
 0x199   : > { %v1176_v26 = vadd.f32 %v1168_v55, %v1155_v19 }
 0x19a   : > { %v1175_v46 = vadd.f32 %v1167_v49, %v1154_v25  ;;  %v7646_v45 = vpop.f32.mrb[54].mxu0 }
 0x19b   : > { %v1170_v44 = vmul.f32 %v7646_v45, %v6546_v20  ;;  %v951_v48 = vpop.f32.mrb[55].mxu0 }
 0x19c   : > { %v1169_v18 = vmul.f32 %v6546_v20, %v951_v48 }
 0x19d   : > { %v1178_v23 = vadd.f32 %v1170_v44, %v1157_v16 }
 0x19e   : > { %v1177_v42 = vadd.f32 %v1169_v18, %v1156_v52  ;;  %v7649_v0 = vpop.f32.mrb[56].mxu0 }
 0x19f   : > { %v1185_v47 = vmul.f32 %v7649_v0, %v6547_v21  ;;  %v961_v13 = vpop.f32.mrb[57].mxu0 }
 0x1a0   : > { %v1184_v17 = vmul.f32 %v6547_v21, %v961_v13 }
 0x1a1   : > { %v1193_v60 = vadd.f32 %v1185_v47, %v1172_v58  ;;  %v6548_v58 = vld [vmem:[%s9007_s7 + $0xa8] ss:$0 sm:$0xff] }
 0x1a2   : > { %v1192_v22 = vadd.f32 %v1184_v17, %v1171_v53  ;;  %v7652_v24 = vpop.f32.mrb[58].mxu0  ;;  %v6549_v17 = vld [vmem:[%s9027_s19] ss:$0 sm:$0xff] }
 0x1a3   : > { %v1187_v14 = vmul.f32 %v7652_v24, %v6547_v21  ;;  %v971_v15 = vpop.f32.mrb[59].mxu0 }
 0x1a4   : > { %v1186_v43 = vmul.f32 %v6547_v21, %v971_v15 }
 0x1a5   : > { %v1195_v19 = vadd.f32 %v1187_v14, %v1174_v50 }
 0x1a6   : > { %v1194_v25 = vadd.f32 %v1186_v43, %v1173_v57  ;;  %v7655_v27 = vpop.f32.mrb[60].mxu0 }
 0x1a7   : > { %v1189_v55 = vmul.f32 %v7655_v27, %v6547_v21  ;;  %v981_v20 = vpop.f32.mrb[61].mxu0 }
 0x1a8   : > { %v1188_v51 = vmul.f32 %v6547_v21, %v981_v20 }
 0x1a9   : > { %v1197_v16 = vadd.f32 %v1189_v55, %v1176_v26 }
 0x1aa   : > { %v1196_v52 = vadd.f32 %v1188_v51, %v1175_v46  ;;  %v7658_v49 = vpop.f32.mrb[62].mxu0  ;;  %v11571_v51 = vld [vmem:[#allocation83_spill] sm:$0xff] }
 0x1ab   : > { %v1191_v45 = vmul.f32 %v7658_v49, %v6547_v21  ;;  %v991_v44 = vpop.f32.mrb[63].mxu0 }
 0x1ac   : > { %v1190_v48 = vmul.f32 %v6547_v21, %v991_v44  ;;  %v11573_v44 = vld [vmem:[#allocation84_spill] sm:$0xff] }
 0x1ad   : > { %v1199_v53 = vadd.f32 %v1191_v45, %v1178_v23 }
 0x1ae   : > { %v1198_v18 = vadd.f32 %v1190_v48, %v1177_v42  ;;  %v7661_v0 = vpop.f32.mrb[64].mxu0 }
 0x1af   : > { %v1206_v47 = vmul.f32 %v7661_v0, %v6548_v58  ;;  %v1001_v13 = vpop.f32.mrb[65].mxu0 }
 0x1b0   : > { %v1205_v50 = vmul.f32 %v6548_v58, %v1001_v13 }
 0x1b1   : > { %v1214_v57 = vadd.f32 %v1206_v47, %v1193_v60 }
 0x1b2   : > { %v1213_v24 = vadd.f32 %v1205_v50, %v1192_v22  ;;  %v7664_v14 = vpop.f32.mrb[66].mxu0 }
 0x1b3   : > { %v1227_v15 = vadd.f32 %v6549_v17, %v1214_v57  ;;  %v1208_v43 = vmul.f32 %v7664_v14, %v6548_v58  ;;  %v1011_v27 = vpop.f32.mrb[67].mxu0 }
 0x1b4   : > { %v1226_v26 = vadd.f32 %v6549_v17, %v1213_v24  ;;  %v1207_v46 = vmul.f32 %v6548_v58, %v1011_v27 }
 0x1b5   : > { %v1216_v55 = vadd.f32 %v1208_v43, %v1195_v19  ;;  %v9578_v48 = vadd.f32 %v1227_v15, %v11573_v44 }
 0x1b6   : > { %v1215_v20 = vadd.f32 %v1207_v46, %v1194_v25  ;;  %v7667_v21 = vpop.f32.mrb[68].mxu0  ;;  %v9575_v23 = vadd.f32 %v1226_v26, %v11571_v51 }
 0x1b7   : > { %v1229_v42 = vadd.f32 %v6549_v17, %v1216_v55  ;;  %v1210_v49 = vmul.f32 %v7667_v21, %v6548_v58  ;;  %v1021_v45 = vpop.f32.mrb[69].mxu0  ;;  %11574 = vst [vmem:[#allocation84_spill] sm:$0xff] %v9578_v48  ;;  %v1248_v24 = vsel %vm1244_vm2, %v9578_v48, 0.0 }
 0x1b8   : > { %11572 = vst [vmem:[#allocation83_spill] sm:$0xff] %v9575_v23  ;;  %v1228_v60 = vadd.f32 %v6549_v17, %v1215_v20  ;;  %v1209_v22 = vmul.f32 %v6548_v58, %v1021_v45  ;;  %v1245_v0 = vsel %vm1244_vm2, %v9575_v23, 0.0 }
 0x1b9   : > { %v1218_v47 = vadd.f32 %v1210_v49, %v1197_v16  ;;  %1246 = vadd.xlane.f32.xlu0 %v1245_v0  ;;  %v9588_v14 = vadd.f32 %v1229_v42, %v9398_v56 }
 0x1ba   : > { %v1217_v19 = vadd.f32 %v1209_v22, %v1196_v52  ;;  %v7670_v13 = vpop.f32.mrb[70].mxu0  ;;  %v9583_v25 = vadd.f32 %v1228_v60, %v9393_v59 }
 0x1bb   : > { %v1212_v50 = vmul.f32 %v7670_v13, %v6548_v58  ;;  %v1031_v57 = vpop.f32.mrb[71].mxu0  ;;  %11576 = vst [vmem:[#allocation86_spill] sm:$0xff] %v9588_v14  ;;  %v1231_v15 = vadd.f32 %v6549_v17, %v1218_v47  ;;  %v1254_v46 = vsel %vm1244_vm2, %v9588_v14, 0.0 }
 0x1bc   : > { %11575 = vst [vmem:[#allocation85_spill] sm:$0xff] %v9583_v25  ;;  %v1230_v43 = vadd.f32 %v6549_v17, %v1217_v19  ;;  %v1211_v27 = vmul.f32 %v6548_v58, %v1031_v57  ;;  %v1251_v16 = vsel %vm1244_vm2, %v9583_v25, 0.0 }
 0x1bd   : > { %v1220_v26 = vadd.f32 %v1212_v50, %v1199_v53  ;;  %1249 = vadd.xlane.f32.xlu0 %v1248_v24  ;;  %1252 = vadd.xlane.f32.xlu1 %v1251_v16  ;;  %v9600_v58 = vadd.f32 %v1231_v15, %v9408_v63 }
 0x1be   : > { %v1219_v52 = vadd.f32 %v1211_v27, %v1198_v18  ;;  %v9593_v59 = vadd.f32 %v1230_v43, %v9405_v62 }
 0x1bf   : > { %v1233_v55 = vadd.f32 %v6549_v17, %v1220_v26  ;;  %11578 = vst [vmem:[#allocation88_spill] sm:$0xff] %v9600_v58  ;;  %v1260_v62 = vsel %vm1244_vm2, %v9600_v58, 0.0 }
 0x1c0   : > { %11577 = vst [vmem:[#allocation87_spill] sm:$0xff] %v9593_v59  ;;  %v1232_v20 = vadd.f32 %v6549_v17, %v1219_v52  ;;  %v1257_v56 = vsel %vm1244_vm2, %v9593_v59, 0.0 }
 0x1c1   : > { %1255 = vadd.xlane.f32.xlu1 %v1254_v46  ;;  %1258 = vadd.xlane.f32.xlu0 %v1257_v56  ;;  %v9610_v21 = vadd.f32 %v1233_v55, %v9416_v61 }
 0x1c2   : > { %v9603_v53 = vadd.f32 %v1232_v20, %v9413_v54 }
 0x1c3   : > { %11580 = vst [vmem:[#allocation90_spill] sm:$0xff] %v9610_v21  ;;  %v1266_v63 = vsel %vm1244_vm2, %v9610_v21, 0.0 }
 0x1c4   : > { %11579 = vst [vmem:[#allocation89_spill] sm:$0xff] %v9603_v53  ;;  %v1263_v18 = vsel %vm1244_vm2, %v9603_v53, 0.0 }
 0x1c5   : > { %1261 = vadd.xlane.f32.xlu1 %v1260_v62  ;;  %1264 = vadd.xlane.f32.xlu0 %v1263_v18 }
 0x1c9   : > { %1267 = vadd.xlane.f32.xlu1 %v1266_v63 }
 0x246   : > { %v1247_v17 = vpop.xlane.xlu0 %1246 }
 0x247   : > { %v1270_v51 = vmul.f32 0.0625, %v1247_v17 }
 0x249   : > { %v9615_v54 = vsub.f32 %v9575_v23, %v1270_v51  ;;  %v11617_v23 = vld [vmem:[#allocation18_spill] sm:$0xff] }
 0x24a   : > { %v1250_v42 = vpop.xlane.xlu0 %1249  ;;  %v1253_v49 = vpop.xlane.xlu1 %1252 }
 0x24b   : > { %v1271_v45 = vmul.f32 0.0625, %v1250_v42  ;;  %v1272_v44 = vmul.f32 0.0625, %v1253_v49  ;;  %v1286_v60 = vmul.f32 %v9615_v54, %v9615_v54 }
 0x24d   : > { %v9620_v61 = vsub.f32 %v9578_v48, %v1271_v45  ;;  %v9623_v22 = vsub.f32 %v9583_v25, %v1272_v44  ;;  %v1294_v0 = vsel %vm1244_vm2, %v1286_v60, 0.0  ;;  %v11615_v25 = vld [vmem:[#allocation17_spill] sm:$0xff]  ;;  %v11618_v48 = vld [vmem:[#allocation47_spill] sm:$0xff] }
 0x24e   : > { %v1256_v47 = vpop.xlane.xlu1 %1255  ;;  %v1259_v19 = vpop.xlane.xlu0 %1258  ;;  %1295 = vadd.xlane.f32.xlu0 %v1294_v0 }
 0x24f   : > { %v1273_v13 = vmul.f32 0.0625, %v1256_v47  ;;  %v1274_v50 = vmul.f32 0.0625, %v1259_v19  ;;  %v1287_v57 = vmul.f32 %v9620_v61, %v9620_v61  ;;  %v1288_v24 = vmul.f32 %v9623_v22, %v9623_v22 }
 0x251   : > { %v9631_v15 = vsub.f32 %v9588_v14, %v1273_v13  ;;  %v9634_v43 = vsub.f32 %v9593_v59, %v1274_v50  ;;  %v1297_v27 = vsel %vm1244_vm2, %v1287_v57, 0.0  ;;  %v1300_v16 = vsel %vm1244_vm2, %v1288_v24, 0.0  ;;  %v1374_v13 = vld [vmem:[%s9007_s7 + $0x50] sm:$0xff]  ;;  %v1375_v50 = vld [vmem:[%s9007_s7 + $0x58] sm:$0xff]  ;;  %v1566_v24 = vld [vmem:[%s9007_s7 + $0x60] sm:$0xff] }
 0x252   : > { %v1262_v26 = vpop.xlane.xlu1 %1261  ;;  %1298 = vadd.xlane.f32.xlu1 %v1297_v27  ;;  %1301 = vadd.xlane.f32.xlu0 %v1300_v16  ;;  %v1265_v52 = vpop.xlane.xlu0 %1264  ;;  %v8390_v57 = vpack.c.bf16 %v1375_v50, %v1374_v13  ;;  %v1567_v27 = vld [vmem:[%s9007_s7 + $0x68] sm:$0xff]  ;;  %v11613_v59 = vld [vmem:[#allocation16_spill] sm:$0xff]  ;;  %v11616_v14 = vld [vmem:[#allocation46_spill] sm:$0xff] }
 0x253   : > { %v1275_v46 = vmul.f32 0.0625, %v1262_v26  ;;  %v1276_v55 = vmul.f32 0.0625, %v1265_v52  ;;  %v1289_v20 = vmul.f32 %v9631_v15, %v9631_v15  ;;  %v1290_v56 = vmul.f32 %v9634_v43, %v9634_v43 }
 0x254   : > { %8391 = vmatprep.subr.bf16.mxu1 %v8390_v57  ;;  %v8394_v16 = vpack.c.bf16 %v1567_v27, %v1566_v24 }
 0x255   : > { %v9643_v62 = vsub.f32 %v9600_v58, %v1275_v46  ;;  %v9646_v18 = vsub.f32 %v9603_v53, %v1276_v55  ;;  %v1303_v63 = vsel %vm1244_vm2, %v1289_v20, 0.0  ;;  %v1306_v17 = vsel %vm1244_vm2, %v1290_v56, 0.0  ;;  %8393 = vmatpush3.bf16.msra.mxu1 %v8390_v57  ;;  %v11611_v53 = vld [vmem:[#allocation15_spill] sm:$0xff]  ;;  %v11614_v58 = vld [vmem:[#allocation45_spill] sm:$0xff] }
 0x256   : > { %1304 = vadd.xlane.f32.xlu1 %v1303_v63  ;;  %v1268_v51 = vpop.xlane.xlu1 %1267  ;;  %1307 = vadd.xlane.f32.xlu0 %v1306_v17 }
 0x257   : > { %v1277_v42 = vmul.f32 0.0625, %v1268_v51  ;;  %v1291_v49 = vmul.f32 %v9643_v62, %v9643_v62  ;;  %v1292_v45 = vmul.f32 %v9646_v18, %v9646_v18  ;;  %8395 = vmatprep.subr.bf16.mxu1 %v8394_v16 }
 0x259   : > { %v9655_v44 = vsub.f32 %v9610_v21, %v1277_v42  ;;  %v1309_v60 = vsel %vm1244_vm2, %v1291_v49, 0.0  ;;  %v1312_v0 = vsel %vm1244_vm2, %v1292_v45, 0.0  ;;  %v11612_v21 = vld [vmem:[#allocation44_spill] sm:$0xff] }
 0x25a   : > { %1310 = vadd.xlane.f32.xlu1 %v1309_v60  ;;  %1313 = vadd.xlane.f32.xlu0 %v1312_v0 }
 0x25b   : > { %v1293_v47 = vmul.f32 %v9655_v44, %v9655_v44 }
 0x25d   : > { %v1315_v19 = vsel %vm1244_vm2, %v1293_v47, 0.0 }
 0x25e   : > { %1316 = vadd.xlane.f32.xlu1 %v1315_v19 }
 0x2db   : > { %v1296_v26 = vpop.xlane.xlu0 %1295 }
 0x2dc   : > { %v1318_v52 = vmul.f32 0.0625, %v1296_v26 }
 0x2de   : > { %v1326_v46 = vadd.f32 1e-05, %v1318_v52  ;;  %v6550_v52 = vld [vmem:[%s9027_s19 + $0x1] ss:$0 sm:$0xff] }
 0x2df   : > { %v1299_v55 = vpop.xlane.xlu1 %1298  ;;  %v1302_v20 = vpop.xlane.xlu0 %1301 }
 0x2e0   : > { %8577 = vrsqrt.f32 %v1326_v46  ;;  %v1319_v56 = vmul.f32 0.0625, %v1299_v55  ;;  %v1320_v63 = vmul.f32 0.0625, %v1302_v20 }
 0x2e2   : > { %v1327_v17 = vadd.f32 1e-05, %v1319_v56  ;;  %v1328_v51 = vadd.f32 1e-05, %v1320_v63  ;;  %v6551_v56 = vld [vmem:[%s9027_s19 + $0x2] ss:$0 sm:$0xff] }
 0x2e3   : > { %v1305_v42 = vpop.xlane.xlu1 %1304  ;;  %v1308_v49 = vpop.xlane.xlu0 %1307 }
 0x2e4   : > { %8579 = vrsqrt.f32 %v1327_v17  ;;  %v1321_v45 = vmul.f32 0.0625, %v1305_v42  ;;  %v1322_v60 = vmul.f32 0.0625, %v1308_v49 }
 0x2e5   : > { %8581 = vrsqrt.f32 %v1328_v51 }
 0x2e6   : > { %v1329_v0 = vadd.f32 1e-05, %v1321_v45  ;;  %v1330_v47 = vadd.f32 1e-05, %v1322_v60 }
 0x2e7   : > { %v1311_v19 = vpop.xlane.xlu1 %1310  ;;  %v1314_v13 = vpop.xlane.xlu0 %1313 }
 0x2e8   : > { %8583 = vrsqrt.f32 %v1329_v0  ;;  %v1323_v50 = vmul.f32 0.0625, %v1311_v19  ;;  %v1324_v57 = vmul.f32 0.0625, %v1314_v13 }
 0x2e9   : > { %8585 = vrsqrt.f32 %v1330_v47 }
 0x2ea   : > { %v8578_v24 = vpop.eup %8577  ;;  %v1331_v27 = vadd.f32 1e-05, %v1323_v50  ;;  %v1332_v26 = vadd.f32 1e-05, %v1324_v57 }
 0x2eb   : > { %v1317_v46 = vpop.xlane.xlu1 %1316  ;;  %v1342_v55 = vmul.f32 %v8578_v24, %v9615_v54 }
 0x2ec   : > { %8587 = vrsqrt.f32 %v1331_v27  ;;  %v1325_v20 = vmul.f32 0.0625, %v1317_v46 }
 0x2ed   : > { %8589 = vrsqrt.f32 %v1332_v26  ;;  %v1354_v63 = vmul.f32 %v6550_v52, %v1342_v55 }
 0x2ee   : > { %v8580_v17 = vpop.eup %8579  ;;  %v1333_v51 = vadd.f32 1e-05, %v1325_v20 }
 0x2ef   : > { %v8582_v42 = vpop.eup %8581  ;;  %v1366_v49 = vadd.f32 %v6551_v56, %v1354_v63  ;;  %v1343_v45 = vmul.f32 %v8580_v17, %v9620_v61 }
 0x2f0   : > { %8591 = vrsqrt.f32 %v1333_v51  ;;  %v1344_v60 = vmul.f32 %v8582_v42, %v9623_v22 }
 0x2f1   : > { %7675 = vmatprep.mubr.msk.f32.mxu1 %vm1244_vm2, %v1366_v49  ;;  %v1355_v0 = vmul.f32 %v6550_v52, %v1343_v45 }
 0x2f2   : > { %v8584_v47 = vpop.eup %8583  ;;  %v1356_v19 = vmul.f32 %v6550_v52, %v1344_v60 }
 0x2f3   : > { %v8586_v54 = vpop.eup %8585  ;;  %v1367_v13 = vadd.f32 %v6551_v56, %v1355_v0  ;;  %v1345_v50 = vmul.f32 %v8584_v47, %v9631_v15 }
 0x2f4   : > { %v1368_v57 = vadd.f32 %v6551_v56, %v1356_v19  ;;  %v1346_v24 = vmul.f32 %v8586_v54, %v9634_v43  ;;  %v6569_v19 = vld [vmem:[%s9027_s19 + $0x4] ss:$0 sm:$0xff] }
 0x2f5   : > { %7676 = vmatmul.mubr.msk.f32.vlgmr.msra.gmra.mrb[0].mxu1 %vm1244_vm2, %v1367_v13  ;;  %v1357_v27 = vmul.f32 %v6550_v52, %v1345_v50 }
 0x2f6   : > { %v8588_v26 = vpop.eup %8587  ;;  %7678 = vmatprep.mubr.msk.f32.mxu1 %vm1244_vm2, %v1368_v57  ;;  %v1358_v61 = vmul.f32 %v6550_v52, %v1346_v24  ;;  %8397 = vmatpush3.bf16.msra.mxu1 %v8394_v16 }
 0x2f7   : > { %v8590_v22 = vpop.eup %8589  ;;  %v1369_v46 = vadd.f32 %v6551_v56, %v1357_v27  ;;  %v1347_v55 = vmul.f32 %v8588_v26, %v9643_v62 }
 0x2f8   : > { %v1370_v20 = vadd.f32 %v6551_v56, %v1358_v61  ;;  %v1348_v63 = vmul.f32 %v8590_v22, %v9646_v18 }
 0x2f9   : > { %7679 = vmatmul.mubr.msk.f32.gmra.mrb[2].mxu1 %vm1244_vm2, %v1369_v46  ;;  %v1359_v15 = vmul.f32 %v6550_v52, %v1347_v55 }
 0x2fa   : > { %v8592_v17 = vpop.eup %8591  ;;  %7681 = vmatprep.mubr.msk.f32.mxu1 %vm1244_vm2, %v1370_v20  ;;  %v1360_v43 = vmul.f32 %v6550_v52, %v1348_v63 }
 0x2fb   : > { %v1371_v51 = vadd.f32 %v6551_v56, %v1359_v15  ;;  %v1349_v42 = vmul.f32 %v8592_v17, %v9655_v44 }
 0x2fc   : > { %v1372_v45 = vadd.f32 %v6551_v56, %v1360_v43 }
 0x2fd   : > { %7682 = vmatmul.mubr.msk.f32.gmra.mrb[4].mxu1 %vm1244_vm2, %v1371_v51  ;;  %v1361_v16 = vmul.f32 %v6550_v52, %v1349_v42 }
 0x2fe   : > { %7684 = vmatprep.mubr.msk.f32.mxu1 %vm1244_vm2, %v1372_v45 }
 0x2ff   : > { %v1373_v62 = vadd.f32 %v6551_v56, %v1361_v16 }
 0x301   : > { %7685 = vmatmul.mubr.msk.f32.gmra.mrb[6].mxu1 %vm1244_vm2, %v1373_v62 }
 0x302   : > { %7691 = vmatprep.mubr.msk.f32.mxu1 %vm1244_vm2, %v1366_v49 }
 0x305   : > { %7692 = vmatmul.mubr.msk.f32.vlgmr.msra.gmra.mrb[8].mxu1 %vm1244_vm2, %v1367_v13 }
 0x306   : > { %7694 = vmatprep.mubr.msk.f32.mxu1 %vm1244_vm2, %v1368_v57 }
 0x309   : > { %7695 = vmatmul.mubr.msk.f32.gmra.mrb[10].mxu1 %vm1244_vm2, %v1369_v46 }
 0x30a   : > { %7697 = vmatprep.mubr.msk.f32.mxu1 %vm1244_vm2, %v1370_v20 }
 0x30d   : > { %7698 = vmatmul.mubr.msk.f32.gmra.mrb[12].mxu1 %vm1244_vm2, %v1371_v51 }
 0x30e   : > { %7700 = vmatprep.mubr.msk.f32.mxu1 %vm1244_vm2, %v1372_v45 }
 0x311   : > { %7701 = vmatmul.mubr.msk.f32.gmra.mrb[14].mxu1 %vm1244_vm2, %v1373_v62  ;;  %v11589_v62 = vld [vmem:[#allocation4_spill] sm:$0xff] }
 0x312   : > { %7761 = vmatprep.mubr.msk.f32.mxu1 %vm398_vm1, %v9052_v28 }
 0x3c8   : > { %v9694_v18 = vpop.f32.mrb[0].mxu1 }
 0x3c9   : > { %11581 = vst [vmem:[#allocation91_spill] sm:$0xff] %v9694_v18  ;;  %v9696_v44 = vpop.f32.mrb[1].mxu1  ;;  %v11626_v18 = vld [vmem:[#allocation55_spill] sm:$0xff] }
 0x3ca   : > { %11582 = vst [vmem:[#allocation92_spill] sm:$0xff] %v9696_v44  ;;  %v11625_v44 = vld [vmem:[#allocation54_spill] sm:$0xff] }
 0x3cc   : > { %v9698_v52 = vpop.f32.mrb[2].mxu1 }
 0x3cd   : > { %11583 = vst [vmem:[#allocation93_spill] sm:$0xff] %v9698_v52  ;;  %v9700_v56 = vpop.f32.mrb[3].mxu1  ;;  %v11624_v52 = vld [vmem:[#allocation53_spill] sm:$0xff] }
 0x3ce   : > { %11584 = vst [vmem:[#allocation94_spill] sm:$0xff] %v9700_v56  ;;  %v11623_v56 = vld [vmem:[#allocation52_spill] sm:$0xff] }
 0x3d0   : > { %v9702_v49 = vpop.f32.mrb[4].mxu1 }
 0x3d1   : > { %11585 = vst [vmem:[#allocation95_spill] sm:$0xff] %v9702_v49  ;;  %v9704_v60 = vpop.f32.mrb[5].mxu1  ;;  %v11622_v49 = vld [vmem:[#allocation51_spill] sm:$0xff] }
 0x3d2   : > { %11586 = vst [vmem:[#allocation96_spill] sm:$0xff] %v9704_v60  ;;  %v11621_v60 = vld [vmem:[#allocation50_spill] sm:$0xff] }
 0x3d4   : > { %v9706_v0 = vpop.f32.mrb[6].mxu1 }
 0x3d5   : > { %11587 = vst [vmem:[#allocation97_spill] sm:$0xff] %v9706_v0  ;;  %v9708_v47 = vpop.f32.mrb[7].mxu1  ;;  %v11620_v0 = vld [vmem:[#allocation49_spill] sm:$0xff] }
 0x3d6   : > { %11588 = vst [vmem:[#allocation98_spill] sm:$0xff] %v9708_v47  ;;  %v11619_v47 = vld [vmem:[#allocation48_spill] sm:$0xff] }
 0x3d8   : > { %v7693_v54 = vpop.f32.mrb[8].mxu1 }
 0x3d9   : > { %v1645_v13 = vadd.f32 %v7693_v54, %v6569_v19  ;;  %v1639_v50 = vpop.f32.mrb[9].mxu1  ;;  %v11591_v54 = vld [vmem:[#allocation5_spill] sm:$0xff] }
 0x3da   : > { %v1640_v57 = vadd.f32 %v6569_v19, %v1639_v50  ;;  %v11593_v50 = vld [vmem:[#allocation6_spill] sm:$0xff] }
 0x3dc   : > { %v8398_v24 = vpack.c.bf16 %v1645_v13, %v1640_v57  ;;  %v7696_v27 = vpop.f32.mrb[10].mxu1  ;;  %v11592_v13 = vld [vmem:[#allocation34_spill] sm:$0xff]  ;;  %v11594_v57 = vld [vmem:[#allocation35_spill] sm:$0xff] }
 0x3dd   : > { %v1655_v26 = vadd.f32 %v7696_v27, %v6569_v19  ;;  %v1649_v61 = vpop.f32.mrb[11].mxu1  ;;  %v11596_v27 = vld [vmem:[#allocation36_spill] sm:$0xff] }
 0x3de   : > { %v1650_v22 = vadd.f32 %v6569_v19, %v1649_v61  ;;  %8399 = vmatprep.subr.bf16.mxu0 %v8398_v24  ;;  %8526 = vmatprep.subr.bf16.mxu1 %v8398_v24  ;;  %v11598_v61 = vld [vmem:[#allocation37_spill] sm:$0xff] }
 0x3df   : > { %8401 = vmatpush3.bf16.msra.mxu0 %v8398_v24  ;;  %8530 = vmatpush3.bf16.msra.mxu1 %v8398_v24  ;;  %v11595_v24 = vld [vmem:[#allocation7_spill] sm:$0xff] }
 0x3e0   : > { %v8402_v46 = vpack.c.bf16 %v1655_v26, %v1650_v22  ;;  %v7699_v55 = vpop.f32.mrb[12].mxu1  ;;  %v11597_v26 = vld [vmem:[#allocation8_spill] sm:$0xff]  ;;  %v11599_v22 = vld [vmem:[#allocation9_spill] sm:$0xff] }
 0x3e1   : > { %v1665_v20 = vadd.f32 %v7699_v55, %v6569_v19  ;;  %v1659_v63 = vpop.f32.mrb[13].mxu1  ;;  %v11601_v55 = vld [vmem:[#allocation10_spill] sm:$0xff] }
 0x3e2   : > { %v1660_v15 = vadd.f32 %v6569_v19, %v1659_v63  ;;  %8403 = vmatprep.subr.bf16.mxu0 %v8402_v46  ;;  %8527 = vmatprep.subr.bf16.mxu1 %v8402_v46  ;;  %v11603_v63 = vld [vmem:[#allocation11_spill] sm:$0xff] }
 0x3e3   : > { %8405 = vmatpush3.bf16.msra.mxu0 %v8402_v46  ;;  %8531 = vmatpush3.bf16.msra.mxu1 %v8402_v46  ;;  %v11600_v46 = vld [vmem:[#allocation38_spill] sm:$0xff] }
 0x3e4   : > { %v8406_v17 = vpack.c.bf16 %v1665_v20, %v1660_v15  ;;  %v7702_v43 = vpop.f32.mrb[14].mxu1  ;;  %v11602_v20 = vld [vmem:[#allocation39_spill] sm:$0xff]  ;;  %v11604_v15 = vld [vmem:[#allocation40_spill] sm:$0xff] }
 0x3e5   : > { %v1675_v51 = vadd.f32 %v7702_v43, %v6569_v19  ;;  %v1669_v42 = vpop.f32.mrb[15].mxu1  ;;  %v11606_v43 = vld [vmem:[#allocation41_spill] sm:$0xff] }
 0x3e6   : > { %v1670_v45 = vadd.f32 %v6569_v19, %v1669_v42  ;;  %8407 = vmatprep.subr.bf16.mxu0 %v8406_v17  ;;  %8528 = vmatprep.subr.bf16.mxu1 %v8406_v17  ;;  %v11590_v19 = vld [vmem:[#allocation33_spill] sm:$0xff]  ;;  %v11608_v42 = vld [vmem:[#allocation42_spill] sm:$0xff] }
 0x3e7   : > { %8409 = vmatpush3.bf16.msra.mxu0 %v8406_v17  ;;  %8532 = vmatpush3.bf16.msra.mxu1 %v8406_v17  ;;  %v11605_v17 = vld [vmem:[#allocation12_spill] sm:$0xff] }
 0x3e8   : > { %v8410_v16 = vpack.c.bf16 %v1675_v51, %v1670_v45  ;;  %v11607_v51 = vld [vmem:[#allocation13_spill] sm:$0xff]  ;;  %v11609_v45 = vld [vmem:[#allocation14_spill] sm:$0xff] }
 0x3ea   : > { %8411 = vmatprep.subr.bf16.mxu0 %v8410_v16  ;;  %8529 = vmatprep.subr.bf16.mxu1 %v8410_v16 }
 0x3eb   : > { %8413 = vmatpush3.bf16.msra.mxu0 %v8410_v16  ;;  %8533 = vmatpush3.bf16.msra.mxu1 %v8410_v16  ;;  %v11610_v16 = vld [vmem:[#allocation43_spill] sm:$0xff] }
 0x3ee   : > { %7762 = vmatmul.mubr.msk.f32.vlgmr.msra.gmra.mrb[16].mxu1 %vm398_vm1, %v9057_v29  ;;  %7720 = vmatmul.mubr.msk.f32.vlgmr.msra.gmra.mrb[72].mxu0 %vm398_vm1, %v8896_v1 }
 0x3ef   : > { %7764 = vmatprep.mubr.msk.f32.mxu1 %vm398_vm1, %v9062_v30  ;;  %7722 = vmatprep.mubr.msk.f32.mxu0 %vm398_vm1, %v8901_v2 }
 0x3f2   : > { %7765 = vmatmul.mubr.msk.f32.gmra.mrb[18].mxu1 %vm398_vm1, %v9067_v31  ;;  %7723 = vmatmul.mubr.msk.f32.gmra.mrb[74].mxu0 %vm398_vm1, %v8906_v3 }
 0x3f3   : > { %7767 = vmatprep.mubr.msk.f32.mxu1 %vm398_vm1, %v9072_v32  ;;  %7725 = vmatprep.mubr.msk.f32.mxu0 %vm398_vm1, %v8911_v4 }
 0x3f6   : > { %7768 = vmatmul.mubr.msk.f32.gmra.mrb[20].mxu1 %vm398_vm1, %v9077_v33  ;;  %7726 = vmatmul.mubr.msk.f32.gmra.mrb[76].mxu0 %vm398_vm1, %v8916_v5 }
 0x3f7   : > { %7770 = vmatprep.mubr.msk.f32.mxu1 %vm398_vm1, %v9082_v34  ;;  %7728 = vmatprep.mubr.msk.f32.mxu0 %vm398_vm1, %v8921_v6 }
 0x3fa   : > { %7771 = vmatmul.mubr.msk.f32.gmra.mrb[22].mxu1 %vm398_vm1, %v9087_v35  ;;  %7729 = vmatmul.mubr.msk.f32.gmra.mrb[78].mxu0 %vm398_vm1, %v8926_v7 }
 0x3fb   : > { %7773 = vmatprep.mubr.msk.f32.mxu1 %vm398_vm1, %v9092_v36  ;;  %7731 = vmatprep.mubr.msk.f32.mxu0 %vm398_vm1, %v8931_v8 }
 0x3fe   : > { %7774 = vmatmul.mubr.msk.f32.gmra.mrb[24].mxu1 %vm398_vm1, %v9097_v37  ;;  %7732 = vmatmul.mubr.msk.f32.gmra.mrb[80].mxu0 %vm398_vm1, %v8937_v9 }
 0x3ff   : > { %7776 = vmatprep.mubr.msk.f32.mxu1 %vm398_vm1, %v9102_v38  ;;  %7734 = vmatprep.mubr.msk.f32.mxu0 %vm398_vm1, %v8942_v10 }
 0x402   : > { %7777 = vmatmul.mubr.msk.f32.gmra.mrb[26].mxu1 %vm398_vm1, %v9107_v39  ;;  %7735 = vmatmul.mubr.msk.f32.gmra.mrb[82].mxu0 %vm398_vm1, %v8947_v11 }
 0x403   : > { %7779 = vmatprep.mubr.msk.f32.mxu1 %vm398_vm1, %v9112_v40  ;;  %7737 = vmatprep.mubr.msk.f32.mxu0 %vm398_vm1, %v8952_v12 }
 0x406   : > { %7780 = vmatmul.mubr.msk.f32.gmra.mrb[28].mxu1 %vm398_vm1, %v9117_v41  ;;  %7738 = vmatmul.mubr.msk.f32.gmra.mrb[84].mxu0 %vm398_vm1, %v11589_v62 }
 0x407   : > { %7782 = vmatprep.mubr.msk.f32.mxu1 %vm398_vm1, %v11590_v19  ;;  %7740 = vmatprep.mubr.msk.f32.mxu0 %vm398_vm1, %v11591_v54 }
 0x40a   : > { %7783 = vmatmul.mubr.msk.f32.gmra.mrb[30].mxu1 %vm398_vm1, %v11592_v13  ;;  %7741 = vmatmul.mubr.msk.f32.gmra.mrb[86].mxu0 %vm398_vm1, %v11593_v50 }
 0x40b   : > { %7785 = vmatprep.mubr.msk.f32.mxu1 %vm398_vm1, %v11594_v57  ;;  %7743 = vmatprep.mubr.msk.f32.mxu0 %vm398_vm1, %v11595_v24 }
 0x40e   : > { %7786 = vmatmul.mubr.msk.f32.gmra.mrb[32].mxu1 %vm398_vm1, %v11596_v27  ;;  %7744 = vmatmul.mubr.msk.f32.gmra.mrb[88].mxu0 %vm398_vm1, %v11597_v26  ;;  %v6651_v27 = vld [vmem:[%s9007_s7 + $0xb1] ss:$0 sm:$0xff] }
 0x40f   : > { %7788 = vmatprep.mubr.msk.f32.mxu1 %vm398_vm1, %v11598_v61  ;;  %7746 = vmatprep.mubr.msk.f32.mxu0 %vm398_vm1, %v11599_v22  ;;  %v6650_v61 = vld [vmem:[%s9007_s7 + $0xb0] ss:$0 sm:$0xff]  ;;  %v9932_v22 = vld [vmem:[%s9007_s7 + $0xb5] ss:$0 sm:$0xff] }
 0x412   : > { %7789 = vmatmul.mubr.msk.f32.gmra.mrb[34].mxu1 %vm398_vm1, %v11600_v46  ;;  %7747 = vmatmul.mubr.msk.f32.gmra.mrb[90].mxu0 %vm398_vm1, %v11601_v55 }
 0x413   : > { %7791 = vmatprep.mubr.msk.f32.mxu1 %vm398_vm1, %v11602_v20  ;;  %7749 = vmatprep.mubr.msk.f32.mxu0 %vm398_vm1, %v11603_v63 }
 0x416   : > { %7792 = vmatmul.mubr.msk.f32.gmra.mrb[36].mxu1 %vm398_vm1, %v11604_v15  ;;  %7750 = vmatmul.mubr.msk.f32.gmra.mrb[92].mxu0 %vm398_vm1, %v11605_v17 }
 0x417   : > { %7794 = vmatprep.mubr.msk.f32.mxu1 %vm398_vm1, %v11606_v43  ;;  %7752 = vmatprep.mubr.msk.f32.mxu0 %vm398_vm1, %v11607_v51 }
 0x41a   : > { %7795 = vmatmul.mubr.msk.f32.gmra.mrb[38].mxu1 %vm398_vm1, %v11608_v42  ;;  %7753 = vmatmul.mubr.msk.f32.gmra.mrb[94].mxu0 %vm398_vm1, %v11609_v45 }
 0x41b   : > { %7797 = vmatprep.mubr.msk.f32.mxu1 %vm398_vm1, %v11610_v16  ;;  %7755 = vmatprep.mubr.msk.f32.mxu0 %vm398_vm1, %v11611_v53 }
 0x41e   : > { %7798 = vmatmul.mubr.msk.f32.gmra.mrb[40].mxu1 %vm398_vm1, %v11612_v21  ;;  %7756 = vmatmul.mubr.msk.f32.gmra.mrb[96].mxu0 %vm398_vm1, %v11613_v59 }
 0x41f   : > { %7800 = vmatprep.mubr.msk.f32.mxu1 %vm398_vm1, %v11614_v58  ;;  %7758 = vmatprep.mubr.msk.f32.mxu0 %vm398_vm1, %v11615_v25  ;;  %v11635_v58 = vld [vmem:[#allocation80_spill] sm:$0xff] }
 0x422   : > { %7801 = vmatmul.mubr.msk.f32.gmra.mrb[42].mxu1 %vm398_vm1, %v11616_v14  ;;  %7759 = vmatmul.mubr.msk.f32.gmra.mrb[98].mxu0 %vm398_vm1, %v11617_v23  ;;  %v2546_v14 = vld [vmem:[%s9007_s7 + $0x88] sm:$0xff] }
 0x423   : > { %7803 = vmatprep.mubr.msk.f32.mxu1 %vm398_vm1, %v11618_v48 }
 0x426   : > { %7804 = vmatmul.mubr.msk.f32.gmra.mrb[44].mxu1 %vm398_vm1, %v11619_v47  ;;  %v11632_v47 = vld [vmem:[#allocation61_spill] sm:$0xff] }
 0x427   : > { %7806 = vmatprep.mubr.msk.f32.mxu1 %vm398_vm1, %v11620_v0  ;;  %v11627_v0 = vld [vmem:[#allocation56_spill] sm:$0xff] }
 0x42a   : > { %7807 = vmatmul.mubr.msk.f32.gmra.mrb[46].mxu1 %vm398_vm1, %v11621_v60  ;;  %v11628_v60 = vld [vmem:[#allocation57_spill] sm:$0xff] }
 0x42b   : > { %7809 = vmatprep.mubr.msk.f32.mxu1 %vm398_vm1, %v11622_v49  ;;  %v11629_v49 = vld [vmem:[#allocation58_spill] sm:$0xff] }
 0x42e   : > { %7810 = vmatmul.mubr.msk.f32.gmra.mrb[48].mxu1 %vm398_vm1, %v11623_v56  ;;  %v11630_v56 = vld [vmem:[#allocation59_spill] sm:$0xff] }
 0x42f   : > { %7812 = vmatprep.mubr.msk.f32.mxu1 %vm398_vm1, %v11624_v52  ;;  %v11631_v52 = vld [vmem:[#allocation60_spill] sm:$0xff] }
 0x432   : > { %7813 = vmatmul.mubr.msk.f32.gmra.mrb[50].mxu1 %vm398_vm1, %v11625_v44  ;;  %v11633_v44 = vld [vmem:[#allocation62_spill] sm:$0xff] }
 0x433   : > { %7815 = vmatprep.mubr.msk.f32.mxu1 %vm398_vm1, %v11626_v18  ;;  %v2353_v18 = vld [vmem:[%s9007_s7 + $0x70] sm:$0xff] }
 0x436   : > { %7816 = vmatmul.mubr.msk.f32.gmra.mrb[52].mxu1 %vm398_vm1, %v11627_v0  ;;  %v2354_v0 = vld [vmem:[%s9007_s7 + $0x78] sm:$0xff] }
 0x437   : > { %7818 = vmatprep.mubr.msk.f32.mxu1 %vm398_vm1, %v11628_v60  ;;  %v8414_v48 = vpack.c.bf16 %v2354_v0, %v2353_v18  ;;  %v2545_v60 = vld [vmem:[%s9007_s7 + $0x80] sm:$0xff] }
 0x439   : > { %8415 = vmatprep.subr.bf16.mxu0 %v8414_v48 }
 0x43a   : > { %7819 = vmatmul.mubr.msk.f32.gmra.mrb[54].mxu1 %vm398_vm1, %v11629_v49  ;;  %8417 = vmatpush3.bf16.msra.mxu0 %v8414_v48  ;;  %v9855_v49 = vpack.c.bf16 %v2546_v14, %v2545_v60 }
 0x43b   : > { %7821 = vmatprep.mubr.msk.f32.mxu1 %vm398_vm1, %v11630_v56  ;;  %v11634_v56 = vld [vmem:[#allocation79_spill] sm:$0xff] }
 0x43c   : > { %8419 = vmatprep.subr.bf16.mxu0 %v9855_v49 }
 0x43e   : > { %7822 = vmatmul.mubr.msk.f32.gmra.mrb[56].mxu1 %vm398_vm1, %v11631_v52  ;;  %v9860_v52 = vpack.c.bf16 %v11635_v58, %v11634_v56 }
 0x43f   : > { %7824 = vmatprep.mubr.msk.f32.mxu1 %vm398_vm1, %v11632_v47 }
 0x440   : > { %8423 = vmatprep.subr.bf16.mxu1 %v9860_v52 }
 0x441   : > { %8425 = vmatpush3.bf16.msra.mxu1 %v9860_v52 }
 0x442   : > { %7825 = vmatmul.mubr.msk.f32.gmra.mrb[58].mxu1 %vm398_vm1, %v11633_v44 }
 0x4c1   : > { %v9864_v44 = vpop.f32.mrb[16].mxu1  ;;  %v7721_v18 = vpop.f32.mrb[72].mxu0 }
 0x4c2   : > { %v9866_v48 = vpop.f32.mrb[17].mxu1  ;;  %v1744_v0 = vpop.f32.mrb[73].mxu0  ;;  %v2109_v19 = vmul.f32 %v7721_v18, %v6650_v61 }
 0x4c3   : > { %v2108_v38 = vmul.f32 %v6650_v61, %v1744_v0 }
 0x4c5   : > { %v9868_v14 = vpop.f32.mrb[18].mxu1  ;;  %v7724_v60 = vpop.f32.mrb[74].mxu0 }
 0x4c6   : > { %v9870_v47 = vpop.f32.mrb[19].mxu1  ;;  %v1754_v21 = vpop.f32.mrb[75].mxu0  ;;  %v2111_v32 = vmul.f32 %v7724_v60, %v6650_v61 }
 0x4c7   : > { %v2110_v28 = vmul.f32 %v6650_v61, %v1754_v21 }
 0x4c9   : > { %v9872_v58 = vpop.f32.mrb[20].mxu1  ;;  %v7727_v56 = vpop.f32.mrb[76].mxu0 }
 0x4ca   : > { %v9874_v16 = vpop.f32.mrb[21].mxu1  ;;  %v1764_v42 = vpop.f32.mrb[77].mxu0  ;;  %v2113_v53 = vmul.f32 %v7727_v56, %v6650_v61  ;;  %v6652_v56 = vld [vmem:[%s9007_s7 + $0xb2] ss:$0 sm:$0xff] }
 0x4cd   : > { %v9876_v43 = vpop.f32.mrb[22].mxu1  ;;  %v7730_v15 = vpop.f32.mrb[78].mxu0 }
 0x4ce   : > { %v9878_v20 = vpop.f32.mrb[23].mxu1  ;;  %v1774_v46 = vpop.f32.mrb[79].mxu0  ;;  %v2115_v21 = vmul.f32 %v7730_v15, %v6650_v61 }
 0x4d1   : > { %v9882_v57 = vpop.f32.mrb[24].mxu1  ;;  %v7733_v13 = vpop.f32.mrb[80].mxu0 }
 0x4d2   : > { %v9884_v41 = vpop.f32.mrb[25].mxu1  ;;  %v2122_v40 = vmul.f32 %v7733_v13, %v6651_v27  ;;  %v1784_v39 = vpop.f32.mrb[81].mxu0 }
 0x4d3   : > { %v2121_v37 = vmul.f32 %v6651_v27, %v1784_v39 }
 0x4d4   : > { %v2130_v36 = vadd.f32 %v2122_v40, %v2109_v19 }
 0x4d5   : > { %v9886_v35 = vpop.f32.mrb[26].mxu1  ;;  %v2129_v34 = vadd.f32 %v2121_v37, %v2108_v38  ;;  %v7736_v33 = vpop.f32.mrb[82].mxu0  ;;  %v2112_v37 = vmul.f32 %v6650_v61, %v1764_v42 }
 0x4d6   : > { %v9888_v31 = vpop.f32.mrb[27].mxu1  ;;  %v2124_v30 = vmul.f32 %v7736_v33, %v6651_v27  ;;  %v1794_v29 = vpop.f32.mrb[83].mxu0 }
 0x4d7   : > { %v2123_v23 = vmul.f32 %v6651_v27, %v1794_v29 }
 0x4d8   : > { %v2132_v25 = vadd.f32 %v2124_v30, %v2111_v32 }
 0x4d9   : > { %v9890_v18 = vpop.f32.mrb[28].mxu1  ;;  %v2131_v59 = vadd.f32 %v2123_v23, %v2110_v28  ;;  %v7739_v13 = vpop.f32.mrb[84].mxu0  ;;  %v2114_v28 = vmul.f32 %v6650_v61, %v1774_v46 }
 0x4da   : > { %v9892_v39 = vpop.f32.mrb[29].mxu1  ;;  %v2126_v40 = vmul.f32 %v7739_v13, %v6651_v27  ;;  %v1804_v19 = vpop.f32.mrb[85].mxu0 }
 0x4db   : > { %v2125_v38 = vmul.f32 %v6651_v27, %v1804_v19 }
 0x4dc   : > { %v2134_v0 = vadd.f32 %v2126_v40, %v2113_v53 }
 0x4dd   : > { %v9894_v60 = vpop.f32.mrb[30].mxu1  ;;  %v2133_v33 = vadd.f32 %v2125_v38, %v2112_v37  ;;  %v7742_v45 = vpop.f32.mrb[86].mxu0 }
 0x4de   : > { %v9896_v29 = vpop.f32.mrb[31].mxu1  ;;  %v2128_v30 = vmul.f32 %v7742_v45, %v6651_v27  ;;  %v1814_v32 = vpop.f32.mrb[87].mxu0 }
 0x4df   : > { %v2127_v23 = vmul.f32 %v6651_v27, %v1814_v32  ;;  %v6654_v32 = vld [vmem:[%s9007_s7 + $0xb4] ss:$0 sm:$0xff] }
 0x4e0   : > { %v2136_v51 = vadd.f32 %v2128_v30, %v2115_v21  ;;  %v9904_v21 = vld [vmem:[%s9007_s7 + $0xb3] ss:$0 sm:$0xff]  ;;  %v2189_v26 = vmul.f32 %v9882_v57, %v6654_v32 }
 0x4e1   : > { %v7787_v17 = vpop.f32.mrb[32].mxu1  ;;  %v2135_v13 = vadd.f32 %v2127_v23, %v2114_v28  ;;  %v7745_v42 = vpop.f32.mrb[88].mxu0 }
 0x4e2   : > { %v1964_v19 = vpop.f32.mrb[33].mxu1  ;;  %v2143_v53 = vmul.f32 %v7745_v42, %v6652_v56  ;;  %v1824_v40 = vpop.f32.mrb[89].mxu0 }
 0x4e3   : > { %v2142_v63 = vmul.f32 %v6652_v56, %v1824_v40  ;;  %v2167_v40 = vmul.f32 %v9904_v21, %v9866_v48 }
 0x4e4   : > { %v9899_v37 = vadd.f32 %v2143_v53, %v2130_v36  ;;  %v2168_v53 = vmul.f32 %v9864_v44, %v9904_v21  ;;  %v9929_v44 = vmul.f32 %v6654_v32, %v9878_v20  ;;  %v2190_v20 = vmul.f32 %v6654_v32, %v9888_v31 }
 0x4e5   : > { %v7790_v15 = vpop.f32.mrb[34].mxu1  ;;  %v9901_v38 = vadd.f32 %v2142_v63, %v2129_v34  ;;  %v7748_v45 = vpop.f32.mrb[90].mxu0 }
 0x4e6   : > { %v1974_v55 = vpop.f32.mrb[35].mxu1  ;;  %v2145_v61 = vmul.f32 %v7748_v45, %v6652_v56  ;;  %v1834_v27 = vpop.f32.mrb[91].mxu0 }
 0x4e7   : > { %v2144_v46 = vmul.f32 %v6652_v56, %v1834_v27 }
 0x4e8   : > { %v9906_v30 = vadd.f32 %v2145_v61, %v2132_v25  ;;  %v2170_v25 = vmul.f32 %v9868_v14, %v9904_v21  ;;  %v2169_v61 = vmul.f32 %v9904_v21, %v9870_v47  ;;  %v2188_v47 = vmul.f32 %v6654_v32, %v9884_v41 }
 0x4e9   : > { %v9909_v28 = vpop.f32.mrb[36].mxu1  ;;  %v9911_v23 = vadd.f32 %v2144_v46, %v2131_v59  ;;  %v7751_v36 = vpop.f32.mrb[92].mxu0  ;;  %v2185_v59 = vmul.f32 %v9872_v58, %v6654_v32  ;;  %v2184_v46 = vmul.f32 %v6654_v32, %v9874_v16  ;;  %v2205_v41 = vmul.f32 %v9932_v22, %v9892_v39 }
 0x4ea   : > { %v9913_v42 = vpop.f32.mrb[37].mxu1  ;;  %v2147_v34 = vmul.f32 %v7751_v36, %v6652_v56  ;;  %v1844_v63 = vpop.f32.mrb[93].mxu0  ;;  %v9926_v36 = vmul.f32 %v9876_v43, %v6654_v32  ;;  %v2212_v39 = vmul.f32 %v7790_v15, %v9932_v22 }
 0x4eb   : > { %v2146_v45 = vmul.f32 %v6652_v56, %v1844_v63 }
 0x4ec   : > { %v2155_v27 = vadd.f32 %v2147_v34, %v2134_v0  ;;  %v2191_v34 = vmul.f32 %v9886_v35, %v6654_v32 }
 0x4ed   : > { %v9934_v48 = vpop.f32.mrb[38].mxu1  ;;  %v2154_v63 = vadd.f32 %v2146_v45, %v2133_v33  ;;  %v7754_v14 = vpop.f32.mrb[94].mxu0  ;;  %v2206_v33 = vmul.f32 %v9890_v18, %v9932_v22  ;;  %v2210_v45 = vmul.f32 %v7787_v17, %v9932_v22 }
 0x4ee   : > { %v2176_v58 = vadd.f32 %v2168_v53, %v2155_v27  ;;  %v9938_v0 = vpop.f32.mrb[39].mxu1  ;;  %v2149_v16 = vmul.f32 %v7754_v14, %v6652_v56  ;;  %v1854_v43 = vpop.f32.mrb[95].mxu0  ;;  %v2209_v53 = vmul.f32 %v9932_v22, %v1964_v19  ;;  %v6656_v27 = vld [vmem:[%s9007_s7 + $0xb6] ss:$0 sm:$0xff] }
 0x4ef   : > { %v2175_v24 = vadd.f32 %v2167_v40, %v2154_v63  ;;  %v2148_v50 = vmul.f32 %v6652_v56, %v1854_v43 }
 0x4f0   : > { %v2157_v57 = vadd.f32 %v2149_v16, %v2136_v51  ;;  %v2197_v54 = vadd.f32 %v2189_v26, %v2176_v58 }
 0x4f1   : > { %v7799_v14 = vpop.f32.mrb[40].mxu1  ;;  %v2156_v62 = vadd.f32 %v2148_v50, %v2135_v13  ;;  %v2196_v35 = vadd.f32 %v2188_v47, %v2175_v24  ;;  %v7757_v12 = vpop.f32.mrb[96].mxu0  ;;  %v2211_v24 = vmul.f32 %v9932_v22, %v1974_v55  ;;  %v2227_v55 = vmul.f32 %v9909_v28, %v6656_v27 }
 0x4f2   : > { %v2178_v31 = vadd.f32 %v2170_v25, %v2157_v57  ;;  %v2218_v32 = vadd.f32 %v2210_v45, %v2197_v54  ;;  %v2231_v56 = vmul.f32 %v7799_v14, %v6656_v27  ;;  %v2004_v40 = vpop.f32.mrb[41].mxu1  ;;  %v2164_v18 = vmul.f32 %v7757_v12, %v9904_v21  ;;  %v1864_v63 = vpop.f32.mrb[97].mxu0 }
 0x4f3   : > { %v2177_v17 = vadd.f32 %v2169_v61, %v2156_v62  ;;  %v2217_v51 = vadd.f32 %v2209_v53, %v2196_v35  ;;  %v2230_v26 = vmul.f32 %v6656_v27, %v2004_v40  ;;  %v2163_v58 = vmul.f32 %v9904_v21, %v1864_v63 }
 0x4f4   : > { %v2239_v19 = vadd.f32 %v2231_v56, %v2218_v32  ;;  %v2172_v16 = vadd.f32 %v2164_v18, %v9899_v37  ;;  %v2199_v50 = vadd.f32 %v2191_v34, %v2178_v31  ;;  %v6657_v34 = vld [vmem:[%s9007_s7 + $0xb7] ss:$0 sm:$0xff]  ;;  %v2207_v28 = vmul.f32 %v9932_v22, %v9896_v29 }
 0x4f5   : > { %v2238_v54 = vadd.f32 %v2230_v26, %v2217_v51  ;;  %v7802_v13 = vpop.f32.mrb[42].mxu1  ;;  %v2171_v25 = vadd.f32 %v2163_v58, %v9901_v38  ;;  %v2198_v12 = vadd.f32 %v2190_v20, %v2177_v17  ;;  %v7760_v47 = vpop.f32.mrb[98].mxu0  ;;  %v2229_v26 = vmul.f32 %v9934_v48, %v6656_v27 }
 0x4f6   : > { %v2193_v62 = vadd.f32 %v2185_v59, %v2172_v16  ;;  %v2220_v61 = vadd.f32 %v2212_v39, %v2199_v50  ;;  %v2233_v43 = vmul.f32 %v7802_v13, %v6656_v27  ;;  %v2014_v45 = vpop.f32.mrb[43].mxu1  ;;  %v2166_v57 = vmul.f32 %v7760_v47, %v9904_v21  ;;  %v1874_v15 = vpop.f32.mrb[99].mxu0 }
 0x4f7   : > { %v2192_v53 = vadd.f32 %v2184_v46, %v2171_v25  ;;  %v2219_v14 = vadd.f32 %v2211_v24, %v2198_v12  ;;  %v2232_v37 = vmul.f32 %v6656_v27, %v2014_v45  ;;  %v2165_v35 = vmul.f32 %v9904_v21, %v1874_v15 }
 0x4f8   : > { %v2241_v31 = vadd.f32 %v2233_v43, %v2220_v61  ;;  %v2214_v32 = vadd.f32 %v2206_v33, %v2193_v62  ;;  %v2174_v38 = vadd.f32 %v2166_v57, %v9906_v30  ;;  %v2226_v59 = vmul.f32 %v6656_v27, %v9913_v42  ;;  %v6658_v57 = vld [vmem:[%s9007_s7 + $0xb8] ss:$0 sm:$0xff] }
 0x4f9   : > { %v2240_v20 = vadd.f32 %v2232_v37, %v2219_v14  ;;  %v7805_v56 = vpop.f32.mrb[44].mxu1  ;;  %v2213_v40 = vadd.f32 %v2205_v41, %v2192_v53  ;;  %v2173_v18 = vadd.f32 %v2165_v35, %v9911_v23  ;;  %v2208_v46 = vmul.f32 %v9894_v60, %v9932_v22 }
 0x4fa   : > { %v2235_v63 = vadd.f32 %v2227_v55, %v2214_v32  ;;  %v2248_v17 = vmul.f32 %v7805_v56, %v6657_v34  ;;  %v2024_v51 = vpop.f32.mrb[45].mxu1  ;;  %v2195_v21 = vadd.f32 %v9926_v36, %v2174_v38  ;;  %v2228_v23 = vmul.f32 %v6656_v27, %v9938_v0  ;;  %v6659_v55 = vld [vmem:[%s9027_s19 + $0x5] ss:$0 sm:$0xff] }
 0x4fb   : > { %v2234_v33 = vadd.f32 %v2226_v59, %v2213_v40  ;;  %v2247_v30 = vmul.f32 %v6657_v34, %v2024_v51  ;;  %v2194_v42 = vadd.f32 %v9929_v44, %v2173_v18 }
 0x4fc   : > { %v2256_v41 = vadd.f32 %v2248_v17, %v2235_v63  ;;  %v2216_v58 = vadd.f32 %v2208_v46, %v2195_v21 }
 0x4fd   : > { %v2255_v39 = vadd.f32 %v2247_v30, %v2234_v33  ;;  %v7808_v60 = vpop.f32.mrb[46].mxu1  ;;  %v2215_v16 = vadd.f32 %v2207_v28, %v2194_v42 }
 0x4fe   : > { %v2237_v50 = vadd.f32 %v2229_v26, %v2216_v58  ;;  %v2250_v24 = vmul.f32 %v7808_v60, %v6657_v34  ;;  %v2034_v36 = vpop.f32.mrb[47].mxu1 }
 0x4ff   : > { %v2236_v13 = vadd.f32 %v2228_v23, %v2215_v16  ;;  %v2249_v25 = vmul.f32 %v6657_v34, %v2034_v36 }
 0x500   : > { %v2258_v22 = vadd.f32 %v2250_v24, %v2237_v50 }
 0x501   : > { %v2257_v29 = vadd.f32 %v2249_v25, %v2236_v13  ;;  %v7811_v12 = vpop.f32.mrb[48].mxu1 }
 0x502   : > { %v2252_v44 = vmul.f32 %v7811_v12, %v6657_v34  ;;  %v2044_v47 = vpop.f32.mrb[49].mxu1 }
 0x503   : > { %v2251_v48 = vmul.f32 %v6657_v34, %v2044_v47 }
 0x504   : > { %v2260_v62 = vadd.f32 %v2252_v44, %v2239_v19 }
 0x505   : > { %v2259_v61 = vadd.f32 %v2251_v48, %v2238_v54  ;;  %v7814_v43 = vpop.f32.mrb[50].mxu1 }
 0x506   : > { %v2254_v0 = vmul.f32 %v7814_v43, %v6657_v34  ;;  %v2054_v27 = vpop.f32.mrb[51].mxu1 }
 0x507   : > { %v2253_v45 = vmul.f32 %v6657_v34, %v2054_v27 }
 0x508   : > { %v2262_v15 = vadd.f32 %v2254_v0, %v2241_v31 }
 0x509   : > { %v2261_v53 = vadd.f32 %v2253_v45, %v2240_v20  ;;  %v7817_v14 = vpop.f32.mrb[52].mxu1 }
 0x50a   : > { %v2269_v37 = vmul.f32 %v7817_v14, %v6658_v57  ;;  %v2064_v35 = vpop.f32.mrb[53].mxu1 }
 0x50b   : > { %v2268_v32 = vmul.f32 %v6658_v57, %v2064_v35 }
 0x50c   : > { %v2277_v38 = vadd.f32 %v2269_v37, %v2256_v41 }
 0x50d   : > { %v2276_v59 = vadd.f32 %v2268_v32, %v2255_v39  ;;  %v7820_v56 = vpop.f32.mrb[54].mxu1 }
 0x50e   : > { %v9972_v40 = vadd.f32 %v6659_v55, %v2277_v38  ;;  %v2271_v18 = vmul.f32 %v7820_v56, %v6658_v57  ;;  %v2074_v19 = vpop.f32.mrb[55].mxu1 }
 0x50f   : > { %v2289_v54 = vadd.f32 %v6659_v55, %v2276_v59  ;;  %v2270_v46 = vmul.f32 %v6658_v57, %v2074_v19 }
 0x510   : > { %v6661_v63 = vmul.f32 -1.442695, %v9972_v40  ;;  %v2279_v34 = vadd.f32 %v2271_v18, %v2258_v22 }
 0x511   : > { %v6660_v17 = vmul.f32 -1.442695, %v2289_v54  ;;  %v2278_v31 = vadd.f32 %v2270_v46, %v2257_v29  ;;  %v7823_v20 = vpop.f32.mrb[56].mxu1 }
 0x512   : > { %8593 = vpow2.f32 %v6661_v63  ;;  %v9975_v51 = vadd.f32 %v6659_v55, %v2279_v34  ;;  %v2273_v21 = vmul.f32 %v7823_v20, %v6658_v57  ;;  %v2084_v28 = vpop.f32.mrb[57].mxu1 }
 0x513   : > { %8595 = vpow2.f32 %v6660_v17  ;;  %v2291_v33 = vadd.f32 %v6659_v55, %v2278_v31  ;;  %v2272_v30 = vmul.f32 %v6658_v57, %v2084_v28 }
 0x514   : > { %v6663_v42 = vmul.f32 -1.442695, %v9975_v51  ;;  %v2281_v26 = vadd.f32 %v2273_v21, %v2260_v62 }
 0x515   : > { %v6662_v41 = vmul.f32 -1.442695, %v2291_v33  ;;  %v2280_v58 = vadd.f32 %v2272_v30, %v2259_v61  ;;  %v7826_v23 = vpop.f32.mrb[58].mxu1 }
 0x516   : > { %8597 = vpow2.f32 %v6663_v42  ;;  %v9978_v39 = vadd.f32 %v6659_v55, %v2281_v26  ;;  %v2275_v60 = vmul.f32 %v7826_v23, %v6658_v57  ;;  %v2094_v16 = vpop.f32.mrb[59].mxu1 }
 0x517   : > { %8599 = vpow2.f32 %v6662_v41  ;;  %v2293_v50 = vadd.f32 %v6659_v55, %v2280_v58  ;;  %v2274_v24 = vmul.f32 %v6658_v57, %v2094_v16 }
 0x518   : > { %v6665_v36 = vmul.f32 -1.442695, %v9978_v39  ;;  %v2283_v13 = vadd.f32 %v2275_v60, %v2262_v15 }
 0x519   : > { %v6664_v25 = vmul.f32 -1.442695, %v2293_v50  ;;  %v2282_v22 = vadd.f32 %v2274_v24, %v2261_v53 }
 0x51a   : > { %8601 = vpow2.f32 %v6665_v36  ;;  %v2296_v29 = vadd.f32 %v6659_v55, %v2283_v13 }
 0x51b   : > { %8603 = vpow2.f32 %v6664_v25  ;;  %v9981_v12 = vadd.f32 %v6659_v55, %v2282_v22 }
 0x51c   : > { %v8594_v44 = vpop.eup %8593  ;;  %v6667_v47 = vmul.f32 -1.442695, %v2296_v29 }
 0x51d   : > { %v8596_v48 = vpop.eup %8595  ;;  %v2322_v62 = vadd.f32 1.0, %v8594_v44  ;;  %v6666_v61 = vmul.f32 -1.442695, %v9981_v12 }
 0x51e   : > { %v2321_v43 = vadd.f32 1.0, %v8596_v48  ;;  %8605 = vpow2.f32 %v6667_v47  ;;  %v6668_v47 = vld [vmem:[%s9027_s19 + $0x6] ss:$0 sm:$0xff] }
 0x51f   : > { %8607 = vrcp.f32 %v2322_v62 }
 0x520   : > { %v8598_v0 = vpop.eup %8597  ;;  %8609 = vrcp.f32 %v2321_v43 }
 0x521   : > { %v8600_v27 = vpop.eup %8599  ;;  %v2324_v45 = vadd.f32 1.0, %v8598_v0  ;;  %8611 = vpow2.f32 %v6666_v61 }
 0x522   : > { %v2323_v57 = vadd.f32 1.0, %v8600_v27 }
 0x523   : > { %8613 = vrcp.f32 %v2324_v45 }
 0x524   : > { %v8602_v15 = vpop.eup %8601  ;;  %8615 = vrcp.f32 %v2323_v57 }
 0x525   : > { %v8604_v53 = vpop.eup %8603  ;;  %v2326_v14 = vadd.f32 1.0, %v8602_v15 }
 0x526   : > { %v2325_v37 = vadd.f32 1.0, %v8604_v53 }
 0x527   : > { %8617 = vrcp.f32 %v2326_v14 }
 0x528   : > { %v8606_v35 = vpop.eup %8605  ;;  %8619 = vrcp.f32 %v2325_v37 }
 0x529   : > { %v8608_v55 = vpop.eup %8607  ;;  %v2328_v32 = vadd.f32 1.0, %v8606_v35 }
 0x52a   : > { %v8610_v38 = vpop.eup %8609  ;;  %v2346_v59 = vmul.f32 %v8608_v55, %v9972_v40 }
 0x52b   : > { %v8612_v56 = vpop.eup %8611  ;;  %v2345_v18 = vmul.f32 %v8610_v38, %v2289_v54  ;;  %8621 = vrcp.f32 %v2328_v32 }
 0x52c   : > { %v2327_v19 = vadd.f32 1.0, %v8612_v56  ;;  %v3204_v46 = vmul.f32 0.125, %v2346_v59 }
 0x52d   : > { %v8614_v63 = vpop.eup %8613  ;;  %7831 = vmatprep.mubr.msk.f32.mxu0 %vm1244_vm2, %v2345_v18  ;;  %v3203_v34 = vmul.f32 0.125, %v2345_v18  ;;  %v9986_v17 = vpack.c.bf16 %v2346_v59, %v2345_v18 }
 0x52e   : > { %v8616_v31 = vpop.eup %8615  ;;  %v2348_v20 = vmul.f32 %v8614_v63, %v9975_v51  ;;  %8623 = vrcp.f32 %v2327_v19  ;;  %7832 = vmatmul.mubr.msk.f32.vlgmr.msra.gmra.mrb[100].mxu0 %vm1244_vm2, %v2346_v59 }
 0x52f   : > { %v2347_v21 = vmul.f32 %v8616_v31, %v2291_v33  ;;  %8421 = vmatpush3.bf16.msra.mxu0 %v9855_v49  ;;  %v9991_v40 = vpack.c.bf16 %v3204_v46, %v3203_v34 }
 0x530   : > { %8427 = vmatprep.subr.bf16.mxu0 %v9860_v52  ;;  %v3206_v54 = vmul.f32 0.125, %v2348_v20 }
 0x531   : > { %v8618_v28 = vpop.eup %8617  ;;  %7834 = vmatprep.mubr.msk.f32.mxu0 %vm1244_vm2, %v2347_v21  ;;  %v3205_v30 = vmul.f32 0.125, %v2347_v21  ;;  %v9995_v42 = vpack.c.bf16 %v2348_v20, %v2347_v21 }
 0x532   : > { %v8620_v26 = vpop.eup %8619  ;;  %v2350_v51 = vmul.f32 %v8618_v28, %v9978_v39  ;;  %7835 = vmatmul.mubr.msk.f32.gmra.mrb[102].mxu0 %vm1244_vm2, %v2348_v20  ;;  %v10041_v28 = vld [vmem:[%s9027_s19 + $0x7] ss:$0 sm:$0xff] }
 0x533   : > { %v2349_v41 = vmul.f32 %v8620_v26, %v2293_v50  ;;  %v9999_v33 = vpack.c.bf16 %v3206_v54, %v3205_v30 }
 0x534   : > { %v3208_v49 = vmul.f32 0.125, %v2350_v51 }
 0x535   : > { %v8622_v58 = vpop.eup %8621  ;;  %7837 = vmatprep.mubr.msk.f32.mxu0 %vm1244_vm2, %v2349_v41  ;;  %v3207_v23 = vmul.f32 0.125, %v2349_v41  ;;  %v10002_v60 = vpack.c.bf16 %v2350_v51, %v2349_v41 }
 0x536   : > { %v2352_v16 = vmul.f32 %v8622_v58, %v2296_v29  ;;  %7838 = vmatmul.mubr.msk.f32.gmra.mrb[104].mxu0 %vm1244_vm2, %v2350_v51  ;;  %v11636_v29 = vld [vmem:[#allocation81_spill] sm:$0xff] }
 0x537   : > { %v10005_v24 = vpack.c.bf16 %v3208_v49, %v3207_v23 }
 0x538   : > { %v8624_v36 = vpop.eup %8623  ;;  %v3210_v13 = vmul.f32 0.125, %v2352_v16 }
 0x539   : > { %v2351_v39 = vmul.f32 %v8624_v36, %v9981_v12  ;;  %v11637_v12 = vld [vmem:[#allocation82_spill] sm:$0xff] }
 0x53a   : > { %v10026_v44 = vpack.c.bf16 %v11637_v12, %v11636_v29 }
 0x53b   : > { %7840 = vmatprep.mubr.msk.f32.mxu0 %vm1244_vm2, %v2351_v39  ;;  %v3209_v50 = vmul.f32 0.125, %v2351_v39  ;;  %v10009_v25 = vpack.c.bf16 %v2352_v16, %v2351_v39 }
 0x53c   : > { %7841 = vmatmul.mubr.msk.f32.gmra.mrb[106].mxu0 %vm1244_vm2, %v2352_v16  ;;  %8431 = vmatprep.subr.bf16.mxu1 %v10026_v44 }
 0x53d   : > { %7847 = vmatprep.mubr.msk.f32.mxu0 %vm1244_vm2, %v2345_v18  ;;  %v10013_v22 = vpack.c.bf16 %v3210_v13, %v3209_v50 }
 0x540   : > { %7848 = vmatmul.mubr.msk.f32.vlgmr.msra.gmra.mrb[108].mxu0 %vm1244_vm2, %v2346_v59 }
 0x541   : > { %7850 = vmatprep.mubr.msk.f32.mxu0 %vm1244_vm2, %v2347_v21  ;;  %8429 = vmatpush3.bf16.msra.mxu0 %v9860_v52 }
 0x542   : > { %8435 = vmatprep.subr.bf16.mxu0 %v9991_v40 }
 0x544   : > { %7851 = vmatmul.mubr.msk.f32.gmra.mrb[110].mxu0 %vm1244_vm2, %v2348_v20 }
 0x545   : > { %7853 = vmatprep.mubr.msk.f32.mxu0 %vm1244_vm2, %v2349_v41 }
 0x548   : > { %7854 = vmatmul.mubr.msk.f32.gmra.mrb[112].mxu0 %vm1244_vm2, %v2350_v51 }
 0x549   : > { %7856 = vmatprep.mubr.msk.f32.mxu0 %vm1244_vm2, %v2351_v39 }
 0x54c   : > { %7857 = vmatmul.mubr.msk.f32.gmra.mrb[114].mxu0 %vm1244_vm2, %v2352_v16 }
 0x601   : > { %v7833_v52 = vpop.f32.mrb[100].mxu0 }
 0x602   : > { %v2456_v48 = vadd.f32 %v7833_v52, %v6668_v47  ;;  %v2450_v62 = vpop.f32.mrb[101].mxu0 }
 0x603   : > { %v2451_v61 = vadd.f32 %v6668_v47, %v2450_v62 }
 0x604   : > { %v2498_v43 = vmin.f32 %v2456_v48, 0.0  ;;  %vm2490_vm3 = vcmp.gt.f32.partialorder %v2456_v48, 0.0 }
 0x605   : > { %v2497_v0 = vmin.f32 %v2451_v61, 0.0  ;;  %v7836_v27 = vpop.f32.mrb[102].mxu0  ;;  %vm2489_vm4 = vcmp.gt.f32.partialorder %v2451_v61, 0.0 }
 0x606   : > { %v2507_v45 = vmul.f32 1.442695, %v2498_v43  ;;  %v2466_v57 = vadd.f32 %v7836_v27, %v6668_v47  ;;  %v2460_v15 = vpop.f32.mrb[103].mxu0 }
 0x607   : > { %v2505_v53 = vmul.f32 1.442695, %v2497_v0  ;;  %v2461_v14 = vadd.f32 %v6668_v47, %v2460_v15 }
 0x608   : > { %8625 = vpow2.f32 %v2507_v45  ;;  %v2500_v37 = vmin.f32 %v2466_v57, 0.0  ;;  %vm2492_vm5 = vcmp.gt.f32.partialorder %v2466_v57, 0.0 }
 0x609   : > { %8627 = vpow2.f32 %v2505_v53  ;;  %v2499_v35 = vmin.f32 %v2461_v14, 0.0  ;;  %v7839_v55 = vpop.f32.mrb[104].mxu0  ;;  %vm2491_vm6 = vcmp.gt.f32.partialorder %v2461_v14, 0.0 }
 0x60a   : > { %v2511_v32 = vmul.f32 1.442695, %v2500_v37  ;;  %v10030_v38 = vadd.f32 %v7839_v55, %v6668_v47  ;;  %v2470_v59 = vpop.f32.mrb[105].mxu0 }
 0x60b   : > { %v2509_v56 = vmul.f32 1.442695, %v2499_v35  ;;  %v10032_v18 = vadd.f32 %v6668_v47, %v2470_v59 }
 0x60c   : > { %8629 = vpow2.f32 %v2511_v32  ;;  %v2502_v19 = vmin.f32 %v10030_v38, 0.0  ;;  %vm2494_vm7 = vcmp.gt.f32.partialorder %v10030_v38, 0.0 }
 0x60d   : > { %8631 = vpow2.f32 %v2509_v56  ;;  %v2501_v46 = vmin.f32 %v10032_v18, 0.0  ;;  %vm2493_vm8 = vcmp.gt.f32.partialorder %v10032_v18, 0.0 }
 0x60e   : > { %v2515_v63 = vmul.f32 1.442695, %v2502_v19 }
 0x60f   : > { %v2513_v34 = vmul.f32 1.442695, %v2501_v46  ;;  %v7842_v31 = vpop.f32.mrb[106].mxu0 }
 0x610   : > { %8633 = vpow2.f32 %v2515_v63  ;;  %v10036_v20 = vadd.f32 %v7842_v31, %v6668_v47  ;;  %v2480_v21 = vpop.f32.mrb[107].mxu0 }
 0x611   : > { %8635 = vpow2.f32 %v2513_v34  ;;  %v10038_v54 = vadd.f32 %v6668_v47, %v2480_v21 }
 0x612   : > { %v8626_v30 = vpop.eup %8625  ;;  %v2504_v26 = vmin.f32 %v10036_v20, 0.0  ;;  %vm2496_vm9 = vcmp.gt.f32.partialorder %v10036_v20, 0.0 }
 0x613   : > { %v8628_v51 = vpop.eup %8627  ;;  %v6678_v41 = vadd.f32 -1.0, %v8626_v30  ;;  %v2503_v49 = vmin.f32 %v10038_v54, 0.0  ;;  %v7849_v58 = vpop.f32.mrb[108].mxu0  ;;  %vm2495_vm10 = vcmp.gt.f32.partialorder %v10038_v54, 0.0 }
 0x614   : > { %v6677_v23 = vadd.f32 -1.0, %v8628_v51  ;;  %v2519_v16 = vmul.f32 1.442695, %v2504_v26  ;;  %v10046_v36 = vadd.f32 %v7849_v58, %v10041_v28  ;;  %v2618_v39 = vpop.f32.mrb[109].mxu0 }
 0x615   : > { %v2530_v13 = vsel %vm2490_vm3, %v2456_v48, %v6678_v41  ;;  %v2517_v50 = vmul.f32 1.442695, %v2503_v49  ;;  %v10049_v47 = vadd.f32 %v10041_v28, %v2618_v39 }
 0x616   : > { %v8630_v52 = vpop.eup %8629  ;;  %v2529_v62 = vsel %vm2489_vm4, %v2451_v61, %v6677_v23  ;;  %8637 = vpow2.f32 %v2519_v16  ;;  %v2666_v45 = vmin.f32 %v10046_v36, 0.0  ;;  %v10054_v53 = vadd.f32 1.0, %v2530_v13 }
 0x617   : > { %v8632_v43 = vpop.eup %8631  ;;  %v10051_v0 = vadd.f32 1.0, %v2529_v62  ;;  %v6680_v27 = vadd.f32 -1.0, %v8630_v52  ;;  %8639 = vpow2.f32 %v2517_v50  ;;  %v7852_v15 = vpop.f32.mrb[110].mxu0  ;;  %v2665_v37 = vmin.f32 %v10049_v47, 0.0 }
 0x618   : > { %v6679_v48 = vadd.f32 -1.0, %v8632_v43  ;;  %v10058_v35 = vadd.f32 %v7852_v15, %v10041_v28  ;;  %v2628_v55 = vpop.f32.mrb[111].mxu0  ;;  %v2675_v32 = vmul.f32 1.442695, %v2666_v45  ;;  %vm2658_vm11 = vcmp.gt.f32.partialorder %v10046_v36, 0.0 }
 0x619   : > { %v2532_v61 = vsel %vm2492_vm5, %v2466_v57, %v6680_v27  ;;  %v10061_v59 = vadd.f32 %v10041_v28, %v2628_v55  ;;  %7863 = vmatprep.mubr.msk.f32.mxu1 %vm1244_vm2, %v10051_v0  ;;  %v2673_v46 = vmul.f32 1.442695, %v2665_v37  ;;  %vm2657_vm12 = vcmp.gt.f32.partialorder %v10049_v47, 0.0 }
 0x61a   : > { %v8634_v56 = vpop.eup %8633  ;;  %v2531_v19 = vsel %vm2491_vm6, %v2461_v14, %v6679_v48  ;;  %7864 = vmatmul.mubr.msk.f32.vlgmr.msra.gmra.mrb[60].mxu1 %vm1244_vm2, %v10054_v53  ;;  %8641 = vpow2.f32 %v2675_v32  ;;  %v2668_v31 = vmin.f32 %v10058_v35, 0.0  ;;  %v10073_v30 = vadd.f32 1.0, %v2532_v61 }
 0x61b   : > { %v8636_v63 = vpop.eup %8635  ;;  %v10069_v57 = vadd.f32 1.0, %v2531_v19  ;;  %v6682_v34 = vadd.f32 -1.0, %v8634_v56  ;;  %v7855_v21 = vpop.f32.mrb[112].mxu0  ;;  %8433 = vmatpush3.bf16.msra.mxu1 %v10026_v44  ;;  %8643 = vpow2.f32 %v2673_v46  ;;  %v2667_v26 = vmin.f32 %v10061_v59, 0.0 }
 0x61c   : > { %v6681_v14 = vadd.f32 -1.0, %v8636_v63  ;;  %v2638_v51 = vpop.f32.mrb[113].mxu0  ;;  %8455 = vmatprep.subr.bf16.mxu1 %v9986_v17  ;;  %v2679_v49 = vmul.f32 1.442695, %v2668_v31  ;;  %v10081_v58 = vadd.f32 %v7855_v21, %v10041_v28  ;;  %vm2660_vm13 = vcmp.gt.f32.partialorder %v10058_v35, 0.0 }
 0x61d   : > { %v2534_v41 = vsel %vm2494_vm7, %v10030_v38, %v6682_v34  ;;  %v10084_v23 = vadd.f32 %v10041_v28, %v2638_v51  ;;  %7866 = vmatprep.mubr.msk.f32.mxu1 %vm1244_vm2, %v10069_v57  ;;  %v2677_v16 = vmul.f32 1.442695, %v2667_v26  ;;  %vm2659_vm14 = vcmp.gt.f32.partialorder %v10061_v59, 0.0 }
 0x61e   : > { %v2533_v44 = vsel %vm2493_vm8, %v10032_v18, %v6681_v14  ;;  %7867 = vmatmul.mubr.msk.f32.gmra.mrb[62].mxu1 %vm1244_vm2, %v10073_v30  ;;  %8645 = vpow2.f32 %v2679_v49  ;;  %v2670_v38 = vmin.f32 %v10081_v58, 0.0  ;;  %v10096_v52 = vadd.f32 1.0, %v2534_v41 }
 0x61f   : > { %v10093_v39 = vadd.f32 1.0, %v2533_v44  ;;  %v7858_v13 = vpop.f32.mrb[114].mxu0  ;;  %8647 = vpow2.f32 %v2677_v16  ;;  %v2669_v62 = vmin.f32 %v10084_v23, 0.0  ;;  %vm2662_vm15 = vcmp.gt.f32.partialorder %v10081_v58, 0.0 }
 0x620   : > { %v8638_v50 = vpop.eup %8637  ;;  %v10100_v43 = vadd.f32 %v7858_v13, %v10041_v28  ;;  %v2648_v18 = vpop.f32.mrb[115].mxu0  ;;  %v2683_v15 = vmul.f32 1.442695, %v2670_v38  ;;  %vm2661_vm0 = vcmp.gt.f32.partialorder %v10084_v23, 0.0 }
 0x621   : > { %v8640_v27 = vpop.eup %8639  ;;  %v6684_v45 = vadd.f32 -1.0, %v8638_v50  ;;  %v10103_v48 = vadd.f32 %v10041_v28, %v2648_v18  ;;  %7869 = vmatprep.mubr.msk.f32.mxu1 %vm1244_vm2, %v10093_v39  ;;  %v2681_v55 = vmul.f32 1.442695, %v2669_v62 }
 0x622   : > { %v6683_v37 = vadd.f32 -1.0, %v8640_v27  ;;  %v2672_v61 = vmin.f32 %v10100_v43, 0.0  ;;  %7870 = vmatmul.mubr.msk.f32.gmra.mrb[64].mxu1 %vm1244_vm2, %v10096_v52  ;;  %8649 = vpow2.f32 %v2683_v15  ;;  %vm2664_vm3 = vcmp.gt.f32.partialorder %v10100_v43, 0.0 }
 0x623   : > { %v2536_v32 = vsel %vm2496_vm9, %v10036_v20, %v6684_v45  ;;  %v2671_v28 = vmin.f32 %v10103_v48, 0.0  ;;  %8651 = vpow2.f32 %v2681_v55  ;;  %vm2663_vm4 = vcmp.gt.f32.partialorder %v10103_v48, 0.0 }
 0x624   : > { %v2535_v56 = vsel %vm2495_vm10, %v10038_v54, %v6683_v37  ;;  %v2687_v19 = vmul.f32 1.442695, %v2672_v61  ;;  %v8642_v46 = vpop.eup %8641  ;;  %v10117_v21 = vadd.f32 1.0, %v2536_v32 }
 0x625   : > { %v10115_v63 = vadd.f32 1.0, %v2535_v56  ;;  %v2685_v34 = vmul.f32 1.442695, %v2671_v28  ;;  %v8644_v31 = vpop.eup %8643  ;;  %v6695_v14 = vadd.f32 -1.0, %v8642_v46 }
 0x626   : > { %8653 = vpow2.f32 %v2687_v19  ;;  %v6694_v20 = vadd.f32 -1.0, %v8644_v31 }
 0x627   : > { %8655 = vpow2.f32 %v2685_v34  ;;  %7872 = vmatprep.mubr.msk.f32.mxu1 %vm1244_vm2, %v10115_v63  ;;  %v2698_v54 = vsel %vm2658_vm11, %v10046_v36, %v6695_v14 }
 0x628   : > { %7873 = vmatmul.mubr.msk.f32.gmra.mrb[66].mxu1 %vm1244_vm2, %v10117_v21  ;;  %v8646_v26 = vpop.eup %8645  ;;  %v10126_v51 = vadd.f32 1.0, %v2698_v54  ;;  %v2697_v41 = vsel %vm2657_vm12, %v10049_v47, %v6694_v20 }
 0x629   : > { %v8648_v49 = vpop.eup %8647  ;;  %v10129_v44 = vadd.f32 1.0, %v2697_v41  ;;  %v6697_v16 = vadd.f32 -1.0, %v8646_v26 }
 0x62a   : > { %v3020_v38 = vsel %vm1244_vm2, %v10126_v51, 0.0  ;;  %v6696_v36 = vadd.f32 -1.0, %v8648_v49 }
 0x62b   : > { %v3019_v13 = vsel %vm1244_vm2, %v10129_v44, 0.0  ;;  %v2700_v50 = vsel %vm2660_vm13, %v10058_v35, %v6697_v16  ;;  %7879 = vmatprep.mubr.msk.f32.mxu0 %vm1244_vm2, %v10129_v44 }
 0x62c   : > { %v8650_v47 = vpop.eup %8649  ;;  %v3021_v62 = vadd.f32 %v3020_v38, %v3019_v13  ;;  %v2699_v18 = vsel %vm2659_vm14, %v10061_v59, %v6696_v36  ;;  %7880 = vmatmul.mubr.msk.f32.vlgmr.msra.gmra.mrb[116].mxu0 %vm1244_vm2, %v10126_v51  ;;  %v10143_v45 = vadd.f32 1.0, %v2700_v50 }
 0x62d   : > { %v8652_v27 = vpop.eup %8651  ;;  %v10145_v15 = vadd.f32 1.0, %v2699_v18  ;;  %v6699_v37 = vadd.f32 -1.0, %v8650_v47  ;;  %8437 = vmatpush3.bf16.msra.mxu0 %v9991_v40 }
 0x62e   : > { %v6698_v35 = vadd.f32 -1.0, %v8652_v27  ;;  %8439 = vmatprep.subr.bf16.mxu0 %v9999_v33  ;;  %v3024_v19 = vsel %vm1244_vm2, %v10143_v45, 0.0 }
 0x62f   : > { %v3022_v59 = vsel %vm1244_vm2, %v10145_v15, 0.0  ;;  %v2702_v61 = vsel %vm2662_vm15, %v10081_v58, %v6699_v37  ;;  %7882 = vmatprep.mubr.msk.f32.mxu0 %vm1244_vm2, %v10145_v15 }
 0x630   : > { %v8654_v55 = vpop.eup %8653  ;;  %v3023_v28 = vadd.f32 %v3022_v59, %v3021_v62  ;;  %v2701_v40 = vsel %vm2661_vm0, %v10084_v23, %v6698_v35  ;;  %7883 = vmatmul.mubr.msk.f32.gmra.mrb[118].mxu0 %vm1244_vm2, %v10143_v45  ;;  %v10162_v46 = vadd.f32 1.0, %v2702_v61 }
 0x631   : > { %v8656_v32 = vpop.eup %8655  ;;  %v6701_v56 = vadd.f32 -1.0, %v8654_v55  ;;  %v10164_v58 = vadd.f32 1.0, %v2701_v40  ;;  %8441 = vmatpush3.bf16.msra.mxu0 %v9999_v33  ;;  %v11643_v40 = vld [vmem:[#allocation7_spill] sm:$0xff] }
 0x632   : > { %v6700_v34 = vadd.f32 -1.0, %v8656_v32  ;;  %v3025_v31 = vadd.f32 %v3024_v19, %v3023_v28  ;;  %8443 = vmatprep.subr.bf16.mxu0 %v10005_v24  ;;  %v3028_v33 = vsel %vm1244_vm2, %v10162_v46, 0.0  ;;  %v11642_v28 = vld [vmem:[#allocation6_spill] sm:$0xff]  ;;  %v11645_v19 = vld [vmem:[#allocation9_spill] sm:$0xff] }
 0x633   : > { %v2704_v14 = vsel %vm2664_vm3, %v10100_v43, %v6701_v56  ;;  %v3026_v23 = vsel %vm1244_vm2, %v10164_v58, 0.0  ;;  %7885 = vmatprep.mubr.msk.f32.mxu0 %vm1244_vm2, %v10164_v58  ;;  %v11644_v56 = vld [vmem:[#allocation8_spill] sm:$0xff] }
 0x634   : > { %v2703_v20 = vsel %vm2663_vm4, %v10103_v48, %v6700_v34  ;;  %v3027_v54 = vadd.f32 %v3026_v23, %v3025_v31  ;;  %7886 = vmatmul.mubr.msk.f32.gmra.mrb[120].mxu0 %vm1244_vm2, %v10162_v46  ;;  %v10181_v43 = vadd.f32 1.0, %v2704_v14  ;;  %v11646_v34 = vld [vmem:[#allocation10_spill] sm:$0xff]  ;;  %v11647_v31 = vld [vmem:[#allocation11_spill] sm:$0xff]  ;;  %v11648_v14 = vld [vmem:[#allocation12_spill] sm:$0xff] }
 0x635   : > { %v10175_v26 = vadd.f32 1.0, %v2703_v20  ;;  %8445 = vmatpush3.bf16.msra.mxu0 %v10005_v24  ;;  %v11649_v23 = vld [vmem:[#allocation13_spill] sm:$0xff]  ;;  %v11650_v20 = vld [vmem:[#allocation14_spill] sm:$0xff] }
 0x636   : > { %v3029_v41 = vadd.f32 %v3028_v33, %v3027_v54  ;;  %8447 = vmatprep.subr.bf16.mxu0 %v10013_v22  ;;  %v3032_v16 = vsel %vm1244_vm2, %v10181_v43, 0.0  ;;  %v11651_v54 = vld [vmem:[#allocation15_spill] sm:$0xff]  ;;  %v11652_v33 = vld [vmem:[#allocation16_spill] sm:$0xff] }
 0x637   : > { %v3030_v48 = vsel %vm1244_vm2, %v10175_v26, 0.0  ;;  %7888 = vmatprep.mubr.msk.f32.mxu0 %vm1244_vm2, %v10175_v26 }
 0x638   : > { %v3031_v49 = vadd.f32 %v3030_v48, %v3029_v41  ;;  %7889 = vmatmul.mubr.msk.f32.gmra.mrb[122].mxu0 %vm1244_vm2, %v10181_v43  ;;  %v11653_v41 = vld [vmem:[#allocation17_spill] sm:$0xff]  ;;  %v11654_v48 = vld [vmem:[#allocation18_spill] sm:$0xff] }
 0x639   : > { %8449 = vmatpush3.bf16.msra.mxu0 %v10013_v22 }
 0x63a   : > { %v3033_v38 = vadd.f32 %v3032_v16, %v3031_v49  ;;  %v11655_v49 = vld [vmem:[#allocation19_spill] sm:$0xff]  ;;  %v11656_v16 = vld [vmem:[#allocation20_spill] sm:$0xff] }
 0x63c   : > { %v3034_v24 = vrot.slane %v3033_v38, 4 }
 0x63e   : > { %v3035_v36 = vadd.f32 %v3034_v24, %v3033_v38  ;;  %v11657_v38 = vld [vmem:[#allocation21_spill] sm:$0xff]  ;;  %v11658_v24 = vld [vmem:[#allocation22_spill] sm:$0xff] }
 0x640   : > { %v3036_v13 = vrot.slane %v3035_v36, 2 }
 0x642   : > { %v3037_v50 = vadd.f32 %v3036_v13, %v3035_v36  ;;  %v11659_v36 = vld [vmem:[#allocation23_spill] sm:$0xff]  ;;  %v11660_v13 = vld [vmem:[#allocation24_spill] sm:$0xff] }
 0x644   : > { %v3038_v47 = vrot.slane %v3037_v50, 1 }
 0x646   : > { %v3039_v62 = vadd.f32 %v3038_v47, %v3037_v50  ;;  %v11661_v50 = vld [vmem:[#allocation25_spill] sm:$0xff]  ;;  %v11662_v47 = vld [vmem:[#allocation26_spill] sm:$0xff] }
 0x648   : > { %v3041_v18 = vmul.f32 0.015625, %v3039_v62  ;;  %v11663_v62 = vld [vmem:[#allocation27_spill] sm:$0xff] }
 0x64a   : > { %v3042_v27 = vmul.f32 %v3041_v18, %v10051_v0  ;;  %v3043_v37 = vmul.f32 %v3041_v18, %v10054_v53  ;;  %v3044_v35 = vmul.f32 %v3041_v18, %v10069_v57  ;;  %v3045_v55 = vmul.f32 %v3041_v18, %v10073_v30 }
 0x64b   : > { %v3046_v59 = vmul.f32 %v3041_v18, %v10093_v39  ;;  %v3047_v22 = vmul.f32 %v3041_v18, %v10096_v52  ;;  %v3048_v61 = vmul.f32 %v3041_v18, %v10115_v63  ;;  %v3049_v32 = vmul.f32 %v3041_v18, %v10117_v21  ;;  %v11664_v18 = vld [vmem:[#allocation28_spill] sm:$0xff] }
 0x64c   : > { %7895 = vmatprep.mubr.msk.f32.mxu1 %vm1244_vm2, %v3042_v27  ;;  %v11665_v27 = vld [vmem:[#allocation29_spill] sm:$0xff] }
 0x64d   : > { %7896 = vmatmul.mubr.msk.f32.vlgmr.msra.gmra.mrb[68].mxu1 %vm1244_vm2, %v3043_v37  ;;  %v11666_v37 = vld [vmem:[#allocation30_spill] sm:$0xff] }
 0x64e   : > { %8457 = vmatpush3.bf16.msra.mxu1 %v9986_v17  ;;  %7898 = vmatprep.mubr.msk.f32.mxu1 %vm1244_vm2, %v3044_v35  ;;  %v11638_v17 = vld [vmem:[#allocation2_spill] sm:$0xff]  ;;  %v11667_v35 = vld [vmem:[#allocation31_spill] sm:$0xff] }
 0x64f   : > { %8459 = vmatprep.subr.bf16.mxu1 %v9995_v42 }
 0x651   : > { %7899 = vmatmul.mubr.msk.f32.gmra.mrb[70].mxu1 %vm1244_vm2, %v3045_v55  ;;  %v11668_v55 = vld [vmem:[#allocation32_spill] sm:$0xff] }
 0x652   : > { %8461 = vmatpush3.bf16.msra.mxu1 %v9995_v42  ;;  %7901 = vmatprep.mubr.msk.f32.mxu1 %vm1244_vm2, %v3046_v59  ;;  %v11639_v42 = vld [vmem:[#allocation3_spill] sm:$0xff]  ;;  %v11669_v59 = vld [vmem:[#allocation33_spill] sm:$0xff] }
 0x653   : > { %8463 = vmatprep.subr.bf16.mxu1 %v10002_v60 }
 0x655   : > { %7902 = vmatmul.mubr.msk.f32.gmra.mrb[72].mxu1 %vm1244_vm2, %v3047_v22  ;;  %v11670_v22 = vld [vmem:[#allocation34_spill] sm:$0xff] }
 0x656   : > { %8465 = vmatpush3.bf16.msra.mxu1 %v10002_v60  ;;  %7904 = vmatprep.mubr.msk.f32.mxu1 %vm1244_vm2, %v3048_v61  ;;  %v11640_v60 = vld [vmem:[#allocation4_spill] sm:$0xff]  ;;  %v11671_v61 = vld [vmem:[#allocation35_spill] sm:$0xff] }
 0x657   : > { %8467 = vmatprep.subr.bf16.mxu1 %v10009_v25 }
 0x659   : > { %7905 = vmatmul.mubr.msk.f32.gmra.mrb[74].mxu1 %vm1244_vm2, %v3049_v32  ;;  %v11672_v32 = vld [vmem:[#allocation36_spill] sm:$0xff] }
 0x65a   : > { %8469 = vmatpush3.bf16.msra.mxu1 %v10009_v25  ;;  %7958 = vmatprep.mubr.msk.f32.mxu1 %vm398_vm1, %v11638_v17  ;;  %v11641_v25 = vld [vmem:[#allocation5_spill] sm:$0xff] }
 0x65d   : > { %7959 = vmatmul.mubr.msk.f32.vlgmr.msra.gmra.mrb[76].mxu1 %vm398_vm1, %v8896_v1 }
 0x65e   : > { %7961 = vmatprep.mubr.msk.f32.mxu1 %vm398_vm1, %v8901_v2 }
 0x661   : > { %7962 = vmatmul.mubr.msk.f32.gmra.mrb[78].mxu1 %vm398_vm1, %v8906_v3 }
 0x662   : > { %7964 = vmatprep.mubr.msk.f32.mxu1 %vm398_vm1, %v8911_v4 }
 0x665   : > { %7965 = vmatmul.mubr.msk.f32.gmra.mrb[80].mxu1 %vm398_vm1, %v8916_v5 }
 0x666   : > { %7967 = vmatprep.mubr.msk.f32.mxu1 %vm398_vm1, %v8921_v6 }
 0x669   : > { %7968 = vmatmul.mubr.msk.f32.gmra.mrb[82].mxu1 %vm398_vm1, %v8926_v7 }
 0x66a   : > { %7970 = vmatprep.mubr.msk.f32.mxu1 %vm398_vm1, %v8931_v8 }
 0x66d   : > { %7971 = vmatmul.mubr.msk.f32.gmra.mrb[84].mxu1 %vm398_vm1, %v8937_v9 }
 0x66e   : > { %7973 = vmatprep.mubr.msk.f32.mxu1 %vm398_vm1, %v8942_v10 }
 0x671   : > { %7974 = vmatmul.mubr.msk.f32.gmra.mrb[86].mxu1 %vm398_vm1, %v8947_v11 }
 0x672   : > { %7976 = vmatprep.mubr.msk.f32.mxu1 %vm398_vm1, %v11639_v42 }
 0x675   : > { %7977 = vmatmul.mubr.msk.f32.gmra.mrb[88].mxu1 %vm398_vm1, %v11640_v60 }
 0x676   : > { %7979 = vmatprep.mubr.msk.f32.mxu1 %vm398_vm1, %v11641_v25 }
 0x679   : > { %7980 = vmatmul.mubr.msk.f32.gmra.mrb[90].mxu1 %vm398_vm1, %v11642_v28 }
 0x67a   : > { %7982 = vmatprep.mubr.msk.f32.mxu1 %vm398_vm1, %v11643_v40 }
 0x67d   : > { %7983 = vmatmul.mubr.msk.f32.gmra.mrb[92].mxu1 %vm398_vm1, %v11644_v56 }
 0x67e   : > { %7985 = vmatprep.mubr.msk.f32.mxu1 %vm398_vm1, %v11645_v19 }
 0x681   : > { %7986 = vmatmul.mubr.msk.f32.gmra.mrb[94].mxu1 %vm398_vm1, %v11646_v34  ;;  %v11714_v34 = vld [vmem:[#allocation77_spill] sm:$0xff] }
 0x682   : > { %7988 = vmatprep.mubr.msk.f32.mxu1 %vm398_vm1, %v11647_v31 }
 0x685   : > { %7989 = vmatmul.mubr.msk.f32.gmra.mrb[96].mxu1 %vm398_vm1, %v11648_v14 }
 0x686   : > { %7991 = vmatprep.mubr.msk.f32.mxu1 %vm398_vm1, %v11649_v23 }
 0x689   : > { %7992 = vmatmul.mubr.msk.f32.gmra.mrb[98].mxu1 %vm398_vm1, %v11650_v20  ;;  %v11710_v20 = vld [vmem:[#allocation75_spill] sm:$0xff] }
 0x68a   : > { %7994 = vmatprep.mubr.msk.f32.mxu1 %vm398_vm1, %v11651_v54 }
 0x68d   : > { %7995 = vmatmul.mubr.msk.f32.gmra.mrb[100].mxu1 %vm398_vm1, %v11652_v33 }
 0x68e   : > { %7997 = vmatprep.mubr.msk.f32.mxu1 %vm398_vm1, %v11653_v41 }
 0x691   : > { %7998 = vmatmul.mubr.msk.f32.gmra.mrb[102].mxu1 %vm398_vm1, %v11654_v48  ;;  %v11706_v48 = vld [vmem:[#allocation73_spill] sm:$0xff] }
 0x692   : > { %8000 = vmatprep.mubr.msk.f32.mxu1 %vm398_vm1, %v11655_v49 }
 0x695   : > { %8001 = vmatmul.mubr.msk.f32.gmra.mrb[104].mxu1 %vm398_vm1, %v11656_v16 }
 0x696   : > { %8003 = vmatprep.mubr.msk.f32.mxu1 %vm398_vm1, %v11657_v38  ;;  %v11704_v38 = vld [vmem:[#allocation74_spill] sm:$0xff] }
 0x699   : > { %8004 = vmatmul.mubr.msk.f32.gmra.mrb[106].mxu1 %vm398_vm1, %v11658_v24  ;;  %v11703_v24 = vld [vmem:[#allocation66_spill] sm:$0xff] }
 0x69a   : > { %8006 = vmatprep.mubr.msk.f32.mxu1 %vm398_vm1, %v11659_v36 }
 0x69d   : > { %8007 = vmatmul.mubr.msk.f32.gmra.mrb[108].mxu1 %vm398_vm1, %v11660_v13 }
 0x69e   : > { %8009 = vmatprep.mubr.msk.f32.mxu1 %vm398_vm1, %v11661_v50 }
 0x6a1   : > { %8010 = vmatmul.mubr.msk.f32.gmra.mrb[110].mxu1 %vm398_vm1, %v11662_v47 }
 0x6a2   : > { %8012 = vmatprep.mubr.msk.f32.mxu1 %vm398_vm1, %v11663_v62 }
 0x6a5   : > { %8013 = vmatmul.mubr.msk.f32.gmra.mrb[112].mxu1 %vm398_vm1, %v11664_v18 }
 0x6a6   : > { %8015 = vmatprep.mubr.msk.f32.mxu1 %vm398_vm1, %v11665_v27  ;;  %v11673_v27 = vld [vmem:[#allocation37_spill] sm:$0xff] }
 0x6a9   : > { %8016 = vmatmul.mubr.msk.f32.gmra.mrb[114].mxu1 %vm398_vm1, %v11666_v37  ;;  %v11674_v37 = vld [vmem:[#allocation38_spill] sm:$0xff] }
 0x6aa   : > { %8018 = vmatprep.mubr.msk.f32.mxu1 %vm398_vm1, %v11667_v35  ;;  %v11675_v35 = vld [vmem:[#allocation39_spill] sm:$0xff] }
 0x6ad   : > { %8019 = vmatmul.mubr.msk.f32.gmra.mrb[116].mxu1 %vm398_vm1, %v11668_v55  ;;  %v11676_v55 = vld [vmem:[#allocation40_spill] sm:$0xff] }
 0x6ae   : > { %8021 = vmatprep.mubr.msk.f32.mxu1 %vm398_vm1, %v11669_v59  ;;  %v11677_v59 = vld [vmem:[#allocation41_spill] sm:$0xff] }
 0x6b1   : > { %8022 = vmatmul.mubr.msk.f32.gmra.mrb[118].mxu1 %vm398_vm1, %v11670_v22  ;;  %v11678_v22 = vld [vmem:[#allocation42_spill] sm:$0xff] }
 0x6b2   : > { %8024 = vmatprep.mubr.msk.f32.mxu1 %vm398_vm1, %v11671_v61  ;;  %v11679_v61 = vld [vmem:[#allocation43_spill] sm:$0xff] }
 0x6b5   : > { %8025 = vmatmul.mubr.msk.f32.gmra.mrb[120].mxu1 %vm398_vm1, %v11672_v32  ;;  %v11680_v32 = vld [vmem:[#allocation44_spill] sm:$0xff] }
 0x6b6   : > { %8027 = vmatprep.mubr.msk.f32.mxu1 %vm398_vm1, %v11673_v27  ;;  %v11681_v27 = vld [vmem:[#allocation45_spill] sm:$0xff] }
 0x6b9   : > { %8028 = vmatmul.mubr.msk.f32.gmra.mrb[122].mxu1 %vm398_vm1, %v11674_v37  ;;  %v11682_v37 = vld [vmem:[#allocation46_spill] sm:$0xff] }
 0x6ba   : > { %8030 = vmatprep.mubr.msk.f32.mxu1 %vm398_vm1, %v11675_v35  ;;  %v11683_v35 = vld [vmem:[#allocation47_spill] sm:$0xff] }
 0x6bd   : > { %8031 = vmatmul.mubr.msk.f32.gmra.mrb[124].mxu1 %vm398_vm1, %v11676_v55  ;;  %v11684_v55 = vld [vmem:[#allocation48_spill] sm:$0xff] }
 0x6be   : > { %8033 = vmatprep.mubr.msk.f32.mxu1 %vm398_vm1, %v11677_v59  ;;  %v11685_v59 = vld [vmem:[#allocation49_spill] sm:$0xff] }
 0x6c1   : > { %8034 = vmatmul.mubr.msk.f32.gmra.mrb[126].mxu1 %vm398_vm1, %v11678_v22  ;;  %v11686_v22 = vld [vmem:[#allocation50_spill] sm:$0xff] }
 0x6c2   : > { %8036 = vmatprep.mubr.msk.f32.mxu1 %vm398_vm1, %v11679_v61  ;;  %v11687_v61 = vld [vmem:[#allocation51_spill] sm:$0xff] }
 0x6c5   : > { %8037 = vmatmul.mubr.msk.f32.gmra.mrb[128].mxu1 %vm398_vm1, %v11680_v32  ;;  %v11688_v32 = vld [vmem:[#allocation52_spill] sm:$0xff] }
 0x6c6   : > { %8039 = vmatprep.mubr.msk.f32.mxu1 %vm398_vm1, %v11681_v27  ;;  %v11689_v27 = vld [vmem:[#allocation53_spill] sm:$0xff] }
 0x6c9   : > { %8040 = vmatmul.mubr.msk.f32.gmra.mrb[130].mxu1 %vm398_vm1, %v11682_v37  ;;  %v11690_v37 = vld [vmem:[#allocation54_spill] sm:$0xff] }
 0x6ca   : > { %8042 = vmatprep.mubr.msk.f32.mxu1 %vm398_vm1, %v11683_v35  ;;  %v11691_v35 = vld [vmem:[#allocation55_spill] sm:$0xff] }
 0x6cd   : > { %8043 = vmatmul.mubr.msk.f32.gmra.mrb[132].mxu1 %vm398_vm1, %v11684_v55  ;;  %v11692_v55 = vld [vmem:[#allocation56_spill] sm:$0xff] }
 0x6ce   : > { %8045 = vmatprep.mubr.msk.f32.mxu1 %vm398_vm1, %v11685_v59  ;;  %v11693_v59 = vld [vmem:[#allocation57_spill] sm:$0xff] }
 0x6d1   : > { %8046 = vmatmul.mubr.msk.f32.gmra.mrb[134].mxu1 %vm398_vm1, %v11686_v22  ;;  %v11694_v22 = vld [vmem:[#allocation58_spill] sm:$0xff] }
 0x6d2   : > { %8048 = vmatprep.mubr.msk.f32.mxu1 %vm398_vm1, %v11687_v61  ;;  %v11695_v61 = vld [vmem:[#allocation59_spill] sm:$0xff] }
 0x6d5   : > { %8049 = vmatmul.mubr.msk.f32.gmra.mrb[136].mxu1 %vm398_vm1, %v11688_v32  ;;  %v11696_v32 = vld [vmem:[#allocation60_spill] sm:$0xff] }
 0x6d6   : > { %8051 = vmatprep.mubr.msk.f32.mxu1 %vm398_vm1, %v11689_v27  ;;  %v11697_v27 = vld [vmem:[#allocation61_spill] sm:$0xff] }
 0x6d9   : > { %8052 = vmatmul.mubr.msk.f32.gmra.mrb[138].mxu1 %vm398_vm1, %v11690_v37  ;;  %v11698_v37 = vld [vmem:[#allocation62_spill] sm:$0xff] }
 0x6da   : > { %8054 = vmatprep.mubr.msk.f32.mxu1 %vm398_vm1, %v11691_v35 }
 0x6dd   : > { %8055 = vmatmul.mubr.msk.f32.gmra.mrb[140].mxu1 %vm398_vm1, %v11692_v55  ;;  %v11699_v55 = vld [vmem:[#allocation64_spill] sm:$0xff] }
 0x6de   : > { %8057 = vmatprep.mubr.msk.f32.mxu1 %vm398_vm1, %v11693_v59  ;;  %v2714_v18 = vmul.f32 %v10054_v53, %v11699_v55  ;;  %v11700_v59 = vld [vmem:[#allocation72_spill] sm:$0xff]  ;;  %v11705_v53 = vld [vmem:[#allocation65_spill] sm:$0xff] }
 0x6e1   : > { %8058 = vmatmul.mubr.msk.f32.gmra.mrb[142].mxu1 %vm398_vm1, %v11694_v22  ;;  %v11701_v22 = vld [vmem:[#allocation63_spill] sm:$0xff] }
 0x6e2   : > { %8060 = vmatprep.mubr.msk.f32.mxu1 %vm398_vm1, %v11695_v61  ;;  %v2713_v50 = vmul.f32 %v10051_v0, %v11701_v22  ;;  %v11702_v61 = vld [vmem:[#allocation71_spill] sm:$0xff] }
 0x6e5   : > { %8061 = vmatmul.mubr.msk.f32.gmra.mrb[144].mxu1 %vm398_vm1, %v11696_v32 }
 0x6e6   : > { %8063 = vmatprep.mubr.msk.f32.mxu1 %vm398_vm1, %v11697_v27 }
 0x6e9   : > { %8064 = vmatmul.mubr.msk.f32.gmra.mrb[146].mxu1 %vm398_vm1, %v11698_v37  ;;  %v2716_v37 = vmul.f32 %v10073_v30, %v11703_v24  ;;  %v11709_v30 = vld [vmem:[#allocation67_spill] sm:$0xff] }
 0x6ed   : > { %v7865_v35 = vpop.f32.mrb[60].mxu1 }
 0x6ee   : > { %v2851_v62 = vmul.f32 %v7865_v35, %v11700_v59  ;;  %v2811_v47 = vpop.f32.mrb[61].mxu1  ;;  %v2715_v35 = vmul.f32 %v10069_v57, %v11705_v53 }
 0x6ef   : > { %v2850_v13 = vmul.f32 %v2811_v47, %v11702_v61 }
 0x6f0   : > { %v10367_v36 = vadd.f32 %v2851_v62, %v2714_v18  ;;  %v11707_v62 = vld [vmem:[#allocation68_spill] sm:$0xff] }
 0x6f1   : > { %v10369_v32 = vadd.f32 %v2850_v13, %v2713_v50  ;;  %v7868_v27 = vpop.f32.mrb[62].mxu1  ;;  %v2718_v13 = vmul.f32 %v10096_v52, %v11707_v62  ;;  %v11708_v50 = vld [vmem:[#allocation76_spill] sm:$0xff]  ;;  %v11713_v52 = vld [vmem:[#allocation69_spill] sm:$0xff] }
 0x6f2   : > { %v2853_v16 = vmul.f32 %v7868_v27, %v11704_v38  ;;  %v2821_v49 = vpop.f32.mrb[63].mxu1  ;;  %v2717_v27 = vmul.f32 %v10093_v39, %v11709_v30 }
 0x6f3   : > { %v2852_v41 = vmul.f32 %v2821_v49, %v11706_v48 }
 0x6f4   : > { %v10377_v33 = vadd.f32 %v2853_v16, %v2716_v37  ;;  %v11711_v16 = vld [vmem:[#allocation70_spill] sm:$0xff] }
 0x6f5   : > { %v10379_v0 = vadd.f32 %v2852_v41, %v2715_v35  ;;  %v7871_v47 = vpop.f32.mrb[64].mxu1  ;;  %v2720_v41 = vmul.f32 %v10117_v21, %v11711_v16  ;;  %v11712_v37 = vld [vmem:[#allocation78_spill] sm:$0xff] }
 0x6f6   : > { %v2855_v18 = vmul.f32 %v7871_v47, %v11708_v50  ;;  %v2831_v54 = vpop.f32.mrb[65].mxu1  ;;  %v2719_v47 = vmul.f32 %v10115_v63, %v11713_v52 }
 0x6f7   : > { %v2854_v23 = vmul.f32 %v2831_v54, %v11710_v20 }
 0x6f8   : > { %v10387_v14 = vadd.f32 %v2855_v18, %v2718_v13 }
 0x6f9   : > { %v10389_v57 = vadd.f32 %v2854_v23, %v2717_v27  ;;  %v2867_v23 = vmul.f32 %v10126_v51, %v11699_v55  ;;  %v2866_v27 = vmul.f32 %v10129_v44, %v11701_v22  ;;  %v2868_v51 = vmul.f32 %v10145_v15, %v11705_v53 }
 0x6fa   : > { %v2871_v44 = vmul.f32 %v10162_v46, %v11707_v62  ;;  %v2872_v62 = vmul.f32 %v10175_v26, %v11713_v52 }
 0x6fb   : > { %v7874_v49 = vpop.f32.mrb[66].mxu1 }
 0x6fc   : > { %v2857_v35 = vmul.f32 %v7874_v49, %v11712_v37  ;;  %v2841_v31 = vpop.f32.mrb[67].mxu1 }
 0x6fd   : > { %v2856_v19 = vmul.f32 %v2841_v31, %v11714_v34  ;;  %v2869_v31 = vmul.f32 %v10143_v45, %v11703_v24 }
 0x6fe   : > { %v10397_v56 = vadd.f32 %v2857_v35, %v2720_v41 }
 0x6ff   : > { %v10399_v39 = vadd.f32 %v2856_v19, %v2719_v47  ;;  %v7881_v54 = vpop.f32.mrb[116].mxu0 }
 0x700   : > { %v3004_v13 = vmul.f32 %v7881_v54, %v11700_v59  ;;  %v2964_v18 = vpop.f32.mrb[117].mxu0 }
 0x701   : > { %v3003_v21 = vmul.f32 %v2964_v18, %v11702_v61 }
 0x702   : > { %v3012_v49 = vadd.f32 %v3004_v13, %v2867_v23 }
 0x703   : > { %v7884_v63 = vpop.f32.mrb[118].mxu0  ;;  %v3011_v40 = vadd.f32 %v3003_v21, %v2866_v27 }
 0x704   : > { %v3006_v19 = vmul.f32 %v7884_v63, %v11704_v38  ;;  %v2974_v41 = vpop.f32.mrb[119].mxu0  ;;  %v3196_v45 = vmul.f32 0.125, %v3012_v49  ;;  %v2870_v38 = vmul.f32 %v10164_v58, %v11709_v30 }
 0x705   : > { %v3005_v55 = vmul.f32 %v2974_v41, %v11706_v48  ;;  %v3195_v59 = vmul.f32 0.125, %v3011_v40  ;;  %v2873_v40 = vmul.f32 %v10181_v43, %v11711_v16 }
 0x706   : > { %v3014_v35 = vadd.f32 %v3006_v19, %v2869_v31 }
 0x707   : > { %v3013_v61 = vadd.f32 %v3005_v55, %v2868_v51  ;;  %v7887_v47 = vpop.f32.mrb[120].mxu0  ;;  %3211 = vxpose.xlu0.b32.start [1/8] (short) (narrow) %v3195_v59, 16 }
 0x708   : > { %v3008_v22 = vmul.f32 %v7887_v47, %v11708_v50  ;;  %v2984_v54 = vpop.f32.mrb[121].mxu0 }
 0x709   : > { %v3007_v24 = vmul.f32 %v2984_v54, %v11710_v20  ;;  %v3197_v46 = vmul.f32 0.125, %v3013_v61  ;;  %v3198_v20 = vmul.f32 0.125, %v3014_v35  ;;  %v6808_v61 = vld [vmem:[%s9007_s7 + $0xc0] ss:$0 sm:$0xff]  ;;  %v6809_v54 = vld [vmem:[%s9007_s7 + $0xc1] ss:$0 sm:$0xff] }
 0x70a   : > { %v3016_v15 = vadd.f32 %v3008_v22, %v2871_v44 }
 0x70b   : > { %v3015_v53 = vadd.f32 %v3007_v24, %v2870_v38  ;;  %v7890_v48 = vpop.f32.mrb[122].mxu0  ;;  %3212 = vxpose.xlu0.b32.cont [2/8] (short) (narrow) %v3196_v45, 16 }
 0x70c   : > { %v3010_v23 = vmul.f32 %v7890_v48, %v11712_v37  ;;  %v2994_v13 = vpop.f32.mrb[123].mxu0  ;;  %v3200_v21 = vmul.f32 0.125, %v3016_v15 }
 0x70d   : > { %v3009_v50 = vmul.f32 %v2994_v13, %v11714_v34  ;;  %v3199_v30 = vmul.f32 0.125, %v3015_v53 }
 0x70e   : > { %v3018_v18 = vadd.f32 %v3010_v23, %v2873_v40 }
 0x70f   : > { %v3017_v58 = vadd.f32 %v3009_v50, %v2872_v62  ;;  %3213 = vxpose.xlu0.b32.cont [3/8] (short) (narrow) %v3197_v46, 16 }
 0x710   : > { %v3202_v16 = vmul.f32 0.125, %v3018_v18 }
 0x711   : > { %v3201_v27 = vmul.f32 0.125, %v3017_v58 }
 0x713   : > { %3214 = vxpose.xlu0.b32.cont [4/8] (short) (narrow) %v3198_v20, 16 }
 0x717   : > { %3215 = vxpose.xlu0.b32.cont [5/8] (short) (narrow) %v3199_v30, 16 }
 0x71b   : > { %3216 = vxpose.xlu0.b32.cont [6/8] (short) (narrow) %v3200_v21, 16 }
 0x71f   : > { %3217 = vxpose.xlu0.b32.cont [7/8] (short) (narrow) %v3201_v27, 16 }
 0x720   : > { %v10425_v43 = vpop.f32.mrb[68].mxu1 }
 0x721   : > { %v10427_v37 = vpop.f32.mrb[69].mxu1 }
 0x723   : > { %3218 = vxpose.xlu0.b32.end [8/8] (short) (narrow) %v3202_v16, 16 }
 0x724   : > { %v10429_v26 = vpop.f32.mrb[70].mxu1 }
 0x725   : > { %v10431_v34 = vpop.f32.mrb[71].mxu1 }
 0x728   : > { %v10433_v52 = vpop.f32.mrb[72].mxu1 }
 0x729   : > { %v10435_v49 = vpop.f32.mrb[73].mxu1 }
 0x72c   : > { %v10437_v63 = vpop.f32.mrb[74].mxu1 }
 0x72d   : > { %v10439_v31 = vpop.f32.mrb[75].mxu1 }
 0x730   : > { %v7960_v51 = vpop.f32.mrb[76].mxu1 }
 0x731   : > { %v3529_v55 = vpop.f32.mrb[77].mxu1  ;;  %v3894_v45 = vmul.f32 %v7960_v51, %v6808_v61 }
 0x732   : > { %v3893_v24 = vmul.f32 %v6808_v61, %v3529_v55 }
 0x734   : > { %v7963_v59 = vpop.f32.mrb[78].mxu1 }
 0x735   : > { %v3539_v35 = vpop.f32.mrb[79].mxu1  ;;  %v3896_v53 = vmul.f32 %v7963_v59, %v6808_v61 }
 0x736   : > { %v3895_v23 = vmul.f32 %v6808_v61, %v3539_v35  ;;  %v6810_v35 = vld [vmem:[%s9007_s7 + $0xc2] ss:$0 sm:$0xff] }
 0x738   : > { %v7966_v47 = vpop.f32.mrb[80].mxu1 }
 0x739   : > { %v3549_v44 = vpop.f32.mrb[81].mxu1 }
 0x73a   : > { %v3897_v58 = vmul.f32 %v6808_v61, %v3549_v44 }
 0x73c   : > { %v7969_v22 = vpop.f32.mrb[82].mxu1 }
 0x73d   : > { %v3559_v38 = vpop.f32.mrb[83].mxu1  ;;  %v3900_v27 = vmul.f32 %v7969_v22, %v6808_v61 }
 0x73e   : > { %v3899_v51 = vmul.f32 %v6808_v61, %v3559_v38 }
 0x740   : > { %v7972_v15 = vpop.f32.mrb[84].mxu1 }
 0x741   : > { %v3907_v48 = vmul.f32 %v7972_v15, %v6809_v54  ;;  %v3569_v40 = vpop.f32.mrb[85].mxu1 }
 0x742   : > { %v3906_v13 = vmul.f32 %v6809_v54, %v3569_v40 }
 0x743   : > { %v3915_v62 = vadd.f32 %v3907_v48, %v3894_v45 }
 0x744   : > { %v7975_v46 = vpop.f32.mrb[86].mxu1  ;;  %v3914_v20 = vadd.f32 %v3906_v13, %v3893_v24 }
 0x745   : > { %v3909_v50 = vmul.f32 %v7975_v46, %v6809_v54  ;;  %v3579_v18 = vpop.f32.mrb[87].mxu1 }
 0x746   : > { %v3908_v30 = vmul.f32 %v6809_v54, %v3579_v18 }
 0x747   : > { %v3917_v16 = vadd.f32 %v3909_v50, %v3896_v53 }
 0x748   : > { %v7978_v21 = vpop.f32.mrb[88].mxu1  ;;  %v3916_v55 = vadd.f32 %v3908_v30, %v3895_v23 }
 0x787   : > { %v3227_v19 = vpop.trf.xlu0 }
 0x788   : > { %7923 = vmatprep.mubr.msk.f32.mxu0 %vm398_vm1, %v3227_v19  ;;  %v3911_v19 = vmul.f32 %v7978_v21, %v6809_v54 }
 0x78b   : > { %v3228_v41 = vpop.trf.xlu0 }
 0x78c   : > { %7924 = vmatmul.mubr.msk.f32.vlgmr.msra.gmra.mrb[124].mxu0 %vm398_vm1, %v3228_v41  ;;  %v3589_v41 = vpop.f32.mrb[89].mxu1 }
 0x78d   : > { %7930 = vmatprep.mubr.msk.f32.mxu0 %vm1244_vm2, %v10369_v32  ;;  %v3898_v32 = vmul.f32 %v7966_v47, %v6808_v61  ;;  %v3910_v59 = vmul.f32 %v6809_v54, %v3589_v41  ;;  %v7981_v15 = vpop.f32.mrb[90].mxu1 }
 0x78e   : > { %v3913_v28 = vmul.f32 %v7981_v15, %v6809_v54  ;;  %v3599_v47 = vpop.f32.mrb[91].mxu1 }
 0x78f   : > { %v3919_v40 = vadd.f32 %v3911_v19, %v3898_v32  ;;  %v3918_v25 = vadd.f32 %v3910_v59, %v3897_v58  ;;  %v3912_v45 = vmul.f32 %v6809_v54, %v3599_v47  ;;  %v7984_v48 = vpop.f32.mrb[92].mxu1  ;;  %v6811_v59 = vld [vmem:[%s9007_s7 + $0xc3] ss:$0 sm:$0xff] }
 0x790   : > { %v3921_v46 = vadd.f32 %v3913_v28, %v3900_v27  ;;  %v3928_v44 = vmul.f32 %v7984_v48, %v6810_v35  ;;  %v3609_v24 = vpop.f32.mrb[93].mxu1 }
 0x791   : > { %v3920_v13 = vadd.f32 %v3912_v45, %v3899_v51  ;;  %v3927_v22 = vmul.f32 %v6810_v35, %v3609_v24  ;;  %v7987_v53 = vpop.f32.mrb[94].mxu1 }
 0x792   : > { %v3936_v50 = vadd.f32 %v3928_v44, %v3915_v62  ;;  %v3930_v18 = vmul.f32 %v7987_v53, %v6810_v35  ;;  %v3619_v61 = vpop.f32.mrb[95].mxu1 }
 0x793   : > { %v3935_v38 = vadd.f32 %v3927_v22, %v3914_v20  ;;  %v3929_v23 = vmul.f32 %v6810_v35, %v3619_v61  ;;  %v7990_v30 = vpop.f32.mrb[96].mxu1 }
 0x794   : > { %v3938_v21 = vadd.f32 %v3930_v18, %v3917_v16  ;;  %v3932_v32 = vmul.f32 %v7990_v30, %v6810_v35  ;;  %v3629_v19 = vpop.f32.mrb[97].mxu1 }
 0x795   : > { %v3937_v41 = vadd.f32 %v3929_v23, %v3916_v55  ;;  %v3931_v58 = vmul.f32 %v6810_v35, %v3629_v19  ;;  %v7993_v54 = vpop.f32.mrb[98].mxu1 }
 0x796   : > { %v3940_v28 = vadd.f32 %v3932_v32, %v3919_v40  ;;  %v3934_v27 = vmul.f32 %v7993_v54, %v6810_v35  ;;  %v3639_v15 = vpop.f32.mrb[99].mxu1 }
 0x797   : > { %v3939_v47 = vadd.f32 %v3931_v58, %v3918_v25  ;;  %v3933_v51 = vmul.f32 %v6810_v35, %v3639_v15  ;;  %v7996_v45 = vpop.f32.mrb[100].mxu1  ;;  %v6812_v58 = vld [vmem:[%s9007_s7 + $0xc4] ss:$0 sm:$0xff] }
 0x798   : > { %v3942_v48 = vadd.f32 %v3934_v27, %v3921_v46  ;;  %v3949_v62 = vmul.f32 %v7996_v45, %v6811_v59  ;;  %v3649_v44 = vpop.f32.mrb[101].mxu1 }
 0x799   : > { %v3941_v20 = vadd.f32 %v3933_v51, %v3920_v13  ;;  %v3948_v24 = vmul.f32 %v6811_v59, %v3649_v44  ;;  %v7999_v22 = vpop.f32.mrb[102].mxu1 }
 0x79a   : > { %v3957_v16 = vadd.f32 %v3949_v62, %v3936_v50  ;;  %v3951_v53 = vmul.f32 %v7999_v22, %v6811_v59  ;;  %v3659_v18 = vpop.f32.mrb[103].mxu1 }
 0x79b   : > { %v3956_v55 = vadd.f32 %v3948_v24, %v3935_v38  ;;  %v3950_v61 = vmul.f32 %v6811_v59, %v3659_v18  ;;  %v8002_v23 = vpop.f32.mrb[104].mxu1 }
 0x79c   : > { %v3959_v30 = vadd.f32 %v3951_v53, %v3938_v21  ;;  %v3953_v40 = vmul.f32 %v8002_v23, %v6811_v59  ;;  %v3669_v32 = vpop.f32.mrb[105].mxu1 }
 0x79d   : > { %v3958_v19 = vadd.f32 %v3950_v61, %v3937_v41  ;;  %v3952_v25 = vmul.f32 %v6811_v59, %v3669_v32  ;;  %v8005_v35 = vpop.f32.mrb[106].mxu1 }
 0x79e   : > { %v3961_v46 = vadd.f32 %v3953_v40, %v3940_v28  ;;  %v3955_v54 = vmul.f32 %v8005_v35, %v6811_v59  ;;  %v3679_v27 = vpop.f32.mrb[107].mxu1 }
 0x79f   : > { %v3960_v15 = vadd.f32 %v3952_v25, %v3939_v47  ;;  %v3954_v13 = vmul.f32 %v6811_v59, %v3679_v27  ;;  %v8008_v51 = vpop.f32.mrb[108].mxu1  ;;  %v6813_v25 = vld [vmem:[%s9007_s7 + $0xc5] ss:$0 sm:$0xff] }
 0x7a0   : > { %v3963_v45 = vadd.f32 %v3955_v54, %v3942_v48  ;;  %v3970_v50 = vmul.f32 %v8008_v51, %v6812_v58  ;;  %v3689_v62 = vpop.f32.mrb[109].mxu1 }
 0x7a1   : > { %v3962_v38 = vadd.f32 %v3954_v13, %v3941_v20  ;;  %v3969_v44 = vmul.f32 %v6812_v58, %v3689_v62  ;;  %v8011_v24 = vpop.f32.mrb[110].mxu1 }
 0x7a2   : > { %v3978_v21 = vadd.f32 %v3970_v50, %v3957_v16  ;;  %v3972_v22 = vmul.f32 %v8011_v24, %v6812_v58  ;;  %v3699_v53 = vpop.f32.mrb[111].mxu1 }
 0x7a3   : > { %v3977_v41 = vadd.f32 %v3969_v44, %v3956_v55  ;;  %v3971_v18 = vmul.f32 %v6812_v58, %v3699_v53  ;;  %v8014_v61 = vpop.f32.mrb[112].mxu1 }
 0x7a4   : > { %v3980_v23 = vadd.f32 %v3972_v22, %v3959_v30  ;;  %v3974_v28 = vmul.f32 %v8014_v61, %v6812_v58  ;;  %v3709_v40 = vpop.f32.mrb[113].mxu1 }
 0x7a5   : > { %v3979_v32 = vadd.f32 %v3971_v18, %v3958_v19  ;;  %v3973_v47 = vmul.f32 %v6812_v58, %v3709_v40  ;;  %v8017_v59 = vpop.f32.mrb[114].mxu1 }
 0x7a6   : > { %v3982_v48 = vadd.f32 %v3974_v28, %v3961_v46  ;;  %v3976_v35 = vmul.f32 %v8017_v59, %v6812_v58  ;;  %v3719_v54 = vpop.f32.mrb[115].mxu1 }
 0x7a7   : > { %v3981_v27 = vadd.f32 %v3973_v47, %v3960_v15  ;;  %v3975_v20 = vmul.f32 %v6812_v58, %v3719_v54  ;;  %v8020_v13 = vpop.f32.mrb[116].mxu1  ;;  %v6814_v47 = vld [vmem:[%s9007_s7 + $0xc6] ss:$0 sm:$0xff] }
 0x7a8   : > { %v3984_v51 = vadd.f32 %v3976_v35, %v3963_v45  ;;  %v3991_v16 = vmul.f32 %v8020_v13, %v6813_v25  ;;  %v3729_v50 = vpop.f32.mrb[117].mxu1 }
 0x7a9   : > { %v3983_v55 = vadd.f32 %v3975_v20, %v3962_v38  ;;  %v3990_v62 = vmul.f32 %v6813_v25, %v3729_v50  ;;  %v8023_v44 = vpop.f32.mrb[118].mxu1 }
 0x7aa   : > { %v3999_v30 = vadd.f32 %v3991_v16, %v3978_v21  ;;  %v3993_v24 = vmul.f32 %v8023_v44, %v6813_v25  ;;  %v3739_v22 = vpop.f32.mrb[119].mxu1 }
 0x7ab   : > { %v3998_v19 = vadd.f32 %v3990_v62, %v3977_v41  ;;  %v3992_v53 = vmul.f32 %v6813_v25, %v3739_v22  ;;  %v8026_v18 = vpop.f32.mrb[120].mxu1 }
 0x7ac   : > { %v4001_v61 = vadd.f32 %v3993_v24, %v3980_v23  ;;  %v3995_v46 = vmul.f32 %v8026_v18, %v6813_v25  ;;  %v3749_v28 = vpop.f32.mrb[121].mxu1 }
 0x7ad   : > { %v4000_v40 = vadd.f32 %v3992_v53, %v3979_v32  ;;  %v3994_v15 = vmul.f32 %v6813_v25, %v3749_v28  ;;  %v8029_v58 = vpop.f32.mrb[122].mxu1 }
 0x7ae   : > { %v4003_v45 = vadd.f32 %v3995_v46, %v3982_v48  ;;  %v3997_v59 = vmul.f32 %v8029_v58, %v6813_v25  ;;  %v3759_v35 = vpop.f32.mrb[123].mxu1 }
 0x7af   : > { %v4002_v54 = vadd.f32 %v3994_v15, %v3981_v27  ;;  %v3996_v38 = vmul.f32 %v6813_v25, %v3759_v35  ;;  %v8032_v20 = vpop.f32.mrb[124].mxu1  ;;  %v6815_v15 = vld [vmem:[%s9007_s7 + $0xc7] ss:$0 sm:$0xff] }
 0x7b0   : > { %v4005_v13 = vadd.f32 %v3997_v59, %v3984_v51  ;;  %v4012_v21 = vmul.f32 %v8032_v20, %v6814_v47  ;;  %v3769_v16 = vpop.f32.mrb[125].mxu1 }
 0x7b1   : > { %v4004_v41 = vadd.f32 %v3996_v38, %v3983_v55  ;;  %v4011_v50 = vmul.f32 %v6814_v47, %v3769_v16  ;;  %v8035_v62 = vpop.f32.mrb[126].mxu1 }
 0x7b2   : > { %v4020_v23 = vadd.f32 %v4012_v21, %v3999_v30  ;;  %v4014_v44 = vmul.f32 %v8035_v62, %v6814_v47  ;;  %v3779_v24 = vpop.f32.mrb[127].mxu1 }
 0x7b3   : > { %v4019_v32 = vadd.f32 %v4011_v50, %v3998_v19  ;;  %v4013_v22 = vmul.f32 %v6814_v47, %v3779_v24  ;;  %v8038_v53 = vpop.f32.mrb[128].mxu1 }
 0x7b4   : > { %v4022_v18 = vadd.f32 %v4014_v44, %v4001_v61  ;;  %v4016_v48 = vmul.f32 %v8038_v53, %v6814_v47  ;;  %v3789_v46 = vpop.f32.mrb[129].mxu1 }
 0x7b5   : > { %v4021_v28 = vadd.f32 %v4013_v22, %v4000_v40  ;;  %v4015_v27 = vmul.f32 %v6814_v47, %v3789_v46  ;;  %v8041_v25 = vpop.f32.mrb[130].mxu1 }
 0x7b6   : > { %v4024_v51 = vadd.f32 %v4016_v48, %v4003_v45  ;;  %v4018_v58 = vmul.f32 %v8041_v25, %v6814_v47  ;;  %v3799_v59 = vpop.f32.mrb[131].mxu1 }
 0x7b7   : > { %v4023_v35 = vadd.f32 %v4015_v27, %v4002_v54  ;;  %v4017_v55 = vmul.f32 %v6814_v47, %v3799_v59  ;;  %v8044_v38 = vpop.f32.mrb[132].mxu1  ;;  %v6816_v27 = vld [vmem:[%s9007_s7 + $0xc8] ss:$0 sm:$0xff] }
 0x7b8   : > { %v4026_v20 = vadd.f32 %v4018_v58, %v4005_v13  ;;  %v4033_v30 = vmul.f32 %v8044_v38, %v6815_v15  ;;  %v3809_v21 = vpop.f32.mrb[133].mxu1 }
 0x7b9   : > { %v4025_v19 = vadd.f32 %v4017_v55, %v4004_v41  ;;  %v4032_v16 = vmul.f32 %v6815_v15, %v3809_v21  ;;  %v8047_v50 = vpop.f32.mrb[134].mxu1 }
 0x7ba   : > { %v4041_v61 = vadd.f32 %v4033_v30, %v4020_v23  ;;  %v4035_v62 = vmul.f32 %v8047_v50, %v6815_v15  ;;  %v3819_v44 = vpop.f32.mrb[135].mxu1 }
 0x7bb   : > { %v4040_v40 = vadd.f32 %v4032_v16, %v4019_v32  ;;  %v4034_v24 = vmul.f32 %v6815_v15, %v3819_v44  ;;  %v8050_v22 = vpop.f32.mrb[136].mxu1 }
 0x7bc   : > { %v4043_v53 = vadd.f32 %v4035_v62, %v4022_v18  ;;  %v4037_v45 = vmul.f32 %v8050_v22, %v6815_v15  ;;  %v3829_v48 = vpop.f32.mrb[137].mxu1 }
 0x7bd   : > { %v4042_v46 = vadd.f32 %v4034_v24, %v4021_v28  ;;  %v4036_v54 = vmul.f32 %v6815_v15, %v3829_v48  ;;  %v8053_v47 = vpop.f32.mrb[138].mxu1 }
 0x7be   : > { %v4045_v13 = vadd.f32 %v4037_v45, %v4024_v51  ;;  %v4039_v25 = vmul.f32 %v8053_v47, %v6815_v15  ;;  %v3839_v58 = vpop.f32.mrb[139].mxu1 }
 0x7bf   : > { %v4044_v59 = vadd.f32 %v4036_v54, %v4023_v35  ;;  %v4038_v41 = vmul.f32 %v6815_v15, %v3839_v58  ;;  %v8056_v55 = vpop.f32.mrb[140].mxu1 }
 0x7c0   : > { %v4047_v38 = vadd.f32 %v4039_v25, %v4026_v20  ;;  %v4054_v23 = vmul.f32 %v8056_v55, %v6816_v27  ;;  %v3849_v30 = vpop.f32.mrb[141].mxu1  ;;  %v11717_v55 = vld [vmem:[#allocation93_spill] sm:$0xff] }
 0x7c1   : > { %v4046_v21 = vadd.f32 %v4038_v41, %v4025_v19  ;;  %v4053_v32 = vmul.f32 %v6816_v27, %v3849_v30  ;;  %v8059_v16 = vpop.f32.mrb[142].mxu1 }
 0x7c2   : > { %v10454_v50 = vadd.f32 %v4054_v23, %v4041_v61  ;;  %v4056_v18 = vmul.f32 %v8059_v16, %v6816_v27  ;;  %v3859_v44 = vpop.f32.mrb[143].mxu1 }
 0x7c3   : > { %v10456_v62 = vadd.f32 %v4053_v32, %v4040_v40  ;;  %v4055_v51 = vmul.f32 %v6816_v27, %v3859_v44  ;;  %v8062_v35 = vpop.f32.mrb[144].mxu1 }
 0x7c4   : > { %v10458_v28 = vadd.f32 %v4056_v18, %v4043_v53  ;;  %v3869_v15 = vpop.f32.mrb[145].mxu1  ;;  %v4058_v22 = vmul.f32 %v8062_v35, %v6816_v27  ;;  %v11720_v18 = vld [vmem:[#allocation96_spill] sm:$0xff]  ;;  %v11721_v35 = vld [vmem:[#allocation97_spill] sm:$0xff] }
 0x7c5   : > { %v10460_v24 = vadd.f32 %v4055_v51, %v4042_v46  ;;  %v4057_v20 = vmul.f32 %v6816_v27, %v3869_v15  ;;  %v8065_v48 = vpop.f32.mrb[146].mxu1 }
 0x7c6   : > { %v10462_v45 = vadd.f32 %v4058_v22, %v4045_v13  ;;  %v3879_v61 = vpop.f32.mrb[147].mxu1  ;;  %v4060_v54 = vmul.f32 %v8065_v48, %v6816_v27 }
 0x7c7   : > { %v10464_v19 = vadd.f32 %v4057_v20, %v4044_v59  ;;  %v4059_v47 = vmul.f32 %v6816_v27, %v3879_v61  ;;  %v11715_v27 = vld [vmem:[#allocation91_spill] sm:$0xff]  ;;  %v11716_v59 = vld [vmem:[#allocation92_spill] sm:$0xff]  ;;  %v11722_v20 = vld [vmem:[#allocation98_spill] sm:$0xff] }
 0x7c8   : > { %v10466_v40 = vadd.f32 %v4060_v54, %v4047_v38 }
 0x7c9   : > { %v10468_v53 = vadd.f32 %v4059_v47, %v4046_v21  ;;  %v11719_v21 = vld [vmem:[#allocation95_spill] sm:$0xff] }
 0x85f   : > { %v7925_v46 = vpop.f32.mrb[124].mxu0 }
 0x860   : > { %v3325_v25 = vmul.f32 %v7925_v46, %v11637_v12  ;;  %v3315_v58 = vpop.f32.mrb[125].mxu0  ;;  %v4099_v12 = vld [vmem:[%s9007_s7 + $0x98] sm:$0xff] }
 0x861   : > { %v3324_v41 = vmul.f32 %v3315_v58, %v11636_v29  ;;  %v4098_v29 = vld [vmem:[%s9007_s7 + $0x90] sm:$0xff] }
 0x863   : > { %v8450_v13 = vpack.c.bf16 %v3325_v25, %v3324_v41 }
 0x865   : > { %8451 = vmatprep.subr.bf16.mxu0 %v8450_v13 }
 0x866   : > { %8453 = vmatpush3.bf16.msra.mxu0 %v8450_v13 }
 0x869   : > { %7931 = vmatmul.mubr.msk.f32.vlgmr.msra.gmra.mrb[126].mxu0 %vm1244_vm2, %v10367_v36  ;;  %v8470_v36 = vpack.c.bf16 %v4099_v12, %v4098_v29  ;;  %v3146_v29 = vadd.f32 1e-06, %v10425_v43  ;;  %v3141_v12 = vadd.f32 1e-06, %v10427_v37  ;;  %v3166_v37 = vadd.f32 1e-06, %v10433_v52 }
 0x86a   : > { %7933 = vmatprep.mubr.msk.f32.mxu0 %vm1244_vm2, %v10379_v0  ;;  %v6552_v0 = vld [vmem:[%s9027_s19 + $0x3] ss:$0 sm:$0xff] }
 0x86b   : > { %8471 = vmatprep.subr.bf16.mxu0 %v8470_v36  ;;  %v10497_v38 = vadd.f32 %v11717_v55, %v6552_v0  ;;  %v10505_v32 = vadd.f32 %v11719_v21, %v6552_v0  ;;  %v10509_v44 = vadd.f32 %v6552_v0, %v11720_v18  ;;  %v10513_v15 = vadd.f32 %v11721_v35, %v6552_v0 }
 0x86c   : > { %8473 = vmatpush3.bf16.msra.mxu0 %v8470_v36  ;;  %v10517_v48 = vadd.f32 %v6552_v0, %v11722_v20  ;;  %v3151_v55 = vadd.f32 1e-06, %v10431_v34  ;;  %v3161_v21 = vadd.f32 1e-06, %v10435_v49  ;;  %v3176_v34 = vadd.f32 1e-06, %v10437_v63 }
 0x86d   : > { %7934 = vmatmul.mubr.msk.f32.gmra.mrb[128].mxu0 %vm1244_vm2, %v10377_v33  ;;  %v10490_v33 = vadd.f32 %v11715_v27, %v6552_v0  ;;  %v6564_v30 = vmul.f32 -1.442695, %v10497_v38  ;;  %v6566_v51 = vmul.f32 -1.442695, %v10505_v32  ;;  %v6565_v22 = vmul.f32 -1.442695, %v10509_v44 }
 0x86e   : > { %7936 = vmatprep.mubr.msk.f32.mxu0 %vm1244_vm2, %v10389_v57  ;;  %v10493_v57 = vadd.f32 %v6552_v0, %v11716_v59  ;;  %v6568_v61 = vmul.f32 -1.442695, %v10513_v15  ;;  %v6567_v54 = vmul.f32 -1.442695, %v10517_v48 }
 0x871   : > { %7937 = vmatmul.mubr.msk.f32.gmra.mrb[130].mxu0 %vm1244_vm2, %v10387_v14  ;;  %v6562_v14 = vmul.f32 -1.442695, %v10490_v33 }
 0x872   : > { %7939 = vmatprep.mubr.msk.f32.mxu0 %vm1244_vm2, %v10399_v39  ;;  %v6561_v39 = vmul.f32 -1.442695, %v10493_v57 }
 0x873   : > { %8657 = vpow2.f32 %v6562_v14  ;;  %v3156_v14 = vadd.f32 1e-06, %v10429_v26 }
 0x874   : > { %8659 = vpow2.f32 %v6561_v39 }
 0x875   : > { %7940 = vmatmul.mubr.msk.f32.gmra.mrb[132].mxu0 %vm1244_vm2, %v10397_v56  ;;  %v11718_v56 = vld [vmem:[#allocation94_spill] sm:$0xff]  ;;  %8661 = vpow2.f32 %v6564_v30 }
 0x876   : > { %v10501_v23 = vadd.f32 %v6552_v0, %v11718_v56 }
 0x878   : > { %v6563_v16 = vmul.f32 -1.442695, %v10501_v23 }
 0x87a   : > { %8663 = vpow2.f32 %v6563_v16 }
 0x87b   : > { %8665 = vpow2.f32 %v6566_v51  ;;  %v10529_v51 = vld [vmem:[%s9027_s19 + $0x8] ss:$0 sm:$0xff] }
 0x87c   : > { %8667 = vpow2.f32 %v6565_v22  ;;  %v3171_v22 = vadd.f32 1e-06, %v10439_v31  ;;  %v4074_v63 = vadd.f32 %v10529_v51, %v10456_v62 }
 0x87d   : > { %v8658_v47 = vpop.eup %8657  ;;  %8669 = vpow2.f32 %v6568_v61 }
 0x87e   : > { %v8660_v46 = vpop.eup %8659  ;;  %v1535_v25 = vadd.f32 1.0, %v8658_v47  ;;  %8671 = vpow2.f32 %v6567_v54  ;;  %v4075_v54 = vadd.f32 %v10529_v51, %v10454_v50 }
 0x87f   : > { %v8662_v58 = vpop.eup %8661  ;;  %v1534_v41 = vadd.f32 1.0, %v8660_v46 }
 0x880   : > { %8673 = vrcp.f32 %v1535_v25  ;;  %v1537_v36 = vadd.f32 1.0, %v8662_v58 }
 0x881   : > { %8675 = vrcp.f32 %v1534_v41 }
 0x882   : > { %8677 = vrcp.f32 %v3146_v29 }
 0x883   : > { %8679 = vrcp.f32 %v3141_v12 }
 0x884   : > { %v8664_v13 = vpop.eup %8663  ;;  %8681 = vrcp.f32 %v1537_v36 }
 0x885   : > { %v8666_v0 = vpop.eup %8665  ;;  %v1536_v27 = vadd.f32 1.0, %v8664_v13 }
 0x886   : > { %v8668_v59 = vpop.eup %8667  ;;  %v1539_v39 = vadd.f32 1.0, %v8666_v0 }
 0x887   : > { %v8670_v56 = vpop.eup %8669  ;;  %8683 = vrcp.f32 %v1536_v27  ;;  %v1538_v43 = vadd.f32 1.0, %v8668_v59  ;;  %v4077_v59 = vadd.f32 %v10529_v51, %v10458_v28 }
 0x888   : > { %v8672_v30 = vpop.eup %8671  ;;  %8685 = vrcp.f32 %v3156_v14  ;;  %v1541_v16 = vadd.f32 1.0, %v8670_v56 }
 0x889   : > { %8687 = vrcp.f32 %v3151_v55  ;;  %v1540_v26 = vadd.f32 1.0, %v8672_v30 }
 0x88a   : > { %8689 = vrcp.f32 %v1539_v39  ;;  %v8674_v18 = vpop.eup %8673 }
 0x88b   : > { %8691 = vrcp.f32 %v1538_v43  ;;  %v8676_v35 = vpop.eup %8675  ;;  %v1559_v41 = vmul.f32 %v8674_v18, %v10490_v33  ;;  %v4076_v33 = vadd.f32 %v10529_v51, %v10460_v24 }
 0x88c   : > { %8693 = vrcp.f32 %v3166_v37  ;;  %v8678_v20 = vpop.eup %8677  ;;  %v1558_v29 = vmul.f32 %v8676_v35, %v10493_v57 }
 0x88d   : > { %8695 = vrcp.f32 %v3161_v21  ;;  %v8680_v61 = vpop.eup %8679 }
 0x88e   : > { %8697 = vrcp.f32 %v1541_v16  ;;  %v8682_v46 = vpop.eup %8681 }
 0x88f   : > { %8699 = vrcp.f32 %v1540_v26  ;;  %v1561_v43 = vmul.f32 %v8682_v46, %v10497_v38 }
 0x890   : > { %8701 = vrcp.f32 %v3176_v34  ;;  %v4079_v34 = vadd.f32 %v10529_v51, %v10462_v45 }
 0x891   : > { %v8684_v58 = vpop.eup %8683  ;;  %8703 = vrcp.f32 %v3171_v22 }
 0x892   : > { %v8686_v13 = vpop.eup %8685  ;;  %v1560_v37 = vmul.f32 %v8684_v58, %v10501_v23  ;;  %v4081_v58 = vadd.f32 %v10529_v51, %v10466_v40 }
 0x893   : > { %v8688_v0 = vpop.eup %8687 }
 0x894   : > { %v8690_v55 = vpop.eup %8689 }
 0x895   : > { %v8692_v56 = vpop.eup %8691 }
 0x896   : > { %v8694_v57 = vpop.eup %8693 }
 0x897   : > { %v8696_v26 = vpop.eup %8695 }
 0x898   : > { %v8698_v24 = vpop.eup %8697 }
 0x899   : > { %v8700_v23 = vpop.eup %8699 }
 0x93c   : > { %v7932_v52 = vpop.f32.mrb[126].mxu0 }
 0x93d   : > { %v3456_v49 = vmul.f32 %v8678_v20, %v7932_v52  ;;  %v3416_v47 = vpop.f32.mrb[127].mxu0  ;;  %v4078_v20 = vadd.f32 %v10529_v51, %v10464_v19  ;;  %v1563_v52 = vmul.f32 %v8690_v55, %v10505_v32 }
 0x93e   : > { %v3455_v25 = vmul.f32 %v8680_v61, %v3416_v47 }
 0x93f   : > { %v4083_v31 = vadd.f32 %v4075_v54, %v3456_v49  ;;  %v8702_v49 = vpop.eup %8701  ;;  %v1562_v54 = vmul.f32 %v8692_v56, %v10509_v44  ;;  %v1565_v44 = vmul.f32 %v8698_v24, %v10513_v15  ;;  %v11728_v24 = vld [vmem:[#allocation87_spill] sm:$0xff] }
 0x940   : > { %v4082_v12 = vadd.f32 %v4074_v63, %v3455_v25  ;;  %v7935_v36 = vpop.f32.mrb[128].mxu0  ;;  %v8704_v45 = vpop.eup %8703 }
 0x941   : > { %v4091_v27 = vmul.f32 %v4083_v31, %v1559_v41  ;;  %v3458_v50 = vmul.f32 %v8686_v13, %v7935_v36  ;;  %v3426_v14 = vpop.f32.mrb[129].mxu0  ;;  %v4080_v31 = vadd.f32 %v10529_v51, %v10468_v53  ;;  %v6818_v53 = vld [vmem:[%s9027_s19 + $0x9] ss:$0 sm:$0xff] }
 0x942   : > { %v4090_v39 = vmul.f32 %v4082_v12, %v1558_v29  ;;  %v3457_v62 = vmul.f32 %v8688_v0, %v3426_v14  ;;  %v1564_v29 = vmul.f32 %v8700_v23, %v10517_v48  ;;  %v11723_v48 = vld [vmem:[#allocation84_spill] sm:$0xff] }
 0x943   : > { %v4085_v30 = vadd.f32 %v4077_v59, %v3458_v50  ;;  %v11724_v59 = vld [vmem:[#allocation83_spill] sm:$0xff] }
 0x944   : > { %v4084_v21 = vadd.f32 %v4076_v33, %v3457_v62  ;;  %v7938_v16 = vpop.f32.mrb[130].mxu0  ;;  %8070 = vmatprep.mubr.msk.f32.mxu0 %vm1244_vm2, %v4090_v39 }
 0x945   : > { %v4093_v28 = vmul.f32 %v4085_v30, %v1561_v43  ;;  %v3460_v18 = vmul.f32 %v8694_v57, %v7938_v16  ;;  %v3436_v35 = vpop.f32.mrb[131].mxu0  ;;  %8071 = vmatmul.mubr.msk.f32.vlgmr.msra.gmra.mrb[134].mxu0 %vm1244_vm2, %v4091_v27  ;;  %v11725_v43 = vld [vmem:[#allocation86_spill] sm:$0xff]  ;;  %v11726_v57 = vld [vmem:[#allocation85_spill] sm:$0xff] }
 0x946   : > { %v4092_v22 = vmul.f32 %v4084_v21, %v1560_v37  ;;  %v3459_v38 = vmul.f32 %v8696_v26, %v3436_v35 }
 0x947   : > { %v4087_v61 = vadd.f32 %v4079_v34, %v3460_v18  ;;  %v11727_v34 = vld [vmem:[#allocation88_spill] sm:$0xff] }
 0x948   : > { %v4086_v47 = vadd.f32 %v4078_v20, %v3459_v38  ;;  %v7941_v46 = vpop.f32.mrb[132].mxu0  ;;  %8073 = vmatprep.mubr.msk.f32.mxu0 %vm1244_vm2, %v4092_v22 }
 0x949   : > { %v4095_v25 = vmul.f32 %v4087_v61, %v1563_v52  ;;  %v3462_v63 = vmul.f32 %v8702_v49, %v7941_v46  ;;  %v3446_v41 = vpop.f32.mrb[133].mxu0  ;;  %8074 = vmatmul.mubr.msk.f32.gmra.mrb[136].mxu0 %vm1244_vm2, %v4093_v28  ;;  %v11729_v49 = vld [vmem:[#allocation90_spill] sm:$0xff] }
 0x94a   : > { %v4094_v19 = vmul.f32 %v4086_v47, %v1562_v54  ;;  %v3461_v32 = vmul.f32 %v8704_v45, %v3446_v41  ;;  %v11730_v47 = vld [vmem:[#allocation89_spill] sm:$0xff]  ;;  %v11734_v41 = vld [vmem:[#allocation8_spill] sm:$0xff] }
 0x94b   : > { %v4089_v13 = vadd.f32 %v4081_v58, %v3462_v63  ;;  %v11732_v63 = vld [vmem:[#allocation6_spill] sm:$0xff]  ;;  %v11733_v58 = vld [vmem:[#allocation7_spill] sm:$0xff] }
 0x94c   : > { %v4088_v12 = vadd.f32 %v4080_v31, %v3461_v32  ;;  %8076 = vmatprep.mubr.msk.f32.mxu0 %vm1244_vm2, %v4094_v19  ;;  %v11735_v19 = vld [vmem:[#allocation9_spill] sm:$0xff]  ;;  %v11736_v32 = vld [vmem:[#allocation10_spill] sm:$0xff]  ;;  %v11737_v31 = vld [vmem:[#allocation11_spill] sm:$0xff] }
 0x94d   : > { %v4097_v36 = vmul.f32 %v4089_v13, %v1565_v44  ;;  %8077 = vmatmul.mubr.msk.f32.gmra.mrb[138].mxu0 %vm1244_vm2, %v4095_v25  ;;  %v11731_v25 = vld [vmem:[#allocation5_spill] sm:$0xff]  ;;  %v11738_v44 = vld [vmem:[#allocation12_spill] sm:$0xff] }
 0x94e   : > { %v4096_v40 = vmul.f32 %v4088_v12, %v1564_v29  ;;  %v11739_v13 = vld [vmem:[#allocation13_spill] sm:$0xff]  ;;  %v11740_v29 = vld [vmem:[#allocation14_spill] sm:$0xff]  ;;  %v11741_v12 = vld [vmem:[#allocation15_spill] sm:$0xff] }
 0x950   : > { %8079 = vmatprep.mubr.msk.f32.mxu0 %vm1244_vm2, %v4096_v40  ;;  %v11743_v40 = vld [vmem:[#allocation17_spill] sm:$0xff] }
 0x951   : > { %8080 = vmatmul.mubr.msk.f32.gmra.mrb[140].mxu0 %vm1244_vm2, %v4097_v36  ;;  %v11742_v36 = vld [vmem:[#allocation16_spill] sm:$0xff] }
 0x952   : > { %8098 = vmatprep.mubr.msk.f32.mxu0 %vm398_vm1, %v11638_v17 }
 0xa18   : > { %v8072_v51 = vpop.f32.mrb[134].mxu0 }
 0xa19   : > { %v4201_v15 = vadd.f32 %v8072_v51, %v6818_v53  ;;  %v4195_v0 = vpop.f32.mrb[135].mxu0  ;;  %v11745_v51 = vld [vmem:[#allocation19_spill] sm:$0xff] }
 0xa1a   : > { %v4196_v27 = vadd.f32 %v6818_v53, %v4195_v0  ;;  %v11747_v0 = vld [vmem:[#allocation21_spill] sm:$0xff] }
 0xa1b   : > { %v10568_v50 = vadd.f32 %v4201_v15, %v11723_v48  ;;  %v11746_v15 = vld [vmem:[#allocation20_spill] sm:$0xff]  ;;  %v11749_v48 = vld [vmem:[#allocation23_spill] sm:$0xff] }
 0xa1c   : > { %v10571_v14 = vadd.f32 %v4196_v27, %v11724_v59  ;;  %v8075_v55 = vpop.f32.mrb[136].mxu0  ;;  %v11748_v27 = vld [vmem:[#allocation22_spill] sm:$0xff]  ;;  %v11750_v59 = vld [vmem:[#allocation24_spill] sm:$0xff] }
 0xa1d   : > { %v4211_v39 = vadd.f32 %v8075_v55, %v6818_v53  ;;  %v4205_v62 = vpop.f32.mrb[137].mxu0  ;;  %v11751_v55 = vld [vmem:[#allocation25_spill] sm:$0xff] }
 0xa1e   : > { %v4206_v33 = vadd.f32 %v6818_v53, %v4205_v62  ;;  %v8474_v56 = vpack.c.bf16 %v10568_v50, %v10571_v14  ;;  %v11753_v62 = vld [vmem:[#allocation27_spill] sm:$0xff] }
 0xa1f   : > { %v10576_v30 = vadd.f32 %v4211_v39, %v11725_v43  ;;  %v11752_v39 = vld [vmem:[#allocation26_spill] sm:$0xff] }
 0xa20   : > { %v10579_v37 = vadd.f32 %v4206_v33, %v11726_v57  ;;  %v8078_v21 = vpop.f32.mrb[138].mxu0  ;;  %8475 = vmatprep.subr.bf16.mxu0 %v8474_v56  ;;  %v11754_v33 = vld [vmem:[#allocation28_spill] sm:$0xff]  ;;  %v11756_v43 = vld [vmem:[#allocation30_spill] sm:$0xff]  ;;  %v11757_v57 = vld [vmem:[#allocation31_spill] sm:$0xff] }
 0xa21   : > { %v4221_v16 = vadd.f32 %v8078_v21, %v6818_v53  ;;  %v4215_v26 = vpop.f32.mrb[139].mxu0  ;;  %8477 = vmatpush3.bf16.msra.mxu0 %v8474_v56  ;;  %v11755_v56 = vld [vmem:[#allocation29_spill] sm:$0xff]  ;;  %v11758_v21 = vld [vmem:[#allocation32_spill] sm:$0xff] }
 0xa22   : > { %v4216_v28 = vadd.f32 %v6818_v53, %v4215_v26  ;;  %v8478_v18 = vpack.c.bf16 %v10576_v30, %v10579_v37  ;;  %v11760_v26 = vld [vmem:[#allocation34_spill] sm:$0xff] }
 0xa23   : > { %v10584_v35 = vadd.f32 %v4221_v16, %v11727_v34  ;;  %v11759_v16 = vld [vmem:[#allocation33_spill] sm:$0xff] }
 0xa24   : > { %v10587_v22 = vadd.f32 %v4216_v28, %v11728_v24  ;;  %v8081_v38 = vpop.f32.mrb[140].mxu0  ;;  %8479 = vmatprep.subr.bf16.mxu0 %v8478_v18  ;;  %v11761_v28 = vld [vmem:[#allocation35_spill] sm:$0xff]  ;;  %v11763_v34 = vld [vmem:[#allocation37_spill] sm:$0xff]  ;;  %v11764_v24 = vld [vmem:[#allocation38_spill] sm:$0xff] }
 0xa25   : > { %v4231_v20 = vadd.f32 %v8081_v38, %v6818_v53  ;;  %v4225_v23 = vpop.f32.mrb[141].mxu0  ;;  %8481 = vmatpush3.bf16.msra.mxu0 %v8478_v18  ;;  %v11762_v18 = vld [vmem:[#allocation36_spill] sm:$0xff]  ;;  %v11765_v38 = vld [vmem:[#allocation39_spill] sm:$0xff] }
 0xa26   : > { %v4226_v52 = vadd.f32 %v6818_v53, %v4225_v23  ;;  %v8482_v61 = vpack.c.bf16 %v10584_v35, %v10587_v22  ;;  %v11744_v53 = vld [vmem:[#allocation18_spill] sm:$0xff]  ;;  %v11767_v23 = vld [vmem:[#allocation41_spill] sm:$0xff] }
 0xa27   : > { %v10592_v54 = vadd.f32 %v4231_v20, %v11729_v49  ;;  %v11766_v20 = vld [vmem:[#allocation40_spill] sm:$0xff] }
 0xa28   : > { %v10595_v46 = vadd.f32 %v4226_v52, %v11730_v47  ;;  %8483 = vmatprep.subr.bf16.mxu0 %v8482_v61  ;;  %v11768_v52 = vld [vmem:[#allocation42_spill] sm:$0xff]  ;;  %v11770_v49 = vld [vmem:[#allocation44_spill] sm:$0xff]  ;;  %v11771_v47 = vld [vmem:[#allocation45_spill] sm:$0xff] }
 0xa29   : > { %8485 = vmatpush3.bf16.msra.mxu0 %v8482_v61  ;;  %v11769_v61 = vld [vmem:[#allocation43_spill] sm:$0xff] }
 0xa2a   : > { %v8486_v45 = vpack.c.bf16 %v10592_v54, %v10595_v46 }
 0xa2c   : > { %8487 = vmatprep.subr.bf16.mxu0 %v8486_v45 }
 0xa2d   : > { %8489 = vmatpush3.bf16.msra.mxu0 %v8486_v45  ;;  %v11772_v45 = vld [vmem:[#allocation46_spill] sm:$0xff] }
 0xa30   : > { %8099 = vmatmul.mubr.msk.f32.vlgmr.msra.gmra.mrb[142].mxu0 %vm398_vm1, %v8896_v1 }
 0xa31   : > { %8101 = vmatprep.mubr.msk.f32.mxu0 %vm398_vm1, %v8901_v2 }
 0xa34   : > { %8102 = vmatmul.mubr.msk.f32.gmra.mrb[144].mxu0 %vm398_vm1, %v8906_v3 }
 0xa35   : > { %8104 = vmatprep.mubr.msk.f32.mxu0 %vm398_vm1, %v8911_v4 }
 0xa38   : > { %8105 = vmatmul.mubr.msk.f32.gmra.mrb[146].mxu0 %vm398_vm1, %v8916_v5 }
 0xa39   : > { %8107 = vmatprep.mubr.msk.f32.mxu0 %vm398_vm1, %v8921_v6 }
 0xa3c   : > { %8108 = vmatmul.mubr.msk.f32.gmra.mrb[148].mxu0 %vm398_vm1, %v8926_v7 }
 0xa3d   : > { %8110 = vmatprep.mubr.msk.f32.mxu0 %vm398_vm1, %v8931_v8 }
 0xa40   : > { %8111 = vmatmul.mubr.msk.f32.gmra.mrb[150].mxu0 %vm398_vm1, %v8937_v9 }
 0xa41   : > { %8113 = vmatprep.mubr.msk.f32.mxu0 %vm398_vm1, %v8942_v10 }
 0xa44   : > { %8114 = vmatmul.mubr.msk.f32.gmra.mrb[152].mxu0 %vm398_vm1, %v8947_v11 }
 0xa45   : > { %8116 = vmatprep.mubr.msk.f32.mxu0 %vm398_vm1, %v11639_v42 }
 0xa48   : > { %8117 = vmatmul.mubr.msk.f32.gmra.mrb[154].mxu0 %vm398_vm1, %v11640_v60 }
 0xa49   : > { %8119 = vmatprep.mubr.msk.f32.mxu0 %vm398_vm1, %v11731_v25 }
 0xa4c   : > { %8120 = vmatmul.mubr.msk.f32.gmra.mrb[156].mxu0 %vm398_vm1, %v11732_v63 }
 0xa4d   : > { %8122 = vmatprep.mubr.msk.f32.mxu0 %vm398_vm1, %v11733_v58 }
 0xa50   : > { %8123 = vmatmul.mubr.msk.f32.gmra.mrb[158].mxu0 %vm398_vm1, %v11734_v41 }
 0xa51   : > { %8125 = vmatprep.mubr.msk.f32.mxu0 %vm398_vm1, %v11735_v19 }
 0xa54   : > { %8126 = vmatmul.mubr.msk.f32.gmra.mrb[160].mxu0 %vm398_vm1, %v11736_v32 }
 0xa55   : > { %8128 = vmatprep.mubr.msk.f32.mxu0 %vm398_vm1, %v11737_v31 }
 0xa58   : > { %8129 = vmatmul.mubr.msk.f32.gmra.mrb[162].mxu0 %vm398_vm1, %v11738_v44 }
 0xa59   : > { %8131 = vmatprep.mubr.msk.f32.mxu0 %vm398_vm1, %v11739_v13 }
 0xa5c   : > { %8132 = vmatmul.mubr.msk.f32.gmra.mrb[164].mxu0 %vm398_vm1, %v11740_v29 }
 0xa5d   : > { %8134 = vmatprep.mubr.msk.f32.mxu0 %vm398_vm1, %v11741_v12 }
 0xa60   : > { %8135 = vmatmul.mubr.msk.f32.gmra.mrb[166].mxu0 %vm398_vm1, %v11742_v36 }
 0xa61   : > { %8137 = vmatprep.mubr.msk.f32.mxu0 %vm398_vm1, %v11743_v40 }
 0xa64   : > { %8138 = vmatmul.mubr.msk.f32.gmra.mrb[168].mxu0 %vm398_vm1, %v11744_v53 }
 0xa65   : > { %8140 = vmatprep.mubr.msk.f32.mxu0 %vm398_vm1, %v11745_v51 }
 0xa68   : > { %8141 = vmatmul.mubr.msk.f32.gmra.mrb[170].mxu0 %vm398_vm1, %v11746_v15 }
 0xa69   : > { %8143 = vmatprep.mubr.msk.f32.mxu0 %vm398_vm1, %v11747_v0 }
 0xa6c   : > { %8144 = vmatmul.mubr.msk.f32.gmra.mrb[172].mxu0 %vm398_vm1, %v11748_v27 }
 0xa6d   : > { %8146 = vmatprep.mubr.msk.f32.mxu0 %vm398_vm1, %v11749_v48 }
 0xa70   : > { %8147 = vmatmul.mubr.msk.f32.gmra.mrb[174].mxu0 %vm398_vm1, %v11750_v59 }
 0xa71   : > { %8149 = vmatprep.mubr.msk.f32.mxu0 %vm398_vm1, %v11751_v55 }
 0xa74   : > { %8150 = vmatmul.mubr.msk.f32.gmra.mrb[176].mxu0 %vm398_vm1, %v11752_v39 }
 0xa75   : > { %8152 = vmatprep.mubr.msk.f32.mxu0 %vm398_vm1, %v11753_v62 }
 0xa78   : > { %8153 = vmatmul.mubr.msk.f32.gmra.mrb[178].mxu0 %vm398_vm1, %v11754_v33 }
 0xa79   : > { %8155 = vmatprep.mubr.msk.f32.mxu0 %vm398_vm1, %v11755_v56 }
 0xa7c   : > { %8156 = vmatmul.mubr.msk.f32.gmra.mrb[180].mxu0 %vm398_vm1, %v11756_v43 }
 0xa7d   : > { %8158 = vmatprep.mubr.msk.f32.mxu0 %vm398_vm1, %v11757_v57 }
 0xa80   : > { %8159 = vmatmul.mubr.msk.f32.gmra.mrb[182].mxu0 %vm398_vm1, %v11758_v21 }
 0xa81   : > { %8161 = vmatprep.mubr.msk.f32.mxu0 %vm398_vm1, %v11759_v16  ;;  %v6900_v16 = vld [vmem:[%s9007_s7 + $0xd1] ss:$0 sm:$0xff] }
 0xa84   : > { %8162 = vmatmul.mubr.msk.f32.gmra.mrb[184].mxu0 %vm398_vm1, %v11760_v26  ;;  %v6899_v26 = vld [vmem:[%s9007_s7 + $0xd0] ss:$0 sm:$0xff] }
 0xa85   : > { %8164 = vmatprep.mubr.msk.f32.mxu0 %vm398_vm1, %v11761_v28 }
 0xa88   : > { %8165 = vmatmul.mubr.msk.f32.gmra.mrb[186].mxu0 %vm398_vm1, %v11762_v18 }
 0xa89   : > { %8167 = vmatprep.mubr.msk.f32.mxu0 %vm398_vm1, %v11763_v34 }
 0xa8c   : > { %8168 = vmatmul.mubr.msk.f32.gmra.mrb[188].mxu0 %vm398_vm1, %v11764_v24 }
 0xa8d   : > { %8170 = vmatprep.mubr.msk.f32.mxu0 %vm398_vm1, %v11765_v38  ;;  %v11773_v38 = vld [vmem:[#allocation47_spill] sm:$0xff] }
 0xa90   : > { %8171 = vmatmul.mubr.msk.f32.gmra.mrb[190].mxu0 %vm398_vm1, %v11766_v20  ;;  %v11774_v20 = vld [vmem:[#allocation48_spill] sm:$0xff] }
 0xa91   : > { %8173 = vmatprep.mubr.msk.f32.mxu0 %vm398_vm1, %v11767_v23  ;;  %v11775_v23 = vld [vmem:[#allocation49_spill] sm:$0xff] }
 0xa94   : > { %8174 = vmatmul.mubr.msk.f32.gmra.mrb[192].mxu0 %vm398_vm1, %v11768_v52  ;;  %v11776_v52 = vld [vmem:[#allocation50_spill] sm:$0xff] }
 0xa95   : > { %8176 = vmatprep.mubr.msk.f32.mxu0 %vm398_vm1, %v11769_v61  ;;  %v11777_v61 = vld [vmem:[#allocation51_spill] sm:$0xff] }
 0xa98   : > { %8177 = vmatmul.mubr.msk.f32.gmra.mrb[194].mxu0 %vm398_vm1, %v11770_v49  ;;  %v11778_v49 = vld [vmem:[#allocation52_spill] sm:$0xff] }
 0xa99   : > { %8179 = vmatprep.mubr.msk.f32.mxu0 %vm398_vm1, %v11771_v47  ;;  %v11779_v47 = vld [vmem:[#allocation53_spill] sm:$0xff] }
 0xa9c   : > { %8180 = vmatmul.mubr.msk.f32.gmra.mrb[196].mxu0 %vm398_vm1, %v11772_v45  ;;  %v11780_v45 = vld [vmem:[#allocation54_spill] sm:$0xff] }
 0xa9d   : > { %8182 = vmatprep.mubr.msk.f32.mxu0 %vm398_vm1, %v11773_v38  ;;  %v11781_v38 = vld [vmem:[#allocation55_spill] sm:$0xff] }
 0xaa0   : > { %8183 = vmatmul.mubr.msk.f32.gmra.mrb[198].mxu0 %vm398_vm1, %v11774_v20  ;;  %v11782_v20 = vld [vmem:[#allocation56_spill] sm:$0xff] }
 0xaa1   : > { %8185 = vmatprep.mubr.msk.f32.mxu0 %vm398_vm1, %v11775_v23 }
 0xaa4   : > { %8186 = vmatmul.mubr.msk.f32.gmra.mrb[200].mxu0 %vm398_vm1, %v11776_v52  ;;  %v11783_v52 = vld [vmem:[#allocation57_spill] sm:$0xff] }
 0xaa5   : > { %8188 = vmatprep.mubr.msk.f32.mxu0 %vm398_vm1, %v11777_v61  ;;  %v11784_v61 = vld [vmem:[#allocation58_spill] sm:$0xff] }
 0xaa8   : > { %8189 = vmatmul.mubr.msk.f32.gmra.mrb[202].mxu0 %vm398_vm1, %v11778_v49  ;;  %v11785_v49 = vld [vmem:[#allocation59_spill] sm:$0xff] }
 0xaa9   : > { %8191 = vmatprep.mubr.msk.f32.mxu0 %vm398_vm1, %v11779_v47  ;;  %v11786_v47 = vld [vmem:[#allocation60_spill] sm:$0xff] }
 0xaac   : > { %8192 = vmatmul.mubr.msk.f32.gmra.mrb[204].mxu0 %vm398_vm1, %v11780_v45  ;;  %v11787_v45 = vld [vmem:[#allocation61_spill] sm:$0xff] }
 0xaad   : > { %8194 = vmatprep.mubr.msk.f32.mxu0 %vm398_vm1, %v11781_v38  ;;  %v11788_v38 = vld [vmem:[#allocation62_spill] sm:$0xff] }
 0xab0   : > { %8195 = vmatmul.mubr.msk.f32.gmra.mrb[206].mxu0 %vm398_vm1, %v11782_v20 }
 0xab1   : > { %8197 = vmatprep.mubr.msk.f32.mxu0 %vm398_vm1, %v11783_v52 }
 0xab4   : > { %8198 = vmatmul.mubr.msk.f32.gmra.mrb[208].mxu0 %vm398_vm1, %v11784_v61 }
 0xab5   : > { %8200 = vmatprep.mubr.msk.f32.mxu0 %vm398_vm1, %v11785_v49 }
 0xab8   : > { %8201 = vmatmul.mubr.msk.f32.gmra.mrb[210].mxu0 %vm398_vm1, %v11786_v47 }
 0xab9   : > { %8203 = vmatprep.mubr.msk.f32.mxu0 %vm398_vm1, %v11787_v45 }
 0xabc   : > { %8204 = vmatmul.mubr.msk.f32.gmra.mrb[212].mxu0 %vm398_vm1, %v11788_v38 }
 0xb03   : > { %v8100_v20 = vpop.f32.mrb[142].mxu0 }
 0xb04   : > { %v4308_v23 = vpop.f32.mrb[143].mxu0  ;;  %v4673_v21 = vmul.f32 %v8100_v20, %v6899_v26 }
 0xb05   : > { %v4672_v43 = vmul.f32 %v6899_v26, %v4308_v23 }
 0xb07   : > { %v8103_v24 = vpop.f32.mrb[144].mxu0 }
 0xb08   : > { %v4318_v34 = vpop.f32.mrb[145].mxu0  ;;  %v4675_v38 = vmul.f32 %v8103_v24, %v6899_v26  ;;  %v6901_v24 = vld [vmem:[%s9007_s7 + $0xd2] ss:$0 sm:$0xff] }
 0xb09   : > { %v4674_v59 = vmul.f32 %v6899_v26, %v4318_v34 }
 0xb0b   : > { %v8106_v52 = vpop.f32.mrb[146].mxu0 }
 0xb0c   : > { %v4328_v18 = vpop.f32.mrb[147].mxu0  ;;  %v4677_v51 = vmul.f32 %v8106_v52, %v6899_v26 }
 0xb0d   : > { %v4676_v20 = vmul.f32 %v6899_v26, %v4328_v18 }
 0xb0f   : > { %v8109_v28 = vpop.f32.mrb[148].mxu0 }
 0xb10   : > { %v4338_v61 = vpop.f32.mrb[149].mxu0 }
 0xb13   : > { %v8112_v49 = vpop.f32.mrb[150].mxu0 }
 0xb14   : > { %v4686_v57 = vmul.f32 %v8112_v49, %v6900_v16  ;;  %v4348_v47 = vpop.f32.mrb[151].mxu0 }
 0xb15   : > { %v4685_v56 = vmul.f32 %v6900_v16, %v4348_v47 }
 0xb16   : > { %v4694_v45 = vadd.f32 %v4686_v57, %v4673_v21  ;;  %v4679_v57 = vmul.f32 %v8109_v28, %v6899_v26  ;;  %v4678_v21 = vmul.f32 %v6899_v26, %v4338_v61 }
 0xb17   : > { %v4693_v33 = vadd.f32 %v4685_v56, %v4672_v43  ;;  %v8115_v62 = vpop.f32.mrb[152].mxu0 }
 0xb18   : > { %v4688_v39 = vmul.f32 %v8115_v62, %v6900_v16  ;;  %v4358_v55 = vpop.f32.mrb[153].mxu0 }
 0xb19   : > { %v4687_v48 = vmul.f32 %v6900_v16, %v4358_v55 }
 0xb1a   : > { %v4696_v27 = vadd.f32 %v4688_v39, %v4675_v38 }
 0xb1b   : > { %v4695_v0 = vadd.f32 %v4687_v48, %v4674_v59  ;;  %v8118_v15 = vpop.f32.mrb[154].mxu0 }
 0xb1c   : > { %v4690_v53 = vmul.f32 %v8118_v15, %v6900_v16  ;;  %v4368_v40 = vpop.f32.mrb[155].mxu0 }
 0xb1d   : > { %v4689_v49 = vmul.f32 %v6900_v16, %v4368_v40 }
 0xb1e   : > { %v4698_v36 = vadd.f32 %v4690_v53, %v4677_v51 }
 0xb1f   : > { %v4697_v23 = vadd.f32 %v4689_v49, %v4676_v20  ;;  %v8121_v47 = vpop.f32.mrb[156].mxu0 }
 0xb20   : > { %v4692_v56 = vmul.f32 %v8121_v47, %v6900_v16  ;;  %v4378_v43 = vpop.f32.mrb[157].mxu0 }
 0xb21   : > { %v4691_v62 = vmul.f32 %v6900_v16, %v4378_v43 }
 0xb22   : > { %v4700_v34 = vadd.f32 %v4692_v56, %v4679_v57 }
 0xb23   : > { %v4699_v55 = vadd.f32 %v4691_v62, %v4678_v21  ;;  %v8124_v39 = vpop.f32.mrb[158].mxu0  ;;  %v6902_v62 = vld [vmem:[%s9007_s7 + $0xd3] ss:$0 sm:$0xff] }
 0xb24   : > { %v4707_v38 = vmul.f32 %v8124_v39, %v6901_v24  ;;  %v4388_v48 = vpop.f32.mrb[159].mxu0 }
 0xb25   : > { %v4706_v59 = vmul.f32 %v6901_v24, %v4388_v48 }
 0xb26   : > { %v4715_v52 = vadd.f32 %v4707_v38, %v4694_v45 }
 0xb27   : > { %v4714_v15 = vadd.f32 %v4706_v59, %v4693_v33  ;;  %v8127_v12 = vpop.f32.mrb[160].mxu0 }
 0xb28   : > { %v4709_v40 = vmul.f32 %v8127_v12, %v6901_v24  ;;  %v4398_v53 = vpop.f32.mrb[161].mxu0 }
 0xb29   : > { %v4708_v51 = vmul.f32 %v6901_v24, %v4398_v53 }
 0xb2a   : > { %v4717_v18 = vadd.f32 %v4709_v40, %v4696_v27 }
 0xb2b   : > { %v4716_v28 = vadd.f32 %v4708_v51, %v4695_v0  ;;  %v8130_v20 = vpop.f32.mrb[162].mxu0 }
 0xb2c   : > { %v4711_v49 = vmul.f32 %v8130_v20, %v6901_v24  ;;  %v4408_v26 = vpop.f32.mrb[163].mxu0 }
 0xb2d   : > { %v4710_v16 = vmul.f32 %v6901_v24, %v4408_v26 }
 0xb2e   : > { %v4719_v61 = vadd.f32 %v4711_v49, %v4698_v36 }
 0xb2f   : > { %v4718_v47 = vadd.f32 %v4710_v16, %v4697_v23  ;;  %v8133_v57 = vpop.f32.mrb[164].mxu0 }
 0xb30   : > { %v4713_v56 = vmul.f32 %v8133_v57, %v6901_v24  ;;  %v4418_v43 = vpop.f32.mrb[165].mxu0 }
 0xb31   : > { %v4712_v21 = vmul.f32 %v6901_v24, %v4418_v43 }
 0xb32   : > { %v4721_v45 = vadd.f32 %v4713_v56, %v4700_v34 }
 0xb33   : > { %v4720_v33 = vadd.f32 %v4712_v21, %v4699_v55  ;;  %v8136_v39 = vpop.f32.mrb[166].mxu0  ;;  %v6903_v21 = vld [vmem:[%s9007_s7 + $0xd4] ss:$0 sm:$0xff] }
 0xb34   : > { %v4728_v38 = vmul.f32 %v8136_v39, %v6902_v62  ;;  %v4428_v12 = vpop.f32.mrb[167].mxu0 }
 0xb35   : > { %v4727_v48 = vmul.f32 %v6902_v62, %v4428_v12 }
 0xb36   : > { %v4736_v59 = vadd.f32 %v4728_v38, %v4715_v52 }
 0xb37   : > { %v4735_v27 = vadd.f32 %v4727_v48, %v4714_v15  ;;  %v8139_v0 = vpop.f32.mrb[168].mxu0 }
 0xb38   : > { %v4730_v40 = vmul.f32 %v8139_v0, %v6902_v62  ;;  %v4438_v53 = vpop.f32.mrb[169].mxu0 }
 0xb39   : > { %v4729_v51 = vmul.f32 %v6902_v62, %v4438_v53 }
 0xb3a   : > { %v4738_v36 = vadd.f32 %v4730_v40, %v4717_v18 }
 0xb3b   : > { %v4737_v23 = vadd.f32 %v4729_v51, %v4716_v28  ;;  %v8142_v20 = vpop.f32.mrb[170].mxu0 }
 0xb3c   : > { %v4732_v49 = vmul.f32 %v8142_v20, %v6902_v62  ;;  %v4448_v26 = vpop.f32.mrb[171].mxu0 }
 0xb3d   : > { %v4731_v24 = vmul.f32 %v6902_v62, %v4448_v26 }
 0xb3e   : > { %v4740_v16 = vadd.f32 %v4732_v49, %v4719_v61 }
 0xb3f   : > { %v4739_v34 = vadd.f32 %v4731_v24, %v4718_v47  ;;  %v8145_v55 = vpop.f32.mrb[172].mxu0 }
 0xb40   : > { %v4734_v57 = vmul.f32 %v8145_v55, %v6902_v62  ;;  %v4458_v56 = vpop.f32.mrb[173].mxu0 }
 0xb41   : > { %v4733_v43 = vmul.f32 %v6902_v62, %v4458_v56 }
 0xb42   : > { %v4742_v52 = vadd.f32 %v4734_v57, %v4721_v45 }
 0xb43   : > { %v4741_v15 = vadd.f32 %v4733_v43, %v4720_v33  ;;  %v8148_v39 = vpop.f32.mrb[174].mxu0  ;;  %v6904_v43 = vld [vmem:[%s9007_s7 + $0xd5] ss:$0 sm:$0xff] }
 0xb44   : > { %v4749_v38 = vmul.f32 %v8148_v39, %v6903_v21  ;;  %v4468_v12 = vpop.f32.mrb[175].mxu0 }
 0xb45   : > { %v4748_v48 = vmul.f32 %v6903_v21, %v4468_v12 }
 0xb46   : > { %v4757_v0 = vadd.f32 %v4749_v38, %v4736_v59 }
 0xb47   : > { %v4756_v18 = vadd.f32 %v4748_v48, %v4735_v27  ;;  %v8151_v28 = vpop.f32.mrb[176].mxu0 }
 0xb48   : > { %v4751_v40 = vmul.f32 %v8151_v28, %v6903_v21  ;;  %v4478_v53 = vpop.f32.mrb[177].mxu0 }
 0xb49   : > { %v4750_v51 = vmul.f32 %v6903_v21, %v4478_v53 }
 0xb4a   : > { %v4759_v61 = vadd.f32 %v4751_v40, %v4738_v36 }
 0xb4b   : > { %v4758_v47 = vadd.f32 %v4750_v51, %v4737_v23  ;;  %v8154_v20 = vpop.f32.mrb[178].mxu0 }
 0xb4c   : > { %v4753_v49 = vmul.f32 %v8154_v20, %v6903_v21  ;;  %v4488_v26 = vpop.f32.mrb[179].mxu0 }
 0xb4d   : > { %v4752_v62 = vmul.f32 %v6903_v21, %v4488_v26 }
 0xb4e   : > { %v4761_v24 = vadd.f32 %v4753_v49, %v4740_v16 }
 0xb4f   : > { %v4760_v45 = vadd.f32 %v4752_v62, %v4739_v34  ;;  %v8157_v33 = vpop.f32.mrb[180].mxu0 }
 0xb50   : > { %v4755_v55 = vmul.f32 %v8157_v33, %v6903_v21  ;;  %v4498_v57 = vpop.f32.mrb[181].mxu0 }
 0xb51   : > { %v4754_v56 = vmul.f32 %v6903_v21, %v4498_v57 }
 0xb52   : > { %v4763_v59 = vadd.f32 %v4755_v55, %v4742_v52 }
 0xb53   : > { %v4762_v27 = vadd.f32 %v4754_v56, %v4741_v15  ;;  %v8160_v39 = vpop.f32.mrb[182].mxu0  ;;  %v6905_v56 = vld [vmem:[%s9007_s7 + $0xd6] ss:$0 sm:$0xff] }
 0xb54   : > { %v4770_v38 = vmul.f32 %v8160_v39, %v6904_v43  ;;  %v4508_v12 = vpop.f32.mrb[183].mxu0 }
 0xb55   : > { %v4769_v48 = vmul.f32 %v6904_v43, %v4508_v12 }
 0xb56   : > { %v4778_v28 = vadd.f32 %v4770_v38, %v4757_v0 }
 0xb57   : > { %v4777_v36 = vadd.f32 %v4769_v48, %v4756_v18  ;;  %v8163_v23 = vpop.f32.mrb[184].mxu0 }
 0xb58   : > { %v4772_v40 = vmul.f32 %v8163_v23, %v6904_v43  ;;  %v4518_v53 = vpop.f32.mrb[185].mxu0 }
 0xb59   : > { %v4771_v51 = vmul.f32 %v6904_v43, %v4518_v53 }
 0xb5a   : > { %v4780_v16 = vadd.f32 %v4772_v40, %v4759_v61 }
 0xb5b   : > { %v4779_v34 = vadd.f32 %v4771_v51, %v4758_v47  ;;  %v8166_v20 = vpop.f32.mrb[186].mxu0 }
 0xb5c   : > { %v4774_v49 = vmul.f32 %v8166_v20, %v6904_v43  ;;  %v4528_v26 = vpop.f32.mrb[187].mxu0 }
 0xb5d   : > { %v4773_v21 = vmul.f32 %v6904_v43, %v4528_v26 }
 0xb5e   : > { %v4782_v62 = vadd.f32 %v4774_v49, %v4761_v24 }
 0xb5f   : > { %v4781_v52 = vadd.f32 %v4773_v21, %v4760_v45  ;;  %v8169_v15 = vpop.f32.mrb[188].mxu0 }
 0xb60   : > { %v4776_v33 = vmul.f32 %v8169_v15, %v6904_v43  ;;  %v4538_v55 = vpop.f32.mrb[189].mxu0 }
 0xb61   : > { %v4775_v57 = vmul.f32 %v6904_v43, %v4538_v55 }
 0xb62   : > { %v4784_v0 = vadd.f32 %v4776_v33, %v4763_v59 }
 0xb63   : > { %v4783_v18 = vadd.f32 %v4775_v57, %v4762_v27  ;;  %v8172_v39 = vpop.f32.mrb[190].mxu0  ;;  %v6906_v57 = vld [vmem:[%s9007_s7 + $0xd7] ss:$0 sm:$0xff] }
 0xb64   : > { %v4791_v38 = vmul.f32 %v8172_v39, %v6905_v56  ;;  %v4548_v12 = vpop.f32.mrb[191].mxu0 }
 0xb65   : > { %v4790_v48 = vmul.f32 %v6905_v56, %v4548_v12 }
 0xb66   : > { %v4799_v23 = vadd.f32 %v4791_v38, %v4778_v28 }
 0xb67   : > { %v4798_v61 = vadd.f32 %v4790_v48, %v4777_v36  ;;  %v8175_v47 = vpop.f32.mrb[192].mxu0 }
 0xb68   : > { %v4793_v40 = vmul.f32 %v8175_v47, %v6905_v56  ;;  %v4558_v53 = vpop.f32.mrb[193].mxu0 }
 0xb69   : > { %v4792_v51 = vmul.f32 %v6905_v56, %v4558_v53 }
 0xb6a   : > { %v4801_v24 = vadd.f32 %v4793_v40, %v4780_v16 }
 0xb6b   : > { %v4800_v45 = vadd.f32 %v4792_v51, %v4779_v34  ;;  %v8178_v20 = vpop.f32.mrb[194].mxu0 }
 0xb6c   : > { %v4795_v49 = vmul.f32 %v8178_v20, %v6905_v56  ;;  %v4568_v26 = vpop.f32.mrb[195].mxu0 }
 0xb6d   : > { %v4794_v43 = vmul.f32 %v6905_v56, %v4568_v26 }
 0xb6e   : > { %v4803_v21 = vadd.f32 %v4795_v49, %v4782_v62 }
 0xb6f   : > { %v4802_v59 = vadd.f32 %v4794_v43, %v4781_v52  ;;  %v8181_v27 = vpop.f32.mrb[196].mxu0 }
 0xb70   : > { %v4797_v15 = vmul.f32 %v8181_v27, %v6905_v56  ;;  %v4578_v33 = vpop.f32.mrb[197].mxu0 }
 0xb71   : > { %v4796_v55 = vmul.f32 %v6905_v56, %v4578_v33 }
 0xb72   : > { %v4805_v28 = vadd.f32 %v4797_v15, %v4784_v0 }
 0xb73   : > { %v4804_v36 = vadd.f32 %v4796_v55, %v4783_v18  ;;  %v8184_v39 = vpop.f32.mrb[198].mxu0 }
 0xb74   : > { %v4812_v38 = vmul.f32 %v8184_v39, %v6906_v57  ;;  %v4588_v12 = vpop.f32.mrb[199].mxu0 }
 0xb75   : > { %v4811_v48 = vmul.f32 %v6906_v57, %v4588_v12 }
 0xb76   : > { %v4820_v47 = vadd.f32 %v4812_v38, %v4799_v23  ;;  %v6907_v23 = vld [vmem:[%s9007_s7 + $0xd8] ss:$0 sm:$0xff] }
 0xb77   : > { %v4819_v16 = vadd.f32 %v4811_v48, %v4798_v61  ;;  %v8187_v34 = vpop.f32.mrb[200].mxu0  ;;  %v6908_v48 = vld [vmem:[%s9027_s19 + $0xa] ss:$0 sm:$0xff] }
 0xb78   : > { %v4814_v40 = vmul.f32 %v8187_v34, %v6906_v57  ;;  %v4598_v53 = vpop.f32.mrb[201].mxu0 }
 0xb79   : > { %v4813_v51 = vmul.f32 %v6906_v57, %v4598_v53 }
 0xb7a   : > { %v4822_v62 = vadd.f32 %v4814_v40, %v4801_v24 }
 0xb7b   : > { %v4821_v52 = vadd.f32 %v4813_v51, %v4800_v45  ;;  %v8190_v20 = vpop.f32.mrb[202].mxu0 }
 0xb7c   : > { %v4816_v49 = vmul.f32 %v8190_v20, %v6906_v57  ;;  %v4608_v56 = vpop.f32.mrb[203].mxu0 }
 0xb7d   : > { %v4815_v26 = vmul.f32 %v6906_v57, %v4608_v56 }
 0xb7e   : > { %v4824_v0 = vadd.f32 %v4816_v49, %v4803_v21 }
 0xb7f   : > { %v4823_v18 = vadd.f32 %v4815_v26, %v4802_v59  ;;  %v8193_v43 = vpop.f32.mrb[204].mxu0 }
 0xb80   : > { %v4818_v27 = vmul.f32 %v8193_v43, %v6906_v57  ;;  %v4618_v15 = vpop.f32.mrb[205].mxu0 }
 0xb81   : > { %v4817_v33 = vmul.f32 %v6906_v57, %v4618_v15 }
 0xb82   : > { %v4826_v61 = vadd.f32 %v4818_v27, %v4805_v28 }
 0xb83   : > { %v4825_v55 = vadd.f32 %v4817_v33, %v4804_v36  ;;  %v8196_v39 = vpop.f32.mrb[206].mxu0 }
 0xb84   : > { %v4833_v38 = vmul.f32 %v8196_v39, %v6907_v23  ;;  %v4628_v12 = vpop.f32.mrb[207].mxu0 }
 0xb85   : > { %v4832_v24 = vmul.f32 %v6907_v23, %v4628_v12 }
 0xb86   : > { %v4841_v45 = vadd.f32 %v4833_v38, %v4820_v47 }
 0xb87   : > { %v4840_v34 = vadd.f32 %v4832_v24, %v4819_v16  ;;  %v8199_v40 = vpop.f32.mrb[208].mxu0 }
 0xb88   : > { %v4854_v53 = vadd.f32 %v6908_v48, %v4841_v45  ;;  %v4835_v51 = vmul.f32 %v8199_v40, %v6907_v23  ;;  %v4638_v20 = vpop.f32.mrb[209].mxu0 }
 0xb89   : > { %v4853_v21 = vadd.f32 %v6908_v48, %v4840_v34  ;;  %v4834_v59 = vmul.f32 %v6907_v23, %v4638_v20 }
 0xb8a   : > { %v4843_v49 = vadd.f32 %v4835_v51, %v4822_v62  ;;  %v10752_v56 = vadd.f32 %v4854_v53, %v10568_v50 }
 0xb8b   : > { %v4842_v57 = vadd.f32 %v4834_v59, %v4821_v52  ;;  %v8202_v28 = vpop.f32.mrb[210].mxu0  ;;  %v10757_v47 = vadd.f32 %v4853_v21, %v10571_v14 }
 0xb8c   : > { %v4856_v36 = vadd.f32 %v6908_v48, %v4843_v49  ;;  %v4837_v26 = vmul.f32 %v8202_v28, %v6907_v23  ;;  %v4648_v43 = vpop.f32.mrb[211].mxu0  ;;  %v4874_v27 = vsel %vm1244_vm2, %v10752_v56, 0.0 }
 0xb8d   : > { %v4836_v16 = vmul.f32 %v6907_v23, %v4648_v43  ;;  %4875 = vadd.xlane.f32.xlu1 %v4874_v27  ;;  %v4855_v62 = vadd.f32 %v6908_v48, %v4842_v57  ;;  %v4871_v52 = vsel %vm1244_vm2, %v10757_v47, 0.0 }
 0xb8e   : > { %v4845_v15 = vadd.f32 %v4837_v26, %v4824_v0  ;;  %v10762_v12 = vadd.f32 %v4856_v36, %v10576_v30 }
 0xb8f   : > { %v4844_v33 = vadd.f32 %v4836_v16, %v4823_v18  ;;  %v8205_v39 = vpop.f32.mrb[212].mxu0  ;;  %v10767_v0 = vadd.f32 %v4855_v62, %v10579_v37 }
 0xb90   : > { %v4839_v38 = vmul.f32 %v8205_v39, %v6907_v23  ;;  %v4658_v50 = vpop.f32.mrb[213].mxu0  ;;  %v4858_v14 = vadd.f32 %v6908_v48, %v4845_v15  ;;  %v4880_v40 = vsel %vm1244_vm2, %v10762_v12, 0.0 }
 0xb91   : > { %v4838_v24 = vmul.f32 %v6907_v23, %v4658_v50  ;;  %4872 = vadd.xlane.f32.xlu1 %v4871_v52  ;;  %v4857_v18 = vadd.f32 %v6908_v48, %v4844_v33  ;;  %v4877_v53 = vsel %vm1244_vm2, %v10767_v0, 0.0 }
 0xb92   : > { %v4847_v45 = vadd.f32 %v4839_v38, %v4826_v61  ;;  %v10772_v51 = vadd.f32 %v4858_v14, %v10584_v35 }
 0xb93   : > { %v4846_v34 = vadd.f32 %v4838_v24, %v4825_v55  ;;  %v10777_v61 = vadd.f32 %v4857_v18, %v10587_v22 }
 0xb94   : > { %v4886_v23 = vsel %vm1244_vm2, %v10772_v51, 0.0  ;;  %v4860_v55 = vadd.f32 %v6908_v48, %v4847_v45 }
 0xb95   : > { %4881 = vadd.xlane.f32.xlu1 %v4880_v40  ;;  %v4859_v30 = vadd.f32 %v6908_v48, %v4846_v34  ;;  %v4883_v37 = vsel %vm1244_vm2, %v10777_v61, 0.0 }
 0xb96   : > { %v10787_v21 = vadd.f32 %v4860_v55, %v10592_v54 }
 0xb97   : > { %v10782_v20 = vadd.f32 %v4859_v30, %v10595_v46 }
 0xb98   : > { %v4892_v22 = vsel %vm1244_vm2, %v10787_v21, 0.0 }
 0xb99   : > { %4878 = vadd.xlane.f32.xlu1 %v4877_v53  ;;  %v4889_v35 = vsel %vm1244_vm2, %v10782_v20, 0.0 }
 0xb9d   : > { %4887 = vadd.xlane.f32.xlu1 %v4886_v23 }
 0xba1   : > { %4884 = vadd.xlane.f32.xlu1 %v4883_v37 }
 0xba5   : > { %4890 = vadd.xlane.f32.xlu1 %v4889_v35 }
 0xba9   : > { %4893 = vadd.xlane.f32.xlu1 %v4892_v22 }
 0xc1a   : > { %v4876_v59 = vpop.xlane.xlu1 %4875 }
 0xc1b   : > { %v4896_v48 = vmul.f32 0.0625, %v4876_v59 }
 0xc1d   : > { %v10792_v49 = vsub.f32 %v10752_v56, %v4896_v48 }
 0xc1e   : > { %v4873_v57 = vpop.xlane.xlu1 %4872 }
 0xc1f   : > { %v4895_v46 = vmul.f32 0.0625, %v4873_v57  ;;  %v4912_v28 = vmul.f32 %v10792_v49, %v10792_v49 }
 0xc21   : > { %v10797_v36 = vsub.f32 %v10757_v47, %v4895_v46  ;;  %v4922_v54 = vsel %vm1244_vm2, %v4912_v28, 0.0 }
 0xc22   : > { %v4882_v26 = vpop.xlane.xlu1 %4881  ;;  %4923 = vadd.xlane.f32.xlu1 %v4922_v54 }
 0xc23   : > { %v4898_v43 = vmul.f32 0.0625, %v4882_v26  ;;  %v4911_v27 = vmul.f32 %v10797_v36, %v10797_v36 }
 0xc25   : > { %v10803_v16 = vsub.f32 %v10762_v12, %v4898_v43  ;;  %v4919_v15 = vsel %vm1244_vm2, %v4911_v27, 0.0  ;;  %v4999_v27 = vld [vmem:[%s9007_s7] sm:$0xff] }
 0xc26   : > { %v4879_v33 = vpop.xlane.xlu1 %4878  ;;  %4920 = vadd.xlane.f32.xlu1 %v4919_v15  ;;  %v5000_v15 = vld [vmem:[%s9007_s7 + $0x8] sm:$0xff] }
 0xc27   : > { %v4897_v39 = vmul.f32 0.0625, %v4879_v33  ;;  %v4914_v62 = vmul.f32 %v10803_v16, %v10803_v16  ;;  %v8490_v33 = vpack.c.bf16 %v5000_v15, %v4999_v27 }
 0xc29   : > { %v10809_v38 = vsub.f32 %v10767_v0, %v4897_v39  ;;  %v4928_v50 = vsel %vm1244_vm2, %v4914_v62, 0.0  ;;  %8491 = vmatprep.subr.bf16.mxu1 %v8490_v33 }
 0xc2a   : > { %v4888_v52 = vpop.xlane.xlu1 %4887  ;;  %4929 = vadd.xlane.f32.xlu1 %v4928_v50  ;;  %8493 = vmatpush3.bf16.msra.mxu1 %v8490_v33  ;;  %v6910_v33 = vld [vmem:[%s9027_s19 + $0xc] ss:$0 sm:$0xff] }
 0xc2b   : > { %v4900_v24 = vmul.f32 0.0625, %v4888_v52  ;;  %v4913_v45 = vmul.f32 %v10809_v38, %v10809_v38 }
 0xc2d   : > { %v10815_v34 = vsub.f32 %v10772_v51, %v4900_v24  ;;  %v4925_v14 = vsel %vm1244_vm2, %v4913_v45, 0.0 }
 0xc2e   : > { %v4885_v40 = vpop.xlane.xlu1 %4884  ;;  %4926 = vadd.xlane.f32.xlu1 %v4925_v14 }
 0xc2f   : > { %v4899_v18 = vmul.f32 0.0625, %v4885_v40  ;;  %v4916_v53 = vmul.f32 %v10815_v34, %v10815_v34 }
 0xc31   : > { %v10821_v30 = vsub.f32 %v10777_v61, %v4899_v18  ;;  %v4934_v23 = vsel %vm1244_vm2, %v4916_v53, 0.0 }
 0xc32   : > { %4935 = vadd.xlane.f32.xlu1 %v4934_v23  ;;  %v4891_v55 = vpop.xlane.xlu1 %4890 }
 0xc33   : > { %v4901_v37 = vmul.f32 0.0625, %v4891_v55  ;;  %v4915_v35 = vmul.f32 %v10821_v30, %v10821_v30 }
 0xc35   : > { %v10827_v22 = vsub.f32 %v10782_v20, %v4901_v37  ;;  %v4931_v59 = vsel %vm1244_vm2, %v4915_v35, 0.0 }
 0xc36   : > { %4932 = vadd.xlane.f32.xlu1 %v4931_v59  ;;  %v4894_v48 = vpop.xlane.xlu1 %4893 }
 0xc37   : > { %v4902_v57 = vmul.f32 0.0625, %v4894_v48  ;;  %v4917_v46 = vmul.f32 %v10827_v22, %v10827_v22 }
 0xc39   : > { %v10833_v28 = vsub.f32 %v10787_v21, %v4902_v57  ;;  %v4937_v54 = vsel %vm1244_vm2, %v4917_v46, 0.0  ;;  %v6909_v57 = vld [vmem:[%s9027_s19 + $0xb] ss:$0 sm:$0xff] }
 0xc3a   : > { %4938 = vadd.xlane.f32.xlu1 %v4937_v54 }
 0xc3b   : > { %v4918_v26 = vmul.f32 %v10833_v28, %v10833_v28 }
 0xc3d   : > { %v4940_v43 = vsel %vm1244_vm2, %v4918_v26, 0.0 }
 0xc3e   : > { %4941 = vadd.xlane.f32.xlu1 %v4940_v43 }
 0xcaf   : > { %v4924_v39 = vpop.xlane.xlu1 %4923 }
 0xcb0   : > { %v4944_v62 = vmul.f32 0.0625, %v4924_v39 }
 0xcb2   : > { %v4952_v50 = vadd.f32 1e-05, %v4944_v62 }
 0xcb3   : > { %v4921_v52 = vpop.xlane.xlu1 %4920 }
 0xcb4   : > { %8705 = vrsqrt.f32 %v4952_v50  ;;  %v4943_v24 = vmul.f32 0.0625, %v4921_v52 }
 0xcb6   : > { %v4951_v45 = vadd.f32 1e-05, %v4943_v24 }
 0xcb7   : > { %v4930_v14 = vpop.xlane.xlu1 %4929 }
 0xcb8   : > { %8707 = vrsqrt.f32 %v4951_v45  ;;  %v4946_v40 = vmul.f32 0.0625, %v4930_v14 }
 0xcba   : > { %v4954_v18 = vadd.f32 1e-05, %v4946_v40 }
 0xcbb   : > { %v4927_v53 = vpop.xlane.xlu1 %4926 }
 0xcbc   : > { %8709 = vrsqrt.f32 %v4954_v18  ;;  %v4945_v23 = vmul.f32 0.0625, %v4927_v53 }
 0xcbe   : > { %v8706_v55 = vpop.eup %8705  ;;  %v4953_v37 = vadd.f32 1e-05, %v4945_v23 }
 0xcbf   : > { %v4936_v35 = vpop.xlane.xlu1 %4935  ;;  %v4968_v59 = vmul.f32 %v8706_v55, %v10792_v49 }
 0xcc0   : > { %8711 = vrsqrt.f32 %v4953_v37  ;;  %v4948_v48 = vmul.f32 0.0625, %v4936_v35 }
 0xcc1   : > { %v4980_v27 = vmul.f32 %v6909_v57, %v4968_v59 }
 0xcc2   : > { %v8708_v46 = vpop.eup %8707  ;;  %v4956_v54 = vadd.f32 1e-05, %v4948_v48 }
 0xcc3   : > { %v4933_v26 = vpop.xlane.xlu1 %4932  ;;  %v4967_v43 = vmul.f32 %v8708_v46, %v10797_v36  ;;  %v4992_v45 = vadd.f32 %v6910_v33, %v4980_v27 }
 0xcc4   : > { %8713 = vrsqrt.f32 %v4956_v54  ;;  %v4947_v15 = vmul.f32 0.0625, %v4933_v26 }
 0xcc5   : > { %v4979_v39 = vmul.f32 %v6909_v57, %v4967_v43 }
 0xcc6   : > { %v8710_v62 = vpop.eup %8709  ;;  %v4955_v50 = vadd.f32 1e-05, %v4947_v15 }
 0xcc7   : > { %v4939_v52 = vpop.xlane.xlu1 %4938  ;;  %v4991_v24 = vadd.f32 %v6910_v33, %v4979_v39  ;;  %v4970_v14 = vmul.f32 %v8710_v62, %v10803_v16 }
 0xcc8   : > { %8715 = vrsqrt.f32 %v4955_v50  ;;  %v4949_v49 = vmul.f32 0.0625, %v4939_v52 }
 0xcc9   : > { %8210 = vmatprep.mubr.msk.f32.mxu1 %vm1244_vm2, %v4991_v24  ;;  %v4982_v55 = vmul.f32 %v6909_v57, %v4970_v14 }
 0xcca   : > { %v8712_v40 = vpop.eup %8711  ;;  %v4957_v18 = vadd.f32 1e-05, %v4949_v49  ;;  %8211 = vmatmul.mubr.msk.f32.vlgmr.msra.gmra.mrb[148].mxu1 %vm1244_vm2, %v4992_v45 }
 0xccb   : > { %v4942_v36 = vpop.xlane.xlu1 %4941  ;;  %v4969_v53 = vmul.f32 %v8712_v40, %v10809_v38  ;;  %v4994_v46 = vadd.f32 %v6910_v33, %v4982_v55 }
 0xccc   : > { %8717 = vrsqrt.f32 %v4957_v18  ;;  %v4950_v23 = vmul.f32 0.0625, %v4942_v36 }
 0xccd   : > { %v4981_v37 = vmul.f32 %v6909_v57, %v4969_v53 }
 0xcce   : > { %v8714_v35 = vpop.eup %8713  ;;  %v4958_v59 = vadd.f32 1e-05, %v4950_v23 }
 0xccf   : > { %v4993_v48 = vadd.f32 %v6910_v33, %v4981_v37  ;;  %v4972_v16 = vmul.f32 %v8714_v35, %v10815_v34 }
 0xcd0   : > { %8719 = vrsqrt.f32 %v4958_v59 }
 0xcd1   : > { %8213 = vmatprep.mubr.msk.f32.mxu1 %vm1244_vm2, %v4993_v48  ;;  %v4984_v43 = vmul.f32 %v6909_v57, %v4972_v16 }
 0xcd2   : > { %v8716_v54 = vpop.eup %8715  ;;  %8214 = vmatmul.mubr.msk.f32.gmra.mrb[150].mxu1 %vm1244_vm2, %v4994_v46 }
 0xcd3   : > { %v4971_v26 = vmul.f32 %v8716_v54, %v10821_v30  ;;  %v4996_v62 = vadd.f32 %v6910_v33, %v4984_v43  ;;  %v11812_v43 = vld [vmem:[#allocation38_spill] sm:$0xff] }
 0xcd5   : > { %v4983_v38 = vmul.f32 %v6909_v57, %v4971_v26 }
 0xcd6   : > { %v8718_v27 = vpop.eup %8717 }
 0xcd7   : > { %v4995_v15 = vadd.f32 %v6910_v33, %v4983_v38  ;;  %v4973_v39 = vmul.f32 %v8718_v27, %v10827_v22  ;;  %v6911_v22 = vld [vmem:[%s9027_s19 + $0xd] ss:$0 sm:$0xff]  ;;  %v11814_v27 = vld [vmem:[#allocation40_spill] sm:$0xff] }
 0xcd8   : > { %v11813_v38 = vld [vmem:[#allocation39_spill] sm:$0xff] }
 0xcd9   : > { %8216 = vmatprep.mubr.msk.f32.mxu1 %vm1244_vm2, %v4995_v15  ;;  %v4985_v50 = vmul.f32 %v6909_v57, %v4973_v39  ;;  %v11815_v15 = vld [vmem:[#allocation41_spill] sm:$0xff]  ;;  %v11816_v39 = vld [vmem:[#allocation42_spill] sm:$0xff] }
 0xcda   : > { %v8720_v52 = vpop.eup %8719  ;;  %8217 = vmatmul.mubr.msk.f32.gmra.mrb[152].mxu1 %vm1244_vm2, %v4996_v62  ;;  %v11817_v62 = vld [vmem:[#allocation43_spill] sm:$0xff] }
 0xcdb   : > { %v4997_v34 = vadd.f32 %v6910_v33, %v4985_v50  ;;  %v4974_v24 = vmul.f32 %v8720_v52, %v10833_v28  ;;  %v11818_v50 = vld [vmem:[#allocation44_spill] sm:$0xff]  ;;  %v11819_v52 = vld [vmem:[#allocation45_spill] sm:$0xff] }
 0xcdd   : > { %8219 = vmatprep.mubr.msk.f32.mxu1 %vm1244_vm2, %v4997_v34  ;;  %v4986_v30 = vmul.f32 %v6909_v57, %v4974_v24  ;;  %v11820_v34 = vld [vmem:[#allocation46_spill] sm:$0xff]  ;;  %v11821_v24 = vld [vmem:[#allocation47_spill] sm:$0xff] }
 0xcdf   : > { %v4998_v45 = vadd.f32 %v6910_v33, %v4986_v30  ;;  %v11822_v30 = vld [vmem:[#allocation48_spill] sm:$0xff] }
 0xce1   : > { %8220 = vmatmul.mubr.msk.f32.gmra.mrb[154].mxu1 %vm1244_vm2, %v4998_v45  ;;  %v11823_v45 = vld [vmem:[#allocation49_spill] sm:$0xff] }
 0xce2   : > { %8238 = vmatprep.mubr.msk.f32.mxu1 %vm398_vm1, %v11638_v17 }
 0xd9d   : > { %v8212_v49 = vpop.f32.mrb[148].mxu1 }
 0xd9e   : > { %v10862_v14 = vadd.f32 %v8212_v49, %v6911_v22  ;;  %v5096_v40 = vpop.f32.mrb[149].mxu1  ;;  %v11825_v49 = vld [vmem:[#allocation51_spill] sm:$0xff] }
 0xd9f   : > { %v10864_v18 = vadd.f32 %v6911_v22, %v5096_v40  ;;  %v11826_v40 = vld [vmem:[#allocation52_spill] sm:$0xff] }
 0xda1   : > { %v8494_v36 = vpack.c.bf16 %v10862_v14, %v10864_v18 }
 0xda3   : > { %8495 = vmatprep.subr.bf16.mxu1 %v8494_v36 }
 0xda4   : > { %8497 = vmatpush3.bf16.msra.mxu1 %v8494_v36  ;;  %v11827_v36 = vld [vmem:[#allocation53_spill] sm:$0xff] }
 0xda5   : > { %v8215_v28 = vpop.f32.mrb[150].mxu1 }
 0xda6   : > { %v10868_v57 = vadd.f32 %v8215_v28, %v6911_v22  ;;  %v5106_v33 = vpop.f32.mrb[151].mxu1  ;;  %v11828_v28 = vld [vmem:[#allocation54_spill] sm:$0xff] }
 0xda7   : > { %v10870_v53 = vadd.f32 %v6911_v22, %v5106_v33  ;;  %v11829_v33 = vld [vmem:[#allocation55_spill] sm:$0xff] }
 0xda9   : > { %v8498_v17 = vpack.c.bf16 %v10868_v57, %v10870_v53 }
 0xdab   : > { %8499 = vmatprep.subr.bf16.mxu1 %v8498_v17 }
 0xdac   : > { %8501 = vmatpush3.bf16.msra.mxu1 %v8498_v17  ;;  %v11830_v17 = vld [vmem:[#allocation56_spill] sm:$0xff] }
 0xdad   : > { %v8218_v23 = vpop.f32.mrb[152].mxu1 }
 0xdae   : > { %v10874_v55 = vadd.f32 %v8218_v23, %v6911_v22  ;;  %v5116_v37 = vpop.f32.mrb[153].mxu1  ;;  %v11831_v23 = vld [vmem:[#allocation57_spill] sm:$0xff] }
 0xdaf   : > { %v10876_v35 = vadd.f32 %v6911_v22, %v5116_v37  ;;  %v11832_v37 = vld [vmem:[#allocation58_spill] sm:$0xff] }
 0xdb1   : > { %v8502_v59 = vpack.c.bf16 %v10874_v55, %v10876_v35 }
 0xdb3   : > { %8503 = vmatprep.subr.bf16.mxu1 %v8502_v59 }
 0xdb4   : > { %v8221_v48 = vpop.f32.mrb[154].mxu1  ;;  %8505 = vmatpush3.bf16.msra.mxu1 %v8502_v59  ;;  %v11833_v59 = vld [vmem:[#allocation59_spill] sm:$0xff] }
 0xdb5   : > { %v10880_v46 = vadd.f32 %v8221_v48, %v6911_v22  ;;  %v5126_v16 = vpop.f32.mrb[155].mxu1  ;;  %v11834_v48 = vld [vmem:[#allocation60_spill] sm:$0xff] }
 0xdb6   : > { %v10882_v54 = vadd.f32 %v6911_v22, %v5126_v16  ;;  %v11824_v22 = vld [vmem:[#allocation50_spill] sm:$0xff]  ;;  %v11835_v16 = vld [vmem:[#allocation61_spill] sm:$0xff] }
 0xdb8   : > { %v8506_v26 = vpack.c.bf16 %v10880_v46, %v10882_v54 }
 0xdba   : > { %8507 = vmatprep.subr.bf16.mxu1 %v8506_v26 }
 0xdbb   : > { %8509 = vmatpush3.bf16.msra.mxu1 %v8506_v26  ;;  %v11836_v26 = vld [vmem:[#allocation62_spill] sm:$0xff] }
 0xdbe   : > { %8239 = vmatmul.mubr.msk.f32.vlgmr.msra.gmra.mrb[156].mxu1 %vm398_vm1, %v8896_v1  ;;  %v11789_v1 = vld [vmem:[#allocation15_spill] sm:$0xff] }
 0xdbf   : > { %8241 = vmatprep.mubr.msk.f32.mxu1 %vm398_vm1, %v8901_v2  ;;  %v11790_v2 = vld [vmem:[#allocation16_spill] sm:$0xff] }
 0xdc2   : > { %8242 = vmatmul.mubr.msk.f32.gmra.mrb[158].mxu1 %vm398_vm1, %v8906_v3  ;;  %v11791_v3 = vld [vmem:[#allocation17_spill] sm:$0xff] }
 0xdc3   : > { %8244 = vmatprep.mubr.msk.f32.mxu1 %vm398_vm1, %v8911_v4  ;;  %v11792_v4 = vld [vmem:[#allocation18_spill] sm:$0xff] }
 0xdc6   : > { %8245 = vmatmul.mubr.msk.f32.gmra.mrb[160].mxu1 %vm398_vm1, %v8916_v5  ;;  %v11793_v5 = vld [vmem:[#allocation19_spill] sm:$0xff] }
 0xdc7   : > { %8247 = vmatprep.mubr.msk.f32.mxu1 %vm398_vm1, %v8921_v6  ;;  %v11794_v6 = vld [vmem:[#allocation20_spill] sm:$0xff] }
 0xdca   : > { %8248 = vmatmul.mubr.msk.f32.gmra.mrb[162].mxu1 %vm398_vm1, %v8926_v7  ;;  %v11795_v7 = vld [vmem:[#allocation21_spill] sm:$0xff] }
 0xdcb   : > { %8250 = vmatprep.mubr.msk.f32.mxu1 %vm398_vm1, %v8931_v8  ;;  %v11796_v8 = vld [vmem:[#allocation22_spill] sm:$0xff] }
 0xdce   : > { %8251 = vmatmul.mubr.msk.f32.gmra.mrb[164].mxu1 %vm398_vm1, %v8937_v9  ;;  %v11797_v9 = vld [vmem:[#allocation23_spill] sm:$0xff] }
 0xdcf   : > { %8253 = vmatprep.mubr.msk.f32.mxu1 %vm398_vm1, %v8942_v10  ;;  %v11798_v10 = vld [vmem:[#allocation24_spill] sm:$0xff] }
 0xdd2   : > { %8254 = vmatmul.mubr.msk.f32.gmra.mrb[166].mxu1 %vm398_vm1, %v8947_v11  ;;  %v11799_v11 = vld [vmem:[#allocation25_spill] sm:$0xff] }
 0xdd3   : > { %8256 = vmatprep.mubr.msk.f32.mxu1 %vm398_vm1, %v11639_v42  ;;  %v11800_v42 = vld [vmem:[#allocation26_spill] sm:$0xff] }
 0xdd6   : > { %8257 = vmatmul.mubr.msk.f32.gmra.mrb[168].mxu1 %vm398_vm1, %v11640_v60  ;;  %v11801_v60 = vld [vmem:[#allocation27_spill] sm:$0xff] }
 0xdd7   : > { %8259 = vmatprep.mubr.msk.f32.mxu1 %vm398_vm1, %v11731_v25  ;;  %v11802_v25 = vld [vmem:[#allocation28_spill] sm:$0xff] }
 0xdda   : > { %8260 = vmatmul.mubr.msk.f32.gmra.mrb[170].mxu1 %vm398_vm1, %v11732_v63  ;;  %v11803_v63 = vld [vmem:[#allocation29_spill] sm:$0xff] }
 0xddb   : > { %8262 = vmatprep.mubr.msk.f32.mxu1 %vm398_vm1, %v11733_v58  ;;  %v11804_v58 = vld [vmem:[#allocation30_spill] sm:$0xff] }
 0xdde   : > { %8263 = vmatmul.mubr.msk.f32.gmra.mrb[172].mxu1 %vm398_vm1, %v11734_v41  ;;  %v11805_v41 = vld [vmem:[#allocation31_spill] sm:$0xff] }
 0xddf   : > { %8265 = vmatprep.mubr.msk.f32.mxu1 %vm398_vm1, %v11735_v19  ;;  %v11806_v19 = vld [vmem:[#allocation32_spill] sm:$0xff] }
 0xde2   : > { %8266 = vmatmul.mubr.msk.f32.gmra.mrb[174].mxu1 %vm398_vm1, %v11736_v32  ;;  %v11807_v32 = vld [vmem:[#allocation33_spill] sm:$0xff] }
 0xde3   : > { %8268 = vmatprep.mubr.msk.f32.mxu1 %vm398_vm1, %v11737_v31  ;;  %v11808_v31 = vld [vmem:[#allocation34_spill] sm:$0xff] }
 0xde6   : > { %8269 = vmatmul.mubr.msk.f32.gmra.mrb[176].mxu1 %vm398_vm1, %v11738_v44  ;;  %v11809_v44 = vld [vmem:[#allocation35_spill] sm:$0xff] }
 0xde7   : > { %8271 = vmatprep.mubr.msk.f32.mxu1 %vm398_vm1, %v11739_v13  ;;  %v11810_v13 = vld [vmem:[#allocation36_spill] sm:$0xff] }
 0xdea   : > { %8272 = vmatmul.mubr.msk.f32.gmra.mrb[178].mxu1 %vm398_vm1, %v11740_v29  ;;  %v11811_v29 = vld [vmem:[#allocation37_spill] sm:$0xff] }
 0xdeb   : > { %8274 = vmatprep.mubr.msk.f32.mxu1 %vm398_vm1, %v11789_v1 }
 0xdee   : > { %8275 = vmatmul.mubr.msk.f32.gmra.mrb[180].mxu1 %vm398_vm1, %v11790_v2 }
 0xdef   : > { %8277 = vmatprep.mubr.msk.f32.mxu1 %vm398_vm1, %v11791_v3 }
 0xdf2   : > { %8278 = vmatmul.mubr.msk.f32.gmra.mrb[182].mxu1 %vm398_vm1, %v11792_v4 }
 0xdf3   : > { %8280 = vmatprep.mubr.msk.f32.mxu1 %vm398_vm1, %v11793_v5 }
 0xdf6   : > { %8281 = vmatmul.mubr.msk.f32.gmra.mrb[184].mxu1 %vm398_vm1, %v11794_v6 }
 0xdf7   : > { %8283 = vmatprep.mubr.msk.f32.mxu1 %vm398_vm1, %v11795_v7 }
 0xdfa   : > { %8284 = vmatmul.mubr.msk.f32.gmra.mrb[186].mxu1 %vm398_vm1, %v11796_v8 }
 0xdfb   : > { %8286 = vmatprep.mubr.msk.f32.mxu1 %vm398_vm1, %v11797_v9  ;;  %v6992_v9 = vld [vmem:[%s9007_s7 + $0xe0] ss:$0 sm:$0xff] }
 0xdfe   : > { %8287 = vmatmul.mubr.msk.f32.gmra.mrb[188].mxu1 %vm398_vm1, %v11798_v10  ;;  %v6993_v10 = vld [vmem:[%s9007_s7 + $0xe1] ss:$0 sm:$0xff] }
 0xdff   : > { %8289 = vmatprep.mubr.msk.f32.mxu1 %vm398_vm1, %v11799_v11 }
 0xe02   : > { %8290 = vmatmul.mubr.msk.f32.gmra.mrb[190].mxu1 %vm398_vm1, %v11800_v42 }
 0xe03   : > { %8292 = vmatprep.mubr.msk.f32.mxu1 %vm398_vm1, %v11801_v60 }
 0xe06   : > { %8293 = vmatmul.mubr.msk.f32.gmra.mrb[192].mxu1 %vm398_vm1, %v11802_v25 }
 0xe07   : > { %8295 = vmatprep.mubr.msk.f32.mxu1 %vm398_vm1, %v11803_v63 }
 0xe0a   : > { %8296 = vmatmul.mubr.msk.f32.gmra.mrb[194].mxu1 %vm398_vm1, %v11804_v58 }
 0xe0b   : > { %8298 = vmatprep.mubr.msk.f32.mxu1 %vm398_vm1, %v11805_v41 }
 0xe0e   : > { %8299 = vmatmul.mubr.msk.f32.gmra.mrb[196].mxu1 %vm398_vm1, %v11806_v19 }
 0xe0f   : > { %8301 = vmatprep.mubr.msk.f32.mxu1 %vm398_vm1, %v11807_v32 }
 0xe12   : > { %8302 = vmatmul.mubr.msk.f32.gmra.mrb[198].mxu1 %vm398_vm1, %v11808_v31 }
 0xe13   : > { %8304 = vmatprep.mubr.msk.f32.mxu1 %vm398_vm1, %v11809_v44 }
 0xe16   : > { %8305 = vmatmul.mubr.msk.f32.gmra.mrb[200].mxu1 %vm398_vm1, %v11810_v13 }
 0xe17   : > { %8307 = vmatprep.mubr.msk.f32.mxu1 %vm398_vm1, %v11811_v29 }
 0xe1a   : > { %8308 = vmatmul.mubr.msk.f32.gmra.mrb[202].mxu1 %vm398_vm1, %v11812_v43 }
 0xe1b   : > { %8310 = vmatprep.mubr.msk.f32.mxu1 %vm398_vm1, %v11813_v38 }
 0xe1e   : > { %8311 = vmatmul.mubr.msk.f32.gmra.mrb[204].mxu1 %vm398_vm1, %v11814_v27 }
 0xe1f   : > { %8313 = vmatprep.mubr.msk.f32.mxu1 %vm398_vm1, %v11815_v15 }
 0xe22   : > { %8314 = vmatmul.mubr.msk.f32.gmra.mrb[206].mxu1 %vm398_vm1, %v11816_v39 }
 0xe23   : > { %8316 = vmatprep.mubr.msk.f32.mxu1 %vm398_vm1, %v11817_v62 }
 0xe26   : > { %8317 = vmatmul.mubr.msk.f32.gmra.mrb[208].mxu1 %vm398_vm1, %v11818_v50 }
 0xe27   : > { %8319 = vmatprep.mubr.msk.f32.mxu1 %vm398_vm1, %v11819_v52 }
 0xe2a   : > { %8320 = vmatmul.mubr.msk.f32.gmra.mrb[210].mxu1 %vm398_vm1, %v11820_v34 }
 0xe2b   : > { %8322 = vmatprep.mubr.msk.f32.mxu1 %vm398_vm1, %v11821_v24 }
 0xe2e   : > { %8323 = vmatmul.mubr.msk.f32.gmra.mrb[212].mxu1 %vm398_vm1, %v11822_v30 }
 0xe2f   : > { %8325 = vmatprep.mubr.msk.f32.mxu1 %vm398_vm1, %v11823_v45 }
 0xe32   : > { %8326 = vmatmul.mubr.msk.f32.gmra.mrb[214].mxu1 %vm398_vm1, %v11824_v22 }
 0xe33   : > { %8328 = vmatprep.mubr.msk.f32.mxu1 %vm398_vm1, %v11825_v49 }
 0xe36   : > { %8329 = vmatmul.mubr.msk.f32.gmra.mrb[216].mxu1 %vm398_vm1, %v11826_v40 }
 0xe37   : > { %8331 = vmatprep.mubr.msk.f32.mxu1 %vm398_vm1, %v11827_v36 }
 0xe3a   : > { %8332 = vmatmul.mubr.msk.f32.gmra.mrb[218].mxu1 %vm398_vm1, %v11828_v28 }
 0xe3b   : > { %8334 = vmatprep.mubr.msk.f32.mxu1 %vm398_vm1, %v11829_v33  ;;  %v6994_v33 = vld [vmem:[%s9007_s7 + $0xe2] ss:$0 sm:$0xff] }
 0xe3e   : > { %8335 = vmatmul.mubr.msk.f32.gmra.mrb[220].mxu1 %vm398_vm1, %v11830_v17 }
 0xe3f   : > { %8337 = vmatprep.mubr.msk.f32.mxu1 %vm398_vm1, %v11831_v23 }
 0xe42   : > { %8338 = vmatmul.mubr.msk.f32.gmra.mrb[222].mxu1 %vm398_vm1, %v11832_v37 }
 0xe43   : > { %8340 = vmatprep.mubr.msk.f32.mxu1 %vm398_vm1, %v11833_v59 }
 0xe46   : > { %8341 = vmatmul.mubr.msk.f32.gmra.mrb[224].mxu1 %vm398_vm1, %v11834_v48 }
 0xe47   : > { %8343 = vmatprep.mubr.msk.f32.mxu1 %vm398_vm1, %v11835_v16 }
 0xe4a   : > { %8344 = vmatmul.mubr.msk.f32.gmra.mrb[226].mxu1 %vm398_vm1, %v11836_v26 }
 0xe91   : > { %v8240_v1 = vpop.f32.mrb[156].mxu1 }
 0xe92   : > { %v5201_v2 = vpop.f32.mrb[157].mxu1  ;;  %v5566_v42 = vmul.f32 %v8240_v1, %v6992_v9 }
 0xe93   : > { %v5565_v63 = vmul.f32 %v6992_v9, %v5201_v2 }
 0xe95   : > { %v8243_v3 = vpop.f32.mrb[158].mxu1 }
 0xe96   : > { %v5211_v4 = vpop.f32.mrb[159].mxu1  ;;  %v5568_v31 = vmul.f32 %v8243_v3, %v6992_v9 }
 0xe97   : > { %v5567_v29 = vmul.f32 %v6992_v9, %v5211_v4 }
 0xe99   : > { %v8246_v5 = vpop.f32.mrb[160].mxu1 }
 0xe9a   : > { %v5221_v6 = vpop.f32.mrb[161].mxu1  ;;  %v5570_v39 = vmul.f32 %v8246_v5, %v6992_v9 }
 0xe9b   : > { %v5569_v52 = vmul.f32 %v6992_v9, %v5221_v6 }
 0xe9d   : > { %v8249_v7 = vpop.f32.mrb[162].mxu1 }
 0xe9e   : > { %v5231_v8 = vpop.f32.mrb[163].mxu1  ;;  %v5572_v22 = vmul.f32 %v8249_v7, %v6992_v9 }
 0xe9f   : > { %v5571_v36 = vmul.f32 %v6992_v9, %v5231_v8 }
 0xea1   : > { %v8252_v11 = vpop.f32.mrb[164].mxu1 }
 0xea2   : > { %v5579_v60 = vmul.f32 %v8252_v11, %v6993_v10  ;;  %v5241_v25 = vpop.f32.mrb[165].mxu1 }
 0xea3   : > { %v5578_v58 = vmul.f32 %v6993_v10, %v5241_v25 }
 0xea4   : > { %v5587_v41 = vadd.f32 %v5579_v60, %v5566_v42 }
 0xea5   : > { %v5586_v19 = vadd.f32 %v5578_v58, %v5565_v63  ;;  %v8255_v32 = vpop.f32.mrb[166].mxu1 }
 0xea6   : > { %v5581_v44 = vmul.f32 %v8255_v32, %v6993_v10  ;;  %v5251_v13 = vpop.f32.mrb[167].mxu1 }
 0xea7   : > { %v5580_v43 = vmul.f32 %v6993_v10, %v5251_v13 }
 0xea8   : > { %v5589_v38 = vadd.f32 %v5581_v44, %v5568_v31  ;;  %v6995_v31 = vld [vmem:[%s9007_s7 + $0xe3] ss:$0 sm:$0xff] }
 0xea9   : > { %v5588_v27 = vadd.f32 %v5580_v43, %v5567_v29  ;;  %v8258_v15 = vpop.f32.mrb[168].mxu1 }
 0xeaa   : > { %v5583_v62 = vmul.f32 %v8258_v15, %v6993_v10  ;;  %v5261_v50 = vpop.f32.mrb[169].mxu1 }
 0xeab   : > { %v5582_v34 = vmul.f32 %v6993_v10, %v5261_v50 }
 0xeac   : > { %v5591_v24 = vadd.f32 %v5583_v62, %v5570_v39 }
 0xead   : > { %v5590_v30 = vadd.f32 %v5582_v34, %v5569_v52  ;;  %v8261_v45 = vpop.f32.mrb[170].mxu1 }
 0xeae   : > { %v5585_v49 = vmul.f32 %v8261_v45, %v6993_v10  ;;  %v5271_v40 = vpop.f32.mrb[171].mxu1 }
 0xeaf   : > { %v5584_v28 = vmul.f32 %v6993_v10, %v5271_v40 }
 0xeb0   : > { %v5593_v17 = vadd.f32 %v5585_v49, %v5572_v22 }
 0xeb1   : > { %v5592_v23 = vadd.f32 %v5584_v28, %v5571_v36  ;;  %v8264_v37 = vpop.f32.mrb[172].mxu1 }
 0xeb2   : > { %v5600_v59 = vmul.f32 %v8264_v37, %v6994_v33  ;;  %v5281_v48 = vpop.f32.mrb[173].mxu1 }
 0xeb3   : > { %v5599_v16 = vmul.f32 %v6994_v33, %v5281_v48 }
 0xeb4   : > { %v5608_v26 = vadd.f32 %v5600_v59, %v5587_v41 }
 0xeb5   : > { %v5607_v1 = vadd.f32 %v5599_v16, %v5586_v19  ;;  %v8267_v2 = vpop.f32.mrb[174].mxu1 }
 0xeb6   : > { %v5602_v3 = vmul.f32 %v8267_v2, %v6994_v33  ;;  %v5291_v4 = vpop.f32.mrb[175].mxu1 }
 0xeb7   : > { %v5601_v5 = vmul.f32 %v6994_v33, %v5291_v4 }
 0xeb8   : > { %v5610_v6 = vadd.f32 %v5602_v3, %v5589_v38 }
 0xeb9   : > { %v5609_v7 = vadd.f32 %v5601_v5, %v5588_v27  ;;  %v8270_v11 = vpop.f32.mrb[176].mxu1 }
 0xeba   : > { %v5604_v42 = vmul.f32 %v8270_v11, %v6994_v33  ;;  %v5301_v8 = vpop.f32.mrb[177].mxu1 }
 0xebb   : > { %v5603_v9 = vmul.f32 %v6994_v33, %v5301_v8 }
 0xebc   : > { %v5612_v10 = vadd.f32 %v5604_v42, %v5591_v24 }
 0xebd   : > { %v5611_v60 = vadd.f32 %v5603_v9, %v5590_v30  ;;  %v8273_v25 = vpop.f32.mrb[178].mxu1 }
 0xebe   : > { %v5606_v63 = vmul.f32 %v8273_v25, %v6994_v33  ;;  %v5311_v58 = vpop.f32.mrb[179].mxu1 }
 0xebf   : > { %v5605_v32 = vmul.f32 %v6994_v33, %v5311_v58 }
 0xec0   : > { %v5614_v41 = vadd.f32 %v5606_v63, %v5593_v17 }
 0xec1   : > { %v5613_v19 = vadd.f32 %v5605_v32, %v5592_v23  ;;  %v8276_v44 = vpop.f32.mrb[180].mxu1  ;;  %v6996_v23 = vld [vmem:[%s9007_s7 + $0xe4] ss:$0 sm:$0xff] }
 0xec2   : > { %v5621_v13 = vmul.f32 %v8276_v44, %v6995_v31  ;;  %v5321_v29 = vpop.f32.mrb[181].mxu1 }
 0xec3   : > { %v5620_v43 = vmul.f32 %v6995_v31, %v5321_v29 }
 0xec4   : > { %v5629_v15 = vadd.f32 %v5621_v13, %v5608_v26 }
 0xec5   : > { %v5628_v38 = vadd.f32 %v5620_v43, %v5607_v1  ;;  %v8279_v27 = vpop.f32.mrb[182].mxu1 }
 0xec6   : > { %v5623_v39 = vmul.f32 %v8279_v27, %v6995_v31  ;;  %v5331_v62 = vpop.f32.mrb[183].mxu1 }
 0xec7   : > { %v5622_v50 = vmul.f32 %v6995_v31, %v5331_v62 }
 0xec8   : > { %v5631_v52 = vadd.f32 %v5623_v39, %v5610_v6 }
 0xec9   : > { %v5630_v34 = vadd.f32 %v5622_v50, %v5609_v7  ;;  %v8282_v24 = vpop.f32.mrb[184].mxu1 }
 0xeca   : > { %v5625_v30 = vmul.f32 %v8282_v24, %v6995_v31  ;;  %v5341_v45 = vpop.f32.mrb[185].mxu1 }
 0xecb   : > { %v5624_v22 = vmul.f32 %v6995_v31, %v5341_v45 }
 0xecc   : > { %v5633_v49 = vadd.f32 %v5625_v30, %v5612_v10 }
 0xecd   : > { %v5632_v40 = vadd.f32 %v5624_v22, %v5611_v60  ;;  %v8285_v36 = vpop.f32.mrb[186].mxu1 }
 0xece   : > { %v5627_v28 = vmul.f32 %v8285_v36, %v6995_v31  ;;  %v5351_v33 = vpop.f32.mrb[187].mxu1 }
 0xecf   : > { %v5626_v17 = vmul.f32 %v6995_v31, %v5351_v33 }
 0xed0   : > { %v5635_v37 = vadd.f32 %v5627_v28, %v5614_v41 }
 0xed1   : > { %v5634_v59 = vadd.f32 %v5626_v17, %v5613_v19  ;;  %v8288_v48 = vpop.f32.mrb[188].mxu1  ;;  %v6997_v19 = vld [vmem:[%s9007_s7 + $0xe5] ss:$0 sm:$0xff] }
 0xed2   : > { %v5642_v16 = vmul.f32 %v8288_v48, %v6996_v23  ;;  %v5361_v26 = vpop.f32.mrb[189].mxu1 }
 0xed3   : > { %v5641_v1 = vmul.f32 %v6996_v23, %v5361_v26 }
 0xed4   : > { %v5650_v2 = vadd.f32 %v5642_v16, %v5629_v15 }
 0xed5   : > { %v5649_v3 = vadd.f32 %v5641_v1, %v5628_v38  ;;  %v8291_v4 = vpop.f32.mrb[190].mxu1 }
 0xed6   : > { %v5644_v5 = vmul.f32 %v8291_v4, %v6996_v23  ;;  %v5371_v6 = vpop.f32.mrb[191].mxu1 }
 0xed7   : > { %v5643_v7 = vmul.f32 %v6996_v23, %v5371_v6 }
 0xed8   : > { %v5652_v11 = vadd.f32 %v5644_v5, %v5631_v52 }
 0xed9   : > { %v5651_v42 = vadd.f32 %v5643_v7, %v5630_v34  ;;  %v8294_v8 = vpop.f32.mrb[192].mxu1 }
 0xeda   : > { %v5646_v9 = vmul.f32 %v8294_v8, %v6996_v23  ;;  %v5381_v10 = vpop.f32.mrb[193].mxu1 }
 0xedb   : > { %v5645_v60 = vmul.f32 %v6996_v23, %v5381_v10 }
 0xedc   : > { %v5654_v25 = vadd.f32 %v5646_v9, %v5633_v49 }
 0xedd   : > { %v5653_v63 = vadd.f32 %v5645_v60, %v5632_v40  ;;  %v8297_v58 = vpop.f32.mrb[194].mxu1 }
 0xede   : > { %v5648_v32 = vmul.f32 %v8297_v58, %v6996_v23  ;;  %v5391_v31 = vpop.f32.mrb[195].mxu1 }
 0xedf   : > { %v5647_v41 = vmul.f32 %v6996_v23, %v5391_v31 }
 0xee0   : > { %v5656_v44 = vadd.f32 %v5648_v32, %v5635_v37 }
 0xee1   : > { %v5655_v13 = vadd.f32 %v5647_v41, %v5634_v59  ;;  %v8300_v29 = vpop.f32.mrb[196].mxu1  ;;  %v6998_v59 = vld [vmem:[%s9007_s7 + $0xe6] ss:$0 sm:$0xff] }
 0xee2   : > { %v5663_v43 = vmul.f32 %v8300_v29, %v6997_v19  ;;  %v5401_v15 = vpop.f32.mrb[197].mxu1 }
 0xee3   : > { %v5662_v38 = vmul.f32 %v6997_v19, %v5401_v15 }
 0xee4   : > { %v5671_v27 = vadd.f32 %v5663_v43, %v5650_v2 }
 0xee5   : > { %v5670_v39 = vadd.f32 %v5662_v38, %v5649_v3  ;;  %v8303_v62 = vpop.f32.mrb[198].mxu1 }
 0xee6   : > { %v5665_v50 = vmul.f32 %v8303_v62, %v6997_v19  ;;  %v5411_v52 = vpop.f32.mrb[199].mxu1 }
 0xee7   : > { %v5664_v34 = vmul.f32 %v6997_v19, %v5411_v52 }
 0xee8   : > { %v5673_v24 = vadd.f32 %v5665_v50, %v5652_v11 }
 0xee9   : > { %v5672_v30 = vadd.f32 %v5664_v34, %v5651_v42  ;;  %v8306_v45 = vpop.f32.mrb[200].mxu1 }
 0xeea   : > { %v5667_v22 = vmul.f32 %v8306_v45, %v6997_v19  ;;  %v5421_v49 = vpop.f32.mrb[201].mxu1 }
 0xeeb   : > { %v5666_v40 = vmul.f32 %v6997_v19, %v5421_v49 }
 0xeec   : > { %v5675_v36 = vadd.f32 %v5667_v22, %v5654_v25 }
 0xeed   : > { %v5674_v28 = vadd.f32 %v5666_v40, %v5653_v63  ;;  %v8309_v33 = vpop.f32.mrb[202].mxu1 }
 0xeee   : > { %v5669_v17 = vmul.f32 %v8309_v33, %v6997_v19  ;;  %v5431_v23 = vpop.f32.mrb[203].mxu1 }
 0xeef   : > { %v5668_v37 = vmul.f32 %v6997_v19, %v5431_v23 }
 0xef0   : > { %v5677_v48 = vadd.f32 %v5669_v17, %v5656_v44 }
 0xef1   : > { %v5676_v16 = vadd.f32 %v5668_v37, %v5655_v13  ;;  %v8312_v26 = vpop.f32.mrb[204].mxu1  ;;  %v6999_v13 = vld [vmem:[%s9007_s7 + $0xe7] ss:$0 sm:$0xff] }
 0xef2   : > { %v5684_v1 = vmul.f32 %v8312_v26, %v6998_v59  ;;  %v5441_v2 = vpop.f32.mrb[205].mxu1 }
 0xef3   : > { %v5683_v3 = vmul.f32 %v6998_v59, %v5441_v2 }
 0xef4   : > { %v5692_v4 = vadd.f32 %v5684_v1, %v5671_v27 }
 0xef5   : > { %v5691_v5 = vadd.f32 %v5683_v3, %v5670_v39  ;;  %v8315_v6 = vpop.f32.mrb[206].mxu1 }
 0xef6   : > { %v5686_v7 = vmul.f32 %v8315_v6, %v6998_v59  ;;  %v5451_v11 = vpop.f32.mrb[207].mxu1  ;;  %v7001_v6 = vld [vmem:[%s9027_s19 + $0xe] ss:$0 sm:$0xff] }
 0xef7   : > { %v5685_v42 = vmul.f32 %v6998_v59, %v5451_v11 }
 0xef8   : > { %v5694_v8 = vadd.f32 %v5686_v7, %v5673_v24 }
 0xef9   : > { %v5693_v9 = vadd.f32 %v5685_v42, %v5672_v30  ;;  %v8318_v10 = vpop.f32.mrb[208].mxu1 }
 0xefa   : > { %v5688_v60 = vmul.f32 %v8318_v10, %v6998_v59  ;;  %v5461_v25 = vpop.f32.mrb[209].mxu1 }
 0xefb   : > { %v5687_v63 = vmul.f32 %v6998_v59, %v5461_v25 }
 0xefc   : > { %v5696_v58 = vadd.f32 %v5688_v60, %v5675_v36 }
 0xefd   : > { %v5695_v32 = vadd.f32 %v5687_v63, %v5674_v28  ;;  %v8321_v31 = vpop.f32.mrb[210].mxu1 }
 0xefe   : > { %v5690_v41 = vmul.f32 %v8321_v31, %v6998_v59  ;;  %v5471_v19 = vpop.f32.mrb[211].mxu1 }
 0xeff   : > { %v5689_v44 = vmul.f32 %v6998_v59, %v5471_v19 }
 0xf00   : > { %v5698_v29 = vadd.f32 %v5690_v41, %v5677_v48 }
 0xf01   : > { %v5697_v43 = vadd.f32 %v5689_v44, %v5676_v16  ;;  %v8324_v15 = vpop.f32.mrb[212].mxu1  ;;  %v7000_v16 = vld [vmem:[%s9007_s7 + $0xe8] ss:$0 sm:$0xff] }
 0xf02   : > { %v5705_v38 = vmul.f32 %v8324_v15, %v6999_v13  ;;  %v5481_v27 = vpop.f32.mrb[213].mxu1 }
 0xf03   : > { %v5704_v39 = vmul.f32 %v6999_v13, %v5481_v27 }
 0xf04   : > { %v5713_v62 = vadd.f32 %v5705_v38, %v5692_v4 }
 0xf05   : > { %v5712_v50 = vadd.f32 %v5704_v39, %v5691_v5  ;;  %v8327_v52 = vpop.f32.mrb[214].mxu1 }
 0xf06   : > { %v5707_v34 = vmul.f32 %v8327_v52, %v6999_v13  ;;  %v5491_v24 = vpop.f32.mrb[215].mxu1 }
 0xf07   : > { %v5706_v30 = vmul.f32 %v6999_v13, %v5491_v24 }
 0xf08   : > { %v5715_v45 = vadd.f32 %v5707_v34, %v5694_v8 }
 0xf09   : > { %v5714_v22 = vadd.f32 %v5706_v30, %v5693_v9  ;;  %v8330_v49 = vpop.f32.mrb[216].mxu1 }
 0xf0a   : > { %v5709_v40 = vmul.f32 %v8330_v49, %v6999_v13  ;;  %v5501_v36 = vpop.f32.mrb[217].mxu1 }
 0xf0b   : > { %v5708_v28 = vmul.f32 %v6999_v13, %v5501_v36 }
 0xf0c   : > { %v5717_v33 = vadd.f32 %v5709_v40, %v5696_v58 }
 0xf0d   : > { %v5716_v17 = vadd.f32 %v5708_v28, %v5695_v32  ;;  %v8333_v23 = vpop.f32.mrb[218].mxu1 }
 0xf0e   : > { %v5711_v37 = vmul.f32 %v8333_v23, %v6999_v13  ;;  %v5511_v59 = vpop.f32.mrb[219].mxu1 }
 0xf0f   : > { %v5710_v48 = vmul.f32 %v6999_v13, %v5511_v59 }
 0xf10   : > { %v5719_v26 = vadd.f32 %v5711_v37, %v5698_v29 }
 0xf11   : > { %v5718_v1 = vadd.f32 %v5710_v48, %v5697_v43  ;;  %v8336_v2 = vpop.f32.mrb[220].mxu1 }
 0xf12   : > { %v5726_v3 = vmul.f32 %v8336_v2, %v7000_v16  ;;  %v5521_v4 = vpop.f32.mrb[221].mxu1 }
 0xf13   : > { %v5725_v5 = vmul.f32 %v7000_v16, %v5521_v4 }
 0xf14   : > { %v5734_v7 = vadd.f32 %v5726_v3, %v5713_v62 }
 0xf15   : > { %v5733_v11 = vadd.f32 %v5725_v5, %v5712_v50  ;;  %v8339_v42 = vpop.f32.mrb[222].mxu1 }
 0xf16   : > { %v5728_v8 = vmul.f32 %v8339_v42, %v7000_v16  ;;  %v5531_v9 = vpop.f32.mrb[223].mxu1  ;;  %v5747_v10 = vadd.f32 %v7001_v6, %v5734_v7 }
 0xf17   : > { %v5727_v60 = vmul.f32 %v7000_v16, %v5531_v9  ;;  %v5746_v25 = vadd.f32 %v7001_v6, %v5733_v11 }
 0xf18   : > { %v5736_v63 = vadd.f32 %v5728_v8, %v5715_v45  ;;  %v5755_v58 = vadd.f32 %v5747_v10, %v10862_v14 }
 0xf19   : > { %v5735_v32 = vadd.f32 %v5727_v60, %v5714_v22  ;;  %v8342_v31 = vpop.f32.mrb[224].mxu1  ;;  %v5754_v41 = vadd.f32 %v5746_v25, %v10864_v18 }
 0xf1a   : > { %v5730_v19 = vmul.f32 %v8342_v31, %v7000_v16  ;;  %v5541_v44 = vpop.f32.mrb[225].mxu1  ;;  %v5767_v13 = vsel %vm398_vm1, %v5755_v58, 0.0  ;;  %v5749_v29 = vadd.f32 %v7001_v6, %v5736_v63 }
 0xf1b   : > { %v5729_v43 = vmul.f32 %v7000_v16, %v5541_v44  ;;  %5768 = vadd.xlane.f32.xlu1 %v5767_v13  ;;  %v5748_v15 = vadd.f32 %v7001_v6, %v5735_v32  ;;  %v5764_v50 = vsel %vm398_vm1, %v5754_v41, 0.0 }
 0xf1c   : > { %v5738_v38 = vadd.f32 %v5730_v19, %v5717_v33  ;;  %v5757_v27 = vadd.f32 %v5749_v29, %v10868_v57 }
 0xf1d   : > { %v5737_v39 = vadd.f32 %v5729_v43, %v5716_v17  ;;  %v8345_v62 = vpop.f32.mrb[226].mxu1  ;;  %v5756_v30 = vadd.f32 %v5748_v15, %v10870_v53 }
 0xf1e   : > { %v5732_v52 = vmul.f32 %v8345_v62, %v7000_v16  ;;  %v5551_v34 = vpop.f32.mrb[227].mxu1  ;;  %v5773_v24 = vsel %vm398_vm1, %v5757_v27, 0.0  ;;  %v5751_v45 = vadd.f32 %v7001_v6, %v5738_v38 }
 0xf1f   : > { %v5731_v22 = vmul.f32 %v7000_v16, %v5551_v34  ;;  %5765 = vadd.xlane.f32.xlu1 %v5764_v50  ;;  %5774 = vadd.xlane.f32.xlu0 %v5773_v24  ;;  %v5770_v36 = vsel %vm398_vm1, %v5756_v30, 0.0  ;;  %v5750_v33 = vadd.f32 %v7001_v6, %v5737_v39 }
 0xf20   : > { %v5740_v49 = vadd.f32 %v5732_v52, %v5719_v26  ;;  %v5759_v28 = vadd.f32 %v5751_v45, %v10874_v55 }
 0xf21   : > { %v5739_v40 = vadd.f32 %v5731_v22, %v5718_v1  ;;  %v5758_v23 = vadd.f32 %v5750_v33, %v10876_v35 }
 0xf22   : > { %v5779_v17 = vsel %vm398_vm1, %v5759_v28, 0.0  ;;  %v5753_v16 = vadd.f32 %v7001_v6, %v5740_v49 }
 0xf23   : > { %5771 = vadd.xlane.f32.xlu1 %v5770_v36  ;;  %v5752_v37 = vadd.f32 %v7001_v6, %v5739_v40  ;;  %v5776_v59 = vsel %vm398_vm1, %v5758_v23, 0.0 }
 0xf24   : > { %v5761_v1 = vadd.f32 %v5753_v16, %v10880_v46 }
 0xf25   : > { %v5760_v48 = vadd.f32 %v5752_v37, %v10882_v54 }
 0xf26   : > { %v5785_v2 = vsel %vm398_vm1, %v5761_v1, 0.0 }
 0xf27   : > { %5780 = vadd.xlane.f32.xlu1 %v5779_v17  ;;  %v5782_v26 = vsel %vm398_vm1, %v5760_v48, 0.0 }
 0xf2b   : > { %5777 = vadd.xlane.f32.xlu1 %v5776_v59 }
 0xf2f   : > { %5783 = vadd.xlane.f32.xlu1 %v5782_v26 }
 0xf33   : > { %5786 = vadd.xlane.f32.xlu1 %v5785_v2 }
 0xfa8   : > { %v5769_v3 = vpop.xlane.xlu1 %5768 }
 0xfa9   : > { %v5789_v4 = vmul.f32 0.015625, %v5769_v3 }
 0xfab   : > { %v11054_v5 = vsub.f32 %v5755_v58, %v5789_v4 }
 0xfac   : > { %v5766_v7 = vpop.xlane.xlu1 %5765  ;;  %v5775_v11 = vpop.xlane.xlu0 %5774 }
 0xfad   : > { %v5788_v42 = vmul.f32 0.015625, %v5766_v7  ;;  %v5791_v8 = vmul.f32 0.015625, %v5775_v11  ;;  %v5805_v6 = vmul.f32 %v11054_v5, %v11054_v5 }
 0xfaf   : > { %v11058_v9 = vsub.f32 %v5754_v41, %v5788_v42  ;;  %v11060_v10 = vsub.f32 %v5757_v27, %v5791_v8  ;;  %v5815_v60 = vsel %vm398_vm1, %v5805_v6, 0.0  ;;  %v11095_v8 = vld [vmem:[%s9027_s19 + $0xf] ss:$0 sm:$0xff] }
 0xfb0   : > { %v5772_v25 = vpop.xlane.xlu1 %5771  ;;  %5816 = vadd.xlane.f32.xlu1 %v5815_v60 }
 0xfb1   : > { %v5790_v63 = vmul.f32 0.015625, %v5772_v25  ;;  %v5804_v58 = vmul.f32 %v11058_v9, %v11058_v9  ;;  %v5807_v19 = vmul.f32 %v11060_v10, %v11060_v10 }
 0xfb3   : > { %v11065_v32 = vsub.f32 %v5756_v30, %v5790_v63  ;;  %v5812_v31 = vsel %vm398_vm1, %v5804_v58, 0.0  ;;  %v5821_v29 = vsel %vm398_vm1, %v5807_v19, 0.0  ;;  %v7003_v63 = vld [vmem:[%s9027_s19 + $0x10] ss:$0 sm:$0xff] }
 0xfb4   : > { %v5781_v44 = vpop.xlane.xlu1 %5780  ;;  %5813 = vadd.xlane.f32.xlu1 %v5812_v31 }
 0xfb5   : > { %v5793_v41 = vmul.f32 0.015625, %v5781_v44  ;;  %v5806_v43 = vmul.f32 %v11065_v32, %v11065_v32 }
 0xfb7   : > { %v11070_v13 = vsub.f32 %v5759_v28, %v5793_v41  ;;  %v5818_v39 = vsel %vm398_vm1, %v5806_v43, 0.0 }
 0xfb8   : > { %v5778_v15 = vpop.xlane.xlu1 %5777  ;;  %5822 = vadd.xlane.f32.xlu1 %v5821_v29 }
 0xfb9   : > { %v5792_v38 = vmul.f32 0.015625, %v5778_v15  ;;  %v5809_v62 = vmul.f32 %v11070_v13, %v11070_v13 }
 0xfbb   : > { %v11075_v27 = vsub.f32 %v5758_v23, %v5792_v38  ;;  %v5827_v24 = vsel %vm398_vm1, %v5809_v62, 0.0 }
 0xfbc   : > { %5819 = vadd.xlane.f32.xlu1 %v5818_v39  ;;  %v5784_v50 = vpop.xlane.xlu1 %5783 }
 0xfbd   : > { %v5794_v52 = vmul.f32 0.015625, %v5784_v50  ;;  %v5808_v30 = vmul.f32 %v11075_v27, %v11075_v27 }
 0xfbf   : > { %v11080_v34 = vsub.f32 %v5760_v48, %v5794_v52  ;;  %v5824_v40 = vsel %vm398_vm1, %v5808_v30, 0.0 }
 0xfc0   : > { %5828 = vadd.xlane.f32.xlu1 %v5827_v24  ;;  %v5787_v45 = vpop.xlane.xlu1 %5786 }
 0xfc1   : > { %v5795_v22 = vmul.f32 0.015625, %v5787_v45  ;;  %v5810_v36 = vmul.f32 %v11080_v34, %v11080_v34 }
 0xfc3   : > { %v11085_v49 = vsub.f32 %v5761_v1, %v5795_v22  ;;  %v5830_v33 = vsel %vm398_vm1, %v5810_v36, 0.0 }
 0xfc4   : > { %5825 = vadd.xlane.f32.xlu1 %v5824_v40 }
 0xfc5   : > { %v5811_v28 = vmul.f32 %v11085_v49, %v11085_v49 }
 0xfc7   : > { %v5833_v17 = vsel %vm398_vm1, %v5811_v28, 0.0 }
 0xfc8   : > { %5831 = vadd.xlane.f32.xlu1 %v5830_v33  ;;  %5834 = vadd.xlane.f32.xlu0 %v5833_v17 }
0x103d   : > { %v5817_v23 = vpop.xlane.xlu1 %5816 }
0x103e   : > { %v5837_v37 = vmul.f32 0.015625, %v5817_v23 }
0x1040   : > { %v5845_v59 = vadd.f32 1e-05, %v5837_v37 }
0x1041   : > { %v5814_v48 = vpop.xlane.xlu1 %5813 }
0x1042   : > { %8721 = vrsqrt.f32 %v5845_v59  ;;  %v5836_v16 = vmul.f32 0.015625, %v5814_v48 }
0x1044   : > { %v5844_v26 = vadd.f32 1e-05, %v5836_v16 }
0x1045   : > { %v5823_v1 = vpop.xlane.xlu1 %5822 }
0x1046   : > { %8723 = vrsqrt.f32 %v5844_v26  ;;  %v5839_v2 = vmul.f32 0.015625, %v5823_v1 }
0x1048   : > { %v5847_v3 = vadd.f32 1e-05, %v5839_v2 }
0x1049   : > { %v5820_v4 = vpop.xlane.xlu1 %5819 }
0x104a   : > { %8725 = vrsqrt.f32 %v5847_v3  ;;  %v5838_v7 = vmul.f32 0.015625, %v5820_v4 }
0x104c   : > { %v8722_v11 = vpop.eup %8721  ;;  %v5846_v42 = vadd.f32 1e-05, %v5838_v7 }
0x104d   : > { %v5829_v6 = vpop.xlane.xlu1 %5828  ;;  %v5861_v60 = vmul.f32 %v8722_v11, %v11054_v5 }
0x104e   : > { %8727 = vrsqrt.f32 %v5846_v42  ;;  %v5841_v25 = vmul.f32 0.015625, %v5829_v6 }
0x104f   : > { %v5873_v58 = vmul.f32 %v11095_v8, %v5861_v60 }
0x1050   : > { %v8724_v31 = vpop.eup %8723  ;;  %v5849_v19 = vadd.f32 1e-05, %v5841_v25 }
0x1051   : > { %v5826_v44 = vpop.xlane.xlu1 %5825  ;;  %v5885_v41 = vadd.f32 %v7003_v63, %v5873_v58  ;;  %v5860_v29 = vmul.f32 %v8724_v31, %v11058_v9 }
0x1052   : > { %8729 = vrsqrt.f32 %v5849_v19  ;;  %v5840_v43 = vmul.f32 0.015625, %v5826_v44 }
0x1053   : > { %v5893_v15 = vadd.f32 %v5885_v41, %v10862_v14  ;;  %v5872_v38 = vmul.f32 %v11095_v8, %v5860_v29 }
0x1054   : > { %v8726_v39 = vpop.eup %8725  ;;  %v5848_v62 = vadd.f32 1e-05, %v5840_v43 }
0x1055   : > { %v5835_v5 = vpop.xlane.xlu0 %5834  ;;  %v5832_v50 = vpop.xlane.xlu1 %5831  ;;  %v5905_v52 = vsel %vm398_vm1, %v5893_v15, 0.0  ;;  %v5884_v24 = vadd.f32 %v7003_v63, %v5872_v38  ;;  %v5863_v30 = vmul.f32 %v8726_v39, %v11060_v10 }
0x1056   : > { %8731 = vrsqrt.f32 %v5848_v62  ;;  %v5843_v45 = vmul.f32 0.015625, %v5835_v5  ;;  %v5842_v22 = vmul.f32 0.015625, %v5832_v50  ;;  %5906 = vadd.xlane.f32.xlu0 %v5905_v52 }
0x1057   : > { %v5892_v9 = vadd.f32 %v5884_v24, %v10864_v18  ;;  %v5875_v40 = vmul.f32 %v11095_v8, %v5863_v30 }
0x1058   : > { %v8728_v36 = vpop.eup %8727  ;;  %v5851_v28 = vadd.f32 1e-05, %v5843_v45  ;;  %v5850_v33 = vadd.f32 1e-05, %v5842_v22 }
0x1059   : > { %v5902_v17 = vsel %vm398_vm1, %v5892_v9, 0.0  ;;  %v5887_v23 = vadd.f32 %v7003_v63, %v5875_v40  ;;  %v5862_v37 = vmul.f32 %v8728_v36, %v11065_v32 }
0x105a   : > { %8733 = vrsqrt.f32 %v5851_v28  ;;  %5903 = vadd.xlane.f32.xlu1 %v5902_v17 }
0x105b   : > { %8735 = vrsqrt.f32 %v5850_v33  ;;  %v5895_v10 = vadd.f32 %v5887_v23, %v10868_v57  ;;  %v5874_v59 = vmul.f32 %v11095_v8, %v5862_v37 }
0x105c   : > { %v8730_v48 = vpop.eup %8729 }
0x105d   : > { %v5911_v16 = vsel %vm398_vm1, %v5895_v10, 0.0  ;;  %v5886_v26 = vadd.f32 %v7003_v63, %v5874_v59  ;;  %v5865_v1 = vmul.f32 %v8730_v48, %v11070_v13 }
0x105e   : > { %5912 = vadd.xlane.f32.xlu0 %v5911_v16 }
0x105f   : > { %v5894_v2 = vadd.f32 %v5886_v26, %v10870_v53  ;;  %v5877_v3 = vmul.f32 %v11095_v8, %v5865_v1 }
0x1060   : > { %v8732_v4 = vpop.eup %8731 }
0x1061   : > { %v5908_v32 = vsel %vm398_vm1, %v5894_v2, 0.0  ;;  %v5889_v7 = vadd.f32 %v7003_v63, %v5877_v3  ;;  %v5864_v11 = vmul.f32 %v8732_v4, %v11075_v27 }
0x1062   : > { %5909 = vadd.xlane.f32.xlu1 %v5908_v32 }
0x1063   : > { %v5897_v42 = vadd.f32 %v5889_v7, %v10874_v55  ;;  %v5876_v6 = vmul.f32 %v11095_v8, %v5864_v11 }
0x1064   : > { %v8734_v60 = vpop.eup %8733 }
0x1065   : > { %v8736_v25 = vpop.eup %8735  ;;  %v5917_v13 = vsel %vm398_vm1, %v5897_v42, 0.0  ;;  %v5888_v58 = vadd.f32 %v7003_v63, %v5876_v6  ;;  %v5867_v31 = vmul.f32 %v8734_v60, %v11085_v49 }
0x1066   : > { %5918 = vadd.xlane.f32.xlu0 %v5917_v13  ;;  %v5866_v19 = vmul.f32 %v8736_v25, %v11080_v34 }
0x1067   : > { %v5896_v44 = vadd.f32 %v5888_v58, %v10876_v35  ;;  %v5879_v41 = vmul.f32 %v11095_v8, %v5867_v31 }
0x1068   : > { %v5878_v27 = vmul.f32 %v11095_v8, %v5866_v19 }
0x1069   : > { %v5914_v29 = vsel %vm398_vm1, %v5896_v44, 0.0  ;;  %v5891_v43 = vadd.f32 %v7003_v63, %v5879_v41 }
0x106a   : > { %5915 = vadd.xlane.f32.xlu1 %v5914_v29  ;;  %v5890_v38 = vadd.f32 %v7003_v63, %v5878_v27 }
0x106b   : > { %v5899_v39 = vadd.f32 %v5891_v43, %v10880_v46 }
0x106c   : > { %v5898_v62 = vadd.f32 %v5890_v38, %v10882_v54 }
0x106d   : > { %v5923_v49 = vsel %vm398_vm1, %v5899_v39, 0.0 }
0x106e   : > { %5924 = vadd.xlane.f32.xlu0 %v5923_v49  ;;  %v5920_v34 = vsel %vm398_vm1, %v5898_v62, 0.0 }
0x106f   : > { %5921 = vadd.xlane.f32.xlu1 %v5920_v34 }
0x10e3   : > { %v5907_v5 = vpop.xlane.xlu0 %5906 }
0x10e4   : > { %v5927_v50 = vmul.f32 0.015625, %v5907_v5 }
0x10e6   : > { %v11130_v52 = vsub.f32 %v5893_v15, %v5927_v50 }
0x10e7   : > { %v5904_v8 = vpop.xlane.xlu1 %5903 }
0x10e8   : > { %v5926_v24 = vmul.f32 0.015625, %v5904_v8  ;;  %v5943_v30 = vmul.f32 %v11130_v52, %v11130_v52 }
0x10ea   : > { %v11134_v63 = vsub.f32 %v5892_v9, %v5926_v24  ;;  %v5953_v45 = vsel %vm398_vm1, %v5943_v30, 0.0 }
0x10eb   : > { %v5913_v22 = vpop.xlane.xlu0 %5912  ;;  %5954 = vadd.xlane.f32.xlu0 %v5953_v45  ;;  %v11171_v45 = vld [vmem:[%s9027_s19 + $0x11] ss:$0 sm:$0xff] }
0x10ec   : > { %v5929_v40 = vmul.f32 0.015625, %v5913_v22  ;;  %v5942_v36 = vmul.f32 %v11134_v63, %v11134_v63 }
0x10ee   : > { %v11139_v28 = vsub.f32 %v5895_v10, %v5929_v40  ;;  %v5950_v15 = vsel %vm398_vm1, %v5942_v36, 0.0 }
0x10ef   : > { %5951 = vadd.xlane.f32.xlu1 %v5950_v15  ;;  %v5910_v33 = vpop.xlane.xlu1 %5909  ;;  %v7005_v15 = vld [vmem:[%s9027_s19 + $0x12] ss:$0 sm:$0xff] }
0x10f0   : > { %v5928_v17 = vmul.f32 0.015625, %v5910_v33  ;;  %v5945_v23 = vmul.f32 %v11139_v28, %v11139_v28 }
0x10f2   : > { %v11144_v9 = vsub.f32 %v5894_v2, %v5928_v17  ;;  %v5959_v37 = vsel %vm398_vm1, %v5945_v23, 0.0 }
0x10f3   : > { %5960 = vadd.xlane.f32.xlu0 %v5959_v37  ;;  %v5919_v59 = vpop.xlane.xlu0 %5918 }
0x10f4   : > { %v5931_v48 = vmul.f32 0.015625, %v5919_v59  ;;  %v5944_v16 = vmul.f32 %v11144_v9, %v11144_v9 }
0x10f6   : > { %v11149_v10 = vsub.f32 %v5897_v42, %v5931_v48  ;;  %v5956_v26 = vsel %vm398_vm1, %v5944_v16, 0.0 }
0x10f7   : > { %5957 = vadd.xlane.f32.xlu1 %v5956_v26  ;;  %v5916_v1 = vpop.xlane.xlu1 %5915 }
0x10f8   : > { %v5930_v3 = vmul.f32 0.015625, %v5916_v1  ;;  %v5947_v4 = vmul.f32 %v11149_v10, %v11149_v10 }
0x10fa   : > { %v11154_v2 = vsub.f32 %v5896_v44, %v5930_v3  ;;  %v5965_v32 = vsel %vm398_vm1, %v5947_v4, 0.0 }
0x10fb   : > { %5966 = vadd.xlane.f32.xlu0 %v5965_v32  ;;  %v5925_v7 = vpop.xlane.xlu0 %5924 }
0x10fc   : > { %v5933_v11 = vmul.f32 0.015625, %v5925_v7  ;;  %v5922_v6 = vpop.xlane.xlu1 %5921  ;;  %v5946_v42 = vmul.f32 %v11154_v2, %v11154_v2 }
0x10fd   : > { %v5932_v60 = vmul.f32 0.015625, %v5922_v6 }
0x10fe   : > { %v11159_v25 = vsub.f32 %v5899_v39, %v5933_v11  ;;  %v5962_v13 = vsel %vm398_vm1, %v5946_v42, 0.0 }
0x10ff   : > { %v11162_v58 = vsub.f32 %v5898_v62, %v5932_v60  ;;  %5963 = vadd.xlane.f32.xlu1 %v5962_v13 }
0x1100   : > { %v5949_v31 = vmul.f32 %v11159_v25, %v11159_v25 }
0x1101   : > { %v5948_v19 = vmul.f32 %v11162_v58, %v11162_v58 }
0x1102   : > { %v5971_v44 = vsel %vm398_vm1, %v5949_v31, 0.0 }
0x1103   : > { %5972 = vadd.xlane.f32.xlu0 %v5971_v44  ;;  %v5968_v41 = vsel %vm398_vm1, %v5948_v19, 0.0 }
0x1104   : > { %5969 = vadd.xlane.f32.xlu1 %v5968_v41 }
0x1178   : > { %v5955_v27 = vpop.xlane.xlu0 %5954 }
0x1179   : > { %v5975_v29 = vmul.f32 0.015625, %v5955_v27 }
0x117b   : > { %v5983_v43 = vadd.f32 1e-05, %v5975_v29 }
0x117c   : > { %v5952_v38 = vpop.xlane.xlu1 %5951 }
0x117d   : > { %8737 = vrsqrt.f32 %v5983_v43  ;;  %v5974_v39 = vmul.f32 0.015625, %v5952_v38 }
0x117f   : > { %v5982_v62 = vadd.f32 1e-05, %v5974_v39 }
0x1180   : > { %v5961_v49 = vpop.xlane.xlu0 %5960 }
0x1181   : > { %8739 = vrsqrt.f32 %v5982_v62  ;;  %v5977_v34 = vmul.f32 0.015625, %v5961_v49 }
0x1183   : > { %v5985_v5 = vadd.f32 1e-05, %v5977_v34 }
0x1184   : > { %v5958_v50 = vpop.xlane.xlu1 %5957 }
0x1185   : > { %8741 = vrsqrt.f32 %v5985_v5  ;;  %v5976_v8 = vmul.f32 0.015625, %v5958_v50 }
0x1187   : > { %v8738_v24 = vpop.eup %8737  ;;  %v5984_v30 = vadd.f32 1e-05, %v5976_v8 }
0x1188   : > { %v5967_v22 = vpop.xlane.xlu0 %5966  ;;  %v5999_v40 = vmul.f32 %v8738_v24, %v11130_v52 }
0x1189   : > { %8743 = vrsqrt.f32 %v5984_v30  ;;  %v5979_v36 = vmul.f32 0.015625, %v5967_v22 }
0x118a   : > { %v6011_v33 = vmul.f32 %v11171_v45, %v5999_v40 }
0x118b   : > { %v8740_v17 = vpop.eup %8739  ;;  %v5987_v23 = vadd.f32 1e-05, %v5979_v36 }
0x118c   : > { %v5964_v37 = vpop.xlane.xlu1 %5963  ;;  %v6023_v59 = vadd.f32 %v7005_v15, %v6011_v33  ;;  %v5998_v48 = vmul.f32 %v8740_v17, %v11134_v63 }
0x118d   : > { %8745 = vrsqrt.f32 %v5987_v23  ;;  %v5978_v16 = vmul.f32 0.015625, %v5964_v37 }
0x118e   : > { %v6031_v26 = vadd.f32 %v6023_v59, %v10862_v14  ;;  %v6010_v1 = vmul.f32 %v11171_v45, %v5998_v48 }
0x118f   : > { %v8742_v3 = vpop.eup %8741  ;;  %v5986_v4 = vadd.f32 1e-05, %v5978_v16 }
0x1190   : > { %v5973_v52 = vpop.xlane.xlu0 %5972  ;;  %v6043_v32 = vsel %vm398_vm1, %v6031_v26, 0.0  ;;  %v6022_v7 = vadd.f32 %v7005_v15, %v6010_v1  ;;  %v6001_v11 = vmul.f32 %v8742_v3, %v11139_v28 }
0x1191   : > { %8747 = vrsqrt.f32 %v5986_v4  ;;  %v5981_v6 = vmul.f32 0.015625, %v5973_v52  ;;  %v5970_v42 = vpop.xlane.xlu1 %5969  ;;  %6044 = vadd.xlane.f32.xlu0 %v6043_v32 }
0x1192   : > { %v5980_v60 = vmul.f32 0.015625, %v5970_v42  ;;  %v6030_v63 = vadd.f32 %v6022_v7, %v10864_v18  ;;  %v6013_v13 = vmul.f32 %v11171_v45, %v6001_v11 }
0x1193   : > { %v8744_v14 = vpop.eup %8743  ;;  %v5989_v31 = vadd.f32 1e-05, %v5981_v6 }
0x1194   : > { %v5988_v19 = vadd.f32 1e-05, %v5980_v60  ;;  %v6040_v44 = vsel %vm398_vm1, %v6030_v63, 0.0  ;;  %v6025_v41 = vadd.f32 %v7005_v15, %v6013_v13  ;;  %v6000_v27 = vmul.f32 %v8744_v14, %v11144_v9 }
0x1195   : > { %8749 = vrsqrt.f32 %v5989_v31  ;;  %6041 = vadd.xlane.f32.xlu1 %v6040_v44 }
0x1196   : > { %8751 = vrsqrt.f32 %v5988_v19  ;;  %v6033_v28 = vadd.f32 %v6025_v41, %v10868_v57  ;;  %v6012_v29 = vmul.f32 %v11171_v45, %v6000_v27 }
0x1197   : > { %v8746_v43 = vpop.eup %8745 }
0x1198   : > { %v6049_v18 = vsel %vm398_vm1, %v6033_v28, 0.0  ;;  %v6024_v38 = vadd.f32 %v7005_v15, %v6012_v29  ;;  %v6003_v39 = vmul.f32 %v8746_v43, %v11149_v10 }
0x1199   : > { %6050 = vadd.xlane.f32.xlu0 %v6049_v18 }
0x119a   : > { %v6032_v62 = vadd.f32 %v6024_v38, %v10870_v53  ;;  %v6015_v49 = vmul.f32 %v11171_v45, %v6003_v39 }
0x119b   : > { %v8748_v34 = vpop.eup %8747 }
0x119c   : > { %v6046_v9 = vsel %vm398_vm1, %v6032_v62, 0.0  ;;  %v6027_v5 = vadd.f32 %v7005_v15, %v6015_v49  ;;  %v6002_v50 = vmul.f32 %v8748_v34, %v11154_v2 }
0x119d   : > { %6047 = vadd.xlane.f32.xlu1 %v6046_v9 }
0x119e   : > { %v6035_v57 = vadd.f32 %v6027_v5, %v10874_v55  ;;  %v6014_v8 = vmul.f32 %v11171_v45, %v6002_v50 }
0x119f   : > { %v8750_v24 = vpop.eup %8749 }
0x11a0   : > { %v8752_v30 = vpop.eup %8751  ;;  %v6055_v10 = vsel %vm398_vm1, %v6035_v57, 0.0  ;;  %v6026_v22 = vadd.f32 %v7005_v15, %v6014_v8  ;;  %v6005_v53 = vmul.f32 %v8750_v24, %v11159_v25  ;;  %v6208_v24 = vld [vmem:[%s9007_s7 + $0x10] sm:$0xff] }
0x11a1   : > { %6056 = vadd.xlane.f32.xlu0 %v6055_v10  ;;  %v6004_v40 = vmul.f32 %v8752_v30, %v11162_v58  ;;  %v6209_v30 = vld [vmem:[%s9007_s7 + $0x18] sm:$0xff] }
0x11a2   : > { %v6034_v36 = vadd.f32 %v6026_v22, %v10876_v35  ;;  %v6017_v33 = vmul.f32 %v11171_v45, %v6005_v53  ;;  %v8510_v10 = vpack.c.bf16 %v6209_v30, %v6208_v24  ;;  %v6210_v22 = vld [vmem:[%s9007_s7 + $0x20] sm:$0xff]  ;;  %v6211_v53 = vld [vmem:[%s9007_s7 + $0x28] sm:$0xff] }
0x11a3   : > { %v6016_v2 = vmul.f32 %v11171_v45, %v6004_v40  ;;  %v8514_v40 = vpack.c.bf16 %v6211_v53, %v6210_v22 }
0x11a4   : > { %v6052_v55 = vsel %vm398_vm1, %v6034_v36, 0.0  ;;  %v6029_v17 = vadd.f32 %v7005_v15, %v6017_v33  ;;  %8511 = vmatprep.subr.bf16.mxu0 %v8510_v10  ;;  %v6213_v33 = vld [vmem:[%s9007_s7 + $0x38] sm:$0xff] }
0x11a5   : > { %6053 = vadd.xlane.f32.xlu1 %v6052_v55  ;;  %v6028_v23 = vadd.f32 %v7005_v15, %v6016_v2  ;;  %8513 = vmatpush3.bf16.msra.mxu0 %v8510_v10  ;;  %v6214_v55 = vld [vmem:[%s9007_s7 + $0x40] sm:$0xff] }
0x11a6   : > { %v6037_v37 = vadd.f32 %v6029_v17, %v10880_v46  ;;  %8515 = vmatprep.subr.bf16.mxu0 %v8514_v40  ;;  %v6215_v17 = vld [vmem:[%s9007_s7 + $0x48] sm:$0xff] }
0x11a7   : > { %v6036_v59 = vadd.f32 %v6028_v23, %v10882_v54  ;;  %v8522_v23 = vpack.c.bf16 %v6215_v17, %v6214_v55 }
0x11a8   : > { %v6061_v25 = vsel %vm398_vm1, %v6037_v37, 0.0 }
0x11a9   : > { %6062 = vadd.xlane.f32.xlu0 %v6061_v25  ;;  %v6058_v58 = vsel %vm398_vm1, %v6036_v59, 0.0  ;;  %8517 = vmatpush3.bf16.msra.mxu0 %v8514_v40 }
0x11aa   : > { %6059 = vadd.xlane.f32.xlu1 %v6058_v58 }
0x121e   : > { %v6045_v35 = vpop.xlane.xlu0 %6044 }
0x121f   : > { %v6065_v48 = vmul.f32 0.015625, %v6045_v35 }
0x1221   : > { %v11206_v16 = vsub.f32 %v6031_v26, %v6065_v48 }
0x1222   : > { %v6042_v45 = vpop.xlane.xlu1 %6041 }
0x1223   : > { %v6064_v1 = vmul.f32 0.015625, %v6042_v45  ;;  %v6081_v3 = vmul.f32 %v11206_v16, %v11206_v16 }
0x1225   : > { %v11210_v15 = vsub.f32 %v6030_v63, %v6064_v1  ;;  %v6091_v46 = vsel %vm398_vm1, %v6081_v3, 0.0 }
0x1226   : > { %6092 = vadd.xlane.f32.xlu0 %v6091_v46  ;;  %v6051_v54 = vpop.xlane.xlu0 %6050 }
0x1227   : > { %v6067_v4 = vmul.f32 0.015625, %v6051_v54  ;;  %v6080_v52 = vmul.f32 %v11210_v15, %v11210_v15 }
0x1229   : > { %v11215_v32 = vsub.f32 %v6033_v28, %v6067_v4  ;;  %v6088_v26 = vsel %vm398_vm1, %v6080_v52, 0.0  ;;  %v11255_v52 = vld [vmem:[%s9027_s19 + $0x13] ss:$0 sm:$0xff] }
0x122a   : > { %6089 = vadd.xlane.f32.xlu1 %v6088_v26  ;;  %v6048_v7 = vpop.xlane.xlu1 %6047 }
0x122b   : > { %v6066_v11 = vmul.f32 0.015625, %v6048_v7  ;;  %v6083_v6 = vmul.f32 %v11215_v32, %v11215_v32 }
0x122d   : > { %v11220_v42 = vsub.f32 %v6032_v62, %v6066_v11  ;;  %v6097_v60 = vsel %vm398_vm1, %v6083_v6, 0.0  ;;  %v11259_v6 = vld [vmem:[%s9027_s19 + $0x14] ss:$0 sm:$0xff] }
0x122e   : > { %6098 = vadd.xlane.f32.xlu0 %v6097_v60  ;;  %v6057_v63 = vpop.xlane.xlu0 %6056 }
0x122f   : > { %v6069_v13 = vmul.f32 0.015625, %v6057_v63  ;;  %v6082_v14 = vmul.f32 %v11220_v42, %v11220_v42 }
0x1231   : > { %v11225_v31 = vsub.f32 %v6035_v57, %v6069_v13  ;;  %v6094_v19 = vsel %vm398_vm1, %v6082_v14, 0.0 }
0x1232   : > { %6095 = vadd.xlane.f32.xlu1 %v6094_v19  ;;  %v6054_v44 = vpop.xlane.xlu1 %6053 }
0x1233   : > { %v6068_v41 = vmul.f32 0.015625, %v6054_v44  ;;  %v6085_v27 = vmul.f32 %v11225_v31, %v11225_v31 }
0x1235   : > { %v11230_v28 = vsub.f32 %v6034_v36, %v6068_v41  ;;  %v6103_v29 = vsel %vm398_vm1, %v6085_v27, 0.0  ;;  %v6212_v36 = vld [vmem:[%s9007_s7 + $0x30] sm:$0xff] }
0x1236   : > { %6104 = vadd.xlane.f32.xlu0 %v6103_v29  ;;  %v6063_v43 = vpop.xlane.xlu0 %6062  ;;  %v8518_v2 = vpack.c.bf16 %v6213_v33, %v6212_v36 }
0x1237   : > { %v6071_v18 = vmul.f32 0.015625, %v6063_v43  ;;  %v6060_v38 = vpop.xlane.xlu1 %6059  ;;  %v6084_v39 = vmul.f32 %v11230_v28, %v11230_v28 }
0x1238   : > { %v6070_v62 = vmul.f32 0.015625, %v6060_v38  ;;  %8519 = vmatprep.subr.bf16.mxu0 %v8518_v2 }
0x1239   : > { %v11235_v49 = vsub.f32 %v6037_v37, %v6071_v18  ;;  %v6100_v34 = vsel %vm398_vm1, %v6084_v39, 0.0  ;;  %8521 = vmatpush3.bf16.msra.mxu0 %v8518_v2 }
0x123a   : > { %v11238_v9 = vsub.f32 %v6036_v59, %v6070_v62  ;;  %6101 = vadd.xlane.f32.xlu1 %v6100_v34  ;;  %8523 = vmatprep.subr.bf16.mxu0 %v8522_v23 }
0x123b   : > { %v6087_v5 = vmul.f32 %v11235_v49, %v11235_v49 }
0x123c   : > { %v6086_v50 = vmul.f32 %v11238_v9, %v11238_v9 }
0x123d   : > { %v6109_v57 = vsel %vm398_vm1, %v6087_v5, 0.0  ;;  %8525 = vmatpush3.bf16.msra.mxu0 %v8522_v23 }
0x123e   : > { %6110 = vadd.xlane.f32.xlu0 %v6109_v57  ;;  %v6106_v8 = vsel %vm398_vm1, %v6086_v50, 0.0 }
0x123f   : > { %6107 = vadd.xlane.f32.xlu1 %v6106_v8 }
0x12b3   : > { %v6093_v37 = vpop.xlane.xlu0 %6092 }
0x12b4   : > { %v6113_v59 = vmul.f32 0.015625, %v6093_v37 }
0x12b6   : > { %v6121_v25 = vadd.f32 1e-05, %v6113_v59 }
0x12b7   : > { %v6090_v58 = vpop.xlane.xlu1 %6089 }
0x12b8   : > { %8753 = vrsqrt.f32 %v6121_v25  ;;  %v6112_v35 = vmul.f32 0.015625, %v6090_v58 }
0x12ba   : > { %v6120_v48 = vadd.f32 1e-05, %v6112_v35 }
0x12bb   : > { %v6099_v45 = vpop.xlane.xlu0 %6098 }
0x12bc   : > { %8755 = vrsqrt.f32 %v6120_v48  ;;  %v6115_v1 = vmul.f32 0.015625, %v6099_v45 }
0x12be   : > { %v6123_v3 = vadd.f32 1e-05, %v6115_v1 }
0x12bf   : > { %v6096_v46 = vpop.xlane.xlu1 %6095 }
0x12c0   : > { %8757 = vrsqrt.f32 %v6123_v3  ;;  %v6114_v54 = vmul.f32 0.015625, %v6096_v46 }
0x12c2   : > { %v8754_v4 = vpop.eup %8753  ;;  %v6122_v26 = vadd.f32 1e-05, %v6114_v54 }
0x12c3   : > { %v6137_v7 = vmul.f32 %v8754_v4, %v11206_v16  ;;  %v6105_v11 = vpop.xlane.xlu0 %6104 }
0x12c4   : > { %8759 = vrsqrt.f32 %v6122_v26  ;;  %v6117_v60 = vmul.f32 0.015625, %v6105_v11 }
0x12c5   : > { %v6149_v63 = vmul.f32 %v11255_v52, %v6137_v7 }
0x12c6   : > { %v8756_v13 = vpop.eup %8755  ;;  %v6125_v14 = vadd.f32 1e-05, %v6117_v60 }
0x12c7   : > { %v6161_v19 = vadd.f32 %v11259_v6, %v6149_v63  ;;  %v6136_v44 = vmul.f32 %v8756_v13, %v11210_v15  ;;  %v6102_v41 = vpop.xlane.xlu1 %6101 }
0x12c8   : > { %8761 = vrsqrt.f32 %v6125_v14  ;;  %v6116_v27 = vmul.f32 0.015625, %v6102_v41 }
0x12c9   : > { %v6177_v29 = vmul.f32 0.70710677, %v6161_v19  ;;  %v6148_v43 = vmul.f32 %v11255_v52, %v6136_v44  ;;  %v6169_v3 = vmul.f32 0.5, %v6161_v19 }
0x12ca   : > { %v8758_v16 = vpop.eup %8757  ;;  %v6124_v18 = vadd.f32 1e-05, %v6116_v27 }
0x12cb   : > { %8763 = verf.f32 %v6177_v29  ;;  %v6139_v38 = vmul.f32 %v8758_v16, %v11215_v32  ;;  %v6111_v39 = vpop.xlane.xlu0 %6110  ;;  %v6160_v62 = vadd.f32 %v11259_v6, %v6148_v43 }
0x12cc   : > { %8765 = vrsqrt.f32 %v6124_v18  ;;  %v6119_v34 = vmul.f32 0.015625, %v6111_v39  ;;  %v6108_v5 = vpop.xlane.xlu1 %6107 }
0x12cd   : > { %v6118_v50 = vmul.f32 0.015625, %v6108_v5  ;;  %v6176_v57 = vmul.f32 0.70710677, %v6160_v62  ;;  %v6151_v15 = vmul.f32 %v11255_v52, %v6139_v38 }
0x12ce   : > { %v8760_v8 = vpop.eup %8759  ;;  %v6127_v24 = vadd.f32 1e-05, %v6119_v34 }
0x12cf   : > { %v6138_v30 = vmul.f32 %v8760_v8, %v11220_v42  ;;  %v6126_v10 = vadd.f32 1e-05, %v6118_v50  ;;  %8767 = verf.f32 %v6176_v57  ;;  %v6163_v22 = vadd.f32 %v11259_v6, %v6151_v15 }
0x12d0   : > { %8769 = vrsqrt.f32 %v6127_v24 }
0x12d1   : > { %8771 = vrsqrt.f32 %v6126_v10  ;;  %v6150_v32 = vmul.f32 %v11255_v52, %v6138_v30  ;;  %v6179_v53 = vmul.f32 0.70710677, %v6163_v22  ;;  %v6171_v29 = vmul.f32 0.5, %v6163_v22 }
0x12d2   : > { %v8762_v40 = vpop.eup %8761 }
0x12d3   : > { %v6141_v36 = vmul.f32 %v8762_v40, %v11225_v31  ;;  %v6162_v33 = vadd.f32 %v11259_v6, %v6150_v32  ;;  %8773 = verf.f32 %v6179_v53  ;;  %v6168_v31 = vmul.f32 0.5, %v6160_v62  ;;  %v7008_v32 = vld [vmem:[%s9027_s19 + $0x15] ss:$0 sm:$0xff] }
0x12d5   : > { %v8764_v2 = vpop.eup %8763  ;;  %v6178_v55 = vmul.f32 0.70710677, %v6162_v33  ;;  %v6153_v17 = vmul.f32 %v11255_v52, %v6141_v36  ;;  %v6170_v44 = vmul.f32 0.5, %v6162_v33 }
0x12d6   : > { %v8766_v42 = vpop.eup %8765  ;;  %v6193_v25 = vadd.f32 1.0, %v8764_v2 }
0x12d7   : > { %v6140_v23 = vmul.f32 %v8766_v42, %v11230_v28  ;;  %8775 = verf.f32 %v6178_v55  ;;  %v6165_v37 = vadd.f32 %v11259_v6, %v6153_v17 }
0x12d8   : > { %v6201_v26 = vmul.f32 %v6193_v25, %v6169_v3 }
0x12d9   : > { %v8768_v59 = vpop.eup %8767  ;;  %v6152_v58 = vmul.f32 %v11255_v52, %v6140_v23  ;;  %v6181_v35 = vmul.f32 0.70710677, %v6165_v37  ;;  %v6173_v62 = vmul.f32 0.5, %v6165_v37 }
0x12da   : > { %v8770_v48 = vpop.eup %8769  ;;  %v6192_v45 = vadd.f32 1.0, %v8768_v59 }
0x12db   : > { %v8772_v1 = vpop.eup %8771  ;;  %v6143_v46 = vmul.f32 %v8770_v48, %v11235_v49  ;;  %v6164_v54 = vadd.f32 %v11259_v6, %v6152_v58  ;;  %8777 = verf.f32 %v6181_v35 }
0x12dc   : > { %v6142_v4 = vmul.f32 %v8772_v1, %v11238_v9  ;;  %v6200_v28 = vmul.f32 %v6192_v45, %v6168_v31 }
0x12dd   : > { %v6180_v7 = vmul.f32 0.70710677, %v6164_v54  ;;  %v6155_v11 = vmul.f32 %v11255_v52, %v6143_v46  ;;  %v8774_v60 = vpop.eup %8773  ;;  %v6172_v39 = vmul.f32 0.5, %v6164_v54 }
0x12de   : > { %8362 = vmatprep.mubr.msk.f32.mxu0 %vm398_vm1, %v6200_v28  ;;  %v6154_v63 = vmul.f32 %v11255_v52, %v6142_v4  ;;  %v6195_v9 = vadd.f32 1.0, %v8774_v60 }
0x12df   : > { %8363 = vmatmul.mubr.msk.f32.vlgmr.msra.gmra.mrb[214].mxu0 %vm398_vm1, %v6201_v26  ;;  %8779 = verf.f32 %v6180_v7  ;;  %v6167_v49 = vadd.f32 %v11259_v6, %v6155_v11 }
0x12e0   : > { %v6166_v13 = vadd.f32 %v11259_v6, %v6154_v63  ;;  %v6203_v16 = vmul.f32 %v6195_v9, %v6171_v29 }
0x12e1   : > { %v8776_v14 = vpop.eup %8775  ;;  %v6183_v19 = vmul.f32 0.70710677, %v6167_v49  ;;  %v6175_v15 = vmul.f32 0.5, %v6167_v49 }
0x12e2   : > { %v6194_v41 = vadd.f32 1.0, %v8776_v14  ;;  %v6182_v27 = vmul.f32 0.70710677, %v6166_v13  ;;  %v6174_v24 = vmul.f32 0.5, %v6166_v13 }
0x12e3   : > { %8781 = verf.f32 %v6183_v19 }
0x12e4   : > { %v6202_v43 = vmul.f32 %v6194_v41, %v6170_v44  ;;  %8783 = verf.f32 %v6182_v27 }
0x12e5   : > { %v8778_v18 = vpop.eup %8777 }
0x12e6   : > { %8365 = vmatprep.mubr.msk.f32.mxu0 %vm398_vm1, %v6202_v43  ;;  %v6197_v38 = vadd.f32 1.0, %v8778_v18 }
0x12e7   : > { %8366 = vmatmul.mubr.msk.f32.gmra.mrb[216].mxu0 %vm398_vm1, %v6203_v16 }
0x12e8   : > { %v6205_v50 = vmul.f32 %v6197_v38, %v6173_v62 }
0x12e9   : > { %v8780_v52 = vpop.eup %8779 }
0x12ea   : > { %v6196_v6 = vadd.f32 1.0, %v8780_v52 }
0x12ec   : > { %v6204_v34 = vmul.f32 %v6196_v6, %v6172_v39 }
0x12ed   : > { %v8782_v5 = vpop.eup %8781 }
0x12ee   : > { %v8784_v57 = vpop.eup %8783  ;;  %8368 = vmatprep.mubr.msk.f32.mxu0 %vm398_vm1, %v6204_v34  ;;  %v6199_v8 = vadd.f32 1.0, %v8782_v5 }
0x12ef   : > { %8369 = vmatmul.mubr.msk.f32.gmra.mrb[218].mxu0 %vm398_vm1, %v6205_v50  ;;  %v6198_v30 = vadd.f32 1.0, %v8784_v57 }
0x12f0   : > { %v6207_v10 = vmul.f32 %v6199_v8, %v6175_v15 }
0x12f1   : > { %v6206_v22 = vmul.f32 %v6198_v30, %v6174_v24 }
0x12f3   : > { %8371 = vmatprep.mubr.msk.f32.mxu0 %vm398_vm1, %v6206_v22 }
0x12f4   : > { %8372 = vmatmul.mubr.msk.f32.gmra.mrb[220].mxu0 %vm398_vm1, %v6207_v10 }
0x13b2   : > { %v8364_v53 = vpop.f32.mrb[214].mxu0 }
0x13b3   : > { %v6317_v40 = vadd.f32 %v8364_v53, %v7008_v32  ;;  %v6311_v36 = vpop.f32.mrb[215].mxu0 }
0x13b4   : > { %v6312_v33 = vadd.f32 %v7008_v32, %v6311_v36 }
0x13b5   : > { %v6351_v2 = vadd.f32 %v6317_v40, %v10752_v56 }
0x13b6   : > { %v6350_v55 = vadd.f32 %v6312_v33, %v10757_v47 }
0x13b7   : > { %6359 = vst.msk [vmem:[%s8987_s10 + $0x8] sm:$0xff] %vm1244_vm2, %v6351_v2 }
0x13b8   : > { %6358 = vst.msk [vmem:[%s8987_s10] sm:$0xff] %vm1244_vm2, %v6350_v55 }
0x13ba   : > { %v8367_v17 = vpop.f32.mrb[216].mxu0 }
0x13bb   : > { %v6327_v42 = vadd.f32 %v8367_v17, %v7008_v32  ;;  %v6321_v23 = vpop.f32.mrb[217].mxu0 }
0x13bc   : > { %v6322_v37 = vadd.f32 %v7008_v32, %v6321_v23 }
0x13bd   : > { %v6353_v59 = vadd.f32 %v6327_v42, %v10762_v12 }
0x13be   : > { %v6352_v25 = vadd.f32 %v6322_v37, %v10767_v0 }
0x13bf   : > { %6361 = vst.msk [vmem:[%s8987_s10 + $0x18] sm:$0xff] %vm1244_vm2, %v6353_v59 }
0x13c0   : > { %6360 = vst.msk [vmem:[%s8987_s10 + $0x10] sm:$0xff] %vm1244_vm2, %v6352_v25 }
0x13c2   : > { %v8370_v56 = vpop.f32.mrb[218].mxu0 }
0x13c3   : > { %v6337_v47 = vadd.f32 %v8370_v56, %v7008_v32  ;;  %v6331_v58 = vpop.f32.mrb[219].mxu0 }
0x13c4   : > { %v6332_v35 = vadd.f32 %v7008_v32, %v6331_v58 }
0x13c5   : > { %v6355_v48 = vadd.f32 %v6337_v47, %v10772_v51 }
0x13c6   : > { %v6354_v31 = vadd.f32 %v6332_v35, %v10777_v61 }
0x13c7   : > { %6363 = vst.msk [vmem:[%s8987_s10 + $0x28] sm:$0xff] %vm1244_vm2, %v6355_v48  ;;  %v8373_v45 = vpop.f32.mrb[220].mxu0 }
0x13c8   : > { %6362 = vst.msk [vmem:[%s8987_s10 + $0x20] sm:$0xff] %vm1244_vm2, %v6354_v31  ;;  %v6347_v12 = vadd.f32 %v8373_v45, %v7008_v32  ;;  %v6341_v0 = vpop.f32.mrb[221].mxu0 }
0x13c9   : > { %v6342_v1 = vadd.f32 %v7008_v32, %v6341_v0 }
0x13ca   : > { %v6357_v3 = vadd.f32 %v6347_v12, %v10787_v21 }
0x13cb   : > { %v6356_v46 = vadd.f32 %v6342_v1, %v10782_v20 }
0x13cc   : > { %6365 = vst.msk [vmem:[%s8987_s10 + $0x38] sm:$0xff] %vm1244_vm2, %v6357_v3 }
0x13cd   : > { %6364 = vst.msk [vmem:[%s8987_s10 + $0x30] sm:$0xff] %vm1244_vm2, %v6356_v46 }
0x13ce PF: > { %s15_s22 = sadd.s32 1, %s8823_s22   ;;  %s11837_s18 = smov %s8815_s20 }
0x13cf   : > { %p12_p8 = scmp.ge.s32.totalorder %s15_s22, 6   ;;  %s11838_s19 = smov %s8819_s21 }
0x13d0   : > { %s11839_s20 = smov %s11842_s23  ;;  %s11840_s21 = smov %s11846_s24 }
0x13d1   :  { %14 = sbr.rel (!%p12_p8) target bundleno = 3 (0x3), region = 80 }

</bundles_post_ra>
